<compile_context>
chip_gen: v7x
topology: tpu7x:2x2x1
jax: 0.10.0
libtpu: 0.0.40
codegen_flags: <defaults>
</compile_context>

<pallas_src>
import functools

import jax
import jax.numpy as jnp
from jax.experimental import pallas as pl
from jax.experimental.pallas import tpu as pltpu

_BN_EPS = 1e-5


def _resblock_kernel(x_ref, w1_ref, w2_ref, bnp_ref, mask_ref, o_ref,
                     y_scr, a_scr, acc_scr, aff_scr,
                     *, n_imgs, H, W, Cp, G, CHUNK, n_chunks):
    Wp = W + 2
    inv_count = 1.0 / float(n_imgs * H * W)

    phase = pl.program_id(0)
    n = pl.program_id(1)

    def conv_chunk(src_ref, w_ref, row0):
        """3x3 conv for output rows [row0, row0+CHUNK): 9 accumulated MXU
        matmuls over row-shifted f32 views (cast to bf16 at the MXU operand).
        The (CHUNK, Cp) f32 accumulator is small enough to stay in vregs."""
        acc = None
        for kh in range(3):
            for kw in range(3):
                off = G + row0 + (kh - 1) * Wp + (kw - 1)     # static row offset
                tap = src_ref[pl.ds(off, CHUNK), :].astype(jnp.bfloat16)
                d = jnp.dot(tap, w_ref[kh * 3 + kw],
                            preferred_element_type=jnp.float32)
                acc = d if acc is None else acc + d
        return acc

    def finalize_bn(g_row, b_row):
        mu = acc_scr[0:1, :] * inv_count
        # clamp: E[y^2] - mu^2 can go slightly negative for low-variance channels
        var = jnp.maximum(acc_scr[1:2, :] * inv_count - mu * mu, 0.0)
        scale = bnp_ref[g_row:g_row + 1, :] * jax.lax.rsqrt(var + _BN_EPS)
        aff_scr[0:1, :] = scale
        aff_scr[1:2, :] = bnp_ref[b_row:b_row + 1, :] - mu * scale
        acc_scr[...] = jnp.zeros_like(acc_scr)                 # reset for next BN

    # ---- first grid step: init accumulators and a_scr guard rows -----------
    @pl.when((phase == 0) & (n == 0))
    def _init():
        acc_scr[...] = jnp.zeros_like(acc_scr)
        a_scr[...] = jnp.zeros_like(a_scr)     # zero guard rows + padding ring

    # ---- phase 0: conv1, stash raw result, accumulate BN1 stats ------------
    @pl.when(phase == 0)
    def _phase0():
        s1 = jnp.zeros((1, Cp), jnp.float32)
        s2 = jnp.zeros((1, Cp), jnp.float32)
        for c in range(n_chunks):
            r0 = c * CHUNK
            y = conv_chunk(x_ref, w1_ref, r0)
            y_scr[n, pl.ds(r0, CHUNK), :] = y
            ym = y * mask_ref[pl.ds(r0, CHUNK), :]
            s1 = s1 + jnp.sum(ym, axis=0, keepdims=True)
            s2 = s2 + jnp.sum(ym * y, axis=0, keepdims=True)
        acc_scr[0:1, :] += s1
        acc_scr[1:2, :] += s2

    # ---- phase 1: BN1 affine + relu, conv2, accumulate BN2 stats -----------
    @pl.when((phase == 1) & (n == 0))
    def _bn1_finalize():
        finalize_bn(0, 1)

    @pl.when(phase == 1)
    def _phase1():
        scale = aff_scr[0:1, :]
        shift = aff_scr[1:2, :]
        # relu(bn1(conv1)), masked back to a zero padding ring, into a_scr.
        # All chunks must be written before conv2 reads (taps cross chunks).
        for c in range(n_chunks):
            r0 = c * CHUNK
            a = jnp.maximum(y_scr[n, pl.ds(r0, CHUNK), :] * scale + shift, 0.0)
            a_scr[pl.ds(G + r0, CHUNK), :] = a * mask_ref[pl.ds(r0, CHUNK), :]
        s1 = jnp.zeros((1, Cp), jnp.float32)
        s2 = jnp.zeros((1, Cp), jnp.float32)
        for c in range(n_chunks):
            r0 = c * CHUNK
            y2 = conv_chunk(a_scr, w2_ref, r0)
            y_scr[n, pl.ds(r0, CHUNK), :] = y2
            ym = y2 * mask_ref[pl.ds(r0, CHUNK), :]
            s1 = s1 + jnp.sum(ym, axis=0, keepdims=True)
            s2 = s2 + jnp.sum(ym * y2, axis=0, keepdims=True)
        acc_scr[0:1, :] += s1
        acc_scr[1:2, :] += s2

    # ---- phase 2: BN2 affine + residual + relu, write output ---------------
    @pl.when((phase == 2) & (n == 0))
    def _bn2_finalize():
        finalize_bn(2, 3)

    @pl.when(phase == 2)
    def _phase2():
        scale = aff_scr[0:1, :]
        shift = aff_scr[1:2, :]
        for c in range(n_chunks):
            r0 = c * CHUNK
            z = y_scr[n, pl.ds(r0, CHUNK), :] * scale + shift
            z = z + x_ref[pl.ds(G + r0, CHUNK), :]        # identity shortcut
            o_ref[pl.ds(r0, CHUNK), :] = jnp.maximum(z, 0.0)


def _round_up(x, m):
    return (x + m - 1) // m * m


def _prep_weight(w_oihw, Cp):
    """(Cout, Cin, 3, 3) -> (9, Cp, Cp) bf16, tap-major [t=kh*3+kw, cin, cout]."""
    c_out, c_in = w_oihw.shape[0], w_oihw.shape[1]
    wt = jnp.transpose(w_oihw, (2, 3, 1, 0)).reshape(9, c_in, c_out)
    wt = jnp.pad(wt, ((0, 0), (0, Cp - c_in), (0, Cp - c_out)))
    return wt.astype(jnp.bfloat16)


def _prep_bn(params, Cp):
    def pad(v, fill):
        return jnp.pad(v, (0, Cp - v.shape[0]), constant_values=fill)
    return jnp.stack([pad(params["g1"], 1.0), pad(params["beta1"], 0.0),
                      pad(params["g2"], 1.0), pad(params["beta2"], 0.0)],
                     axis=0).astype(jnp.float32)


@jax.jit
def resblock_forward(x_nchw, params):
    """ResBlock(first=False): relu(bn2(conv2(relu(bn1(conv1(x))))) + x)."""
    N, C, H, W = x_nchw.shape
    Cp = _round_up(max(C, 128), 128)          # lane-dense channel padding
    Hp, Wp = H + 2, W + 2
    P = Hp * Wp                               # rows of one spatially-padded image

    # Row chunking: keeps the per-chunk (CHUNK, Cp) f32 conv accumulator
    # register-resident instead of spilling to VMEM on every tap.
    n_chunks = max(1, -(-P // 128))
    CHUNK = _round_up(-(-P // n_chunks), 8)
    PR = n_chunks * CHUNK                     # chunk-padded row count
    G = _round_up(Wp + 1, 8)                  # guard rows >= max tap shift
    Gext = 2 * G + PR                         # rows of the guarded image block

    # NCHW -> NHWC, zero-pad channels to Cp and spatial dims by 1, flatten the
    # padded image to rows and add zero guard rows so every 3x3 tap is a slice.
    x_nhwc = jnp.transpose(x_nchw, (0, 2, 3, 1)).astype(jnp.float32)
    x_pad = jnp.pad(x_nhwc, ((0, 0), (1, 1), (1, 1), (0, Cp - C)))
    x_ext = jnp.pad(x_pad.reshape(N, P, Cp), ((0, 0), (G, G + PR - P), (0, 0)))

    w1 = _prep_weight(params["w1"], Cp)
    w2 = _prep_weight(params["w2"], Cp)
    bnp = _prep_bn(params, Cp)
    # NOTE: conv biases b1/b2 are intentionally dropped — they cancel exactly
    # under training-mode BatchNorm (mean subtraction).

    # Row-validity mask, pre-replicated to full lane width (no (P,1) buffer,
    # no per-use lane broadcast).  Rows >= P (chunk padding) are masked out.
    hh = (jnp.arange(Hp) >= 1) & (jnp.arange(Hp) <= H)
    ww = (jnp.arange(Wp) >= 1) & (jnp.arange(Wp) <= W)
    mrow = jnp.pad((hh[:, None] & ww[None, :]).reshape(P).astype(jnp.float32),
                   (0, PR - P))
    mask = jnp.tile(mrow[:, None], (1, Cp))

    kernel = functools.partial(_resblock_kernel, n_imgs=N, H=H, W=W, Cp=Cp,
                               G=G, CHUNK=CHUNK, n_chunks=n_chunks)

    # VMEM budget: resident scratch + double-buffered inputs/outputs, with 2x
    # headroom (capped below physical VMEM).
    vmem_est = (N * PR * Cp * 4               # y_scr
                + Gext * Cp * 4               # a_scr
                + 2 * Gext * Cp * 4           # x (2 buffers)
                + 2 * 2 * 9 * Cp * Cp * 2     # w1 + w2 (bf16, 2 buffers each)
                + 2 * PR * Cp * 4             # mask (2 buffers)
                + 2 * PR * Cp * 4             # out (2 buffers)
                + 16 * Cp * 4)                # bnp / acc / aff
    vmem_limit = int(min(96 * 1024 * 1024, max(32 * 1024 * 1024, 2 * vmem_est)))

    out_ext = pl.pallas_call(
        kernel,
        out_shape=jax.ShapeDtypeStruct((N, PR, Cp), jnp.float32),
        grid_spec=pltpu.PrefetchScalarGridSpec(
            num_scalar_prefetch=0,
            grid=(3, N),                                   # (phase, image)
            in_specs=[
                # x: pin block index during phase 1 (unused there) -> no re-DMA
                pl.BlockSpec((None, Gext, Cp),
                             lambda p, n: (jnp.where(p == 1, 0, n), 0, 0)),
                pl.BlockSpec((9, Cp, Cp), lambda p, n: (0, 0, 0)),
                pl.BlockSpec((9, Cp, Cp), lambda p, n: (0, 0, 0)),
                pl.BlockSpec((4, Cp), lambda p, n: (0, 0)),
                pl.BlockSpec((PR, Cp), lambda p, n: (0, 0)),
            ],
            # only phase 2 produces real output; pin the block index elsewhere
            # so no garbage / duplicate write-backs happen in phases 0-1.
            out_specs=pl.BlockSpec((None, PR, Cp),
                                   lambda p, n: (jnp.where(p == 2, n, 0), 0, 0)),
            scratch_shapes=[
                pltpu.VMEM((N, PR, Cp), jnp.float32),   # raw conv1/conv2 outputs
                pltpu.VMEM((Gext, Cp), jnp.float32),    # padded relu(bn1(conv1))
                pltpu.VMEM((2, Cp), jnp.float32),       # BN sum / sum-of-squares
                pltpu.VMEM((2, Cp), jnp.float32),       # BN scale / shift
            ]),
        compiler_params=pltpu.CompilerParams(
            dimension_semantics=("arbitrary", "arbitrary"),
            vmem_limit_bytes=vmem_limit),
    )(x_ext, w1, w2, bnp, mask)

    out = out_ext[:, :P, :].reshape(N, Hp, Wp, Cp)[:, 1:H + 1, 1:W + 1, :C]
    return jnp.transpose(out, (0, 3, 1, 2))               # NHWC -> NCHW


def init_resblock_params(key, channels):
    """Deterministic synthetic parameters (conv + BatchNorm affine)."""
    ks = jax.random.split(key, 8)
    c = channels
    return {
        "w1": 0.1 * jax.random.normal(ks[0], (c, c, 3, 3), jnp.float32),
        "b1": 0.1 * jax.random.normal(ks[1], (c,), jnp.float32),
        "g1": 1.0 + 0.1 * jax.random.normal(ks[2], (c,), jnp.float32),
        "beta1": 0.1 * jax.random.normal(ks[3], (c,), jnp.float32),
        "w2": 0.1 * jax.random.normal(ks[4], (c, c, 3, 3), jnp.float32),
        "b2": 0.1 * jax.random.normal(ks[5], (c,), jnp.float32),
        "g2": 1.0 + 0.1 * jax.random.normal(ks[6], (c,), jnp.float32),
        "beta2": 0.1 * jax.random.normal(ks[7], (c,), jnp.float32),
    }


def _reference(x_nchw, params):
    """Pure-JAX f32 reference reproducing the PyTorch forward (training-mode BN)."""
    def conv_bn(x, w, b, g, beta):
        y = jax.lax.conv_general_dilated(
            x, w, window_strides=(1, 1), padding=((1, 1), (1, 1)),
            dimension_numbers=("NCHW", "OIHW", "NCHW"))
        y = y + b[None, :, None, None]
        mu = jnp.mean(y, axis=(0, 2, 3), keepdims=True)
        var = jnp.mean((y - mu) ** 2, axis=(0, 2, 3), keepdims=True)
        y = (y - mu) * jax.lax.rsqrt(var + _BN_EPS)
        return y * g[None, :, None, None] + beta[None, :, None, None]

    y = jax.nn.relu(conv_bn(x_nchw, params["w1"], params["b1"],
                            params["g1"], params["beta1"]))
    y = conv_bn(y, params["w2"], params["b2"], params["g2"], params["beta2"])
    return jax.nn.relu(y + x_nchw)


if __name__ == "__main__":
    key = jax.random.PRNGKey(0)
    kx, kp = jax.random.split(key)
    N, C, H, W = 2, 4, 16, 16                 # in_channels == out_channels == 4
    x = jax.random.normal(kx, (N, C, H, W), jnp.float32)
    params = init_resblock_params(kp, C)

    out = resblock_forward(x, params)
    jax.block_until_ready(out)

    ref = _reference(x, params)
    assert out.shape == (N, C, H, W)
    # bf16 MXU operands vs f32 reference -> percent-level tolerance.
    if not jnp.allclose(out, ref, rtol=5e-2, atol=5e-2):
        err = float(jnp.max(jnp.abs(out - ref)))
        raise AssertionError(f"Pallas ResBlock mismatch vs reference, max|err|={err}")
    print("KERNEL_OK")
</pallas_src>

<mosaic_0001>
module attributes {stable_mosaic.version = 11 : i64} {
  func.func @_resblock_kernel(%arg0: i32, %arg1: i32, %arg2: memref<1x384x128xf32, #tpu.memory_space<vmem>>, %arg3: memref<9x128x128xbf16, #tpu.memory_space<vmem>>, %arg4: memref<9x128x128xbf16, #tpu.memory_space<vmem>>, %arg5: memref<4x128xf32, #tpu.memory_space<vmem>>, %arg6: memref<336x128xf32, #tpu.memory_space<vmem>>, %arg7: memref<1x336x128xf32, #tpu.memory_space<vmem>>, %arg8: memref<2x336x128xf32, #tpu.memory_space<vmem>>, %arg9: memref<384x128xf32, #tpu.memory_space<vmem>>, %arg10: memref<2x128xf32, #tpu.memory_space<vmem>>, %arg11: memref<2x128xf32, #tpu.memory_space<vmem>>) attributes {dimension_semantics = [#tpu.dimension_semantics<arbitrary>, #tpu.dimension_semantics<arbitrary>], iteration_bounds = array<i64: 3, 2>, scalar_prefetch = 0 : i64, scratch_operands = 4 : i64, tpu.core_type = #tpu.core_type<tc>, window_params = [{transform_indices = @transform_0, window_bounds = array<i64: 1, 384, 128>}, {pipeline_mode = #tpu.pipeline_mode<synchronous>, transform_indices = @transform_1, window_bounds = array<i64: 9, 128, 128>}, {pipeline_mode = #tpu.pipeline_mode<synchronous>, transform_indices = @transform_2, window_bounds = array<i64: 9, 128, 128>}, {pipeline_mode = #tpu.pipeline_mode<synchronous>, transform_indices = @transform_3, window_bounds = array<i64: 4, 128>}, {pipeline_mode = #tpu.pipeline_mode<synchronous>, transform_indices = @transform_4, window_bounds = array<i64: 336, 128>}, {transform_indices = @transform_5, window_bounds = array<i64: 1, 336, 128>}]} {
    %c0_i32 = arith.constant 0 : i32
    %0 = arith.cmpi eq, %arg0, %c0_i32 : i32
    %c0_i32_0 = arith.constant 0 : i32
    %1 = arith.cmpi eq, %arg1, %c0_i32_0 : i32
    %2 = arith.andi %0, %1 : i1
    %3 = arith.extui %2 : i1 to i32
    %c0_i32_1 = arith.constant 0 : i32
    %4 = arith.cmpi ne, %3, %c0_i32_1 : i32
    scf.if %4 {
      %cst = arith.constant 0.000000e+00 : f32
      %24 = vector.broadcast %cst : f32 to vector<2x128xf32>
      %c0 = arith.constant 0 : index
      %c0_12 = arith.constant 0 : index
      %25 = vector.load %arg10[%c0, %c0_12] : memref<2x128xf32, #tpu.memory_space<vmem>>, vector<2x128xf32>
      tpu.vector_store %arg10[%c0, %c0_12], %24 {strides = array<i32>} : memref<2x128xf32, #tpu.memory_space<vmem>>, vector<2x128xf32>,
      %cst_13 = arith.constant 0.000000e+00 : f32
      %26 = vector.broadcast %cst_13 : f32 to vector<384x128xf32>
      %c0_14 = arith.constant 0 : index
      %c0_15 = arith.constant 0 : index
      %27 = vector.load %arg9[%c0_14, %c0_15] : memref<384x128xf32, #tpu.memory_space<vmem>>, vector<384x128xf32>
      tpu.vector_store %arg9[%c0_14, %c0_15], %26 {strides = array<i32>} : memref<384x128xf32, #tpu.memory_space<vmem>>, vector<384x128xf32>,
    } else {
    }
    %c0_i32_2 = arith.constant 0 : i32
    %5 = arith.cmpi eq, %arg0, %c0_i32_2 : i32
    %6 = arith.extui %5 : i1 to i32
    %c0_i32_3 = arith.constant 0 : i32
    %7 = arith.cmpi ne, %6, %c0_i32_3 : i32
    scf.if %7 {
      %cst = arith.constant 0.000000e+00 : f32
      %24 = vector.broadcast %cst : f32 to vector<1x128xf32>
      %cst_12 = arith.constant 0.000000e+00 : f32
      %25 = vector.broadcast %cst_12 : f32 to vector<1x128xf32>
      %c0 = arith.constant 0 : index
      %c5 = arith.constant 5 : index
      %c0_13 = arith.constant 0 : index
      %26 = vector.load %arg2[%c0, %c5, %c0_13] : memref<1x384x128xf32, #tpu.memory_space<vmem>>, vector<1x112x128xf32>
      %27 = vector.shape_cast %26 : vector<1x112x128xf32> to vector<112x128xf32>
      %28 = arith.truncf %27 : vector<112x128xf32> to vector<112x128xbf16>
      %c0_14 = arith.constant 0 : index
      %c0_15 = arith.constant 0 : index
      %c0_16 = arith.constant 0 : index
      %29 = vector.load %arg3[%c0_14, %c0_15, %c0_16] : memref<9x128x128xbf16, #tpu.memory_space<vmem>>, vector<1x128x128xbf16>
      %30 = vector.shape_cast %29 : vector<1x128x128xbf16> to vector<128x128xbf16>
      %cst_17 = arith.constant dense<0.000000e+00> : vector<112x128xf32>
      %31 = tpu.matmul %28, %30, %cst_17 {dimension_numbers = #tpu.dot_dimension_numbers<[1], [0], [0], [1], [0, 0, 1, 1], [], []>} : vector<112x128xbf16>, vector<128x128xbf16>, vector<112x128xf32> -> vector<112x128xf32>
      %c0_18 = arith.constant 0 : index
      %c6 = arith.constant 6 : index
      %c0_19 = arith.constant 0 : index
      %32 = vector.load %arg2[%c0_18, %c6, %c0_19] : memref<1x384x128xf32, #tpu.memory_space<vmem>>, vector<1x112x128xf32>
      %33 = vector.shape_cast %32 : vector<1x112x128xf32> to vector<112x128xf32>
      %34 = arith.truncf %33 : vector<112x128xf32> to vector<112x128xbf16>
      %c1 = arith.constant 1 : index
      %c0_20 = arith.constant 0 : index
      %c0_21 = arith.constant 0 : index
      %35 = vector.load %arg3[%c1, %c0_20, %c0_21] : memref<9x128x128xbf16, #tpu.memory_space<vmem>>, vector<1x128x128xbf16>
      %36 = vector.shape_cast %35 : vector<1x128x128xbf16> to vector<128x128xbf16>
      %cst_22 = arith.constant dense<0.000000e+00> : vector<112x128xf32>
      %37 = tpu.matmul %34, %36, %cst_22 {dimension_numbers = #tpu.dot_dimension_numbers<[1], [0], [0], [1], [0, 0, 1, 1], [], []>} : vector<112x128xbf16>, vector<128x128xbf16>, vector<112x128xf32> -> vector<112x128xf32>
      %38 = arith.addf %31, %37 : vector<112x128xf32>
      %c0_23 = arith.constant 0 : index
      %c7 = arith.constant 7 : index
      %c0_24 = arith.constant 0 : index
      %39 = vector.load %arg2[%c0_23, %c7, %c0_24] : memref<1x384x128xf32, #tpu.memory_space<vmem>>, vector<1x112x128xf32>
      %40 = vector.shape_cast %39 : vector<1x112x128xf32> to vector<112x128xf32>
      %41 = arith.truncf %40 : vector<112x128xf32> to vector<112x128xbf16>
      %c2 = arith.constant 2 : index
      %c0_25 = arith.constant 0 : index
      %c0_26 = arith.constant 0 : index
      %42 = vector.load %arg3[%c2, %c0_25, %c0_26] : memref<9x128x128xbf16, #tpu.memory_space<vmem>>, vector<1x128x128xbf16>
      %43 = vector.shape_cast %42 : vector<1x128x128xbf16> to vector<128x128xbf16>
      %cst_27 = arith.constant dense<0.000000e+00> : vector<112x128xf32>
      %44 = tpu.matmul %41, %43, %cst_27 {dimension_numbers = #tpu.dot_dimension_numbers<[1], [0], [0], [1], [0, 0, 1, 1], [], []>} : vector<112x128xbf16>, vector<128x128xbf16>, vector<112x128xf32> -> vector<112x128xf32>
      %45 = arith.addf %38, %44 : vector<112x128xf32>
      %c0_28 = arith.constant 0 : index
      %c23 = arith.constant 23 : index
      %c0_29 = arith.constant 0 : index
      %46 = vector.load %arg2[%c0_28, %c23, %c0_29] : memref<1x384x128xf32, #tpu.memory_space<vmem>>, vector<1x112x128xf32>
      %47 = vector.shape_cast %46 : vector<1x112x128xf32> to vector<112x128xf32>
      %48 = arith.truncf %47 : vector<112x128xf32> to vector<112x128xbf16>
      %c3 = arith.constant 3 : index
      %c0_30 = arith.constant 0 : index
      %c0_31 = arith.constant 0 : index
      %49 = vector.load %arg3[%c3, %c0_30, %c0_31] : memref<9x128x128xbf16, #tpu.memory_space<vmem>>, vector<1x128x128xbf16>
      %50 = vector.shape_cast %49 : vector<1x128x128xbf16> to vector<128x128xbf16>
      %cst_32 = arith.constant dense<0.000000e+00> : vector<112x128xf32>
      %51 = tpu.matmul %48, %50, %cst_32 {dimension_numbers = #tpu.dot_dimension_numbers<[1], [0], [0], [1], [0, 0, 1, 1], [], []>} : vector<112x128xbf16>, vector<128x128xbf16>, vector<112x128xf32> -> vector<112x128xf32>
      %52 = arith.addf %45, %51 : vector<112x128xf32>
      %c0_33 = arith.constant 0 : index
      %c24 = arith.constant 24 : index
      %c0_34 = arith.constant 0 : index
      %53 = vector.load %arg2[%c0_33, %c24, %c0_34] : memref<1x384x128xf32, #tpu.memory_space<vmem>>, vector<1x112x128xf32>
      %54 = vector.shape_cast %53 : vector<1x112x128xf32> to vector<112x128xf32>
      %55 = arith.truncf %54 : vector<112x128xf32> to vector<112x128xbf16>
      %c4 = arith.constant 4 : index
      %c0_35 = arith.constant 0 : index
      %c0_36 = arith.constant 0 : index
      %56 = vector.load %arg3[%c4, %c0_35, %c0_36] : memref<9x128x128xbf16, #tpu.memory_space<vmem>>, vector<1x128x128xbf16>
      %57 = vector.shape_cast %56 : vector<1x128x128xbf16> to vector<128x128xbf16>
      %cst_37 = arith.constant dense<0.000000e+00> : vector<112x128xf32>
      %58 = tpu.matmul %55, %57, %cst_37 {dimension_numbers = #tpu.dot_dimension_numbers<[1], [0], [0], [1], [0, 0, 1, 1], [], []>} : vector<112x128xbf16>, vector<128x128xbf16>, vector<112x128xf32> -> vector<112x128xf32>
      %59 = arith.addf %52, %58 : vector<112x128xf32>
      %c0_38 = arith.constant 0 : index
      %c25 = arith.constant 25 : index
      %c0_39 = arith.constant 0 : index
      %60 = vector.load %arg2[%c0_38, %c25, %c0_39] : memref<1x384x128xf32, #tpu.memory_space<vmem>>, vector<1x112x128xf32>
      %61 = vector.shape_cast %60 : vector<1x112x128xf32> to vector<112x128xf32>
      %62 = arith.truncf %61 : vector<112x128xf32> to vector<112x128xbf16>
      %c5_40 = arith.constant 5 : index
      %c0_41 = arith.constant 0 : index
      %c0_42 = arith.constant 0 : index
      %63 = vector.load %arg3[%c5_40, %c0_41, %c0_42] : memref<9x128x128xbf16, #tpu.memory_space<vmem>>, vector<1x128x128xbf16>
      %64 = vector.shape_cast %63 : vector<1x128x128xbf16> to vector<128x128xbf16>
      %cst_43 = arith.constant dense<0.000000e+00> : vector<112x128xf32>
      %65 = tpu.matmul %62, %64, %cst_43 {dimension_numbers = #tpu.dot_dimension_numbers<[1], [0], [0], [1], [0, 0, 1, 1], [], []>} : vector<112x128xbf16>, vector<128x128xbf16>, vector<112x128xf32> -> vector<112x128xf32>
      %66 = arith.addf %59, %65 : vector<112x128xf32>
      %c0_44 = arith.constant 0 : index
      %c41 = arith.constant 41 : index
      %c0_45 = arith.constant 0 : index
      %67 = vector.load %arg2[%c0_44, %c41, %c0_45] : memref<1x384x128xf32, #tpu.memory_space<vmem>>, vector<1x112x128xf32>
      %68 = vector.shape_cast %67 : vector<1x112x128xf32> to vector<112x128xf32>
      %69 = arith.truncf %68 : vector<112x128xf32> to vector<112x128xbf16>
      %c6_46 = arith.constant 6 : index
      %c0_47 = arith.constant 0 : index
      %c0_48 = arith.constant 0 : index
      %70 = vector.load %arg3[%c6_46, %c0_47, %c0_48] : memref<9x128x128xbf16, #tpu.memory_space<vmem>>, vector<1x128x128xbf16>
      %71 = vector.shape_cast %70 : vector<1x128x128xbf16> to vector<128x128xbf16>
      %cst_49 = arith.constant dense<0.000000e+00> : vector<112x128xf32>
      %72 = tpu.matmul %69, %71, %cst_49 {dimension_numbers = #tpu.dot_dimension_numbers<[1], [0], [0], [1], [0, 0, 1, 1], [], []>} : vector<112x128xbf16>, vector<128x128xbf16>, vector<112x128xf32> -> vector<112x128xf32>
      %73 = arith.addf %66, %72 : vector<112x128xf32>
      %c0_50 = arith.constant 0 : index
      %c42 = arith.constant 42 : index
      %c0_51 = arith.constant 0 : index
      %74 = vector.load %arg2[%c0_50, %c42, %c0_51] : memref<1x384x128xf32, #tpu.memory_space<vmem>>, vector<1x112x128xf32>
      %75 = vector.shape_cast %74 : vector<1x112x128xf32> to vector<112x128xf32>
      %76 = arith.truncf %75 : vector<112x128xf32> to vector<112x128xbf16>
      %c7_52 = arith.constant 7 : index
      %c0_53 = arith.constant 0 : index
      %c0_54 = arith.constant 0 : index
      %77 = vector.load %arg3[%c7_52, %c0_53, %c0_54] : memref<9x128x128xbf16, #tpu.memory_space<vmem>>, vector<1x128x128xbf16>
      %78 = vector.shape_cast %77 : vector<1x128x128xbf16> to vector<128x128xbf16>
      %cst_55 = arith.constant dense<0.000000e+00> : vector<112x128xf32>
      %79 = tpu.matmul %76, %78, %cst_55 {dimension_numbers = #tpu.dot_dimension_numbers<[1], [0], [0], [1], [0, 0, 1, 1], [], []>} : vector<112x128xbf16>, vector<128x128xbf16>, vector<112x128xf32> -> vector<112x128xf32>
      %80 = arith.addf %73, %79 : vector<112x128xf32>
      %c0_56 = arith.constant 0 : index
      %c43 = arith.constant 43 : index
      %c0_57 = arith.constant 0 : index
      %81 = vector.load %arg2[%c0_56, %c43, %c0_57] : memref<1x384x128xf32, #tpu.memory_space<vmem>>, vector<1x112x128xf32>
      %82 = vector.shape_cast %81 : vector<1x112x128xf32> to vector<112x128xf32>
      %83 = arith.truncf %82 : vector<112x128xf32> to vector<112x128xbf16>
      %c8 = arith.constant 8 : index
      %c0_58 = arith.constant 0 : index
      %c0_59 = arith.constant 0 : index
      %84 = vector.load %arg3[%c8, %c0_58, %c0_59] : memref<9x128x128xbf16, #tpu.memory_space<vmem>>, vector<1x128x128xbf16>
      %85 = vector.shape_cast %84 : vector<1x128x128xbf16> to vector<128x128xbf16>
      %cst_60 = arith.constant dense<0.000000e+00> : vector<112x128xf32>
      %86 = tpu.matmul %83, %85, %cst_60 {dimension_numbers = #tpu.dot_dimension_numbers<[1], [0], [0], [1], [0, 0, 1, 1], [], []>} : vector<112x128xbf16>, vector<128x128xbf16>, vector<112x128xf32> -> vector<112x128xf32>
      %87 = arith.addf %80, %86 : vector<112x128xf32>
      %88 = arith.index_cast %arg1 : i32 to index
      %c0_61 = arith.constant 0 : index
      %c0_62 = arith.constant 0 : index
      %89 = vector.load %arg8[%88, %c0_61, %c0_62] : memref<2x336x128xf32, #tpu.memory_space<vmem>>, vector<1x112x128xf32>
      %90 = vector.shape_cast %89 : vector<1x112x128xf32> to vector<112x128xf32>
      %91 = vector.shape_cast %87 : vector<112x128xf32> to vector<1x112x128xf32>
      tpu.vector_store %arg8[%88, %c0_61, %c0_62], %91 {strides = array<i32>} : memref<2x336x128xf32, #tpu.memory_space<vmem>>, vector<1x112x128xf32>,
      %c0_63 = arith.constant 0 : index
      %c0_64 = arith.constant 0 : index
      %92 = vector.load %arg6[%c0_63, %c0_64] : memref<336x128xf32, #tpu.memory_space<vmem>>, vector<112x128xf32>
      %93 = arith.mulf %87, %92 : vector<112x128xf32>
      %cst_65 = arith.constant dense<0.000000e+00> : vector<128xf32>
      %94 = vector.multi_reduction <add>, %93, %cst_65 [0] : vector<112x128xf32> to vector<128xf32>
      %95 = vector.shape_cast %94 : vector<128xf32> to vector<1x128xf32>
      %96 = arith.addf %24, %95 : vector<1x128xf32>
      %97 = arith.mulf %93, %87 : vector<112x128xf32>
      %cst_66 = arith.constant dense<0.000000e+00> : vector<128xf32>
      %98 = vector.multi_reduction <add>, %97, %cst_66 [0] : vector<112x128xf32> to vector<128xf32>
      %99 = vector.shape_cast %98 : vector<128xf32> to vector<1x128xf32>
      %100 = arith.addf %25, %99 : vector<1x128xf32>
      %c0_67 = arith.constant 0 : index
      %c117 = arith.constant 117 : index
      %c0_68 = arith.constant 0 : index
      %101 = vector.load %arg2[%c0_67, %c117, %c0_68] : memref<1x384x128xf32, #tpu.memory_space<vmem>>, vector<1x112x128xf32>
      %102 = vector.shape_cast %101 : vector<1x112x128xf32> to vector<112x128xf32>
      %103 = arith.truncf %102 : vector<112x128xf32> to vector<112x128xbf16>
      %c0_69 = arith.constant 0 : index
      %c0_70 = arith.constant 0 : index
      %c0_71 = arith.constant 0 : index
      %104 = vector.load %arg3[%c0_69, %c0_70, %c0_71] : memref<9x128x128xbf16, #tpu.memory_space<vmem>>, vector<1x128x128xbf16>
      %105 = vector.shape_cast %104 : vector<1x128x128xbf16> to vector<128x128xbf16>
      %cst_72 = arith.constant dense<0.000000e+00> : vector<112x128xf32>
      %106 = tpu.matmul %103, %105, %cst_72 {dimension_numbers = #tpu.dot_dimension_numbers<[1], [0], [0], [1], [0, 0, 1, 1], [], []>} : vector<112x128xbf16>, vector<128x128xbf16>, vector<112x128xf32> -> vector<112x128xf32>
      %c0_73 = arith.constant 0 : index
      %c118 = arith.constant 118 : index
      %c0_74 = arith.constant 0 : index
      %107 = vector.load %arg2[%c0_73, %c118, %c0_74] : memref<1x384x128xf32, #tpu.memory_space<vmem>>, vector<1x112x128xf32>
      %108 = vector.shape_cast %107 : vector<1x112x128xf32> to vector<112x128xf32>
      %109 = arith.truncf %108 : vector<112x128xf32> to vector<112x128xbf16>
      %c1_75 = arith.constant 1 : index
      %c0_76 = arith.constant 0 : index
      %c0_77 = arith.constant 0 : index
      %110 = vector.load %arg3[%c1_75, %c0_76, %c0_77] : memref<9x128x128xbf16, #tpu.memory_space<vmem>>, vector<1x128x128xbf16>
      %111 = vector.shape_cast %110 : vector<1x128x128xbf16> to vector<128x128xbf16>
      %cst_78 = arith.constant dense<0.000000e+00> : vector<112x128xf32>
      %112 = tpu.matmul %109, %111, %cst_78 {dimension_numbers = #tpu.dot_dimension_numbers<[1], [0], [0], [1], [0, 0, 1, 1], [], []>} : vector<112x128xbf16>, vector<128x128xbf16>, vector<112x128xf32> -> vector<112x128xf32>
      %113 = arith.addf %106, %112 : vector<112x128xf32>
      %c0_79 = arith.constant 0 : index
      %c119 = arith.constant 119 : index
      %c0_80 = arith.constant 0 : index
      %114 = vector.load %arg2[%c0_79, %c119, %c0_80] : memref<1x384x128xf32, #tpu.memory_space<vmem>>, vector<1x112x128xf32>
      %115 = vector.shape_cast %114 : vector<1x112x128xf32> to vector<112x128xf32>
      %116 = arith.truncf %115 : vector<112x128xf32> to vector<112x128xbf16>
      %c2_81 = arith.constant 2 : index
      %c0_82 = arith.constant 0 : index
      %c0_83 = arith.constant 0 : index
      %117 = vector.load %arg3[%c2_81, %c0_82, %c0_83] : memref<9x128x128xbf16, #tpu.memory_space<vmem>>, vector<1x128x128xbf16>
      %118 = vector.shape_cast %117 : vector<1x128x128xbf16> to vector<128x128xbf16>
      %cst_84 = arith.constant dense<0.000000e+00> : vector<112x128xf32>
      %119 = tpu.matmul %116, %118, %cst_84 {dimension_numbers = #tpu.dot_dimension_numbers<[1], [0], [0], [1], [0, 0, 1, 1], [], []>} : vector<112x128xbf16>, vector<128x128xbf16>, vector<112x128xf32> -> vector<112x128xf32>
      %120 = arith.addf %113, %119 : vector<112x128xf32>
      %c0_85 = arith.constant 0 : index
      %c135 = arith.constant 135 : index
      %c0_86 = arith.constant 0 : index
      %121 = vector.load %arg2[%c0_85, %c135, %c0_86] : memref<1x384x128xf32, #tpu.memory_space<vmem>>, vector<1x112x128xf32>
      %122 = vector.shape_cast %121 : vector<1x112x128xf32> to vector<112x128xf32>
      %123 = arith.truncf %122 : vector<112x128xf32> to vector<112x128xbf16>
      %c3_87 = arith.constant 3 : index
      %c0_88 = arith.constant 0 : index
      %c0_89 = arith.constant 0 : index
      %124 = vector.load %arg3[%c3_87, %c0_88, %c0_89] : memref<9x128x128xbf16, #tpu.memory_space<vmem>>, vector<1x128x128xbf16>
      %125 = vector.shape_cast %124 : vector<1x128x128xbf16> to vector<128x128xbf16>
      %cst_90 = arith.constant dense<0.000000e+00> : vector<112x128xf32>
      %126 = tpu.matmul %123, %125, %cst_90 {dimension_numbers = #tpu.dot_dimension_numbers<[1], [0], [0], [1], [0, 0, 1, 1], [], []>} : vector<112x128xbf16>, vector<128x128xbf16>, vector<112x128xf32> -> vector<112x128xf32>
      %127 = arith.addf %120, %126 : vector<112x128xf32>
      %c0_91 = arith.constant 0 : index
      %c136 = arith.constant 136 : index
      %c0_92 = arith.constant 0 : index
      %128 = vector.load %arg2[%c0_91, %c136, %c0_92] : memref<1x384x128xf32, #tpu.memory_space<vmem>>, vector<1x112x128xf32>
      %129 = vector.shape_cast %128 : vector<1x112x128xf32> to vector<112x128xf32>
      %130 = arith.truncf %129 : vector<112x128xf32> to vector<112x128xbf16>
      %c4_93 = arith.constant 4 : index
      %c0_94 = arith.constant 0 : index
      %c0_95 = arith.constant 0 : index
      %131 = vector.load %arg3[%c4_93, %c0_94, %c0_95] : memref<9x128x128xbf16, #tpu.memory_space<vmem>>, vector<1x128x128xbf16>
      %132 = vector.shape_cast %131 : vector<1x128x128xbf16> to vector<128x128xbf16>
      %cst_96 = arith.constant dense<0.000000e+00> : vector<112x128xf32>
      %133 = tpu.matmul %130, %132, %cst_96 {dimension_numbers = #tpu.dot_dimension_numbers<[1], [0], [0], [1], [0, 0, 1, 1], [], []>} : vector<112x128xbf16>, vector<128x128xbf16>, vector<112x128xf32> -> vector<112x128xf32>
      %134 = arith.addf %127, %133 : vector<112x128xf32>
      %c0_97 = arith.constant 0 : index
      %c137 = arith.constant 137 : index
      %c0_98 = arith.constant 0 : index
      %135 = vector.load %arg2[%c0_97, %c137, %c0_98] : memref<1x384x128xf32, #tpu.memory_space<vmem>>, vector<1x112x128xf32>
      %136 = vector.shape_cast %135 : vector<1x112x128xf32> to vector<112x128xf32>
      %137 = arith.truncf %136 : vector<112x128xf32> to vector<112x128xbf16>
      %c5_99 = arith.constant 5 : index
      %c0_100 = arith.constant 0 : index
      %c0_101 = arith.constant 0 : index
      %138 = vector.load %arg3[%c5_99, %c0_100, %c0_101] : memref<9x128x128xbf16, #tpu.memory_space<vmem>>, vector<1x128x128xbf16>
      %139 = vector.shape_cast %138 : vector<1x128x128xbf16> to vector<128x128xbf16>
      %cst_102 = arith.constant dense<0.000000e+00> : vector<112x128xf32>
      %140 = tpu.matmul %137, %139, %cst_102 {dimension_numbers = #tpu.dot_dimension_numbers<[1], [0], [0], [1], [0, 0, 1, 1], [], []>} : vector<112x128xbf16>, vector<128x128xbf16>, vector<112x128xf32> -> vector<112x128xf32>
      %141 = arith.addf %134, %140 : vector<112x128xf32>
      %c0_103 = arith.constant 0 : index
      %c153 = arith.constant 153 : index
      %c0_104 = arith.constant 0 : index
      %142 = vector.load %arg2[%c0_103, %c153, %c0_104] : memref<1x384x128xf32, #tpu.memory_space<vmem>>, vector<1x112x128xf32>
      %143 = vector.shape_cast %142 : vector<1x112x128xf32> to vector<112x128xf32>
      %144 = arith.truncf %143 : vector<112x128xf32> to vector<112x128xbf16>
      %c6_105 = arith.constant 6 : index
      %c0_106 = arith.constant 0 : index
      %c0_107 = arith.constant 0 : index
      %145 = vector.load %arg3[%c6_105, %c0_106, %c0_107] : memref<9x128x128xbf16, #tpu.memory_space<vmem>>, vector<1x128x128xbf16>
      %146 = vector.shape_cast %145 : vector<1x128x128xbf16> to vector<128x128xbf16>
      %cst_108 = arith.constant dense<0.000000e+00> : vector<112x128xf32>
      %147 = tpu.matmul %144, %146, %cst_108 {dimension_numbers = #tpu.dot_dimension_numbers<[1], [0], [0], [1], [0, 0, 1, 1], [], []>} : vector<112x128xbf16>, vector<128x128xbf16>, vector<112x128xf32> -> vector<112x128xf32>
      %148 = arith.addf %141, %147 : vector<112x128xf32>
      %c0_109 = arith.constant 0 : index
      %c154 = arith.constant 154 : index
      %c0_110 = arith.constant 0 : index
      %149 = vector.load %arg2[%c0_109, %c154, %c0_110] : memref<1x384x128xf32, #tpu.memory_space<vmem>>, vector<1x112x128xf32>
      %150 = vector.shape_cast %149 : vector<1x112x128xf32> to vector<112x128xf32>
      %151 = arith.truncf %150 : vector<112x128xf32> to vector<112x128xbf16>
      %c7_111 = arith.constant 7 : index
      %c0_112 = arith.constant 0 : index
      %c0_113 = arith.constant 0 : index
      %152 = vector.load %arg3[%c7_111, %c0_112, %c0_113] : memref<9x128x128xbf16, #tpu.memory_space<vmem>>, vector<1x128x128xbf16>
      %153 = vector.shape_cast %152 : vector<1x128x128xbf16> to vector<128x128xbf16>
      %cst_114 = arith.constant dense<0.000000e+00> : vector<112x128xf32>
      %154 = tpu.matmul %151, %153, %cst_114 {dimension_numbers = #tpu.dot_dimension_numbers<[1], [0], [0], [1], [0, 0, 1, 1], [], []>} : vector<112x128xbf16>, vector<128x128xbf16>, vector<112x128xf32> -> vector<112x128xf32>
      %155 = arith.addf %148, %154 : vector<112x128xf32>
      %c0_115 = arith.constant 0 : index
      %c155 = arith.constant 155 : index
      %c0_116 = arith.constant 0 : index
      %156 = vector.load %arg2[%c0_115, %c155, %c0_116] : memref<1x384x128xf32, #tpu.memory_space<vmem>>, vector<1x112x128xf32>
      %157 = vector.shape_cast %156 : vector<1x112x128xf32> to vector<112x128xf32>
      %158 = arith.truncf %157 : vector<112x128xf32> to vector<112x128xbf16>
      %c8_117 = arith.constant 8 : index
      %c0_118 = arith.constant 0 : index
      %c0_119 = arith.constant 0 : index
      %159 = vector.load %arg3[%c8_117, %c0_118, %c0_119] : memref<9x128x128xbf16, #tpu.memory_space<vmem>>, vector<1x128x128xbf16>
      %160 = vector.shape_cast %159 : vector<1x128x128xbf16> to vector<128x128xbf16>
      %cst_120 = arith.constant dense<0.000000e+00> : vector<112x128xf32>
      %161 = tpu.matmul %158, %160, %cst_120 {dimension_numbers = #tpu.dot_dimension_numbers<[1], [0], [0], [1], [0, 0, 1, 1], [], []>} : vector<112x128xbf16>, vector<128x128xbf16>, vector<112x128xf32> -> vector<112x128xf32>
      %162 = arith.addf %155, %161 : vector<112x128xf32>
      %163 = arith.index_cast %arg1 : i32 to index
      %c112 = arith.constant 112 : index
      %c0_121 = arith.constant 0 : index
      %164 = vector.load %arg8[%163, %c112, %c0_121] : memref<2x336x128xf32, #tpu.memory_space<vmem>>, vector<1x112x128xf32>
      %165 = vector.shape_cast %164 : vector<1x112x128xf32> to vector<112x128xf32>
      %166 = vector.shape_cast %162 : vector<112x128xf32> to vector<1x112x128xf32>
      tpu.vector_store %arg8[%163, %c112, %c0_121], %166 {strides = array<i32>} : memref<2x336x128xf32, #tpu.memory_space<vmem>>, vector<1x112x128xf32>,
      %c112_122 = arith.constant 112 : index
      %c0_123 = arith.constant 0 : index
      %167 = vector.load %arg6[%c112_122, %c0_123] : memref<336x128xf32, #tpu.memory_space<vmem>>, vector<112x128xf32>
      %168 = arith.mulf %162, %167 : vector<112x128xf32>
      %cst_124 = arith.constant dense<0.000000e+00> : vector<128xf32>
      %169 = vector.multi_reduction <add>, %168, %cst_124 [0] : vector<112x128xf32> to vector<128xf32>
      %170 = vector.shape_cast %169 : vector<128xf32> to vector<1x128xf32>
      %171 = arith.addf %96, %170 : vector<1x128xf32>
      %172 = arith.mulf %168, %162 : vector<112x128xf32>
      %cst_125 = arith.constant dense<0.000000e+00> : vector<128xf32>
      %173 = vector.multi_reduction <add>, %172, %cst_125 [0] : vector<112x128xf32> to vector<128xf32>
      %174 = vector.shape_cast %173 : vector<128xf32> to vector<1x128xf32>
      %175 = arith.addf %100, %174 : vector<1x128xf32>
      %c0_126 = arith.constant 0 : index
      %c229 = arith.constant 229 : index
      %c0_127 = arith.constant 0 : index
      %176 = vector.load %arg2[%c0_126, %c229, %c0_127] : memref<1x384x128xf32, #tpu.memory_space<vmem>>, vector<1x112x128xf32>
      %177 = vector.shape_cast %176 : vector<1x112x128xf32> to vector<112x128xf32>
      %178 = arith.truncf %177 : vector<112x128xf32> to vector<112x128xbf16>
      %c0_128 = arith.constant 0 : index
      %c0_129 = arith.constant 0 : index
      %c0_130 = arith.constant 0 : index
      %179 = vector.load %arg3[%c0_128, %c0_129, %c0_130] : memref<9x128x128xbf16, #tpu.memory_space<vmem>>, vector<1x128x128xbf16>
      %180 = vector.shape_cast %179 : vector<1x128x128xbf16> to vector<128x128xbf16>
      %cst_131 = arith.constant dense<0.000000e+00> : vector<112x128xf32>
      %181 = tpu.matmul %178, %180, %cst_131 {dimension_numbers = #tpu.dot_dimension_numbers<[1], [0], [0], [1], [0, 0, 1, 1], [], []>} : vector<112x128xbf16>, vector<128x128xbf16>, vector<112x128xf32> -> vector<112x128xf32>
      %c0_132 = arith.constant 0 : index
      %c230 = arith.constant 230 : index
      %c0_133 = arith.constant 0 : index
      %182 = vector.load %arg2[%c0_132, %c230, %c0_133] : memref<1x384x128xf32, #tpu.memory_space<vmem>>, vector<1x112x128xf32>
      %183 = vector.shape_cast %182 : vector<1x112x128xf32> to vector<112x128xf32>
      %184 = arith.truncf %183 : vector<112x128xf32> to vector<112x128xbf16>
      %c1_134 = arith.constant 1 : index
      %c0_135 = arith.constant 0 : index
      %c0_136 = arith.constant 0 : index
      %185 = vector.load %arg3[%c1_134, %c0_135, %c0_136] : memref<9x128x128xbf16, #tpu.memory_space<vmem>>, vector<1x128x128xbf16>
      %186 = vector.shape_cast %185 : vector<1x128x128xbf16> to vector<128x128xbf16>
      %cst_137 = arith.constant dense<0.000000e+00> : vector<112x128xf32>
      %187 = tpu.matmul %184, %186, %cst_137 {dimension_numbers = #tpu.dot_dimension_numbers<[1], [0], [0], [1], [0, 0, 1, 1], [], []>} : vector<112x128xbf16>, vector<128x128xbf16>, vector<112x128xf32> -> vector<112x128xf32>
      %188 = arith.addf %181, %187 : vector<112x128xf32>
      %c0_138 = arith.constant 0 : index
      %c231 = arith.constant 231 : index
      %c0_139 = arith.constant 0 : index
      %189 = vector.load %arg2[%c0_138, %c231, %c0_139] : memref<1x384x128xf32, #tpu.memory_space<vmem>>, vector<1x112x128xf32>
      %190 = vector.shape_cast %189 : vector<1x112x128xf32> to vector<112x128xf32>
      %191 = arith.truncf %190 : vector<112x128xf32> to vector<112x128xbf16>
      %c2_140 = arith.constant 2 : index
      %c0_141 = arith.constant 0 : index
      %c0_142 = arith.constant 0 : index
      %192 = vector.load %arg3[%c2_140, %c0_141, %c0_142] : memref<9x128x128xbf16, #tpu.memory_space<vmem>>, vector<1x128x128xbf16>
      %193 = vector.shape_cast %192 : vector<1x128x128xbf16> to vector<128x128xbf16>
      %cst_143 = arith.constant dense<0.000000e+00> : vector<112x128xf32>
      %194 = tpu.matmul %191, %193, %cst_143 {dimension_numbers = #tpu.dot_dimension_numbers<[1], [0], [0], [1], [0, 0, 1, 1], [], []>} : vector<112x128xbf16>, vector<128x128xbf16>, vector<112x128xf32> -> vector<112x128xf32>
      %195 = arith.addf %188, %194 : vector<112x128xf32>
      %c0_144 = arith.constant 0 : index
      %c247 = arith.constant 247 : index
      %c0_145 = arith.constant 0 : index
      %196 = vector.load %arg2[%c0_144, %c247, %c0_145] : memref<1x384x128xf32, #tpu.memory_space<vmem>>, vector<1x112x128xf32>
      %197 = vector.shape_cast %196 : vector<1x112x128xf32> to vector<112x128xf32>
      %198 = arith.truncf %197 : vector<112x128xf32> to vector<112x128xbf16>
      %c3_146 = arith.constant 3 : index
      %c0_147 = arith.constant 0 : index
      %c0_148 = arith.constant 0 : index
      %199 = vector.load %arg3[%c3_146, %c0_147, %c0_148] : memref<9x128x128xbf16, #tpu.memory_space<vmem>>, vector<1x128x128xbf16>
      %200 = vector.shape_cast %199 : vector<1x128x128xbf16> to vector<128x128xbf16>
      %cst_149 = arith.constant dense<0.000000e+00> : vector<112x128xf32>
      %201 = tpu.matmul %198, %200, %cst_149 {dimension_numbers = #tpu.dot_dimension_numbers<[1], [0], [0], [1], [0, 0, 1, 1], [], []>} : vector<112x128xbf16>, vector<128x128xbf16>, vector<112x128xf32> -> vector<112x128xf32>
      %202 = arith.addf %195, %201 : vector<112x128xf32>
      %c0_150 = arith.constant 0 : index
      %c248 = arith.constant 248 : index
      %c0_151 = arith.constant 0 : index
      %203 = vector.load %arg2[%c0_150, %c248, %c0_151] : memref<1x384x128xf32, #tpu.memory_space<vmem>>, vector<1x112x128xf32>
      %204 = vector.shape_cast %203 : vector<1x112x128xf32> to vector<112x128xf32>
      %205 = arith.truncf %204 : vector<112x128xf32> to vector<112x128xbf16>
      %c4_152 = arith.constant 4 : index
      %c0_153 = arith.constant 0 : index
      %c0_154 = arith.constant 0 : index
      %206 = vector.load %arg3[%c4_152, %c0_153, %c0_154] : memref<9x128x128xbf16, #tpu.memory_space<vmem>>, vector<1x128x128xbf16>
      %207 = vector.shape_cast %206 : vector<1x128x128xbf16> to vector<128x128xbf16>
      %cst_155 = arith.constant dense<0.000000e+00> : vector<112x128xf32>
      %208 = tpu.matmul %205, %207, %cst_155 {dimension_numbers = #tpu.dot_dimension_numbers<[1], [0], [0], [1], [0, 0, 1, 1], [], []>} : vector<112x128xbf16>, vector<128x128xbf16>, vector<112x128xf32> -> vector<112x128xf32>
      %209 = arith.addf %202, %208 : vector<112x128xf32>
      %c0_156 = arith.constant 0 : index
      %c249 = arith.constant 249 : index
      %c0_157 = arith.constant 0 : index
      %210 = vector.load %arg2[%c0_156, %c249, %c0_157] : memref<1x384x128xf32, #tpu.memory_space<vmem>>, vector<1x112x128xf32>
      %211 = vector.shape_cast %210 : vector<1x112x128xf32> to vector<112x128xf32>
      %212 = arith.truncf %211 : vector<112x128xf32> to vector<112x128xbf16>
      %c5_158 = arith.constant 5 : index
      %c0_159 = arith.constant 0 : index
      %c0_160 = arith.constant 0 : index
      %213 = vector.load %arg3[%c5_158, %c0_159, %c0_160] : memref<9x128x128xbf16, #tpu.memory_space<vmem>>, vector<1x128x128xbf16>
      %214 = vector.shape_cast %213 : vector<1x128x128xbf16> to vector<128x128xbf16>
      %cst_161 = arith.constant dense<0.000000e+00> : vector<112x128xf32>
      %215 = tpu.matmul %212, %214, %cst_161 {dimension_numbers = #tpu.dot_dimension_numbers<[1], [0], [0], [1], [0, 0, 1, 1], [], []>} : vector<112x128xbf16>, vector<128x128xbf16>, vector<112x128xf32> -> vector<112x128xf32>
      %216 = arith.addf %209, %215 : vector<112x128xf32>
      %c0_162 = arith.constant 0 : index
      %c265 = arith.constant 265 : index
      %c0_163 = arith.constant 0 : index
      %217 = vector.load %arg2[%c0_162, %c265, %c0_163] : memref<1x384x128xf32, #tpu.memory_space<vmem>>, vector<1x112x128xf32>
      %218 = vector.shape_cast %217 : vector<1x112x128xf32> to vector<112x128xf32>
      %219 = arith.truncf %218 : vector<112x128xf32> to vector<112x128xbf16>
      %c6_164 = arith.constant 6 : index
      %c0_165 = arith.constant 0 : index
      %c0_166 = arith.constant 0 : index
      %220 = vector.load %arg3[%c6_164, %c0_165, %c0_166] : memref<9x128x128xbf16, #tpu.memory_space<vmem>>, vector<1x128x128xbf16>
      %221 = vector.shape_cast %220 : vector<1x128x128xbf16> to vector<128x128xbf16>
      %cst_167 = arith.constant dense<0.000000e+00> : vector<112x128xf32>
      %222 = tpu.matmul %219, %221, %cst_167 {dimension_numbers = #tpu.dot_dimension_numbers<[1], [0], [0], [1], [0, 0, 1, 1], [], []>} : vector<112x128xbf16>, vector<128x128xbf16>, vector<112x128xf32> -> vector<112x128xf32>
      %223 = arith.addf %216, %222 : vector<112x128xf32>
      %c0_168 = arith.constant 0 : index
      %c266 = arith.constant 266 : index
      %c0_169 = arith.constant 0 : index
      %224 = vector.load %arg2[%c0_168, %c266, %c0_169] : memref<1x384x128xf32, #tpu.memory_space<vmem>>, vector<1x112x128xf32>
      %225 = vector.shape_cast %224 : vector<1x112x128xf32> to vector<112x128xf32>
      %226 = arith.truncf %225 : vector<112x128xf32> to vector<112x128xbf16>
      %c7_170 = arith.constant 7 : index
      %c0_171 = arith.constant 0 : index
      %c0_172 = arith.constant 0 : index
      %227 = vector.load %arg3[%c7_170, %c0_171, %c0_172] : memref<9x128x128xbf16, #tpu.memory_space<vmem>>, vector<1x128x128xbf16>
      %228 = vector.shape_cast %227 : vector<1x128x128xbf16> to vector<128x128xbf16>
      %cst_173 = arith.constant dense<0.000000e+00> : vector<112x128xf32>
      %229 = tpu.matmul %226, %228, %cst_173 {dimension_numbers = #tpu.dot_dimension_numbers<[1], [0], [0], [1], [0, 0, 1, 1], [], []>} : vector<112x128xbf16>, vector<128x128xbf16>, vector<112x128xf32> -> vector<112x128xf32>
      %230 = arith.addf %223, %229 : vector<112x128xf32>
      %c0_174 = arith.constant 0 : index
      %c267 = arith.constant 267 : index
      %c0_175 = arith.constant 0 : index
      %231 = vector.load %arg2[%c0_174, %c267, %c0_175] : memref<1x384x128xf32, #tpu.memory_space<vmem>>, vector<1x112x128xf32>
      %232 = vector.shape_cast %231 : vector<1x112x128xf32> to vector<112x128xf32>
      %233 = arith.truncf %232 : vector<112x128xf32> to vector<112x128xbf16>
      %c8_176 = arith.constant 8 : index
      %c0_177 = arith.constant 0 : index
      %c0_178 = arith.constant 0 : index
      %234 = vector.load %arg3[%c8_176, %c0_177, %c0_178] : memref<9x128x128xbf16, #tpu.memory_space<vmem>>, vector<1x128x128xbf16>
      %235 = vector.shape_cast %234 : vector<1x128x128xbf16> to vector<128x128xbf16>
      %cst_179 = arith.constant dense<0.000000e+00> : vector<112x128xf32>
      %236 = tpu.matmul %233, %235, %cst_179 {dimension_numbers = #tpu.dot_dimension_numbers<[1], [0], [0], [1], [0, 0, 1, 1], [], []>} : vector<112x128xbf16>, vector<128x128xbf16>, vector<112x128xf32> -> vector<112x128xf32>
      %237 = arith.addf %230, %236 : vector<112x128xf32>
      %238 = arith.index_cast %arg1 : i32 to index
      %c224 = arith.constant 224 : index
      %c0_180 = arith.constant 0 : index
      %239 = vector.load %arg8[%238, %c224, %c0_180] : memref<2x336x128xf32, #tpu.memory_space<vmem>>, vector<1x112x128xf32>
      %240 = vector.shape_cast %239 : vector<1x112x128xf32> to vector<112x128xf32>
      %241 = vector.shape_cast %237 : vector<112x128xf32> to vector<1x112x128xf32>
      tpu.vector_store %arg8[%238, %c224, %c0_180], %241 {strides = array<i32>} : memref<2x336x128xf32, #tpu.memory_space<vmem>>, vector<1x112x128xf32>,
      %c224_181 = arith.constant 224 : index
      %c0_182 = arith.constant 0 : index
      %242 = vector.load %arg6[%c224_181, %c0_182] : memref<336x128xf32, #tpu.memory_space<vmem>>, vector<112x128xf32>
      %243 = arith.mulf %237, %242 : vector<112x128xf32>
      %cst_183 = arith.constant dense<0.000000e+00> : vector<128xf32>
      %244 = vector.multi_reduction <add>, %243, %cst_183 [0] : vector<112x128xf32> to vector<128xf32>
      %245 = vector.shape_cast %244 : vector<128xf32> to vector<1x128xf32>
      %246 = arith.addf %171, %245 : vector<1x128xf32>
      %247 = arith.mulf %243, %237 : vector<112x128xf32>
      %cst_184 = arith.constant dense<0.000000e+00> : vector<128xf32>
      %248 = vector.multi_reduction <add>, %247, %cst_184 [0] : vector<112x128xf32> to vector<128xf32>
      %249 = vector.shape_cast %248 : vector<128xf32> to vector<1x128xf32>
      %250 = arith.addf %175, %249 : vector<1x128xf32>
      %c0_185 = arith.constant 0 : index
      %c0_186 = arith.constant 0 : index
      %251 = vector.load %arg10[%c0_185, %c0_186] : memref<2x128xf32, #tpu.memory_space<vmem>>, vector<1x128xf32>
      %252 = arith.addf %251, %246 : vector<1x128xf32>
      %c0_187 = arith.constant 0 : index
      %c0_188 = arith.constant 0 : index
      %253 = vector.load %arg10[%c0_187, %c0_188] : memref<2x128xf32, #tpu.memory_space<vmem>>, vector<1x128xf32>
      tpu.vector_store %arg10[%c0_187, %c0_188], %252 {strides = array<i32>} : memref<2x128xf32, #tpu.memory_space<vmem>>, vector<1x128xf32>,
      %c1_189 = arith.constant 1 : index
      %c0_190 = arith.constant 0 : index
      %254 = vector.load %arg10[%c1_189, %c0_190] : memref<2x128xf32, #tpu.memory_space<vmem>>, vector<1x128xf32>
      %255 = arith.addf %254, %250 : vector<1x128xf32>
      %c1_191 = arith.constant 1 : index
      %c0_192 = arith.constant 0 : index
      %256 = vector.load %arg10[%c1_191, %c0_192] : memref<2x128xf32, #tpu.memory_space<vmem>>, vector<1x128xf32>
      tpu.vector_store %arg10[%c1_191, %c0_192], %255 {strides = array<i32>} : memref<2x128xf32, #tpu.memory_space<vmem>>, vector<1x128xf32>,
    } else {
    }
    %c1_i32 = arith.constant 1 : i32
    %8 = arith.cmpi eq, %arg0, %c1_i32 : i32
    %c0_i32_4 = arith.constant 0 : i32
    %9 = arith.cmpi eq, %arg1, %c0_i32_4 : i32
    %10 = arith.andi %8, %9 : i1
    %11 = arith.extui %10 : i1 to i32
    %c0_i32_5 = arith.constant 0 : i32
    %12 = arith.cmpi ne, %11, %c0_i32_5 : i32
    scf.if %12 {
      %c0 = arith.constant 0 : index
      %c0_12 = arith.constant 0 : index
      %24 = vector.load %arg10[%c0, %c0_12] : memref<2x128xf32, #tpu.memory_space<vmem>>, vector<1x128xf32>
      %cst = arith.constant 0.001953125 : f32
      %25 = vector.broadcast %cst : f32 to vector<1x128xf32>
      %26 = arith.mulf %24, %25 : vector<1x128xf32>
      %c1 = arith.constant 1 : index
      %c0_13 = arith.constant 0 : index
      %27 = vector.load %arg10[%c1, %c0_13] : memref<2x128xf32, #tpu.memory_space<vmem>>, vector<1x128xf32>
      %cst_14 = arith.constant 0.001953125 : f32
      %28 = vector.broadcast %cst_14 : f32 to vector<1x128xf32>
      %29 = arith.mulf %27, %28 : vector<1x128xf32>
      %30 = arith.mulf %26, %26 : vector<1x128xf32>
      %31 = arith.subf %29, %30 : vector<1x128xf32>
      %cst_15 = arith.constant 0.000000e+00 : f32
      %32 = vector.broadcast %cst_15 : f32 to vector<1x128xf32>
      %33 = arith.maximumf %31, %32 : vector<1x128xf32>
      %c0_16 = arith.constant 0 : index
      %c0_17 = arith.constant 0 : index
      %34 = vector.load %arg5[%c0_16, %c0_17] : memref<4x128xf32, #tpu.memory_space<vmem>>, vector<1x128xf32>
      %cst_18 = arith.constant 9.99999974E-6 : f32
      %35 = vector.broadcast %cst_18 : f32 to vector<1x128xf32>
      %36 = arith.addf %33, %35 : vector<1x128xf32>
      %37 = math.rsqrt %36 : vector<1x128xf32>
      %38 = arith.mulf %34, %37 : vector<1x128xf32>
      %c0_19 = arith.constant 0 : index
      %c0_20 = arith.constant 0 : index
      %39 = vector.load %arg11[%c0_19, %c0_20] : memref<2x128xf32, #tpu.memory_space<vmem>>, vector<1x128xf32>
      tpu.vector_store %arg11[%c0_19, %c0_20], %38 {strides = array<i32>} : memref<2x128xf32, #tpu.memory_space<vmem>>, vector<1x128xf32>,
      %c1_21 = arith.constant 1 : index
      %c0_22 = arith.constant 0 : index
      %40 = vector.load %arg5[%c1_21, %c0_22] : memref<4x128xf32, #tpu.memory_space<vmem>>, vector<1x128xf32>
      %41 = arith.mulf %26, %38 : vector<1x128xf32>
      %42 = arith.subf %40, %41 : vector<1x128xf32>
      %c1_23 = arith.constant 1 : index
      %c0_24 = arith.constant 0 : index
      %43 = vector.load %arg11[%c1_23, %c0_24] : memref<2x128xf32, #tpu.memory_space<vmem>>, vector<1x128xf32>
      tpu.vector_store %arg11[%c1_23, %c0_24], %42 {strides = array<i32>} : memref<2x128xf32, #tpu.memory_space<vmem>>, vector<1x128xf32>,
      %cst_25 = arith.constant 0.000000e+00 : f32
      %44 = vector.broadcast %cst_25 : f32 to vector<2x128xf32>
      %c0_26 = arith.constant 0 : index
      %c0_27 = arith.constant 0 : index
      %45 = vector.load %arg10[%c0_26, %c0_27] : memref<2x128xf32, #tpu.memory_space<vmem>>, vector<2x128xf32>
      tpu.vector_store %arg10[%c0_26, %c0_27], %44 {strides = array<i32>} : memref<2x128xf32, #tpu.memory_space<vmem>>, vector<2x128xf32>,
    } else {
    }
    %c1_i32_6 = arith.constant 1 : i32
    %13 = arith.cmpi eq, %arg0, %c1_i32_6 : i32
    %14 = arith.extui %13 : i1 to i32
    %c0_i32_7 = arith.constant 0 : i32
    %15 = arith.cmpi ne, %14, %c0_i32_7 : i32
    scf.if %15 {
      %c0 = arith.constant 0 : index
      %c0_12 = arith.constant 0 : index
      %24 = vector.load %arg11[%c0, %c0_12] : memref<2x128xf32, #tpu.memory_space<vmem>>, vector<1x128xf32>
      %c1 = arith.constant 1 : index
      %c0_13 = arith.constant 0 : index
      %25 = vector.load %arg11[%c1, %c0_13] : memref<2x128xf32, #tpu.memory_space<vmem>>, vector<1x128xf32>
      %26 = arith.index_cast %arg1 : i32 to index
      %c0_14 = arith.constant 0 : index
      %c0_15 = arith.constant 0 : index
      %27 = vector.load %arg8[%26, %c0_14, %c0_15] : memref<2x336x128xf32, #tpu.memory_space<vmem>>, vector<1x112x128xf32>
      %28 = vector.shape_cast %27 : vector<1x112x128xf32> to vector<112x128xf32>
      %29 = vector.broadcast %24 : vector<1x128xf32> to vector<112x128xf32>
      %30 = arith.mulf %28, %29 : vector<112x128xf32>
      %31 = vector.broadcast %25 : vector<1x128xf32> to vector<112x128xf32>
      %32 = arith.addf %30, %31 : vector<112x128xf32>
      %cst = arith.constant 0.000000e+00 : f32
      %33 = vector.broadcast %cst : f32 to vector<112x128xf32>
      %34 = arith.maximumf %32, %33 : vector<112x128xf32>
      %c0_16 = arith.constant 0 : index
      %c0_17 = arith.constant 0 : index
      %35 = vector.load %arg6[%c0_16, %c0_17] : memref<336x128xf32, #tpu.memory_space<vmem>>, vector<112x128xf32>
      %36 = arith.mulf %34, %35 : vector<112x128xf32>
      %c24 = arith.constant 24 : index
      %c0_18 = arith.constant 0 : index
      %37 = vector.load %arg9[%c24, %c0_18] : memref<384x128xf32, #tpu.memory_space<vmem>>, vector<112x128xf32>
      tpu.vector_store %arg9[%c24, %c0_18], %36 {strides = array<i32>} : memref<384x128xf32, #tpu.memory_space<vmem>>, vector<112x128xf32>,
      %38 = arith.index_cast %arg1 : i32 to index
      %c112 = arith.constant 112 : index
      %c0_19 = arith.constant 0 : index
      %39 = vector.load %arg8[%38, %c112, %c0_19] : memref<2x336x128xf32, #tpu.memory_space<vmem>>, vector<1x112x128xf32>
      %40 = vector.shape_cast %39 : vector<1x112x128xf32> to vector<112x128xf32>
      %41 = vector.broadcast %24 : vector<1x128xf32> to vector<112x128xf32>
      %42 = arith.mulf %40, %41 : vector<112x128xf32>
      %43 = vector.broadcast %25 : vector<1x128xf32> to vector<112x128xf32>
      %44 = arith.addf %42, %43 : vector<112x128xf32>
      %cst_20 = arith.constant 0.000000e+00 : f32
      %45 = vector.broadcast %cst_20 : f32 to vector<112x128xf32>
      %46 = arith.maximumf %44, %45 : vector<112x128xf32>
      %c112_21 = arith.constant 112 : index
      %c0_22 = arith.constant 0 : index
      %47 = vector.load %arg6[%c112_21, %c0_22] : memref<336x128xf32, #tpu.memory_space<vmem>>, vector<112x128xf32>
      %48 = arith.mulf %46, %47 : vector<112x128xf32>
      %c136 = arith.constant 136 : index
      %c0_23 = arith.constant 0 : index
      %49 = vector.load %arg9[%c136, %c0_23] : memref<384x128xf32, #tpu.memory_space<vmem>>, vector<112x128xf32>
      tpu.vector_store %arg9[%c136, %c0_23], %48 {strides = array<i32>} : memref<384x128xf32, #tpu.memory_space<vmem>>, vector<112x128xf32>,
      %50 = arith.index_cast %arg1 : i32 to index
      %c224 = arith.constant 224 : index
      %c0_24 = arith.constant 0 : index
      %51 = vector.load %arg8[%50, %c224, %c0_24] : memref<2x336x128xf32, #tpu.memory_space<vmem>>, vector<1x112x128xf32>
      %52 = vector.shape_cast %51 : vector<1x112x128xf32> to vector<112x128xf32>
      %53 = vector.broadcast %24 : vector<1x128xf32> to vector<112x128xf32>
      %54 = arith.mulf %52, %53 : vector<112x128xf32>
      %55 = vector.broadcast %25 : vector<1x128xf32> to vector<112x128xf32>
      %56 = arith.addf %54, %55 : vector<112x128xf32>
      %cst_25 = arith.constant 0.000000e+00 : f32
      %57 = vector.broadcast %cst_25 : f32 to vector<112x128xf32>
      %58 = arith.maximumf %56, %57 : vector<112x128xf32>
      %c224_26 = arith.constant 224 : index
      %c0_27 = arith.constant 0 : index
      %59 = vector.load %arg6[%c224_26, %c0_27] : memref<336x128xf32, #tpu.memory_space<vmem>>, vector<112x128xf32>
      %60 = arith.mulf %58, %59 : vector<112x128xf32>
      %c248 = arith.constant 248 : index
      %c0_28 = arith.constant 0 : index
      %61 = vector.load %arg9[%c248, %c0_28] : memref<384x128xf32, #tpu.memory_space<vmem>>, vector<112x128xf32>
      tpu.vector_store %arg9[%c248, %c0_28], %60 {strides = array<i32>} : memref<384x128xf32, #tpu.memory_space<vmem>>, vector<112x128xf32>,
      %cst_29 = arith.constant 0.000000e+00 : f32
      %62 = vector.broadcast %cst_29 : f32 to vector<1x128xf32>
      %cst_30 = arith.constant 0.000000e+00 : f32
      %63 = vector.broadcast %cst_30 : f32 to vector<1x128xf32>
      %c5 = arith.constant 5 : index
      %c0_31 = arith.constant 0 : index
      %64 = vector.load %arg9[%c5, %c0_31] : memref<384x128xf32, #tpu.memory_space<vmem>>, vector<112x128xf32>
      %65 = arith.truncf %64 : vector<112x128xf32> to vector<112x128xbf16>
      %c0_32 = arith.constant 0 : index
      %c0_33 = arith.constant 0 : index
      %c0_34 = arith.constant 0 : index
      %66 = vector.load %arg4[%c0_32, %c0_33, %c0_34] : memref<9x128x128xbf16, #tpu.memory_space<vmem>>, vector<1x128x128xbf16>
      %67 = vector.shape_cast %66 : vector<1x128x128xbf16> to vector<128x128xbf16>
      %cst_35 = arith.constant dense<0.000000e+00> : vector<112x128xf32>
      %68 = tpu.matmul %65, %67, %cst_35 {dimension_numbers = #tpu.dot_dimension_numbers<[1], [0], [0], [1], [0, 0, 1, 1], [], []>} : vector<112x128xbf16>, vector<128x128xbf16>, vector<112x128xf32> -> vector<112x128xf32>
      %c6 = arith.constant 6 : index
      %c0_36 = arith.constant 0 : index
      %69 = vector.load %arg9[%c6, %c0_36] : memref<384x128xf32, #tpu.memory_space<vmem>>, vector<112x128xf32>
      %70 = arith.truncf %69 : vector<112x128xf32> to vector<112x128xbf16>
      %c1_37 = arith.constant 1 : index
      %c0_38 = arith.constant 0 : index
      %c0_39 = arith.constant 0 : index
      %71 = vector.load %arg4[%c1_37, %c0_38, %c0_39] : memref<9x128x128xbf16, #tpu.memory_space<vmem>>, vector<1x128x128xbf16>
      %72 = vector.shape_cast %71 : vector<1x128x128xbf16> to vector<128x128xbf16>
      %cst_40 = arith.constant dense<0.000000e+00> : vector<112x128xf32>
      %73 = tpu.matmul %70, %72, %cst_40 {dimension_numbers = #tpu.dot_dimension_numbers<[1], [0], [0], [1], [0, 0, 1, 1], [], []>} : vector<112x128xbf16>, vector<128x128xbf16>, vector<112x128xf32> -> vector<112x128xf32>
      %74 = arith.addf %68, %73 : vector<112x128xf32>
      %c7 = arith.constant 7 : index
      %c0_41 = arith.constant 0 : index
      %75 = vector.load %arg9[%c7, %c0_41] : memref<384x128xf32, #tpu.memory_space<vmem>>, vector<112x128xf32>
      %76 = arith.truncf %75 : vector<112x128xf32> to vector<112x128xbf16>
      %c2 = arith.constant 2 : index
      %c0_42 = arith.constant 0 : index
      %c0_43 = arith.constant 0 : index
      %77 = vector.load %arg4[%c2, %c0_42, %c0_43] : memref<9x128x128xbf16, #tpu.memory_space<vmem>>, vector<1x128x128xbf16>
      %78 = vector.shape_cast %77 : vector<1x128x128xbf16> to vector<128x128xbf16>
      %cst_44 = arith.constant dense<0.000000e+00> : vector<112x128xf32>
      %79 = tpu.matmul %76, %78, %cst_44 {dimension_numbers = #tpu.dot_dimension_numbers<[1], [0], [0], [1], [0, 0, 1, 1], [], []>} : vector<112x128xbf16>, vector<128x128xbf16>, vector<112x128xf32> -> vector<112x128xf32>
      %80 = arith.addf %74, %79 : vector<112x128xf32>
      %c23 = arith.constant 23 : index
      %c0_45 = arith.constant 0 : index
      %81 = vector.load %arg9[%c23, %c0_45] : memref<384x128xf32, #tpu.memory_space<vmem>>, vector<112x128xf32>
      %82 = arith.truncf %81 : vector<112x128xf32> to vector<112x128xbf16>
      %c3 = arith.constant 3 : index
      %c0_46 = arith.constant 0 : index
      %c0_47 = arith.constant 0 : index
      %83 = vector.load %arg4[%c3, %c0_46, %c0_47] : memref<9x128x128xbf16, #tpu.memory_space<vmem>>, vector<1x128x128xbf16>
      %84 = vector.shape_cast %83 : vector<1x128x128xbf16> to vector<128x128xbf16>
      %cst_48 = arith.constant dense<0.000000e+00> : vector<112x128xf32>
      %85 = tpu.matmul %82, %84, %cst_48 {dimension_numbers = #tpu.dot_dimension_numbers<[1], [0], [0], [1], [0, 0, 1, 1], [], []>} : vector<112x128xbf16>, vector<128x128xbf16>, vector<112x128xf32> -> vector<112x128xf32>
      %86 = arith.addf %80, %85 : vector<112x128xf32>
      %c24_49 = arith.constant 24 : index
      %c0_50 = arith.constant 0 : index
      %87 = vector.load %arg9[%c24_49, %c0_50] : memref<384x128xf32, #tpu.memory_space<vmem>>, vector<112x128xf32>
      %88 = arith.truncf %87 : vector<112x128xf32> to vector<112x128xbf16>
      %c4 = arith.constant 4 : index
      %c0_51 = arith.constant 0 : index
      %c0_52 = arith.constant 0 : index
      %89 = vector.load %arg4[%c4, %c0_51, %c0_52] : memref<9x128x128xbf16, #tpu.memory_space<vmem>>, vector<1x128x128xbf16>
      %90 = vector.shape_cast %89 : vector<1x128x128xbf16> to vector<128x128xbf16>
      %cst_53 = arith.constant dense<0.000000e+00> : vector<112x128xf32>
      %91 = tpu.matmul %88, %90, %cst_53 {dimension_numbers = #tpu.dot_dimension_numbers<[1], [0], [0], [1], [0, 0, 1, 1], [], []>} : vector<112x128xbf16>, vector<128x128xbf16>, vector<112x128xf32> -> vector<112x128xf32>
      %92 = arith.addf %86, %91 : vector<112x128xf32>
      %c25 = arith.constant 25 : index
      %c0_54 = arith.constant 0 : index
      %93 = vector.load %arg9[%c25, %c0_54] : memref<384x128xf32, #tpu.memory_space<vmem>>, vector<112x128xf32>
      %94 = arith.truncf %93 : vector<112x128xf32> to vector<112x128xbf16>
      %c5_55 = arith.constant 5 : index
      %c0_56 = arith.constant 0 : index
      %c0_57 = arith.constant 0 : index
      %95 = vector.load %arg4[%c5_55, %c0_56, %c0_57] : memref<9x128x128xbf16, #tpu.memory_space<vmem>>, vector<1x128x128xbf16>
      %96 = vector.shape_cast %95 : vector<1x128x128xbf16> to vector<128x128xbf16>
      %cst_58 = arith.constant dense<0.000000e+00> : vector<112x128xf32>
      %97 = tpu.matmul %94, %96, %cst_58 {dimension_numbers = #tpu.dot_dimension_numbers<[1], [0], [0], [1], [0, 0, 1, 1], [], []>} : vector<112x128xbf16>, vector<128x128xbf16>, vector<112x128xf32> -> vector<112x128xf32>
      %98 = arith.addf %92, %97 : vector<112x128xf32>
      %c41 = arith.constant 41 : index
      %c0_59 = arith.constant 0 : index
      %99 = vector.load %arg9[%c41, %c0_59] : memref<384x128xf32, #tpu.memory_space<vmem>>, vector<112x128xf32>
      %100 = arith.truncf %99 : vector<112x128xf32> to vector<112x128xbf16>
      %c6_60 = arith.constant 6 : index
      %c0_61 = arith.constant 0 : index
      %c0_62 = arith.constant 0 : index
      %101 = vector.load %arg4[%c6_60, %c0_61, %c0_62] : memref<9x128x128xbf16, #tpu.memory_space<vmem>>, vector<1x128x128xbf16>
      %102 = vector.shape_cast %101 : vector<1x128x128xbf16> to vector<128x128xbf16>
      %cst_63 = arith.constant dense<0.000000e+00> : vector<112x128xf32>
      %103 = tpu.matmul %100, %102, %cst_63 {dimension_numbers = #tpu.dot_dimension_numbers<[1], [0], [0], [1], [0, 0, 1, 1], [], []>} : vector<112x128xbf16>, vector<128x128xbf16>, vector<112x128xf32> -> vector<112x128xf32>
      %104 = arith.addf %98, %103 : vector<112x128xf32>
      %c42 = arith.constant 42 : index
      %c0_64 = arith.constant 0 : index
      %105 = vector.load %arg9[%c42, %c0_64] : memref<384x128xf32, #tpu.memory_space<vmem>>, vector<112x128xf32>
      %106 = arith.truncf %105 : vector<112x128xf32> to vector<112x128xbf16>
      %c7_65 = arith.constant 7 : index
      %c0_66 = arith.constant 0 : index
      %c0_67 = arith.constant 0 : index
      %107 = vector.load %arg4[%c7_65, %c0_66, %c0_67] : memref<9x128x128xbf16, #tpu.memory_space<vmem>>, vector<1x128x128xbf16>
      %108 = vector.shape_cast %107 : vector<1x128x128xbf16> to vector<128x128xbf16>
      %cst_68 = arith.constant dense<0.000000e+00> : vector<112x128xf32>
      %109 = tpu.matmul %106, %108, %cst_68 {dimension_numbers = #tpu.dot_dimension_numbers<[1], [0], [0], [1], [0, 0, 1, 1], [], []>} : vector<112x128xbf16>, vector<128x128xbf16>, vector<112x128xf32> -> vector<112x128xf32>
      %110 = arith.addf %104, %109 : vector<112x128xf32>
      %c43 = arith.constant 43 : index
      %c0_69 = arith.constant 0 : index
      %111 = vector.load %arg9[%c43, %c0_69] : memref<384x128xf32, #tpu.memory_space<vmem>>, vector<112x128xf32>
      %112 = arith.truncf %111 : vector<112x128xf32> to vector<112x128xbf16>
      %c8 = arith.constant 8 : index
      %c0_70 = arith.constant 0 : index
      %c0_71 = arith.constant 0 : index
      %113 = vector.load %arg4[%c8, %c0_70, %c0_71] : memref<9x128x128xbf16, #tpu.memory_space<vmem>>, vector<1x128x128xbf16>
      %114 = vector.shape_cast %113 : vector<1x128x128xbf16> to vector<128x128xbf16>
      %cst_72 = arith.constant dense<0.000000e+00> : vector<112x128xf32>
      %115 = tpu.matmul %112, %114, %cst_72 {dimension_numbers = #tpu.dot_dimension_numbers<[1], [0], [0], [1], [0, 0, 1, 1], [], []>} : vector<112x128xbf16>, vector<128x128xbf16>, vector<112x128xf32> -> vector<112x128xf32>
      %116 = arith.addf %110, %115 : vector<112x128xf32>
      %117 = arith.index_cast %arg1 : i32 to index
      %c0_73 = arith.constant 0 : index
      %c0_74 = arith.constant 0 : index
      %118 = vector.load %arg8[%117, %c0_73, %c0_74] : memref<2x336x128xf32, #tpu.memory_space<vmem>>, vector<1x112x128xf32>
      %119 = vector.shape_cast %118 : vector<1x112x128xf32> to vector<112x128xf32>
      %120 = vector.shape_cast %116 : vector<112x128xf32> to vector<1x112x128xf32>
      tpu.vector_store %arg8[%117, %c0_73, %c0_74], %120 {strides = array<i32>} : memref<2x336x128xf32, #tpu.memory_space<vmem>>, vector<1x112x128xf32>,
      %c0_75 = arith.constant 0 : index
      %c0_76 = arith.constant 0 : index
      %121 = vector.load %arg6[%c0_75, %c0_76] : memref<336x128xf32, #tpu.memory_space<vmem>>, vector<112x128xf32>
      %122 = arith.mulf %116, %121 : vector<112x128xf32>
      %cst_77 = arith.constant dense<0.000000e+00> : vector<128xf32>
      %123 = vector.multi_reduction <add>, %122, %cst_77 [0] : vector<112x128xf32> to vector<128xf32>
      %124 = vector.shape_cast %123 : vector<128xf32> to vector<1x128xf32>
      %125 = arith.addf %62, %124 : vector<1x128xf32>
      %126 = arith.mulf %122, %116 : vector<112x128xf32>
      %cst_78 = arith.constant dense<0.000000e+00> : vector<128xf32>
      %127 = vector.multi_reduction <add>, %126, %cst_78 [0] : vector<112x128xf32> to vector<128xf32>
      %128 = vector.shape_cast %127 : vector<128xf32> to vector<1x128xf32>
      %129 = arith.addf %63, %128 : vector<1x128xf32>
      %c117 = arith.constant 117 : index
      %c0_79 = arith.constant 0 : index
      %130 = vector.load %arg9[%c117, %c0_79] : memref<384x128xf32, #tpu.memory_space<vmem>>, vector<112x128xf32>
      %131 = arith.truncf %130 : vector<112x128xf32> to vector<112x128xbf16>
      %c0_80 = arith.constant 0 : index
      %c0_81 = arith.constant 0 : index
      %c0_82 = arith.constant 0 : index
      %132 = vector.load %arg4[%c0_80, %c0_81, %c0_82] : memref<9x128x128xbf16, #tpu.memory_space<vmem>>, vector<1x128x128xbf16>
      %133 = vector.shape_cast %132 : vector<1x128x128xbf16> to vector<128x128xbf16>
      %cst_83 = arith.constant dense<0.000000e+00> : vector<112x128xf32>
      %134 = tpu.matmul %131, %133, %cst_83 {dimension_numbers = #tpu.dot_dimension_numbers<[1], [0], [0], [1], [0, 0, 1, 1], [], []>} : vector<112x128xbf16>, vector<128x128xbf16>, vector<112x128xf32> -> vector<112x128xf32>
      %c118 = arith.constant 118 : index
      %c0_84 = arith.constant 0 : index
      %135 = vector.load %arg9[%c118, %c0_84] : memref<384x128xf32, #tpu.memory_space<vmem>>, vector<112x128xf32>
      %136 = arith.truncf %135 : vector<112x128xf32> to vector<112x128xbf16>
      %c1_85 = arith.constant 1 : index
      %c0_86 = arith.constant 0 : index
      %c0_87 = arith.constant 0 : index
      %137 = vector.load %arg4[%c1_85, %c0_86, %c0_87] : memref<9x128x128xbf16, #tpu.memory_space<vmem>>, vector<1x128x128xbf16>
      %138 = vector.shape_cast %137 : vector<1x128x128xbf16> to vector<128x128xbf16>
      %cst_88 = arith.constant dense<0.000000e+00> : vector<112x128xf32>
      %139 = tpu.matmul %136, %138, %cst_88 {dimension_numbers = #tpu.dot_dimension_numbers<[1], [0], [0], [1], [0, 0, 1, 1], [], []>} : vector<112x128xbf16>, vector<128x128xbf16>, vector<112x128xf32> -> vector<112x128xf32>
      %140 = arith.addf %134, %139 : vector<112x128xf32>
      %c119 = arith.constant 119 : index
      %c0_89 = arith.constant 0 : index
      %141 = vector.load %arg9[%c119, %c0_89] : memref<384x128xf32, #tpu.memory_space<vmem>>, vector<112x128xf32>
      %142 = arith.truncf %141 : vector<112x128xf32> to vector<112x128xbf16>
      %c2_90 = arith.constant 2 : index
      %c0_91 = arith.constant 0 : index
      %c0_92 = arith.constant 0 : index
      %143 = vector.load %arg4[%c2_90, %c0_91, %c0_92] : memref<9x128x128xbf16, #tpu.memory_space<vmem>>, vector<1x128x128xbf16>
      %144 = vector.shape_cast %143 : vector<1x128x128xbf16> to vector<128x128xbf16>
      %cst_93 = arith.constant dense<0.000000e+00> : vector<112x128xf32>
      %145 = tpu.matmul %142, %144, %cst_93 {dimension_numbers = #tpu.dot_dimension_numbers<[1], [0], [0], [1], [0, 0, 1, 1], [], []>} : vector<112x128xbf16>, vector<128x128xbf16>, vector<112x128xf32> -> vector<112x128xf32>
      %146 = arith.addf %140, %145 : vector<112x128xf32>
      %c135 = arith.constant 135 : index
      %c0_94 = arith.constant 0 : index
      %147 = vector.load %arg9[%c135, %c0_94] : memref<384x128xf32, #tpu.memory_space<vmem>>, vector<112x128xf32>
      %148 = arith.truncf %147 : vector<112x128xf32> to vector<112x128xbf16>
      %c3_95 = arith.constant 3 : index
      %c0_96 = arith.constant 0 : index
      %c0_97 = arith.constant 0 : index
      %149 = vector.load %arg4[%c3_95, %c0_96, %c0_97] : memref<9x128x128xbf16, #tpu.memory_space<vmem>>, vector<1x128x128xbf16>
      %150 = vector.shape_cast %149 : vector<1x128x128xbf16> to vector<128x128xbf16>
      %cst_98 = arith.constant dense<0.000000e+00> : vector<112x128xf32>
      %151 = tpu.matmul %148, %150, %cst_98 {dimension_numbers = #tpu.dot_dimension_numbers<[1], [0], [0], [1], [0, 0, 1, 1], [], []>} : vector<112x128xbf16>, vector<128x128xbf16>, vector<112x128xf32> -> vector<112x128xf32>
      %152 = arith.addf %146, %151 : vector<112x128xf32>
      %c136_99 = arith.constant 136 : index
      %c0_100 = arith.constant 0 : index
      %153 = vector.load %arg9[%c136_99, %c0_100] : memref<384x128xf32, #tpu.memory_space<vmem>>, vector<112x128xf32>
      %154 = arith.truncf %153 : vector<112x128xf32> to vector<112x128xbf16>
      %c4_101 = arith.constant 4 : index
      %c0_102 = arith.constant 0 : index
      %c0_103 = arith.constant 0 : index
      %155 = vector.load %arg4[%c4_101, %c0_102, %c0_103] : memref<9x128x128xbf16, #tpu.memory_space<vmem>>, vector<1x128x128xbf16>
      %156 = vector.shape_cast %155 : vector<1x128x128xbf16> to vector<128x128xbf16>
      %cst_104 = arith.constant dense<0.000000e+00> : vector<112x128xf32>
      %157 = tpu.matmul %154, %156, %cst_104 {dimension_numbers = #tpu.dot_dimension_numbers<[1], [0], [0], [1], [0, 0, 1, 1], [], []>} : vector<112x128xbf16>, vector<128x128xbf16>, vector<112x128xf32> -> vector<112x128xf32>
      %158 = arith.addf %152, %157 : vector<112x128xf32>
      %c137 = arith.constant 137 : index
      %c0_105 = arith.constant 0 : index
      %159 = vector.load %arg9[%c137, %c0_105] : memref<384x128xf32, #tpu.memory_space<vmem>>, vector<112x128xf32>
      %160 = arith.truncf %159 : vector<112x128xf32> to vector<112x128xbf16>
      %c5_106 = arith.constant 5 : index
      %c0_107 = arith.constant 0 : index
      %c0_108 = arith.constant 0 : index
      %161 = vector.load %arg4[%c5_106, %c0_107, %c0_108] : memref<9x128x128xbf16, #tpu.memory_space<vmem>>, vector<1x128x128xbf16>
      %162 = vector.shape_cast %161 : vector<1x128x128xbf16> to vector<128x128xbf16>
      %cst_109 = arith.constant dense<0.000000e+00> : vector<112x128xf32>
      %163 = tpu.matmul %160, %162, %cst_109 {dimension_numbers = #tpu.dot_dimension_numbers<[1], [0], [0], [1], [0, 0, 1, 1], [], []>} : vector<112x128xbf16>, vector<128x128xbf16>, vector<112x128xf32> -> vector<112x128xf32>
      %164 = arith.addf %158, %163 : vector<112x128xf32>
      %c153 = arith.constant 153 : index
      %c0_110 = arith.constant 0 : index
      %165 = vector.load %arg9[%c153, %c0_110] : memref<384x128xf32, #tpu.memory_space<vmem>>, vector<112x128xf32>
      %166 = arith.truncf %165 : vector<112x128xf32> to vector<112x128xbf16>
      %c6_111 = arith.constant 6 : index
      %c0_112 = arith.constant 0 : index
      %c0_113 = arith.constant 0 : index
      %167 = vector.load %arg4[%c6_111, %c0_112, %c0_113] : memref<9x128x128xbf16, #tpu.memory_space<vmem>>, vector<1x128x128xbf16>
      %168 = vector.shape_cast %167 : vector<1x128x128xbf16> to vector<128x128xbf16>
      %cst_114 = arith.constant dense<0.000000e+00> : vector<112x128xf32>
      %169 = tpu.matmul %166, %168, %cst_114 {dimension_numbers = #tpu.dot_dimension_numbers<[1], [0], [0], [1], [0, 0, 1, 1], [], []>} : vector<112x128xbf16>, vector<128x128xbf16>, vector<112x128xf32> -> vector<112x128xf32>
      %170 = arith.addf %164, %169 : vector<112x128xf32>
      %c154 = arith.constant 154 : index
      %c0_115 = arith.constant 0 : index
      %171 = vector.load %arg9[%c154, %c0_115] : memref<384x128xf32, #tpu.memory_space<vmem>>, vector<112x128xf32>
      %172 = arith.truncf %171 : vector<112x128xf32> to vector<112x128xbf16>
      %c7_116 = arith.constant 7 : index
      %c0_117 = arith.constant 0 : index
      %c0_118 = arith.constant 0 : index
      %173 = vector.load %arg4[%c7_116, %c0_117, %c0_118] : memref<9x128x128xbf16, #tpu.memory_space<vmem>>, vector<1x128x128xbf16>
      %174 = vector.shape_cast %173 : vector<1x128x128xbf16> to vector<128x128xbf16>
      %cst_119 = arith.constant dense<0.000000e+00> : vector<112x128xf32>
      %175 = tpu.matmul %172, %174, %cst_119 {dimension_numbers = #tpu.dot_dimension_numbers<[1], [0], [0], [1], [0, 0, 1, 1], [], []>} : vector<112x128xbf16>, vector<128x128xbf16>, vector<112x128xf32> -> vector<112x128xf32>
      %176 = arith.addf %170, %175 : vector<112x128xf32>
      %c155 = arith.constant 155 : index
      %c0_120 = arith.constant 0 : index
      %177 = vector.load %arg9[%c155, %c0_120] : memref<384x128xf32, #tpu.memory_space<vmem>>, vector<112x128xf32>
      %178 = arith.truncf %177 : vector<112x128xf32> to vector<112x128xbf16>
      %c8_121 = arith.constant 8 : index
      %c0_122 = arith.constant 0 : index
      %c0_123 = arith.constant 0 : index
      %179 = vector.load %arg4[%c8_121, %c0_122, %c0_123] : memref<9x128x128xbf16, #tpu.memory_space<vmem>>, vector<1x128x128xbf16>
      %180 = vector.shape_cast %179 : vector<1x128x128xbf16> to vector<128x128xbf16>
      %cst_124 = arith.constant dense<0.000000e+00> : vector<112x128xf32>
      %181 = tpu.matmul %178, %180, %cst_124 {dimension_numbers = #tpu.dot_dimension_numbers<[1], [0], [0], [1], [0, 0, 1, 1], [], []>} : vector<112x128xbf16>, vector<128x128xbf16>, vector<112x128xf32> -> vector<112x128xf32>
      %182 = arith.addf %176, %181 : vector<112x128xf32>
      %183 = arith.index_cast %arg1 : i32 to index
      %c112_125 = arith.constant 112 : index
      %c0_126 = arith.constant 0 : index
      %184 = vector.load %arg8[%183, %c112_125, %c0_126] : memref<2x336x128xf32, #tpu.memory_space<vmem>>, vector<1x112x128xf32>
      %185 = vector.shape_cast %184 : vector<1x112x128xf32> to vector<112x128xf32>
      %186 = vector.shape_cast %182 : vector<112x128xf32> to vector<1x112x128xf32>
      tpu.vector_store %arg8[%183, %c112_125, %c0_126], %186 {strides = array<i32>} : memref<2x336x128xf32, #tpu.memory_space<vmem>>, vector<1x112x128xf32>,
      %c112_127 = arith.constant 112 : index
      %c0_128 = arith.constant 0 : index
      %187 = vector.load %arg6[%c112_127, %c0_128] : memref<336x128xf32, #tpu.memory_space<vmem>>, vector<112x128xf32>
      %188 = arith.mulf %182, %187 : vector<112x128xf32>
      %cst_129 = arith.constant dense<0.000000e+00> : vector<128xf32>
      %189 = vector.multi_reduction <add>, %188, %cst_129 [0] : vector<112x128xf32> to vector<128xf32>
      %190 = vector.shape_cast %189 : vector<128xf32> to vector<1x128xf32>
      %191 = arith.addf %125, %190 : vector<1x128xf32>
      %192 = arith.mulf %188, %182 : vector<112x128xf32>
      %cst_130 = arith.constant dense<0.000000e+00> : vector<128xf32>
      %193 = vector.multi_reduction <add>, %192, %cst_130 [0] : vector<112x128xf32> to vector<128xf32>
      %194 = vector.shape_cast %193 : vector<128xf32> to vector<1x128xf32>
      %195 = arith.addf %129, %194 : vector<1x128xf32>
      %c229 = arith.constant 229 : index
      %c0_131 = arith.constant 0 : index
      %196 = vector.load %arg9[%c229, %c0_131] : memref<384x128xf32, #tpu.memory_space<vmem>>, vector<112x128xf32>
      %197 = arith.truncf %196 : vector<112x128xf32> to vector<112x128xbf16>
      %c0_132 = arith.constant 0 : index
      %c0_133 = arith.constant 0 : index
      %c0_134 = arith.constant 0 : index
      %198 = vector.load %arg4[%c0_132, %c0_133, %c0_134] : memref<9x128x128xbf16, #tpu.memory_space<vmem>>, vector<1x128x128xbf16>
      %199 = vector.shape_cast %198 : vector<1x128x128xbf16> to vector<128x128xbf16>
      %cst_135 = arith.constant dense<0.000000e+00> : vector<112x128xf32>
      %200 = tpu.matmul %197, %199, %cst_135 {dimension_numbers = #tpu.dot_dimension_numbers<[1], [0], [0], [1], [0, 0, 1, 1], [], []>} : vector<112x128xbf16>, vector<128x128xbf16>, vector<112x128xf32> -> vector<112x128xf32>
      %c230 = arith.constant 230 : index
      %c0_136 = arith.constant 0 : index
      %201 = vector.load %arg9[%c230, %c0_136] : memref<384x128xf32, #tpu.memory_space<vmem>>, vector<112x128xf32>
      %202 = arith.truncf %201 : vector<112x128xf32> to vector<112x128xbf16>
      %c1_137 = arith.constant 1 : index
      %c0_138 = arith.constant 0 : index
      %c0_139 = arith.constant 0 : index
      %203 = vector.load %arg4[%c1_137, %c0_138, %c0_139] : memref<9x128x128xbf16, #tpu.memory_space<vmem>>, vector<1x128x128xbf16>
      %204 = vector.shape_cast %203 : vector<1x128x128xbf16> to vector<128x128xbf16>
      %cst_140 = arith.constant dense<0.000000e+00> : vector<112x128xf32>
      %205 = tpu.matmul %202, %204, %cst_140 {dimension_numbers = #tpu.dot_dimension_numbers<[1], [0], [0], [1], [0, 0, 1, 1], [], []>} : vector<112x128xbf16>, vector<128x128xbf16>, vector<112x128xf32> -> vector<112x128xf32>
      %206 = arith.addf %200, %205 : vector<112x128xf32>
      %c231 = arith.constant 231 : index
      %c0_141 = arith.constant 0 : index
      %207 = vector.load %arg9[%c231, %c0_141] : memref<384x128xf32, #tpu.memory_space<vmem>>, vector<112x128xf32>
      %208 = arith.truncf %207 : vector<112x128xf32> to vector<112x128xbf16>
      %c2_142 = arith.constant 2 : index
      %c0_143 = arith.constant 0 : index
      %c0_144 = arith.constant 0 : index
      %209 = vector.load %arg4[%c2_142, %c0_143, %c0_144] : memref<9x128x128xbf16, #tpu.memory_space<vmem>>, vector<1x128x128xbf16>
      %210 = vector.shape_cast %209 : vector<1x128x128xbf16> to vector<128x128xbf16>
      %cst_145 = arith.constant dense<0.000000e+00> : vector<112x128xf32>
      %211 = tpu.matmul %208, %210, %cst_145 {dimension_numbers = #tpu.dot_dimension_numbers<[1], [0], [0], [1], [0, 0, 1, 1], [], []>} : vector<112x128xbf16>, vector<128x128xbf16>, vector<112x128xf32> -> vector<112x128xf32>
      %212 = arith.addf %206, %211 : vector<112x128xf32>
      %c247 = arith.constant 247 : index
      %c0_146 = arith.constant 0 : index
      %213 = vector.load %arg9[%c247, %c0_146] : memref<384x128xf32, #tpu.memory_space<vmem>>, vector<112x128xf32>
      %214 = arith.truncf %213 : vector<112x128xf32> to vector<112x128xbf16>
      %c3_147 = arith.constant 3 : index
      %c0_148 = arith.constant 0 : index
      %c0_149 = arith.constant 0 : index
      %215 = vector.load %arg4[%c3_147, %c0_148, %c0_149] : memref<9x128x128xbf16, #tpu.memory_space<vmem>>, vector<1x128x128xbf16>
      %216 = vector.shape_cast %215 : vector<1x128x128xbf16> to vector<128x128xbf16>
      %cst_150 = arith.constant dense<0.000000e+00> : vector<112x128xf32>
      %217 = tpu.matmul %214, %216, %cst_150 {dimension_numbers = #tpu.dot_dimension_numbers<[1], [0], [0], [1], [0, 0, 1, 1], [], []>} : vector<112x128xbf16>, vector<128x128xbf16>, vector<112x128xf32> -> vector<112x128xf32>
      %218 = arith.addf %212, %217 : vector<112x128xf32>
      %c248_151 = arith.constant 248 : index
      %c0_152 = arith.constant 0 : index
      %219 = vector.load %arg9[%c248_151, %c0_152] : memref<384x128xf32, #tpu.memory_space<vmem>>, vector<112x128xf32>
      %220 = arith.truncf %219 : vector<112x128xf32> to vector<112x128xbf16>
      %c4_153 = arith.constant 4 : index
      %c0_154 = arith.constant 0 : index
      %c0_155 = arith.constant 0 : index
      %221 = vector.load %arg4[%c4_153, %c0_154, %c0_155] : memref<9x128x128xbf16, #tpu.memory_space<vmem>>, vector<1x128x128xbf16>
      %222 = vector.shape_cast %221 : vector<1x128x128xbf16> to vector<128x128xbf16>
      %cst_156 = arith.constant dense<0.000000e+00> : vector<112x128xf32>
      %223 = tpu.matmul %220, %222, %cst_156 {dimension_numbers = #tpu.dot_dimension_numbers<[1], [0], [0], [1], [0, 0, 1, 1], [], []>} : vector<112x128xbf16>, vector<128x128xbf16>, vector<112x128xf32> -> vector<112x128xf32>
      %224 = arith.addf %218, %223 : vector<112x128xf32>
      %c249 = arith.constant 249 : index
      %c0_157 = arith.constant 0 : index
      %225 = vector.load %arg9[%c249, %c0_157] : memref<384x128xf32, #tpu.memory_space<vmem>>, vector<112x128xf32>
      %226 = arith.truncf %225 : vector<112x128xf32> to vector<112x128xbf16>
      %c5_158 = arith.constant 5 : index
      %c0_159 = arith.constant 0 : index
      %c0_160 = arith.constant 0 : index
      %227 = vector.load %arg4[%c5_158, %c0_159, %c0_160] : memref<9x128x128xbf16, #tpu.memory_space<vmem>>, vector<1x128x128xbf16>
      %228 = vector.shape_cast %227 : vector<1x128x128xbf16> to vector<128x128xbf16>
      %cst_161 = arith.constant dense<0.000000e+00> : vector<112x128xf32>
      %229 = tpu.matmul %226, %228, %cst_161 {dimension_numbers = #tpu.dot_dimension_numbers<[1], [0], [0], [1], [0, 0, 1, 1], [], []>} : vector<112x128xbf16>, vector<128x128xbf16>, vector<112x128xf32> -> vector<112x128xf32>
      %230 = arith.addf %224, %229 : vector<112x128xf32>
      %c265 = arith.constant 265 : index
      %c0_162 = arith.constant 0 : index
      %231 = vector.load %arg9[%c265, %c0_162] : memref<384x128xf32, #tpu.memory_space<vmem>>, vector<112x128xf32>
      %232 = arith.truncf %231 : vector<112x128xf32> to vector<112x128xbf16>
      %c6_163 = arith.constant 6 : index
      %c0_164 = arith.constant 0 : index
      %c0_165 = arith.constant 0 : index
      %233 = vector.load %arg4[%c6_163, %c0_164, %c0_165] : memref<9x128x128xbf16, #tpu.memory_space<vmem>>, vector<1x128x128xbf16>
      %234 = vector.shape_cast %233 : vector<1x128x128xbf16> to vector<128x128xbf16>
      %cst_166 = arith.constant dense<0.000000e+00> : vector<112x128xf32>
      %235 = tpu.matmul %232, %234, %cst_166 {dimension_numbers = #tpu.dot_dimension_numbers<[1], [0], [0], [1], [0, 0, 1, 1], [], []>} : vector<112x128xbf16>, vector<128x128xbf16>, vector<112x128xf32> -> vector<112x128xf32>
      %236 = arith.addf %230, %235 : vector<112x128xf32>
      %c266 = arith.constant 266 : index
      %c0_167 = arith.constant 0 : index
      %237 = vector.load %arg9[%c266, %c0_167] : memref<384x128xf32, #tpu.memory_space<vmem>>, vector<112x128xf32>
      %238 = arith.truncf %237 : vector<112x128xf32> to vector<112x128xbf16>
      %c7_168 = arith.constant 7 : index
      %c0_169 = arith.constant 0 : index
      %c0_170 = arith.constant 0 : index
      %239 = vector.load %arg4[%c7_168, %c0_169, %c0_170] : memref<9x128x128xbf16, #tpu.memory_space<vmem>>, vector<1x128x128xbf16>
      %240 = vector.shape_cast %239 : vector<1x128x128xbf16> to vector<128x128xbf16>
      %cst_171 = arith.constant dense<0.000000e+00> : vector<112x128xf32>
      %241 = tpu.matmul %238, %240, %cst_171 {dimension_numbers = #tpu.dot_dimension_numbers<[1], [0], [0], [1], [0, 0, 1, 1], [], []>} : vector<112x128xbf16>, vector<128x128xbf16>, vector<112x128xf32> -> vector<112x128xf32>
      %242 = arith.addf %236, %241 : vector<112x128xf32>
      %c267 = arith.constant 267 : index
      %c0_172 = arith.constant 0 : index
      %243 = vector.load %arg9[%c267, %c0_172] : memref<384x128xf32, #tpu.memory_space<vmem>>, vector<112x128xf32>
      %244 = arith.truncf %243 : vector<112x128xf32> to vector<112x128xbf16>
      %c8_173 = arith.constant 8 : index
      %c0_174 = arith.constant 0 : index
      %c0_175 = arith.constant 0 : index
      %245 = vector.load %arg4[%c8_173, %c0_174, %c0_175] : memref<9x128x128xbf16, #tpu.memory_space<vmem>>, vector<1x128x128xbf16>
      %246 = vector.shape_cast %245 : vector<1x128x128xbf16> to vector<128x128xbf16>
      %cst_176 = arith.constant dense<0.000000e+00> : vector<112x128xf32>
      %247 = tpu.matmul %244, %246, %cst_176 {dimension_numbers = #tpu.dot_dimension_numbers<[1], [0], [0], [1], [0, 0, 1, 1], [], []>} : vector<112x128xbf16>, vector<128x128xbf16>, vector<112x128xf32> -> vector<112x128xf32>
      %248 = arith.addf %242, %247 : vector<112x128xf32>
      %249 = arith.index_cast %arg1 : i32 to index
      %c224_177 = arith.constant 224 : index
      %c0_178 = arith.constant 0 : index
      %250 = vector.load %arg8[%249, %c224_177, %c0_178] : memref<2x336x128xf32, #tpu.memory_space<vmem>>, vector<1x112x128xf32>
      %251 = vector.shape_cast %250 : vector<1x112x128xf32> to vector<112x128xf32>
      %252 = vector.shape_cast %248 : vector<112x128xf32> to vector<1x112x128xf32>
      tpu.vector_store %arg8[%249, %c224_177, %c0_178], %252 {strides = array<i32>} : memref<2x336x128xf32, #tpu.memory_space<vmem>>, vector<1x112x128xf32>,
      %c224_179 = arith.constant 224 : index
      %c0_180 = arith.constant 0 : index
      %253 = vector.load %arg6[%c224_179, %c0_180] : memref<336x128xf32, #tpu.memory_space<vmem>>, vector<112x128xf32>
      %254 = arith.mulf %248, %253 : vector<112x128xf32>
      %cst_181 = arith.constant dense<0.000000e+00> : vector<128xf32>
      %255 = vector.multi_reduction <add>, %254, %cst_181 [0] : vector<112x128xf32> to vector<128xf32>
      %256 = vector.shape_cast %255 : vector<128xf32> to vector<1x128xf32>
      %257 = arith.addf %191, %256 : vector<1x128xf32>
      %258 = arith.mulf %254, %248 : vector<112x128xf32>
      %cst_182 = arith.constant dense<0.000000e+00> : vector<128xf32>
      %259 = vector.multi_reduction <add>, %258, %cst_182 [0] : vector<112x128xf32> to vector<128xf32>
      %260 = vector.shape_cast %259 : vector<128xf32> to vector<1x128xf32>
      %261 = arith.addf %195, %260 : vector<1x128xf32>
      %c0_183 = arith.constant 0 : index
      %c0_184 = arith.constant 0 : index
      %262 = vector.load %arg10[%c0_183, %c0_184] : memref<2x128xf32, #tpu.memory_space<vmem>>, vector<1x128xf32>
      %263 = arith.addf %262, %257 : vector<1x128xf32>
      %c0_185 = arith.constant 0 : index
      %c0_186 = arith.constant 0 : index
      %264 = vector.load %arg10[%c0_185, %c0_186] : memref<2x128xf32, #tpu.memory_space<vmem>>, vector<1x128xf32>
      tpu.vector_store %arg10[%c0_185, %c0_186], %263 {strides = array<i32>} : memref<2x128xf32, #tpu.memory_space<vmem>>, vector<1x128xf32>,
      %c1_187 = arith.constant 1 : index
      %c0_188 = arith.constant 0 : index
      %265 = vector.load %arg10[%c1_187, %c0_188] : memref<2x128xf32, #tpu.memory_space<vmem>>, vector<1x128xf32>
      %266 = arith.addf %265, %261 : vector<1x128xf32>
      %c1_189 = arith.constant 1 : index
      %c0_190 = arith.constant 0 : index
      %267 = vector.load %arg10[%c1_189, %c0_190] : memref<2x128xf32, #tpu.memory_space<vmem>>, vector<1x128xf32>
      tpu.vector_store %arg10[%c1_189, %c0_190], %266 {strides = array<i32>} : memref<2x128xf32, #tpu.memory_space<vmem>>, vector<1x128xf32>,
    } else {
    }
    %c2_i32 = arith.constant 2 : i32
    %16 = arith.cmpi eq, %arg0, %c2_i32 : i32
    %c0_i32_8 = arith.constant 0 : i32
    %17 = arith.cmpi eq, %arg1, %c0_i32_8 : i32
    %18 = arith.andi %16, %17 : i1
    %19 = arith.extui %18 : i1 to i32
    %c0_i32_9 = arith.constant 0 : i32
    %20 = arith.cmpi ne, %19, %c0_i32_9 : i32
    scf.if %20 {
      %c0 = arith.constant 0 : index
      %c0_12 = arith.constant 0 : index
      %24 = vector.load %arg10[%c0, %c0_12] : memref<2x128xf32, #tpu.memory_space<vmem>>, vector<1x128xf32>
      %cst = arith.constant 0.001953125 : f32
      %25 = vector.broadcast %cst : f32 to vector<1x128xf32>
      %26 = arith.mulf %24, %25 : vector<1x128xf32>
      %c1 = arith.constant 1 : index
      %c0_13 = arith.constant 0 : index
      %27 = vector.load %arg10[%c1, %c0_13] : memref<2x128xf32, #tpu.memory_space<vmem>>, vector<1x128xf32>
      %cst_14 = arith.constant 0.001953125 : f32
      %28 = vector.broadcast %cst_14 : f32 to vector<1x128xf32>
      %29 = arith.mulf %27, %28 : vector<1x128xf32>
      %30 = arith.mulf %26, %26 : vector<1x128xf32>
      %31 = arith.subf %29, %30 : vector<1x128xf32>
      %cst_15 = arith.constant 0.000000e+00 : f32
      %32 = vector.broadcast %cst_15 : f32 to vector<1x128xf32>
      %33 = arith.maximumf %31, %32 : vector<1x128xf32>
      %c2 = arith.constant 2 : index
      %c0_16 = arith.constant 0 : index
      %34 = vector.load %arg5[%c2, %c0_16] : memref<4x128xf32, #tpu.memory_space<vmem>>, vector<1x128xf32>
      %cst_17 = arith.constant 9.99999974E-6 : f32
      %35 = vector.broadcast %cst_17 : f32 to vector<1x128xf32>
      %36 = arith.addf %33, %35 : vector<1x128xf32>
      %37 = math.rsqrt %36 : vector<1x128xf32>
      %38 = arith.mulf %34, %37 : vector<1x128xf32>
      %c0_18 = arith.constant 0 : index
      %c0_19 = arith.constant 0 : index
      %39 = vector.load %arg11[%c0_18, %c0_19] : memref<2x128xf32, #tpu.memory_space<vmem>>, vector<1x128xf32>
      tpu.vector_store %arg11[%c0_18, %c0_19], %38 {strides = array<i32>} : memref<2x128xf32, #tpu.memory_space<vmem>>, vector<1x128xf32>,
      %c3 = arith.constant 3 : index
      %c0_20 = arith.constant 0 : index
      %40 = vector.load %arg5[%c3, %c0_20] : memref<4x128xf32, #tpu.memory_space<vmem>>, vector<1x128xf32>
      %41 = arith.mulf %26, %38 : vector<1x128xf32>
      %42 = arith.subf %40, %41 : vector<1x128xf32>
      %c1_21 = arith.constant 1 : index
      %c0_22 = arith.constant 0 : index
      %43 = vector.load %arg11[%c1_21, %c0_22] : memref<2x128xf32, #tpu.memory_space<vmem>>, vector<1x128xf32>
      tpu.vector_store %arg11[%c1_21, %c0_22], %42 {strides = array<i32>} : memref<2x128xf32, #tpu.memory_space<vmem>>, vector<1x128xf32>,
      %cst_23 = arith.constant 0.000000e+00 : f32
      %44 = vector.broadcast %cst_23 : f32 to vector<2x128xf32>
      %c0_24 = arith.constant 0 : index
      %c0_25 = arith.constant 0 : index
      %45 = vector.load %arg10[%c0_24, %c0_25] : memref<2x128xf32, #tpu.memory_space<vmem>>, vector<2x128xf32>
      tpu.vector_store %arg10[%c0_24, %c0_25], %44 {strides = array<i32>} : memref<2x128xf32, #tpu.memory_space<vmem>>, vector<2x128xf32>,
    } else {
    }
    %c2_i32_10 = arith.constant 2 : i32
    %21 = arith.cmpi eq, %arg0, %c2_i32_10 : i32
    %22 = arith.extui %21 : i1 to i32
    %c0_i32_11 = arith.constant 0 : i32
    %23 = arith.cmpi ne, %22, %c0_i32_11 : i32
    scf.if %23 {
      %c0 = arith.constant 0 : index
      %c0_12 = arith.constant 0 : index
      %24 = vector.load %arg11[%c0, %c0_12] : memref<2x128xf32, #tpu.memory_space<vmem>>, vector<1x128xf32>
      %c1 = arith.constant 1 : index
      %c0_13 = arith.constant 0 : index
      %25 = vector.load %arg11[%c1, %c0_13] : memref<2x128xf32, #tpu.memory_space<vmem>>, vector<1x128xf32>
      %26 = arith.index_cast %arg1 : i32 to index
      %c0_14 = arith.constant 0 : index
      %c0_15 = arith.constant 0 : index
      %27 = vector.load %arg8[%26, %c0_14, %c0_15] : memref<2x336x128xf32, #tpu.memory_space<vmem>>, vector<1x112x128xf32>
      %28 = vector.shape_cast %27 : vector<1x112x128xf32> to vector<112x128xf32>
      %29 = vector.broadcast %24 : vector<1x128xf32> to vector<112x128xf32>
      %30 = arith.mulf %28, %29 : vector<112x128xf32>
      %31 = vector.broadcast %25 : vector<1x128xf32> to vector<112x128xf32>
      %32 = arith.addf %30, %31 : vector<112x128xf32>
      %c0_16 = arith.constant 0 : index
      %c24 = arith.constant 24 : index
      %c0_17 = arith.constant 0 : index
      %33 = vector.load %arg2[%c0_16, %c24, %c0_17] : memref<1x384x128xf32, #tpu.memory_space<vmem>>, vector<1x112x128xf32>
      %34 = vector.shape_cast %33 : vector<1x112x128xf32> to vector<112x128xf32>
      %35 = arith.addf %32, %34 : vector<112x128xf32>
      %cst = arith.constant 0.000000e+00 : f32
      %36 = vector.broadcast %cst : f32 to vector<112x128xf32>
      %37 = arith.maximumf %35, %36 : vector<112x128xf32>
      %c0_18 = arith.constant 0 : index
      %c0_19 = arith.constant 0 : index
      %c0_20 = arith.constant 0 : index
      %38 = vector.load %arg7[%c0_18, %c0_19, %c0_20] : memref<1x336x128xf32, #tpu.memory_space<vmem>>, vector<1x112x128xf32>
      %39 = vector.shape_cast %38 : vector<1x112x128xf32> to vector<112x128xf32>
      %40 = vector.shape_cast %37 : vector<112x128xf32> to vector<1x112x128xf32>
      tpu.vector_store %arg7[%c0_18, %c0_19, %c0_20], %40 {strides = array<i32>} : memref<1x336x128xf32, #tpu.memory_space<vmem>>, vector<1x112x128xf32>,
      %41 = arith.index_cast %arg1 : i32 to index
      %c112 = arith.constant 112 : index
      %c0_21 = arith.constant 0 : index
      %42 = vector.load %arg8[%41, %c112, %c0_21] : memref<2x336x128xf32, #tpu.memory_space<vmem>>, vector<1x112x128xf32>
      %43 = vector.shape_cast %42 : vector<1x112x128xf32> to vector<112x128xf32>
      %44 = vector.broadcast %24 : vector<1x128xf32> to vector<112x128xf32>
      %45 = arith.mulf %43, %44 : vector<112x128xf32>
      %46 = vector.broadcast %25 : vector<1x128xf32> to vector<112x128xf32>
      %47 = arith.addf %45, %46 : vector<112x128xf32>
      %c0_22 = arith.constant 0 : index
      %c136 = arith.constant 136 : index
      %c0_23 = arith.constant 0 : index
      %48 = vector.load %arg2[%c0_22, %c136, %c0_23] : memref<1x384x128xf32, #tpu.memory_space<vmem>>, vector<1x112x128xf32>
      %49 = vector.shape_cast %48 : vector<1x112x128xf32> to vector<112x128xf32>
      %50 = arith.addf %47, %49 : vector<112x128xf32>
      %cst_24 = arith.constant 0.000000e+00 : f32
      %51 = vector.broadcast %cst_24 : f32 to vector<112x128xf32>
      %52 = arith.maximumf %50, %51 : vector<112x128xf32>
      %c0_25 = arith.constant 0 : index
      %c112_26 = arith.constant 112 : index
      %c0_27 = arith.constant 0 : index
      %53 = vector.load %arg7[%c0_25, %c112_26, %c0_27] : memref<1x336x128xf32, #tpu.memory_space<vmem>>, vector<1x112x128xf32>
      %54 = vector.shape_cast %53 : vector<1x112x128xf32> to vector<112x128xf32>
      %55 = vector.shape_cast %52 : vector<112x128xf32> to vector<1x112x128xf32>
      tpu.vector_store %arg7[%c0_25, %c112_26, %c0_27], %55 {strides = array<i32>} : memref<1x336x128xf32, #tpu.memory_space<vmem>>, vector<1x112x128xf32>,
      %56 = arith.index_cast %arg1 : i32 to index
      %c224 = arith.constant 224 : index
      %c0_28 = arith.constant 0 : index
      %57 = vector.load %arg8[%56, %c224, %c0_28] : memref<2x336x128xf32, #tpu.memory_space<vmem>>, vector<1x112x128xf32>
      %58 = vector.shape_cast %57 : vector<1x112x128xf32> to vector<112x128xf32>
      %59 = vector.broadcast %24 : vector<1x128xf32> to vector<112x128xf32>
      %60 = arith.mulf %58, %59 : vector<112x128xf32>
      %61 = vector.broadcast %25 : vector<1x128xf32> to vector<112x128xf32>
      %62 = arith.addf %60, %61 : vector<112x128xf32>
      %c0_29 = arith.constant 0 : index
      %c248 = arith.constant 248 : index
      %c0_30 = arith.constant 0 : index
      %63 = vector.load %arg2[%c0_29, %c248, %c0_30] : memref<1x384x128xf32, #tpu.memory_space<vmem>>, vector<1x112x128xf32>
      %64 = vector.shape_cast %63 : vector<1x112x128xf32> to vector<112x128xf32>
      %65 = arith.addf %62, %64 : vector<112x128xf32>
      %cst_31 = arith.constant 0.000000e+00 : f32
      %66 = vector.broadcast %cst_31 : f32 to vector<112x128xf32>
      %67 = arith.maximumf %65, %66 : vector<112x128xf32>
      %c0_32 = arith.constant 0 : index
      %c224_33 = arith.constant 224 : index
      %c0_34 = arith.constant 0 : index
      %68 = vector.load %arg7[%c0_32, %c224_33, %c0_34] : memref<1x336x128xf32, #tpu.memory_space<vmem>>, vector<1x112x128xf32>
      %69 = vector.shape_cast %68 : vector<1x112x128xf32> to vector<112x128xf32>
      %70 = vector.shape_cast %67 : vector<112x128xf32> to vector<1x112x128xf32>
      tpu.vector_store %arg7[%c0_32, %c224_33, %c0_34], %70 {strides = array<i32>} : memref<1x336x128xf32, #tpu.memory_space<vmem>>, vector<1x112x128xf32>,
    } else {
    }
    return
  }
  func.func @transform_0(%arg0: i32, %arg1: i32) -> (i32, i32, i32) {
    %c1_i32 = arith.constant 1 : i32
    %0 = arith.cmpi eq, %arg0, %c1_i32 : i32
    %c0_i32 = arith.constant 0 : i32
    %1 = arith.select %0, %c0_i32, %arg1 : i32
    %c0_i32_0 = arith.constant 0 : i32
    %c0_i32_1 = arith.constant 0 : i32
    %c0_i32_2 = arith.constant 0 : i32
    return %1, %c0_i32_0, %c0_i32_1 : i32, i32, i32
  }
  func.func @transform_1(%arg0: i32, %arg1: i32) -> (i32, i32, i32) {
    %c0_i32 = arith.constant 0 : i32
    %c0_i32_0 = arith.constant 0 : i32
    %c0_i32_1 = arith.constant 0 : i32
    %c0_i32_2 = arith.constant 0 : i32
    return %c0_i32, %c0_i32_0, %c0_i32_1 : i32, i32, i32
  }
  func.func @transform_2(%arg0: i32, %arg1: i32) -> (i32, i32, i32) {
    %c0_i32 = arith.constant 0 : i32
    %c0_i32_0 = arith.constant 0 : i32
    %c0_i32_1 = arith.constant 0 : i32
    %c0_i32_2 = arith.constant 0 : i32
    return %c0_i32, %c0_i32_0, %c0_i32_1 : i32, i32, i32
  }
  func.func @transform_3(%arg0: i32, %arg1: i32) -> (i32, i32) {
    %c0_i32 = arith.constant 0 : i32
    %c0_i32_0 = arith.constant 0 : i32
    %c0_i32_1 = arith.constant 0 : i32
    return %c0_i32, %c0_i32_0 : i32, i32
  }
  func.func @transform_4(%arg0: i32, %arg1: i32) -> (i32, i32) {
    %c0_i32 = arith.constant 0 : i32
    %c0_i32_0 = arith.constant 0 : i32
    %c0_i32_1 = arith.constant 0 : i32
    return %c0_i32, %c0_i32_0 : i32, i32
  }
  func.func @transform_5(%arg0: i32, %arg1: i32) -> (i32, i32, i32) {
    %c2_i32 = arith.constant 2 : i32
    %0 = arith.cmpi eq, %arg0, %c2_i32 : i32
    %c0_i32 = arith.constant 0 : i32
    %1 = arith.select %0, %arg1, %c0_i32 : i32
    %c0_i32_0 = arith.constant 0 : i32
    %c0_i32_1 = arith.constant 0 : i32
    %c0_i32_2 = arith.constant 0 : i32
    return %1, %c0_i32_0, %c0_i32_1 : i32, i32, i32
  }
}

</mosaic_0001>

<bundles_post_ra>
// kernel: resblock_forward.1
= control target key start
LH: loop header
LB: loop body
LE: loop exit
PB: predicated region body
PF: predicated region fallthrough
CT: control target
= control target key end

     0   :  { %s17985_s18 = smov 0   ;;  %s17987_s19 = smov 0   ;;  %s22141_s0 = inlined_call_operand.vmem [shape: f32[2,384,128], index: 0, kind: input, shape index: {}]   ;;  %s22142_s1 = inlined_call_operand.vmem [shape: bf16[9,128,128], index: 1, kind: input, shape index: {}]   ;;  %s22143_s2 = inlined_call_operand.vmem [shape: bf16[9,128,128], index: 2, kind: input, shape index: {}]   ;;  %s22144_s3 = inlined_call_operand.vmem [shape: f32[4,128], index: 3, kind: input, shape index: {}]   ;;  %s22145_s4 = inlined_call_operand.vmem [shape: f32[336,128], index: 4, kind: input, shape index: {}]   ;;  %s22146_s5 = inlined_call_operand.vmem [shape: f32[2,336,128], index: 5, kind: output, shape index: {}]  }
   0x1   :  { %s17989_s20 = smov 0   ;;  %s17991_s21 = smov 0  }
   0x2   :  { %s17993_s22 = smov 0  }
   0x3 LB: > { %s24_s23 = sadd.s32 1, %s17938_s20  ;;  %s27_s24 = sadd.s32 1, %s17942_s21  ;;  %s17946_s22 = sphi %s17993_s22, %s15_s22   ;;  %s17942_s21 = sphi %s17991_s21, %s22150_s21   ;;  %s17938_s20 = sphi %s17989_s20, %s22149_s20   ;;  %s17934_s19 = sphi %s17987_s19, %s22148_s19   ;;  %s17930_s18 = sphi %s17985_s18, %s22147_s18  }
   0x4   : > { %p25_p0 = scmp.ge.s32.totalorder %s24_s23, 2  ;;  %p11655_p1 = scmp.ge.s32.totalorder %s17946_s22, 1 }
   0x5   : > { %p211_p2 = scmp.lt.s32.totalorder %s17946_s22, 7 }
   0x6   : > { %s22152_s23 = smov (%p25_p0, %s24_s23), 0  ;;  %s22154_s24 = smov (!%p25_p0, %s27_s24), %s17942_s21 }
   0x7   : > { %p212_p3 = pnand %p11655_p1, %p211_p2  ;;  %p29_p4 = scmp.ge.s32.totalorder %s22154_s24, 3 }
   0x8   : > { %p243_p5 = scmp.eq.s32.totalorder (!%p212_p3), %s17934_s19, 1  ;;  %p252_p6 = scmp.eq.s32.totalorder (!%p212_p3), %s17934_s19, 2 }
   0x9   : > { %s22156_s24 = smov (%p29_p4, %s22154_s24), 0  ;;  %215 = sbr.rel (%p212_p3) target bundleno = 2216 (0x8a8), region = 40 }
   0xa   : > { %p262_p7 = scmp.eq.s32.totalorder (!%p212_p3), %s17934_s19, 0  ;;  %p263_p8 = scmp.eq.s32.totalorder (!%p212_p3), %s17930_s18, 0 }
   0xc   : > { %p264_p10 = pnand (!%p212_p3), %p263_p8, %p262_p7 }
  0x10   : > { %s244_s25 = scalar_select %p243_p5, 0, %s17930_s18 }
  0x11   : > { %s253_s26 = scalar_select %p252_p6, %s17930_s18, 0 }
  0x12   : > { %p245_p9 = scmp.lt.s32.totalorder %s244_s25, 1  ;;  %267 = sbr.rel (%p264_p10) target bundleno = 44 (0x2c), region = 44  ;;  %v17948_v0 = vmov (!%p264_p10), 0.0  }
  0x13   : > { %p254_p11 = scmp.lt.s32.totalorder %s253_s26, 1  ;;  %268 = vst [vmem:[#allocation4] sm:$0x3] (!%p264_p10), %v17948_v0  ;;  %269 = vst [vmem:[#allocation3] sm:$0xff] (!%p264_p10), %v17948_v0 }
  0x14   : > { %s22158_s25 = smov (!%p245_p9, %s244_s25), 1  ;;  %270 = vst [vmem:[#allocation3 + $0x8] sm:$0xff] (!%p264_p10), %v17948_v0  ;;  %271 = vst [vmem:[#allocation3 + $0x10] sm:$0xff] (!%p264_p10), %v17948_v0 }
  0x15   : > { %s22160_s26 = smov (!%p254_p11, %s253_s26), 1  ;;  %s17401_s27 = smul.u32 384, %s22158_s25  ;;  %272 = vst [vmem:[#allocation3 + $0x18] sm:$0xff] (!%p264_p10), %v17948_v0  ;;  %273 = vst [vmem:[#allocation3 + $0x20] sm:$0xff] (!%p264_p10), %v17948_v0 }
  0x16   : > { %s17402_s28 = smul.u32 336, %s22160_s26  ;;  %274 = vst [vmem:[#allocation3 + $0x28] sm:$0xff] (!%p264_p10), %v17948_v0  ;;  %275 = vst [vmem:[#allocation3 + $0x30] sm:$0xff] (!%p264_p10), %v17948_v0 }
  0x17   : > { %s18034_s6 = scalar_lea.vmem %s22141_s0, %s17401_s27  ;;  %276 = vst [vmem:[#allocation3 + $0x38] sm:$0xff] (!%p264_p10), %v17948_v0  ;;  %277 = vst [vmem:[#allocation3 + $0x40] sm:$0xff] (!%p264_p10), %v17948_v0 }
  0x18   : > { %s18039_s9 = scalar_lea.vmem %s22146_s5, %s17402_s28  ;;  %278 = vst [vmem:[#allocation3 + $0x48] sm:$0xff] (!%p264_p10), %v17948_v0  ;;  %279 = vst [vmem:[#allocation3 + $0x50] sm:$0xff] (!%p264_p10), %v17948_v0 }
  0x19   : > { %280 = vst [vmem:[#allocation3 + $0x58] sm:$0xff] %v17948_v0  ;;  %281 = vst [vmem:[#allocation3 + $0x60] sm:$0xff] %v17948_v0 }
  0x1a   : > { %282 = vst [vmem:[#allocation3 + $0x68] sm:$0xff] %v17948_v0  ;;  %283 = vst [vmem:[#allocation3 + $0x70] sm:$0xff] %v17948_v0 }
  0x1b   : > { %284 = vst [vmem:[#allocation3 + $0x78] sm:$0xff] %v17948_v0  ;;  %285 = vst [vmem:[#allocation3 + $0x80] sm:$0xff] %v17948_v0 }
  0x1c   : > { %286 = vst [vmem:[#allocation3 + $0x88] sm:$0xff] %v17948_v0  ;;  %287 = vst [vmem:[#allocation3 + $0x90] sm:$0xff] %v17948_v0 }
  0x1d   : > { %288 = vst [vmem:[#allocation3 + $0x98] sm:$0xff] %v17948_v0  ;;  %289 = vst [vmem:[#allocation3 + $0xa0] sm:$0xff] %v17948_v0 }
  0x1e   : > { %290 = vst [vmem:[#allocation3 + $0xa8] sm:$0xff] %v17948_v0  ;;  %291 = vst [vmem:[#allocation3 + $0xb0] sm:$0xff] %v17948_v0 }
  0x1f   : > { %292 = vst [vmem:[#allocation3 + $0xb8] sm:$0xff] %v17948_v0  ;;  %293 = vst [vmem:[#allocation3 + $0xc0] sm:$0xff] %v17948_v0 }
  0x20   : > { %294 = vst [vmem:[#allocation3 + $0xc8] sm:$0xff] %v17948_v0  ;;  %295 = vst [vmem:[#allocation3 + $0xd0] sm:$0xff] %v17948_v0 }
  0x21   : > { %296 = vst [vmem:[#allocation3 + $0xd8] sm:$0xff] %v17948_v0  ;;  %297 = vst [vmem:[#allocation3 + $0xe0] sm:$0xff] %v17948_v0 }
  0x22   : > { %298 = vst [vmem:[#allocation3 + $0xe8] sm:$0xff] %v17948_v0  ;;  %299 = vst [vmem:[#allocation3 + $0xf0] sm:$0xff] %v17948_v0 }
  0x23   : > { %300 = vst [vmem:[#allocation3 + $0xf8] sm:$0xff] %v17948_v0  ;;  %301 = vst [vmem:[#allocation3 + $0x100] sm:$0xff] %v17948_v0 }
  0x24   : > { %302 = vst [vmem:[#allocation3 + $0x108] sm:$0xff] %v17948_v0  ;;  %303 = vst [vmem:[#allocation3 + $0x110] sm:$0xff] %v17948_v0 }
  0x25   : > { %304 = vst [vmem:[#allocation3 + $0x118] sm:$0xff] %v17948_v0  ;;  %305 = vst [vmem:[#allocation3 + $0x120] sm:$0xff] %v17948_v0 }
  0x26   : > { %306 = vst [vmem:[#allocation3 + $0x128] sm:$0xff] %v17948_v0  ;;  %307 = vst [vmem:[#allocation3 + $0x130] sm:$0xff] %v17948_v0 }
  0x27   : > { %308 = vst [vmem:[#allocation3 + $0x138] sm:$0xff] %v17948_v0  ;;  %309 = vst [vmem:[#allocation3 + $0x140] sm:$0xff] %v17948_v0 }
  0x28   : > { %310 = vst [vmem:[#allocation3 + $0x148] sm:$0xff] %v17948_v0  ;;  %311 = vst [vmem:[#allocation3 + $0x150] sm:$0xff] %v17948_v0 }
  0x29   : > { %312 = vst [vmem:[#allocation3 + $0x158] sm:$0xff] %v17948_v0  ;;  %313 = vst [vmem:[#allocation3 + $0x160] sm:$0xff] %v17948_v0 }
  0x2a   : > { %314 = vst [vmem:[#allocation3 + $0x168] sm:$0xff] %v17948_v0  ;;  %315 = vst [vmem:[#allocation3 + $0x170] sm:$0xff] %v17948_v0 }
  0x2b   : > { %316 = vst [vmem:[#allocation3 + $0x178] sm:$0xff] %v17948_v0 }
  0x2c PF: > { %p11658_p12 = scmp.ne.s32.totalorder %s17934_s19, 0 }
  0x2d   : > { %v17450_v1 = vld [vmem:[%s22142_s1 + $0x40] sm:$0xff] (!%p11658_p12)   ;;  %v17949_v2 = vmov (!%p11658_p12), 0.0   ;;  %v17452_v4 = vld [vmem:[%s22142_s1 + $0x48] sm:$0xff] (!%p11658_p12)   ;;  %vm17950_vm0 = vmmov (!%p11658_p12), 0   ;;  %v17454_v6 = vld [vmem:[%s22142_s1 + $0x50] sm:$0xff] (!%p11658_p12)   ;;  %s1992_s10 = smul.u32 (!%p11658_p12), 336, %s17930_s18 }
  0x2e   : > { %319 = sbr.rel (%p11658_p12) target bundleno = 1070 (0x42e), region = 48  ;;  %13677 = vmatprep.subr.bf16.mxu1 (!%p11658_p12), %v17949_v2  ;;  %13853 = vmatprep.subr.bf16.mxu0 (!%p11658_p12), %v17949_v2  ;;  %v17451_v3 = vld [vmem:[%s22142_s1 + $0x100] sm:$0xff] (!%p11658_p12)   ;;  %v17453_v5 = vld [vmem:[%s22142_s1 + $0x108] sm:$0xff] (!%p11658_p12)   ;;  %v17455_v7 = vld [vmem:[%s22142_s1 + $0x110] sm:$0xff] (!%p11658_p12)  }
  0x2f   : > { %13678 = vmatpush3.bf16.msra.mxu1 (!%p11658_p12), %v17450_v1  ;;  %13693 = vmatprep.mubr.msk.bf16.mxu1 (!%p11658_p12), %vm17950_vm0, %v17949_v2  ;;  %v17456_v8 = vld [vmem:[%s22142_s1 + $0x58] sm:$0xff] (!%p11658_p12)   ;;  %v17458_v10 = vld [vmem:[%s22142_s1 + $0x60] sm:$0xff] (!%p11658_p12)   ;;  %v17460_v12 = vld [vmem:[%s22142_s1 + $0x68] sm:$0xff] (!%p11658_p12)   ;;  %s19127_s15 = scalar_lea.vmem (!%p11658_p12), [#allocation2], %s1992_s10 }
  0x30   : > { %13854 = vmatpush3.bf16.msra.mxu0 (!%p11658_p12), %v17451_v3  ;;  %13679 = vmatprep.subr.bf16.mxu1 (!%p11658_p12), %v17949_v2  ;;  %v17457_v9 = vld [vmem:[%s22142_s1 + $0x118] sm:$0xff] (!%p11658_p12)   ;;  %v17459_v11 = vld [vmem:[%s22142_s1 + $0x120] sm:$0xff] (!%p11658_p12)   ;;  %v17461_v13 = vld [vmem:[%s22142_s1 + $0x128] sm:$0xff] (!%p11658_p12)  }
  0x31   : > { %13855 = vmatprep.subr.bf16.mxu0 (!%p11658_p12), %v17949_v2  ;;  %13869 = vmatprep.mubr.msk.bf16.mxu0 (!%p11658_p12), %vm17950_vm0, %v17949_v2  ;;  %v17462_v14 = vld [vmem:[%s22142_s1 + $0x70] sm:$0xff] (!%p11658_p12)   ;;  %v17464_v16 = vld [vmem:[%s22142_s1 + $0x78] sm:$0xff] (!%p11658_p12)   ;;  %v357_v18 = vld [vmem:[%s18034_s6 + $0x6] sm:$0xff] (!%p11658_p12) }
  0x32   : > { %v17463_v15 = vld [vmem:[%s22142_s1 + $0x130] sm:$0xff] (!%p11658_p12)   ;;  %v17465_v17 = vld [vmem:[%s22142_s1 + $0x138] sm:$0xff] (!%p11658_p12)   ;;  %v1048_v21 = vld [vmem:[%s18034_s6 + $0x20] sm:$0xff] (!%p11658_p12) }
  0x33   : > { %13680 = vmatpush3.bf16.msra.mxu1 (!%p11658_p12), %v17452_v4  ;;  %v358_v19 = vld [vmem:[%s18034_s6 + $0xe] sm:$0xff] (!%p11658_p12)  ;;  %v1047_v20 = vld [vmem:[%s18034_s6 + $0x18] sm:$0xff] (!%p11658_p12)  ;;  %v17466_v24 = vld [vmem:[%s22142_s1] sm:$0xff] (!%p11658_p12)  }
  0x34   : > { %13856 = vmatpush3.bf16.msra.mxu0 (!%p11658_p12), %v17453_v5  ;;  %13681 = vmatprep.subr.bf16.mxu1 (!%p11658_p12), %v17949_v2  ;;  %v371_v22 = vpack.c.bf16 (!%p11658_p12), %v358_v19, %v357_v18  ;;  %v1061_v23 = vpack.c.bf16 (!%p11658_p12), %v1048_v21, %v1047_v20  ;;  %v17467_v25 = vld [vmem:[%s22142_s1 + $0x140] sm:$0xff] (!%p11658_p12)   ;;  %v17468_v26 = vld [vmem:[%s22142_s1 + $0x148] sm:$0xff] (!%p11658_p12)   ;;  %v359_v27 = vld [vmem:[%s18034_s6 + $0x16] sm:$0xff] (!%p11658_p12) }
  0x35   : > { %13857 = vmatprep.subr.bf16.mxu0 %v17949_v2  ;;  %v360_v28 = vld [vmem:[%s18034_s6 + $0x1e] sm:$0xff]  ;;  %v17469_v29 = vld [vmem:[%s22142_s1 + $0x8] sm:$0xff]   ;;  %v1050_v31 = vld [vmem:[%s18034_s6 + $0x30] sm:$0xff] }
  0x36   : > { %v1049_v30 = vld [vmem:[%s18034_s6 + $0x28] sm:$0xff]  ;;  %v372_v32 = vpack.c.bf16 %v360_v28, %v359_v27  ;;  %v17470_v34 = vld [vmem:[%s22142_s1 + $0x150] sm:$0xff]   ;;  %v17471_v36 = vld [vmem:[%s22142_s1 + $0x158] sm:$0xff]  }
  0x37   : > { %13682 = vmatpush3.bf16.msra.mxu1 %v17454_v6  ;;  %v1062_v33 = vpack.c.bf16 %v1050_v31, %v1049_v30  ;;  %v17472_v35 = vld [vmem:[%s22142_s1 + $0x10] sm:$0xff]   ;;  %v361_v37 = vld [vmem:[%s18034_s6 + $0x26] sm:$0xff]  ;;  %v1051_v39 = vld [vmem:[%s18034_s6 + $0x38] sm:$0xff] }
  0x38   : > { %13858 = vmatpush3.bf16.msra.mxu0 %v17455_v7  ;;  %13683 = vmatprep.subr.bf16.mxu1 %v17949_v2  ;;  %v362_v38 = vld [vmem:[%s18034_s6 + $0x2e] sm:$0xff]  ;;  %v1052_v40 = vld [vmem:[%s18034_s6 + $0x40] sm:$0xff]  ;;  %v17475_v41 = vld [vmem:[%s22142_s1 + $0x18] sm:$0xff]  }
  0x39   : > { %13859 = vmatprep.subr.bf16.mxu0 %v17949_v2  ;;  %v373_v42 = vpack.c.bf16 %v362_v38, %v361_v37  ;;  %v1063_v43 = vpack.c.bf16 %v1052_v40, %v1051_v39  ;;  %v17473_v44 = vld [vmem:[%s22142_s1 + $0x160] sm:$0xff]   ;;  %v17474_v46 = vld [vmem:[%s22142_s1 + $0x168] sm:$0xff]   ;;  %v363_v47 = vld [vmem:[%s18034_s6 + $0x36] sm:$0xff] }
  0x3a   : > { %v17477_v45 = vld [vmem:[%s22142_s1 + $0x20] sm:$0xff]   ;;  %v1053_v49 = vld [vmem:[%s18034_s6 + $0x48] sm:$0xff]  ;;  %v1054_v50 = vld [vmem:[%s18034_s6 + $0x50] sm:$0xff] }
  0x3b   : > { %13684 = vmatpush3.bf16.msra.mxu1 %v17456_v8  ;;  %v364_v48 = vld [vmem:[%s18034_s6 + $0x3e] sm:$0xff]  ;;  %v17480_v51 = vld [vmem:[%s22142_s1 + $0x28] sm:$0xff]   ;;  %v1064_v53 = vpack.c.bf16 %v1054_v50, %v1053_v49  ;;  %v17476_v54 = vld [vmem:[%s22142_s1 + $0x170] sm:$0xff]  }
  0x3c   : > { %13860 = vmatpush3.bf16.msra.mxu0 %v17457_v9  ;;  %13685 = vmatprep.subr.bf16.mxu1 %v17949_v2  ;;  %v374_v52 = vpack.c.bf16 %v364_v48, %v363_v47  ;;  %v17482_v55 = vld [vmem:[%s22142_s1 + $0x30] sm:$0xff]   ;;  %v17478_v56 = vld [vmem:[%s22142_s1 + $0x178] sm:$0xff]   ;;  %v365_v57 = vld [vmem:[%s18034_s6 + $0x46] sm:$0xff] }
  0x3d   : > { %13861 = vmatprep.subr.bf16.mxu0 %v17949_v2  ;;  %v366_v58 = vld [vmem:[%s18034_s6 + $0x4e] sm:$0xff]  ;;  %v1236_v59 = vld [vmem:[%s18034_s6 + $0x19] sm:$0xff]  ;;  %v1237_v60 = vld [vmem:[%s18034_s6 + $0x21] sm:$0xff] }
  0x3e   : > { %v17484_v61 = vld [vmem:[%s22142_s1 + $0x38] sm:$0xff]   ;;  %v375_v62 = vpack.c.bf16 %v366_v58, %v365_v57  ;;  %v1250_v63 = vpack.c.bf16 %v1237_v60, %v1236_v59  ;;  %v17479_v0 = vld [vmem:[%s22142_s1 + $0x180] sm:$0xff]   ;;  %v1238_v4 = vld [vmem:[%s18034_s6 + $0x29] sm:$0xff] }
  0x3f   : > { %13686 = vmatpush3.bf16.msra.mxu1 %v17458_v10  ;;  %v367_v1 = vld [vmem:[%s18034_s6 + $0x56] sm:$0xff]  ;;  %v368_v3 = vld [vmem:[%s18034_s6 + $0x5e] sm:$0xff]  ;;  %v17481_v6 = vld [vmem:[%s22142_s1 + $0x188] sm:$0xff]  }
  0x40   : > { %13862 = vmatpush3.bf16.msra.mxu0 %v17459_v11  ;;  %13687 = vmatprep.subr.bf16.mxu1 %v17949_v2  ;;  %v1239_v5 = vld [vmem:[%s18034_s6 + $0x31] sm:$0xff]  ;;  %v376_v7 = vpack.c.bf16 %v368_v3, %v367_v1  ;;  %v369_v10 = vld [vmem:[%s18034_s6 + $0x66] sm:$0xff]  ;;  %v323_v27 = vld [vmem:[%s18034_s6 + $0x1d] sm:$0xff] }
  0x41   : > { %13863 = vmatprep.subr.bf16.mxu0 %v17949_v2  ;;  %v18227_v8 = vpack.c.bf16 %v1239_v5, %v1238_v4  ;;  %v17483_v9 = vld [vmem:[%s22142_s1 + $0x190] sm:$0xff]   ;;  %v320_v18 = vld [vmem:[%s18034_s6 + $0x5] sm:$0xff]  ;;  %v1244_v30 = vld [vmem:[%s18034_s6 + $0x59] sm:$0xff] }
  0x42   : > { %v370_v11 = vld [vmem:[%s18034_s6 + $0x6e] sm:$0xff]  ;;  %v1245_v31 = vld [vmem:[%s18034_s6 + $0x61] sm:$0xff]  ;;  %v17492_v40 = vld [vmem:[%s22142_s1 + $0x98] sm:$0xff]  }
  0x43   : > { %13688 = vmatpush3.bf16.msra.mxu1 %v17460_v12  ;;  %v1240_v12 = vld [vmem:[%s18034_s6 + $0x39] sm:$0xff]  ;;  %v321_v19 = vld [vmem:[%s18034_s6 + $0xd] sm:$0xff]  ;;  %v1249_v47 = vld [vmem:[%s18034_s6 + $0x81] sm:$0xff] }
  0x44   : > { %13864 = vmatpush3.bf16.msra.mxu0 %v17461_v13  ;;  %13689 = vmatprep.subr.bf16.mxu1 %v17949_v2  ;;  %v1241_v13 = vld [vmem:[%s18034_s6 + $0x41] sm:$0xff]  ;;  %v1242_v20 = vld [vmem:[%s18034_s6 + $0x49] sm:$0xff]  ;;  %v1243_v21 = vld [vmem:[%s18034_s6 + $0x51] sm:$0xff] }
  0x45   : > { %13865 = vmatprep.subr.bf16.mxu0 %v17949_v2  ;;  %v17491_v28 = vld [vmem:[%s22142_s1 + $0x1b0] sm:$0xff]   ;;  %v17496_v48 = vld [vmem:[%s22142_s1 + $0xa8] sm:$0xff]   ;;  %v331_v58 = vld [vmem:[%s18034_s6 + $0x5d] sm:$0xff] }
  0x46   : > { %v325_v37 = vld [vmem:[%s18034_s6 + $0x2d] sm:$0xff]  ;;  %v330_v57 = vld [vmem:[%s18034_s6 + $0x55] sm:$0xff]  ;;  %v17503_v3 = vld [vmem:[%s22142_s1 + $0x1e0] sm:$0xff]  }
  0x47   : > { %13690 = vmatpush3.bf16.msra.mxu1 %v17462_v14  ;;  %v17485_v14 = vld [vmem:[%s22142_s1 + $0x198] sm:$0xff]   ;;  %v1246_v38 = vld [vmem:[%s18034_s6 + $0x69] sm:$0xff]  ;;  %v339_v60 = vpack.c.bf16 %v331_v58, %v330_v57  ;;  %v17666_v58 = vld [vmem:[%s22142_s1 + $0x100] sm:$0xff]  }
  0x48   : > { %13866 = vmatpush3.bf16.msra.mxu0 %v17463_v15  ;;  %13691 = vmatprep.subr.bf16.mxu1 %v17949_v2  ;;  %v377_v15 = vpack.c.bf16 %v370_v11, %v369_v10  ;;  %v1247_v39 = vld [vmem:[%s18034_s6 + $0x71] sm:$0xff]  ;;  %v17497_v59 = vld [vmem:[%s22142_s1 + $0x1c8] sm:$0xff]   ;;  %v672_v10 = vld [vmem:[%s18034_s6 + $0x1f] sm:$0xff] }
  0x49   : > { %13867 = vmatprep.subr.bf16.mxu0 %v17949_v2  ;;  %v669_v4 = vld [vmem:[%s18034_s6 + $0x7] sm:$0xff]  ;;  %v670_v5 = vld [vmem:[%s18034_s6 + $0xf] sm:$0xff] }
  0x4a   : > { %v17504_v11 = vld [vmem:[%s22142_s1 + $0xc8] sm:$0xff]   ;;  %v17520_v57 = vld [vmem:[%s22142_s1 + $0x230] sm:$0xff]  }
  0x4b   : > { %13692 = vmatpush3.bf16.msra.mxu1 %v17464_v16  ;;  %v18246_v16 = vpack.c.bf16 %v1241_v13, %v1240_v12  ;;  %v17507_v12 = vld [vmem:[%s22142_s1 + $0x1f0] sm:$0xff]   ;;  %v17509_v13 = vld [vmem:[%s22142_s1 + $0x1f8] sm:$0xff]  }
  0x4c   : > { %13868 = vmatpush3.bf16.msra.mxu0 %v17465_v17  ;;  %13721 = vmatprep.subr.bf16.mxu1 %v17949_v2  ;;  %v17487_v17 = vld [vmem:[%s22142_s1 + $0x1a0] sm:$0xff]  }
  0x4d   : > { %13897 = vmatprep.subr.bf16.mxu0 %v17949_v2 }
  0x4e   : > { %13694 = vmatmul.mubr.bf16.vlgmr.msra.gmra.mrb[0].mxu1 %v371_v22  ;;  %v17489_v22 = vld [vmem:[%s22142_s1 + $0x1a8] sm:$0xff]  }
  0x4f   : > { %13870 = vmatmul.mubr.bf16.vlgmr.msra.gmra.mrb[0].mxu0 %v1061_v23  ;;  %13722 = vmatpush3.bf16.msra.mxu1 %v17466_v24  ;;  %v334_v23 = vpack.c.bf16 %v321_v19, %v320_v18  ;;  %v18265_v24 = vpack.c.bf16 %v1243_v21, %v1242_v20  ;;  %v17508_v18 = vld [vmem:[%s22142_s1 + $0xd8] sm:$0xff]   ;;  %v17510_v20 = vld [vmem:[%s22142_s1 + $0xe0] sm:$0xff]  }
  0x50   : > { %13898 = vmatpush3.bf16.msra.mxu0 %v17467_v25  ;;  %13697 = vmatprep.mubr.msk.bf16.mxu1 %vm17950_vm0, %v17949_v2  ;;  %v17486_v25 = vld [vmem:[%s22142_s1 + $0x80] sm:$0xff]   ;;  %v675_v21 = vld [vmem:[%s18034_s6 + $0x37] sm:$0xff] }
  0x51   : > { %13899 = vmatprep.subr.bf16.mxu0 %v17949_v2  ;;  %13723 = vmatprep.subr.bf16.mxu1 %v17949_v2 }
  0x52   : > { %13873 = vmatprep.mubr.msk.bf16.mxu0 %vm17950_vm0, %v17949_v2 }
  0x53   : > { %13724 = vmatpush3.bf16.msra.mxu1 %v17469_v29  ;;  %v17488_v29 = vld [vmem:[%s22142_s1 + $0x88] sm:$0xff]  }
  0x54   : > { %13900 = vmatpush3.bf16.msra.mxu0 %v17468_v26  ;;  %13725 = vmatprep.subr.bf16.mxu1 %v17949_v2  ;;  %v322_v26 = vld [vmem:[%s18034_s6 + $0x15] sm:$0xff] }
  0x55   : > { %13901 = vmatprep.subr.bf16.mxu0 %v17949_v2 }
  0x56   : > { %13698 = vmatmul.mubr.bf16.gmra.mrb[4].mxu1 %v372_v32  ;;  %v17493_v32 = vld [vmem:[%s22142_s1 + $0x1b8] sm:$0xff]  }
  0x57   : > { %13874 = vmatmul.mubr.bf16.gmra.mrb[4].mxu0 %v1062_v33  ;;  %13701 = vmatprep.mubr.msk.bf16.mxu1 %vm17950_vm0, %v17949_v2  ;;  %v335_v33 = vpack.c.bf16 %v323_v27, %v322_v26 }
  0x58   : > { %13902 = vmatpush3.bf16.msra.mxu0 %v17470_v34  ;;  %13726 = vmatpush3.bf16.msra.mxu1 %v17472_v35  ;;  %v18291_v34 = vpack.c.bf16 %v1245_v31, %v1244_v30  ;;  %v17490_v35 = vld [vmem:[%s22142_s1 + $0x90] sm:$0xff]  }
  0x59   : > { %13903 = vmatprep.subr.bf16.mxu0 %v17949_v2  ;;  %13877 = vmatprep.mubr.msk.bf16.mxu0 %vm17950_vm0, %v17949_v2  ;;  %v678_v30 = vld [vmem:[%s18034_s6 + $0x4f] sm:$0xff] }
  0x5a   : > { %13727 = vmatprep.subr.bf16.mxu1 %v17949_v2  ;;  %v1614_v31 = vld [vmem:[%s18034_s6 + $0x2a] sm:$0xff] }
  0x5c   : > { %13904 = vmatpush3.bf16.msra.mxu0 %v17471_v36  ;;  %13728 = vmatpush3.bf16.msra.mxu1 %v17475_v41  ;;  %v324_v36 = vld [vmem:[%s18034_s6 + $0x25] sm:$0xff] }
  0x5d   : > { %13905 = vmatprep.subr.bf16.mxu0 %v17949_v2  ;;  %13729 = vmatprep.subr.bf16.mxu1 %v17949_v2  ;;  %v336_v41 = vpack.c.bf16 %v325_v37, %v324_v36  ;;  %v17511_v36 = vld [vmem:[%s22142_s1 + $0x200] sm:$0xff]   ;;  %v679_v37 = vld [vmem:[%s18034_s6 + $0x57] sm:$0xff] }
  0x5e   : > { %13702 = vmatmul.mubr.bf16.gmra.mrb[8].mxu1 %v373_v42  ;;  %v18311_v42 = vpack.c.bf16 %v1247_v39, %v1246_v38  ;;  %v680_v38 = vld [vmem:[%s18034_s6 + $0x5f] sm:$0xff] }
  0x5f   : > { %13878 = vmatmul.mubr.bf16.gmra.mrb[8].mxu0 %v1063_v43  ;;  %13705 = vmatprep.mubr.msk.bf16.mxu1 %vm17950_vm0, %v17949_v2  ;;  %v17494_v43 = vld [vmem:[%s22142_s1 + $0xa0] sm:$0xff]  }
  0x60   : > { %13906 = vmatpush3.bf16.msra.mxu0 %v17473_v44  ;;  %13881 = vmatprep.mubr.msk.bf16.mxu0 %vm17950_vm0, %v17949_v2  ;;  %v326_v44 = vld [vmem:[%s18034_s6 + $0x35] sm:$0xff] }
  0x61   : > { %13907 = vmatprep.subr.bf16.mxu0 %v17949_v2  ;;  %13730 = vmatpush3.bf16.msra.mxu1 %v17477_v45  ;;  %v327_v45 = vld [vmem:[%s18034_s6 + $0x3d] sm:$0xff] }
  0x62   : > { %13731 = vmatprep.subr.bf16.mxu1 %v17949_v2  ;;  %v337_v49 = vpack.c.bf16 %v327_v45, %v326_v44  ;;  %v1616_v39 = vld [vmem:[%s18034_s6 + $0x3a] sm:$0xff]  ;;  %v17515_v44 = vld [vmem:[%s22142_s1 + $0x210] sm:$0xff]   ;;  %v681_v45 = vld [vmem:[%s18034_s6 + $0x67] sm:$0xff] }
  0x64   : > { %13908 = vmatpush3.bf16.msra.mxu0 %v17474_v46  ;;  %v1248_v46 = vld [vmem:[%s18034_s6 + $0x79] sm:$0xff] }
  0x65   : > { %13909 = vmatprep.subr.bf16.mxu0 %v17949_v2  ;;  %13732 = vmatpush3.bf16.msra.mxu1 %v17480_v51  ;;  %v18330_v50 = vpack.c.bf16 %v1249_v47, %v1248_v46  ;;  %v17498_v51 = vld [vmem:[%s22142_s1 + $0xb0] sm:$0xff]  }
  0x66   : > { %13706 = vmatmul.mubr.bf16.gmra.mrb[12].mxu1 %v374_v52  ;;  %13733 = vmatprep.subr.bf16.mxu1 %v17949_v2  ;;  %v328_v52 = vld [vmem:[%s18034_s6 + $0x45] sm:$0xff]  ;;  %v682_v46 = vld [vmem:[%s18034_s6 + $0x6f] sm:$0xff] }
  0x67   : > { %13882 = vmatmul.mubr.bf16.gmra.mrb[12].mxu0 %v1064_v53  ;;  %13709 = vmatprep.mubr.msk.bf16.mxu1 %vm17950_vm0, %v17949_v2  ;;  %v329_v53 = vld [vmem:[%s18034_s6 + $0x4d] sm:$0xff] }
  0x68   : > { %13910 = vmatpush3.bf16.msra.mxu0 %v17476_v54  ;;  %13913 = vmatprep.mubr.msk.bf16.mxu0 %vm17950_vm0, %v17949_v2  ;;  %v17500_v54 = vld [vmem:[%s22142_s1 + $0xb8] sm:$0xff]   ;;  %v1618_v47 = vld [vmem:[%s18034_s6 + $0x4a] sm:$0xff] }
  0x69   : > { %13911 = vmatprep.subr.bf16.mxu0 %v17949_v2  ;;  %13734 = vmatpush3.bf16.msra.mxu1 %v17482_v55  ;;  %v338_v55 = vpack.c.bf16 %v329_v53, %v328_v52  ;;  %v17518_v52 = vld [vmem:[%s22142_s1 + $0x220] sm:$0xff]  }
  0x6a   : > { %13735 = vmatprep.subr.bf16.mxu1 %v17949_v2  ;;  %v1620_v53 = vld [vmem:[%s18034_s6 + $0x5a] sm:$0xff] }
  0x6c   : > { %13912 = vmatpush3.bf16.msra.mxu0 %v17478_v56  ;;  %v17495_v56 = vld [vmem:[%s22142_s1 + $0x1c0] sm:$0xff]  }
  0x6d   : > { %13941 = vmatprep.subr.bf16.mxu0 %v17949_v2  ;;  %13736 = vmatpush3.bf16.msra.mxu1 %v17484_v61  ;;  %v17499_v61 = vld [vmem:[%s22142_s1 + $0x1d0] sm:$0xff]  }
  0x6e   : > { %13710 = vmatmul.mubr.bf16.gmra.mrb[16].mxu1 %v375_v62  ;;  %13765 = vmatprep.subr.bf16.mxu1 %v17949_v2  ;;  %v332_v62 = vld [vmem:[%s18034_s6 + $0x65] sm:$0xff] }
  0x6f   : > { %13914 = vmatmul.mubr.bf16.vlgmr.msra.gmra.mrb[0].mxu0 %v1250_v63  ;;  %13713 = vmatprep.mubr.msk.bf16.mxu1 %vm17950_vm0, %v17949_v2  ;;  %v333_v63 = vld [vmem:[%s18034_s6 + $0x6d] sm:$0xff] }
  0x70   : > { %13942 = vmatpush3.bf16.msra.mxu0 %v17479_v0  ;;  %13917 = vmatprep.mubr.msk.bf16.mxu0 %vm17950_vm0, %v17949_v2  ;;  %v17501_v0 = vld [vmem:[%s22142_s1 + $0x1d8] sm:$0xff]   ;;  %v340_v1 = vpack.c.bf16 %v333_v63, %v332_v62  ;;  %v17667_v62 = vld [vmem:[%s22142_s1 + $0x108] sm:$0xff]  }
  0x71   : > { %13943 = vmatprep.subr.bf16.mxu0 %v17949_v2 }
  0x74   : > { %13944 = vmatpush3.bf16.msra.mxu0 %v17481_v6  ;;  %v17505_v6 = vld [vmem:[%s22142_s1 + $0x1e8] sm:$0xff]  }
  0x75   : > { %13945 = vmatprep.subr.bf16.mxu0 %v17949_v2 }
  0x76   : > { %13714 = vmatmul.mubr.bf16.gmra.mrb[20].mxu1 %v376_v7  ;;  %v683_v7 = vpack.c.bf16 %v670_v5, %v669_v4  ;;  %v17669_v5 = vld [vmem:[%s22142_s1 + $0x118] sm:$0xff]  }
  0x77   : > { %13918 = vmatmul.mubr.bf16.gmra.mrb[4].mxu0 %v18227_v8  ;;  %13717 = vmatprep.mubr.msk.bf16.mxu1 %vm17950_vm0, %v17949_v2 }
  0x78   : > { %13921 = vmatprep.mubr.msk.bf16.mxu0 %vm17950_vm0, %v17949_v2  ;;  %13946 = vmatpush3.bf16.msra.mxu0 %v17483_v9  ;;  %v671_v9 = vld [vmem:[%s18034_s6 + $0x17] sm:$0xff] }
  0x79   : > { %13947 = vmatprep.subr.bf16.mxu0 %v17949_v2 }
  0x7c   : > { %13948 = vmatpush3.bf16.msra.mxu0 %v17485_v14  ;;  %v18413_v14 = vpack.c.bf16 %v672_v10, %v671_v9  ;;  %v17671_v10 = vld [vmem:[%s22142_s1 + $0x128] sm:$0xff]  }
  0x7d   : > { %13949 = vmatprep.subr.bf16.mxu0 %v17949_v2 }
  0x7e   : > { %13718 = vmatmul.mubr.bf16.gmra.mrb[24].mxu1 %v377_v15  ;;  %v17506_v15 = vld [vmem:[%s22142_s1 + $0xd0] sm:$0xff]  }
  0x7f   : > { %13922 = vmatmul.mubr.bf16.gmra.mrb[8].mxu0 %v18246_v16  ;;  %13737 = vmatprep.mubr.msk.bf16.mxu1 %vm17950_vm0, %v17949_v2 }
  0x80   : > { %13925 = vmatprep.mubr.msk.bf16.mxu0 %vm17950_vm0, %v17949_v2  ;;  %13950 = vmatpush3.bf16.msra.mxu0 %v17487_v17  ;;  %v674_v17 = vld [vmem:[%s18034_s6 + $0x2f] sm:$0xff] }
  0x81   : > { %13951 = vmatprep.subr.bf16.mxu0 %v17949_v2 }
  0x84   : > { %13952 = vmatpush3.bf16.msra.mxu0 %v17489_v22  ;;  %v676_v22 = vld [vmem:[%s18034_s6 + $0x3f] sm:$0xff] }
  0x85   : > { %13953 = vmatprep.subr.bf16.mxu0 %v17949_v2  ;;  %v18453_v26 = vpack.c.bf16 %v676_v22, %v675_v21  ;;  %v17524_v21 = vld [vmem:[%s22142_s1 + $0x50] sm:$0xff]  }
  0x86   : > { %13738 = vmatmul.mubr.bf16.vlgmr.msra.gmra.mrb[0].mxu1 %v334_v23  ;;  %v1437_v23 = vld [vmem:[%s18034_s6 + $0x89] sm:$0xff]  ;;  %v870_v22 = vld [vmem:[%s18034_s6 + $0x77] sm:$0xff] }
  0x87   : > { %13926 = vmatmul.mubr.bf16.gmra.mrb[12].mxu0 %v18265_v24  ;;  %13766 = vmatpush3.bf16.msra.mxu1 %v17486_v25  ;;  %v17512_v25 = vld [vmem:[%s22142_s1 + $0xe8] sm:$0xff]  }
  0x88   : > { %13741 = vmatprep.mubr.msk.bf16.mxu1 %vm17950_vm0, %v17949_v2  ;;  %13767 = vmatprep.subr.bf16.mxu1 %v17949_v2 }
  0x89   : > { %13929 = vmatprep.mubr.msk.bf16.mxu0 %vm17950_vm0, %v17949_v2  ;;  %13954 = vmatpush3.bf16.msra.mxu0 %v17491_v28  ;;  %v17514_v28 = vld [vmem:[%s22142_s1 + $0xf0] sm:$0xff]  }
  0x8a   : > { %13955 = vmatprep.subr.bf16.mxu0 %v17949_v2 }
  0x8b   : > { %13768 = vmatpush3.bf16.msra.mxu1 %v17488_v29  ;;  %v677_v29 = vld [vmem:[%s18034_s6 + $0x47] sm:$0xff] }
  0x8c   : > { %13769 = vmatprep.subr.bf16.mxu1 %v17949_v2 }
  0x8d   : > { %13956 = vmatpush3.bf16.msra.mxu0 %v17493_v32  ;;  %v1615_v32 = vld [vmem:[%s18034_s6 + $0x32] sm:$0xff] }
  0x8e   : > { %13742 = vmatmul.mubr.bf16.gmra.mrb[4].mxu1 %v335_v33  ;;  %13985 = vmatprep.subr.bf16.mxu0 %v17949_v2  ;;  %v17516_v33 = vld [vmem:[%s22142_s1 + $0xf8] sm:$0xff]  }
  0x8f   : > { %13930 = vmatmul.mubr.bf16.gmra.mrb[16].mxu0 %v18291_v34  ;;  %13745 = vmatprep.mubr.msk.bf16.mxu1 %vm17950_vm0, %v17949_v2 }
  0x90   : > { %13770 = vmatpush3.bf16.msra.mxu1 %v17490_v35  ;;  %13933 = vmatprep.mubr.msk.bf16.mxu0 %vm17950_vm0, %v17949_v2  ;;  %v1628_v35 = vpack.c.bf16 %v1615_v32, %v1614_v31  ;;  %v1056_v31 = vld [vmem:[%s18034_s6 + $0x60] sm:$0xff] }
  0x91   : > { %13771 = vmatprep.subr.bf16.mxu1 %v17949_v2  ;;  %v1809_v32 = vld [vmem:[%s18034_s6 + $0x5b] sm:$0xff] }
  0x94   : > { %13772 = vmatpush3.bf16.msra.mxu1 %v17492_v40  ;;  %v1617_v40 = vld [vmem:[%s18034_s6 + $0x42] sm:$0xff] }
  0x95   : > { %13773 = vmatprep.subr.bf16.mxu1 %v17949_v2 }
  0x96   : > { %13746 = vmatmul.mubr.bf16.gmra.mrb[8].mxu1 %v336_v41  ;;  %v17513_v41 = vld [vmem:[%s22142_s1 + $0x208] sm:$0xff]  }
  0x97   : > { %13934 = vmatmul.mubr.bf16.gmra.mrb[20].mxu0 %v18311_v42  ;;  %13749 = vmatprep.mubr.msk.bf16.mxu1 %vm17950_vm0, %v17949_v2 }
  0x98   : > { %13937 = vmatprep.mubr.msk.bf16.mxu0 %vm17950_vm0, %v17949_v2  ;;  %13774 = vmatpush3.bf16.msra.mxu1 %v17494_v43  ;;  %v1629_v43 = vpack.c.bf16 %v1617_v40, %v1616_v39  ;;  %v17527_v39 = vld [vmem:[%s22142_s1 + $0x48] sm:$0xff]  }
  0x99   : > { %13775 = vmatprep.subr.bf16.mxu1 %v17949_v2  ;;  %v1057_v40 = vld [vmem:[%s18034_s6 + $0x68] sm:$0xff] }
  0x9c   : > { %13776 = vmatpush3.bf16.msra.mxu1 %v17496_v48  ;;  %v1619_v48 = vld [vmem:[%s18034_s6 + $0x52] sm:$0xff] }
  0x9d   : > { %13777 = vmatprep.subr.bf16.mxu1 %v17949_v2 }
  0x9e   : > { %13750 = vmatmul.mubr.bf16.gmra.mrb[12].mxu1 %v337_v49  ;;  %v17517_v49 = vld [vmem:[%s22142_s1 + $0x218] sm:$0xff]  }
  0x9f   : > { %13938 = vmatmul.mubr.bf16.gmra.mrb[24].mxu0 %v18330_v50  ;;  %13753 = vmatprep.mubr.msk.bf16.mxu1 %vm17950_vm0, %v17949_v2 }
  0xa0   : > { %13957 = vmatprep.mubr.msk.bf16.mxu0 %vm17950_vm0, %v17949_v2  ;;  %13778 = vmatpush3.bf16.msra.mxu1 %v17498_v51  ;;  %v1630_v51 = vpack.c.bf16 %v1619_v48, %v1618_v47  ;;  %v17529_v47 = vld [vmem:[%s22142_s1 + $0x50] sm:$0xff]   ;;  %v17530_v48 = vld [vmem:[%s22142_s1 + $0x58] sm:$0xff]  }
  0xa1   : > { %13779 = vmatprep.subr.bf16.mxu1 %v17949_v2 }
  0xa4   : > { %13780 = vmatpush3.bf16.msra.mxu1 %v17500_v54  ;;  %v1621_v54 = vld [vmem:[%s18034_s6 + $0x62] sm:$0xff] }
  0xa5   : > { %13809 = vmatprep.subr.bf16.mxu1 %v17949_v2 }
  0xa6   : > { %13754 = vmatmul.mubr.bf16.gmra.mrb[16].mxu1 %v338_v55  ;;  %v17519_v55 = vld [vmem:[%s22142_s1 + $0x228] sm:$0xff]  }
  0xa7   : > { %13958 = vmatmul.mubr.bf16.vlgmr.msra.gmra.mrb[0].mxu0 %v18227_v8  ;;  %13757 = vmatprep.mubr.msk.bf16.mxu1 %vm17950_vm0, %v17949_v2  ;;  %v17502_v8 = vld [vmem:[%s22142_s1 + $0xc0] sm:$0xff]  }
  0xa8   : > { %13986 = vmatpush3.bf16.msra.mxu0 %v17495_v56  ;;  %13961 = vmatprep.mubr.msk.bf16.mxu0 %vm17950_vm0, %v17949_v2  ;;  %v1631_v56 = vpack.c.bf16 %v1621_v54, %v1620_v53 }
  0xa9   : > { %13987 = vmatprep.subr.bf16.mxu0 %v17949_v2 }
  0xac   : > { %13988 = vmatpush3.bf16.msra.mxu0 %v17497_v59  ;;  %v1622_v59 = vld [vmem:[%s18034_s6 + $0x6a] sm:$0xff] }
  0xad   : > { %13989 = vmatprep.subr.bf16.mxu0 %v17949_v2 }
  0xae   : > { %13758 = vmatmul.mubr.bf16.gmra.mrb[20].mxu1 %v339_v60  ;;  %v1623_v60 = vld [vmem:[%s18034_s6 + $0x72] sm:$0xff] }
  0xaf   : > { %13962 = vmatmul.mubr.bf16.gmra.mrb[4].mxu0 %v18246_v16  ;;  %13761 = vmatprep.mubr.msk.bf16.mxu1 %vm17950_vm0, %v17949_v2  ;;  %v673_v16 = vld [vmem:[%s18034_s6 + $0x27] sm:$0xff]  ;;  %v1632_v63 = vpack.c.bf16 %v1623_v60, %v1622_v59  ;;  %v17535_v60 = vld [vmem:[%s22142_s1 + $0x70] sm:$0xff]  }
  0xb0   : > { %13965 = vmatprep.mubr.msk.bf16.mxu0 %vm17950_vm0, %v17949_v2  ;;  %13990 = vmatpush3.bf16.msra.mxu0 %v17499_v61  ;;  %v18433_v19 = vpack.c.bf16 %v674_v17, %v673_v16  ;;  %v17521_v61 = vld [vmem:[%s22142_s1 + $0x238] sm:$0xff]  }
  0xb1   : > { %13991 = vmatprep.subr.bf16.mxu0 %v17949_v2  ;;  %v17673_v16 = vld [vmem:[%s22142_s1 + $0x138] sm:$0xff]  }
  0xb2   : > { %v1805_v17 = vld [vmem:[%s18034_s6 + $0x3b] sm:$0xff] }
  0xb4   : > { %13992 = vmatpush3.bf16.msra.mxu0 %v17501_v0  ;;  %v1624_v0 = vld [vmem:[%s18034_s6 + $0x7a] sm:$0xff] }
  0xb5   : > { %13993 = vmatprep.subr.bf16.mxu0 %v17949_v2 }
  0xb6   : > { %13762 = vmatmul.mubr.bf16.gmra.mrb[24].mxu1 %v340_v1  ;;  %v17668_v1 = vld [vmem:[%s22142_s1 + $0x110] sm:$0xff]  }
  0xb7   : > { %13966 = vmatmul.mubr.bf16.gmra.mrb[8].mxu0 %v18265_v24  ;;  %13781 = vmatprep.mubr.msk.bf16.mxu1 %vm17950_vm0, %v17949_v2  ;;  %v1438_v24 = vld [vmem:[%s18034_s6 + $0x91] sm:$0xff] }
  0xb8   : > { %13969 = vmatprep.mubr.msk.bf16.mxu0 %vm17950_vm0, %v17949_v2  ;;  %13994 = vmatpush3.bf16.msra.mxu0 %v17503_v3  ;;  %v1445_v27 = vpack.c.bf16 %v1438_v24, %v1437_v23  ;;  %v1625_v3 = vld [vmem:[%s18034_s6 + $0x82] sm:$0xff]  ;;  %v1807_v24 = vld [vmem:[%s18034_s6 + $0x4b] sm:$0xff] }
  0xb9   : > { %13995 = vmatprep.subr.bf16.mxu0 %v17949_v2  ;;  %v1633_v4 = vpack.c.bf16 %v1625_v3, %v1624_v0  ;;  %v871_v23 = vld [vmem:[%s18034_s6 + $0x7f] sm:$0xff] }
  0xba   : > { %v3887_v0 = vld [vmem:[%s18034_s6 + $0xe6] sm:$0xff] }
  0xbc   : > { %13996 = vmatpush3.bf16.msra.mxu0 %v17505_v6  ;;  %v1626_v6 = vld [vmem:[%s18034_s6 + $0x8a] sm:$0xff] }
  0xbd   : > { %13997 = vmatprep.subr.bf16.mxu0 %v17949_v2 }
  0xbe   : > { %13782 = vmatmul.mubr.bf16.vlgmr.msra.gmra.mrb[0].mxu1 %v683_v7  ;;  %v1627_v7 = vld [vmem:[%s18034_s6 + $0x92] sm:$0xff] }
  0xbf   : > { %13970 = vmatmul.mubr.bf16.gmra.mrb[12].mxu0 %v18291_v34  ;;  %13810 = vmatpush3.bf16.msra.mxu1 %v17502_v8  ;;  %v18472_v34 = vpack.c.bf16 %v678_v30, %v677_v29  ;;  %v17670_v8 = vld [vmem:[%s22142_s1 + $0x120] sm:$0xff]   ;;  %v1634_v9 = vpack.c.bf16 %v1627_v7, %v1626_v6  ;;  %v1055_v30 = vld [vmem:[%s18034_s6 + $0x58] sm:$0xff] }
  0xc0   : > { %13785 = vmatprep.mubr.msk.bf16.mxu1 %vm17950_vm0, %v17949_v2  ;;  %13811 = vmatprep.subr.bf16.mxu1 %v17949_v2  ;;  %v17528_v29 = vld [vmem:[%s22142_s1 + $0x60] sm:$0xff]  }
  0xc1   : > { %13973 = vmatprep.mubr.msk.bf16.mxu0 %vm17950_vm0, %v17949_v2  ;;  %13998 = vmatpush3.bf16.msra.mxu0 %v17507_v12  ;;  %v1804_v12 = vld [vmem:[%s18034_s6 + $0x33] sm:$0xff]  ;;  %v17539_v6 = vld [vmem:[%s22142_s1] sm:$0xff]  }
  0xc2   : > { %13999 = vmatprep.subr.bf16.mxu0 %v17949_v2  ;;  %v2129_v7 = vld [vmem:[%s18034_s6 + $0x86] sm:$0xff] }
  0xc3   : > { %13812 = vmatpush3.bf16.msra.mxu1 %v17504_v11  ;;  %v1803_v11 = vld [vmem:[%s18034_s6 + $0x2b] sm:$0xff] }
  0xc4   : > { %13813 = vmatprep.subr.bf16.mxu1 %v17949_v2 }
  0xc5   : > { %14000 = vmatpush3.bf16.msra.mxu0 %v17509_v13  ;;  %v17672_v13 = vld [vmem:[%s22142_s1 + $0x130] sm:$0xff]  }
  0xc6   : > { %13786 = vmatmul.mubr.bf16.gmra.mrb[4].mxu1 %v18413_v14  ;;  %14029 = vmatprep.subr.bf16.mxu0 %v17949_v2 }
  0xc7   : > { %13974 = vmatmul.mubr.bf16.gmra.mrb[16].mxu0 %v18311_v42  ;;  %13789 = vmatprep.mubr.msk.bf16.mxu1 %vm17950_vm0, %v17949_v2  ;;  %v18491_v42 = vpack.c.bf16 %v680_v38, %v679_v37  ;;  %v17526_v37 = vld [vmem:[%s22142_s1 + $0x40] sm:$0xff]   ;;  %v17534_v38 = vld [vmem:[%s22142_s1 + $0x70] sm:$0xff]  }
  0xc8   : > { %13814 = vmatpush3.bf16.msra.mxu1 %v17506_v15  ;;  %13977 = vmatprep.mubr.msk.bf16.mxu0 %vm17950_vm0, %v17949_v2  ;;  %v17522_v15 = vld [vmem:[%s22142_s1 + $0x40] sm:$0xff]  }
  0xc9   : > { %13815 = vmatprep.subr.bf16.mxu1 %v17949_v2 }
  0xcc   : > { %13816 = vmatpush3.bf16.msra.mxu1 %v17508_v18  ;;  %v1806_v18 = vld [vmem:[%s18034_s6 + $0x43] sm:$0xff] }
  0xcd   : > { %13817 = vmatprep.subr.bf16.mxu1 %v17949_v2 }
  0xce   : > { %13790 = vmatmul.mubr.bf16.gmra.mrb[8].mxu1 %v18433_v19 }
  0xcf   : > { %13978 = vmatmul.mubr.bf16.gmra.mrb[20].mxu0 %v18330_v50  ;;  %13793 = vmatprep.mubr.msk.bf16.mxu1 %vm17950_vm0, %v17949_v2  ;;  %v18510_v50 = vpack.c.bf16 %v682_v46, %v681_v45 }
  0xd0   : > { %13981 = vmatprep.mubr.msk.bf16.mxu0 %vm17950_vm0, %v17949_v2  ;;  %13818 = vmatpush3.bf16.msra.mxu1 %v17510_v20  ;;  %v1818_v20 = vpack.c.bf16 %v1806_v18, %v1805_v17  ;;  %v2131_v17 = vld [vmem:[%s18034_s6 + $0x96] sm:$0xff]  ;;  %v2132_v18 = vld [vmem:[%s18034_s6 + $0x9e] sm:$0xff] }
  0xd1   : > { %13819 = vmatprep.subr.bf16.mxu1 %v17949_v2 }
  0xd4   : > { %13820 = vmatpush3.bf16.msra.mxu1 %v17512_v25  ;;  %v1808_v25 = vld [vmem:[%s18034_s6 + $0x53] sm:$0xff] }
  0xd5   : > { %13821 = vmatprep.subr.bf16.mxu1 %v17949_v2 }
  0xd6   : > { %13794 = vmatmul.mubr.bf16.gmra.mrb[12].mxu1 %v18453_v26 }
  0xd7   : > { %13982 = vmatmul.mubr.bf16.gmra.mrb[24].mxu0 %v1445_v27  ;;  %13797 = vmatprep.mubr.msk.bf16.mxu1 %vm17950_vm0, %v17949_v2  ;;  %v18627_v27 = vpack.c.bf16 %v871_v23, %v870_v22  ;;  %v17545_v22 = vld [vmem:[%s22142_s1 + $0x18] sm:$0xff]   ;;  %v2143_v23 = vpack.c.bf16 %v2132_v18, %v2131_v17 }
  0xd8   : > { %14001 = vmatprep.mubr.msk.bf16.mxu0 %vm17950_vm0, %v17949_v2  ;;  %13822 = vmatpush3.bf16.msra.mxu1 %v17514_v28  ;;  %v1819_v28 = vpack.c.bf16 %v1808_v25, %v1807_v24  ;;  %v17546_v25 = vld [vmem:[%s22142_s1 + $0x20] sm:$0xff]   ;;  %v17560_v17 = vld [vmem:[%s22142_s1 + $0x98] sm:$0xff]  }
  0xd9   : > { %13823 = vmatprep.subr.bf16.mxu1 %v17949_v2  ;;  %v17561_v18 = vld [vmem:[%s22142_s1 + $0x98] sm:$0xff]  }
  0xdc   : > { %13824 = vmatpush3.bf16.msra.mxu1 %v17516_v33  ;;  %v1810_v33 = vld [vmem:[%s18034_s6 + $0x63] sm:$0xff] }
  0xdd   : > { %16053 = vmatprep.subr.bf16.mxu1 %v17949_v2 }
  0xde   : > { %13798 = vmatmul.mubr.bf16.gmra.mrb[16].mxu1 %v18472_v34 }
  0xdf   : > { %14002 = vmatmul.mubr.bf16.vlgmr.msra.gmra.mrb[0].mxu0 %v1628_v35  ;;  %13801 = vmatprep.mubr.msk.bf16.mxu1 %vm17950_vm0, %v17949_v2  ;;  %v1065_v35 = vpack.c.bf16 %v1056_v31, %v1055_v30  ;;  %v3893_v30 = vld [vmem:[%s18034_s6 + $0x116] sm:$0xff]  ;;  %v3894_v31 = vld [vmem:[%s18034_s6 + $0x11e] sm:$0xff] }
  0xe0   : > { %14030 = vmatpush3.bf16.msra.mxu0 %v17511_v36  ;;  %14005 = vmatprep.mubr.msk.bf16.mxu0 %vm17950_vm0, %v17949_v2  ;;  %v1820_v36 = vpack.c.bf16 %v1810_v33, %v1809_v32  ;;  %v17548_v32 = vld [vmem:[%s22142_s1 + $0x28] sm:$0xff]  }
  0xe1   : > { %14031 = vmatprep.subr.bf16.mxu0 %v17949_v2  ;;  %v17549_v33 = vld [vmem:[%s22142_s1 + $0x28] sm:$0xff]  }
  0xe4   : > { %14032 = vmatpush3.bf16.msra.mxu0 %v17513_v41  ;;  %v1058_v41 = vld [vmem:[%s18034_s6 + $0x70] sm:$0xff] }
  0xe5   : > { %14033 = vmatprep.subr.bf16.mxu0 %v17949_v2  ;;  %v1066_v45 = vpack.c.bf16 %v1058_v41, %v1057_v40  ;;  %v3895_v40 = vld [vmem:[%s18034_s6 + $0x126] sm:$0xff]  ;;  %v3896_v41 = vld [vmem:[%s18034_s6 + $0x12e] sm:$0xff] }
  0xe6   : > { %13802 = vmatmul.mubr.bf16.gmra.mrb[20].mxu1 %v18491_v42 }
  0xe7   : > { %14006 = vmatmul.mubr.bf16.gmra.mrb[4].mxu0 %v1629_v43  ;;  %13805 = vmatprep.mubr.msk.bf16.mxu1 %vm17950_vm0, %v17949_v2  ;;  %v1812_v43 = vld [vmem:[%s18034_s6 + $0x73] sm:$0xff] }
  0xe8   : > { %14009 = vmatprep.mubr.msk.bf16.mxu0 %vm17950_vm0, %v17949_v2  ;;  %14034 = vmatpush3.bf16.msra.mxu0 %v17515_v44  ;;  %v17536_v44 = vld [vmem:[%s22142_s1 + $0x78] sm:$0xff]  }
  0xe9   : > { %14035 = vmatprep.subr.bf16.mxu0 %v17949_v2 }
  0xec   : > { %14036 = vmatpush3.bf16.msra.mxu0 %v17517_v49  ;;  %v1059_v49 = vld [vmem:[%s18034_s6 + $0x78] sm:$0xff] }
  0xed   : > { %14037 = vmatprep.subr.bf16.mxu0 %v17949_v2 }
  0xee   : > { %13806 = vmatmul.mubr.bf16.gmra.mrb[24].mxu1 %v18510_v50 }
  0xef   : > { %14010 = vmatmul.mubr.bf16.gmra.mrb[8].mxu0 %v1630_v51  ;;  %13825 = vmatprep.mubr.msk.bf16.mxu1 %vm17950_vm0, %v17949_v2  ;;  %v1813_v51 = vld [vmem:[%s18034_s6 + $0x7b] sm:$0xff] }
  0xf0   : > { %14013 = vmatprep.mubr.msk.bf16.mxu0 %vm17950_vm0, %v17949_v2  ;;  %14038 = vmatpush3.bf16.msra.mxu0 %v17518_v52  ;;  %v1814_v52 = vld [vmem:[%s18034_s6 + $0x83] sm:$0xff] }
  0xf1   : > { %14039 = vmatprep.subr.bf16.mxu0 %v17949_v2  ;;  %v1822_v54 = vpack.c.bf16 %v1814_v52, %v1813_v51  ;;  %v2139_v52 = vld [vmem:[%s18034_s6 + $0xd6] sm:$0xff] }
  0xf4   : > { %14040 = vmatpush3.bf16.msra.mxu0 %v17519_v55  ;;  %v17532_v55 = vld [vmem:[%s22142_s1 + $0x60] sm:$0xff]  }
  0xf5   : > { %14041 = vmatprep.subr.bf16.mxu0 %v17949_v2 }
  0xf6   : > { %13826 = vmatmul.mubr.bf16.vlgmr.msra.gmra.mrb[0].mxu1 %v18413_v14  ;;  %v1817_v14 = vpack.c.bf16 %v1804_v12, %v1803_v11  ;;  %v3890_v11 = vld [vmem:[%s18034_s6 + $0xfe] sm:$0xff]  ;;  %v17541_v12 = vld [vmem:[%s22142_s1 + $0x8] sm:$0xff]  }
  0xf7   : > { %14014 = vmatmul.mubr.bf16.gmra.mrb[12].mxu0 %v1631_v56  ;;  %16061 = vmatpush3.bf16.msra.mxu1 %v17666_v58  ;;  %v17533_v56 = vld [vmem:[%s22142_s1 + $0x68] sm:$0xff]   ;;  %v1816_v58 = vld [vmem:[%s18034_s6 + $0x93] sm:$0xff] }
  0xf8   : > { %13829 = vmatprep.mubr.msk.bf16.mxu1 %vm17950_vm0, %v17949_v2  ;;  %16054 = vmatprep.subr.bf16.mxu1 %v17949_v2 }
  0xf9   : > { %14017 = vmatprep.mubr.msk.bf16.mxu0 %vm17950_vm0, %v17949_v2  ;;  %14042 = vmatpush3.bf16.msra.mxu0 %v17520_v57  ;;  %v1815_v57 = vld [vmem:[%s18034_s6 + $0x8b] sm:$0xff] }
  0xfa   : > { %14043 = vmatprep.subr.bf16.mxu0 %v17949_v2  ;;  %v1823_v59 = vpack.c.bf16 %v1816_v58, %v1815_v57  ;;  %v2090_v58 = vld [vmem:[%s18034_s6 + $0x75] sm:$0xff] }
  0xfb   : > { %16062 = vmatpush3.bf16.msra.mxu1 %v17667_v62  ;;  %v2127_v62 = vld [vmem:[%s18034_s6 + $0x76] sm:$0xff] }
  0xfc   : > { %16055 = vmatprep.subr.bf16.mxu1 %v17949_v2 }
  0xfd   : > { %14044 = vmatpush3.bf16.msra.mxu0 %v17521_v61  ;;  %v17537_v61 = vld [vmem:[%s22142_s1 + $0x78] sm:$0xff]  }
  0xfe   : > { %13830 = vmatmul.mubr.bf16.gmra.mrb[4].mxu1 %v18433_v19  ;;  %14469 = vmatprep.subr.bf16.mxu0 %v17949_v2  ;;  %v17523_v19 = vld [vmem:[%s22142_s1 + $0x48] sm:$0xff]  }
  0xff   : > { %14018 = vmatmul.mubr.bf16.gmra.mrb[16].mxu0 %v1632_v63  ;;  %13833 = vmatprep.mubr.msk.bf16.mxu1 %vm17950_vm0, %v17949_v2  ;;  %v2128_v63 = vld [vmem:[%s18034_s6 + $0x7e] sm:$0xff] }
 0x100   : > { %16063 = vmatpush3.bf16.msra.mxu1 %v17668_v1  ;;  %14021 = vmatprep.mubr.msk.bf16.mxu0 %vm17950_vm0, %v17949_v2  ;;  %v3888_v1 = vld [vmem:[%s18034_s6 + $0xee] sm:$0xff]  ;;  %v2141_v3 = vpack.c.bf16 %v2128_v63, %v2127_v62  ;;  %v17554_v63 = vld [vmem:[%s22142_s1 + $0x80] sm:$0xff]  }
 0x101   : > { %16056 = vmatprep.subr.bf16.mxu1 %v17949_v2 }
 0x104   : > { %16064 = vmatpush3.bf16.msra.mxu1 %v17669_v5  ;;  %v3901_v5 = vpack.c.bf16 %v3888_v1, %v3887_v0  ;;  %v17555_v1 = vld [vmem:[%s22142_s1 + $0x80] sm:$0xff]  }
 0x105   : > { %16057 = vmatprep.subr.bf16.mxu1 %v17949_v2 }
 0x106   : > { %13834 = vmatmul.mubr.bf16.gmra.mrb[8].mxu1 %v18453_v26  ;;  %v17525_v26 = vld [vmem:[%s22142_s1 + $0x58] sm:$0xff]  }
 0x107   : > { %14022 = vmatmul.mubr.bf16.gmra.mrb[20].mxu0 %v1633_v4  ;;  %13837 = vmatprep.mubr.msk.bf16.mxu1 %vm17950_vm0, %v17949_v2  ;;  %v17538_v4 = vld [vmem:[%s22142_s1] sm:$0xff]  }
 0x108   : > { %14025 = vmatprep.mubr.msk.bf16.mxu0 %vm17950_vm0, %v17949_v2  ;;  %16065 = vmatpush3.bf16.msra.mxu1 %v17670_v8  ;;  %v2130_v8 = vld [vmem:[%s18034_s6 + $0x8e] sm:$0xff] }
 0x109   : > { %16058 = vmatprep.subr.bf16.mxu1 %v17949_v2 }
 0x10c   : > { %16066 = vmatpush3.bf16.msra.mxu1 %v17671_v10  ;;  %v3889_v10 = vld [vmem:[%s18034_s6 + $0xf6] sm:$0xff] }
 0x10d   : > { %16059 = vmatprep.subr.bf16.mxu1 %v17949_v2 }
 0x10e   : > { %13838 = vmatmul.mubr.bf16.gmra.mrb[12].mxu1 %v18472_v34  ;;  %v17531_v34 = vld [vmem:[%s22142_s1 + $0x68] sm:$0xff]  }
 0x10f   : > { %14026 = vmatmul.mubr.bf16.gmra.mrb[24].mxu0 %v1634_v9  ;;  %13841 = vmatprep.mubr.msk.bf16.mxu1 %vm17950_vm0, %v17949_v2  ;;  %v17540_v9 = vld [vmem:[%s22142_s1 + $0x8] sm:$0xff]  }
 0x110   : > { %14045 = vmatprep.mubr.msk.bf16.mxu0 %vm17950_vm0, %v17949_v2  ;;  %16067 = vmatpush3.bf16.msra.mxu1 %v17672_v13  ;;  %v2142_v13 = vpack.c.bf16 %v2130_v8, %v2129_v7  ;;  %v3853_v7 = vld [vmem:[%s18034_s6 + $0xfd] sm:$0xff]  ;;  %v17557_v8 = vld [vmem:[%s22142_s1 + $0x88] sm:$0xff]  }
 0x111   : > { %16060 = vmatprep.subr.bf16.mxu1 %v17949_v2 }
 0x114   : > { %16068 = vmatpush3.bf16.msra.mxu1 %v17673_v16  ;;  %v17543_v16 = vld [vmem:[%s22142_s1 + $0x10] sm:$0xff]  }
 0x115   : > { %14073 = vmatprep.subr.bf16.mxu1 %v17949_v2 }
 0x116   : > { %13842 = vmatmul.mubr.bf16.gmra.mrb[16].mxu1 %v18491_v42  ;;  %v1811_v42 = vld [vmem:[%s18034_s6 + $0x6b] sm:$0xff] }
 0x117   : > { %14046 = vmatmul.mubr.bf16.vlgmr.msra.gmra.mrb[0].mxu0 %v1817_v14  ;;  %13845 = vmatprep.mubr.msk.bf16.mxu1 %vm17950_vm0, %v17949_v2  ;;  %v1821_v46 = vpack.c.bf16 %v1812_v43, %v1811_v42  ;;  %v3902_v14 = vpack.c.bf16 %v3890_v11, %v3889_v10  ;;  %v17552_v42 = vld [vmem:[%s22142_s1 + $0x38] sm:$0xff]   ;;  %v17558_v11 = vld [vmem:[%s22142_s1 + $0x90] sm:$0xff]  }
 0x118   : > { %14470 = vmatpush3.bf16.msra.mxu0 %v17522_v15  ;;  %14049 = vmatprep.mubr.msk.bf16.mxu0 %vm17950_vm0, %v17949_v2  ;;  %v17542_v15 = vld [vmem:[%s22142_s1 + $0x10] sm:$0xff]   ;;  %v17553_v43 = vld [vmem:[%s22142_s1 + $0x38] sm:$0xff]  }
 0x119   : > { %14471 = vmatprep.subr.bf16.mxu0 %v17949_v2 }
 0x11c   : > { %14472 = vmatpush3.bf16.msra.mxu0 %v17523_v19  ;;  %v3891_v19 = vld [vmem:[%s18034_s6 + $0x106] sm:$0xff] }
 0x11d   : > { %14473 = vmatprep.subr.bf16.mxu0 %v17949_v2 }
 0x11e   : > { %13846 = vmatmul.mubr.bf16.gmra.mrb[20].mxu1 %v18510_v50  ;;  %v1060_v50 = vld [vmem:[%s18034_s6 + $0x80] sm:$0xff] }
 0x11f   : > { %14050 = vmatmul.mubr.bf16.gmra.mrb[4].mxu0 %v1818_v20  ;;  %13849 = vmatprep.mubr.msk.bf16.mxu1 %vm17950_vm0, %v17949_v2  ;;  %v1067_v53 = vpack.c.bf16 %v1060_v50, %v1059_v49  ;;  %v3892_v20 = vld [vmem:[%s18034_s6 + $0x10e] sm:$0xff]  ;;  %v3898_v49 = vld [vmem:[%s18034_s6 + $0x13e] sm:$0xff] }
 0x120   : > { %14053 = vmatprep.mubr.msk.bf16.mxu0 %vm17950_vm0, %v17949_v2  ;;  %14474 = vmatpush3.bf16.msra.mxu0 %v17524_v21  ;;  %v17544_v21 = vld [vmem:[%s22142_s1 + $0x18] sm:$0xff]   ;;  %v3903_v24 = vpack.c.bf16 %v3892_v20, %v3891_v19 }
 0x121   : > { %14475 = vmatprep.subr.bf16.mxu0 %v17949_v2 }
 0x124   : > { %14476 = vmatpush3.bf16.msra.mxu0 %v17525_v26  ;;  %v17547_v26 = vld [vmem:[%s22142_s1 + $0x20] sm:$0xff]  }
 0x125   : > { %14477 = vmatprep.subr.bf16.mxu0 %v17949_v2 }
 0x126   : > { %13850 = vmatmul.mubr.bf16.gmra.mrb[24].mxu1 %v18627_v27 }
 0x127   : > { %14054 = vmatmul.mubr.bf16.gmra.mrb[8].mxu0 %v1819_v28  ;;  %13885 = vmatprep.mubr.msk.bf16.mxu1 %vm17950_vm0, %v17949_v2  ;;  %v2133_v28 = vld [vmem:[%s18034_s6 + $0xa6] sm:$0xff] }
 0x128   : > { %14057 = vmatprep.mubr.msk.bf16.mxu0 %vm17950_vm0, %v17949_v2  ;;  %14478 = vmatpush3.bf16.msra.mxu0 %v17528_v29  ;;  %v2134_v29 = vld [vmem:[%s18034_s6 + $0xae] sm:$0xff] }
 0x129   : > { %14479 = vmatprep.subr.bf16.mxu0 %v17949_v2 }
 0x12c   : > { %14480 = vmatpush3.bf16.msra.mxu0 %v17531_v34  ;;  %v2144_v34 = vpack.c.bf16 %v2134_v29, %v2133_v28  ;;  %v17564_v28 = vld [vmem:[%s22142_s1 + $0xa8] sm:$0xff]  }
 0x12d   : > { %14481 = vmatprep.subr.bf16.mxu0 %v17949_v2  ;;  %v17565_v29 = vld [vmem:[%s22142_s1 + $0xa8] sm:$0xff]  }
 0x12e   : > { %13886 = vmatmul.mubr.bf16.vlgmr.msra.gmra.mrb[16].mxu1 %v1065_v35  ;;  %v3904_v35 = vpack.c.bf16 %v3894_v31, %v3893_v30 }
 0x12f   : > { %14058 = vmatmul.mubr.bf16.gmra.mrb[12].mxu0 %v1820_v36  ;;  %14074 = vmatpush3.bf16.msra.mxu1 %v17526_v37  ;;  %v17550_v36 = vld [vmem:[%s22142_s1 + $0x30] sm:$0xff]  }
 0x130   : > { %14075 = vmatprep.subr.bf16.mxu1 %v17949_v2  ;;  %13889 = vmatprep.mubr.msk.bf16.mxu1 %vm17950_vm0, %v17949_v2  ;;  %v17551_v37 = vld [vmem:[%s22142_s1 + $0x30] sm:$0xff]  }
 0x131   : > { %14061 = vmatprep.mubr.msk.bf16.mxu0 %vm17950_vm0, %v17949_v2  ;;  %14482 = vmatpush3.bf16.msra.mxu0 %v17534_v38  ;;  %v2135_v38 = vld [vmem:[%s18034_s6 + $0xb6] sm:$0xff] }
 0x132   : > { %14483 = vmatprep.subr.bf16.mxu0 %v17949_v2 }
 0x133   : > { %14076 = vmatpush3.bf16.msra.mxu1 %v17527_v39  ;;  %v2136_v39 = vld [vmem:[%s18034_s6 + $0xbe] sm:$0xff] }
 0x134   : > { %14077 = vmatprep.subr.bf16.mxu1 %v17949_v2 }
 0x135   : > { %14484 = vmatpush3.bf16.msra.mxu0 %v17536_v44  ;;  %v2145_v44 = vpack.c.bf16 %v2136_v39, %v2135_v38  ;;  %v17568_v38 = vld [vmem:[%s22142_s1 + $0xb8] sm:$0xff]  }
 0x136   : > { %13890 = vmatmul.mubr.bf16.gmra.mrb[20].mxu1 %v1066_v45  ;;  %14513 = vmatprep.subr.bf16.mxu0 %v17949_v2  ;;  %v3905_v45 = vpack.c.bf16 %v3896_v41, %v3895_v40  ;;  %v17569_v39 = vld [vmem:[%s22142_s1 + $0xb8] sm:$0xff]  }
 0x137   : > { %14062 = vmatmul.mubr.bf16.gmra.mrb[16].mxu0 %v1821_v46  ;;  %14078 = vmatpush3.bf16.msra.mxu1 %v17529_v47  ;;  %v2137_v46 = vld [vmem:[%s18034_s6 + $0xc6] sm:$0xff]  ;;  %v2138_v47 = vld [vmem:[%s18034_s6 + $0xce] sm:$0xff] }
 0x138   : > { %14079 = vmatprep.subr.bf16.mxu1 %v17949_v2  ;;  %13893 = vmatprep.mubr.msk.bf16.mxu1 %vm17950_vm0, %v17949_v2  ;;  %v2146_v50 = vpack.c.bf16 %v2138_v47, %v2137_v46 }
 0x139   : > { %14065 = vmatprep.mubr.msk.bf16.mxu0 %vm17950_vm0, %v17949_v2 }
 0x13b   : > { %14080 = vmatpush3.bf16.msra.mxu1 %v17530_v48  ;;  %v3897_v48 = vld [vmem:[%s18034_s6 + $0x136] sm:$0xff] }
 0x13c   : > { %14081 = vmatprep.subr.bf16.mxu1 %v17949_v2  ;;  %v3906_v51 = vpack.c.bf16 %v3898_v49, %v3897_v48  ;;  %v2102_v48 = vld [vmem:[%s18034_s6 + $0xd5] sm:$0xff]  ;;  %v2103_v49 = vld [vmem:[%s18034_s6 + $0xdd] sm:$0xff] }
 0x13e   : > { %13894 = vmatmul.mubr.bf16.gmra.mrb[24].mxu1 %v1067_v53  ;;  %v2140_v53 = vld [vmem:[%s18034_s6 + $0xde] sm:$0xff] }
 0x13f   : > { %14066 = vmatmul.mubr.bf16.gmra.mrb[20].mxu0 %v1822_v54  ;;  %14082 = vmatpush3.bf16.msra.mxu1 %v17532_v55  ;;  %v3899_v54 = vld [vmem:[%s18034_s6 + $0x146] sm:$0xff]  ;;  %v3900_v55 = vld [vmem:[%s18034_s6 + $0x14e] sm:$0xff] }
 0x140   : > { %14083 = vmatprep.subr.bf16.mxu1 %v17949_v2  ;;  %14069 = vmatprep.mubr.msk.bf16.mxu0 %vm17950_vm0, %v17949_v2  ;;  %v3907_v57 = vpack.c.bf16 %v3900_v55, %v3899_v54  ;;  %v4198_v54 = vld [vmem:[%s18034_s6 + $0xe7] sm:$0xff]  ;;  %v4199_v55 = vld [vmem:[%s18034_s6 + $0xef] sm:$0xff] }
 0x141   : > { %14089 = vmatprep.mubr.msk.bf16.mxu1 %vm17950_vm0, %v17949_v2 }
 0x143   : > { %14084 = vmatpush3.bf16.msra.mxu1 %v17533_v56  ;;  %v2147_v56 = vpack.c.bf16 %v2140_v53, %v2139_v52  ;;  %v2110_v52 = vpack.c.bf16 %v2103_v49, %v2102_v48  ;;  %v4208_v48 = vld [vmem:[%s18034_s6 + $0x137] sm:$0xff]  ;;  %v4209_v49 = vld [vmem:[%s18034_s6 + $0x13f] sm:$0xff] }
 0x144   : > { %14085 = vmatprep.subr.bf16.mxu1 %v17949_v2 }
 0x147   : > { %14070 = vmatmul.mubr.bf16.gmra.mrb[24].mxu0 %v1823_v59  ;;  %14086 = vmatpush3.bf16.msra.mxu1 %v17535_v60  ;;  %v2091_v59 = vld [vmem:[%s18034_s6 + $0x7d] sm:$0xff]  ;;  %v3850_v60 = vld [vmem:[%s18034_s6 + $0xe5] sm:$0xff] }
 0x148   : > { %14087 = vmatprep.subr.bf16.mxu1 %v17949_v2  ;;  %14485 = vmatprep.mubr.msk.bf16.mxu0 %vm17950_vm0, %v17949_v2  ;;  %v2104_v62 = vpack.c.bf16 %v2091_v59, %v2090_v58  ;;  %v17571_v58 = vld [vmem:[%s22142_s1 + $0xc0] sm:$0xff]  }
 0x149   : > { %v2440_v59 = vld [vmem:[%s18034_s6 + $0x87] sm:$0xff] }
 0x14b   : > { %14088 = vmatpush3.bf16.msra.mxu1 %v17537_v61  ;;  %v3851_v61 = vld [vmem:[%s18034_s6 + $0xed] sm:$0xff] }
 0x14c   : > { %14117 = vmatprep.subr.bf16.mxu1 %v17949_v2  ;;  %v3864_v0 = vpack.c.bf16 %v3851_v61, %v3850_v60  ;;  %v2441_v60 = vld [vmem:[%s18034_s6 + $0x8f] sm:$0xff] }
 0x14d   : > { %v17572_v61 = vld [vmem:[%s22142_s1 + $0xc8] sm:$0xff]  }
 0x14e   : > { %14090 = vmatmul.mubr.bf16.vlgmr.msra.gmra.mrb[28].mxu1 %v2141_v3  ;;  %v2092_v3 = vld [vmem:[%s18034_s6 + $0x85] sm:$0xff] }
 0x14f   : > { %14118 = vmatpush3.bf16.msra.mxu1 %v17538_v4  ;;  %14486 = vmatmul.mubr.bf16.vlgmr.msra.gmra.mrb[28].mxu0 %v3901_v5  ;;  %v2093_v4 = vld [vmem:[%s18034_s6 + $0x8d] sm:$0xff] }
 0x150   : > { %14514 = vmatpush3.bf16.msra.mxu0 %v17539_v6  ;;  %14093 = vmatprep.mubr.msk.bf16.mxu1 %vm17950_vm0, %v17949_v2  ;;  %v17556_v5 = vld [vmem:[%s22142_s1 + $0x88] sm:$0xff]   ;;  %v3852_v6 = vld [vmem:[%s18034_s6 + $0xf5] sm:$0xff] }
 0x151   : > { %14119 = vmatprep.subr.bf16.mxu1 %v17949_v2  ;;  %14489 = vmatprep.mubr.msk.bf16.mxu0 %vm17950_vm0, %v17949_v2  ;;  %v3865_v10 = vpack.c.bf16 %v3853_v7, %v3852_v6  ;;  %v2443_v6 = vld [vmem:[%s18034_s6 + $0x9f] sm:$0xff]  ;;  %v4202_v7 = vld [vmem:[%s18034_s6 + $0x107] sm:$0xff] }
 0x152   : > { %14515 = vmatprep.subr.bf16.mxu0 %v17949_v2 }
 0x153   : > { %14120 = vmatpush3.bf16.msra.mxu1 %v17540_v9  ;;  %v2105_v9 = vpack.c.bf16 %v2093_v4, %v2092_v3  ;;  %v17574_v3 = vld [vmem:[%s22142_s1 + $0xd0] sm:$0xff]  }
 0x154   : > { %14516 = vmatpush3.bf16.msra.mxu0 %v17541_v12  ;;  %14121 = vmatprep.subr.bf16.mxu1 %v17949_v2  ;;  %v17559_v12 = vld [vmem:[%s22142_s1 + $0x90] sm:$0xff]  }
 0x155   : > { %14517 = vmatprep.subr.bf16.mxu0 %v17949_v2  ;;  %v17575_v4 = vld [vmem:[%s22142_s1 + $0xd0] sm:$0xff]  }
 0x156   : > { %14094 = vmatmul.mubr.bf16.gmra.mrb[32].mxu1 %v2142_v13  ;;  %v2094_v13 = vld [vmem:[%s18034_s6 + $0x95] sm:$0xff] }
 0x157   : > { %14490 = vmatmul.mubr.bf16.gmra.mrb[32].mxu0 %v3902_v14  ;;  %14097 = vmatprep.mubr.msk.bf16.mxu1 %vm17950_vm0, %v17949_v2  ;;  %v2095_v14 = vld [vmem:[%s18034_s6 + $0x9d] sm:$0xff] }
 0x158   : > { %14122 = vmatpush3.bf16.msra.mxu1 %v17542_v15  ;;  %14493 = vmatprep.mubr.msk.bf16.mxu0 %vm17950_vm0, %v17949_v2  ;;  %v3854_v15 = vld [vmem:[%s18034_s6 + $0x105] sm:$0xff]  ;;  %v2106_v19 = vpack.c.bf16 %v2095_v14, %v2094_v13 }
 0x159   : > { %14518 = vmatpush3.bf16.msra.mxu0 %v17543_v16  ;;  %14123 = vmatprep.subr.bf16.mxu1 %v17949_v2  ;;  %v3855_v16 = vld [vmem:[%s18034_s6 + $0x10d] sm:$0xff] }
 0x15a   : > { %14519 = vmatprep.subr.bf16.mxu0 %v17949_v2  ;;  %v3866_v20 = vpack.c.bf16 %v3855_v16, %v3854_v15 }
 0x15c   : > { %14124 = vmatpush3.bf16.msra.mxu1 %v17544_v21  ;;  %v17562_v21 = vld [vmem:[%s22142_s1 + $0xa0] sm:$0xff]  }
 0x15d   : > { %14520 = vmatpush3.bf16.msra.mxu0 %v17545_v22  ;;  %14125 = vmatprep.subr.bf16.mxu1 %v17949_v2  ;;  %v17563_v22 = vld [vmem:[%s22142_s1 + $0xa0] sm:$0xff]  }
 0x15e   : > { %14098 = vmatmul.mubr.bf16.gmra.mrb[36].mxu1 %v2143_v23  ;;  %14521 = vmatprep.subr.bf16.mxu0 %v17949_v2  ;;  %v2096_v23 = vld [vmem:[%s18034_s6 + $0xa5] sm:$0xff] }
 0x15f   : > { %14494 = vmatmul.mubr.bf16.gmra.mrb[36].mxu0 %v3903_v24  ;;  %14101 = vmatprep.mubr.msk.bf16.mxu1 %vm17950_vm0, %v17949_v2  ;;  %v2097_v24 = vld [vmem:[%s18034_s6 + $0xad] sm:$0xff] }
 0x160   : > { %14497 = vmatprep.mubr.msk.bf16.mxu0 %vm17950_vm0, %v17949_v2  ;;  %14126 = vmatpush3.bf16.msra.mxu1 %v17546_v25  ;;  %v3856_v25 = vld [vmem:[%s18034_s6 + $0x115] sm:$0xff]  ;;  %v2107_v30 = vpack.c.bf16 %v2097_v24, %v2096_v23  ;;  %v17580_v23 = vld [vmem:[%s22142_s1 + $0xe8] sm:$0xff]  }
 0x161   : > { %14522 = vmatpush3.bf16.msra.mxu0 %v17547_v26  ;;  %14127 = vmatprep.subr.bf16.mxu1 %v17949_v2  ;;  %v3857_v26 = vld [vmem:[%s18034_s6 + $0x11d] sm:$0xff] }
 0x162   : > { %14523 = vmatprep.subr.bf16.mxu0 %v17949_v2  ;;  %v3867_v31 = vpack.c.bf16 %v3857_v26, %v3856_v25  ;;  %v17581_v25 = vld [vmem:[%s22142_s1 + $0xe8] sm:$0xff]  }
 0x164   : > { %14128 = vmatpush3.bf16.msra.mxu1 %v17548_v32  ;;  %v17566_v32 = vld [vmem:[%s22142_s1 + $0xb0] sm:$0xff]  }
 0x165   : > { %14524 = vmatpush3.bf16.msra.mxu0 %v17549_v33  ;;  %14129 = vmatprep.subr.bf16.mxu1 %v17949_v2  ;;  %v17567_v33 = vld [vmem:[%s22142_s1 + $0xb0] sm:$0xff]  }
 0x166   : > { %14102 = vmatmul.mubr.bf16.gmra.mrb[40].mxu1 %v2144_v34  ;;  %14525 = vmatprep.subr.bf16.mxu0 %v17949_v2  ;;  %v2098_v34 = vld [vmem:[%s18034_s6 + $0xb5] sm:$0xff] }
 0x167   : > { %14498 = vmatmul.mubr.bf16.gmra.mrb[40].mxu0 %v3904_v35  ;;  %14105 = vmatprep.mubr.msk.bf16.mxu1 %vm17950_vm0, %v17949_v2  ;;  %v2099_v35 = vld [vmem:[%s18034_s6 + $0xbd] sm:$0xff] }
 0x168   : > { %14501 = vmatprep.mubr.msk.bf16.mxu0 %vm17950_vm0, %v17949_v2  ;;  %14130 = vmatpush3.bf16.msra.mxu1 %v17550_v36  ;;  %v3858_v36 = vld [vmem:[%s18034_s6 + $0x125] sm:$0xff]  ;;  %v2108_v40 = vpack.c.bf16 %v2099_v35, %v2098_v34  ;;  %v2446_v34 = vld [vmem:[%s18034_s6 + $0xb7] sm:$0xff] }
 0x169   : > { %14526 = vmatpush3.bf16.msra.mxu0 %v17551_v37  ;;  %14131 = vmatprep.subr.bf16.mxu1 %v17949_v2  ;;  %v3859_v37 = vld [vmem:[%s18034_s6 + $0x12d] sm:$0xff]  ;;  %v2447_v35 = vld [vmem:[%s18034_s6 + $0xbf] sm:$0xff] }
 0x16a   : > { %14527 = vmatprep.subr.bf16.mxu0 %v17949_v2  ;;  %v3868_v41 = vpack.c.bf16 %v3859_v37, %v3858_v36  ;;  %v4206_v36 = vld [vmem:[%s18034_s6 + $0x127] sm:$0xff]  ;;  %v4207_v37 = vld [vmem:[%s18034_s6 + $0x12f] sm:$0xff] }
 0x16c   : > { %14132 = vmatpush3.bf16.msra.mxu1 %v17552_v42  ;;  %v2100_v42 = vld [vmem:[%s18034_s6 + $0xc5] sm:$0xff] }
 0x16d   : > { %14528 = vmatpush3.bf16.msra.mxu0 %v17553_v43  ;;  %14161 = vmatprep.subr.bf16.mxu1 %v17949_v2  ;;  %v2101_v43 = vld [vmem:[%s18034_s6 + $0xcd] sm:$0xff] }
 0x16e   : > { %14106 = vmatmul.mubr.bf16.gmra.mrb[44].mxu1 %v2145_v44  ;;  %14557 = vmatprep.subr.bf16.mxu0 %v17949_v2  ;;  %v3860_v44 = vld [vmem:[%s18034_s6 + $0x135] sm:$0xff]  ;;  %v2109_v46 = vpack.c.bf16 %v2101_v43, %v2100_v42  ;;  %v19078_v42 = vpack.c.bf16 %v2447_v35, %v2446_v34  ;;  %v17588_v35 = vld [vmem:[%s22142_s1 + $0x108] sm:$0xff]  }
 0x16f   : > { %14502 = vmatmul.mubr.bf16.gmra.mrb[44].mxu0 %v3905_v45  ;;  %14109 = vmatprep.mubr.msk.bf16.mxu1 %vm17950_vm0, %v17949_v2  ;;  %v3861_v45 = vld [vmem:[%s18034_s6 + $0x13d] sm:$0xff] }
 0x170   : > { %14505 = vmatprep.mubr.msk.bf16.mxu0 %vm17950_vm0, %v17949_v2  ;;  %v3869_v47 = vpack.c.bf16 %v3861_v45, %v3860_v44  ;;  %v19083_v44 = vpack.c.bf16 %v4207_v37, %v4206_v36 }
 0x176   : > { %14110 = vmatmul.mubr.bf16.gmra.mrb[48].mxu1 %v2146_v50  ;;  %v3862_v50 = vld [vmem:[%s18034_s6 + $0x145] sm:$0xff] }
 0x177   : > { %14506 = vmatmul.mubr.bf16.gmra.mrb[48].mxu0 %v3906_v51  ;;  %14113 = vmatprep.mubr.msk.bf16.mxu1 %vm17950_vm0, %v17949_v2  ;;  %v3863_v51 = vld [vmem:[%s18034_s6 + $0x14d] sm:$0xff] }
 0x178   : > { %14509 = vmatprep.mubr.msk.bf16.mxu0 %vm17950_vm0, %v17949_v2  ;;  %v3870_v53 = vpack.c.bf16 %v3863_v51, %v3862_v50 }
 0x17e   : > { %14114 = vmatmul.mubr.bf16.gmra.mrb[52].mxu1 %v2147_v56  ;;  %v17570_v56 = vld [vmem:[%s22142_s1 + $0xc0] sm:$0xff]  }
 0x17f   : > { %14510 = vmatmul.mubr.bf16.gmra.mrb[52].mxu0 %v3907_v57  ;;  %14133 = vmatprep.mubr.msk.bf16.mxu1 %vm17950_vm0, %v17949_v2  ;;  %v18956_v57 = vpack.c.bf16 %v4199_v55, %v4198_v54  ;;  %v19103_v54 = vpack.c.bf16 %v4209_v49, %v4208_v48  ;;  %v17590_v48 = vld [vmem:[%s22142_s1 + $0x110] sm:$0xff]  }
 0x180   : > { %14529 = vmatprep.mubr.msk.bf16.mxu0 %vm17950_vm0, %v17949_v2 }
 0x186   : > { %14134 = vmatmul.mubr.bf16.vlgmr.msra.gmra.mrb[28].mxu1 %v2104_v62  ;;  %v4200_v62 = vld [vmem:[%s18034_s6 + $0xf7] sm:$0xff] }
 0x187   : > { %14162 = vmatpush3.bf16.msra.mxu1 %v17554_v63  ;;  %14530 = vmatmul.mubr.bf16.vlgmr.msra.gmra.mrb[28].mxu0 %v3864_v0  ;;  %v4201_v63 = vld [vmem:[%s18034_s6 + $0xff] sm:$0xff]  ;;  %v18978_v0 = vpack.c.bf16 %v2441_v60, %v2440_v59  ;;  %v4210_v59 = vld [vmem:[%s18034_s6 + $0x147] sm:$0xff]  ;;  %v4211_v60 = vld [vmem:[%s18034_s6 + $0x14f] sm:$0xff] }
 0x188   : > { %14558 = vmatpush3.bf16.msra.mxu0 %v17555_v1  ;;  %14137 = vmatprep.mubr.msk.bf16.mxu1 %vm17950_vm0, %v17949_v2  ;;  %v18981_v1 = vpack.c.bf16 %v4201_v63, %v4200_v62  ;;  %v2008_v62 = vld [vmem:[%s22145_s4] sm:$0xff] }
 0x189   : > { %14163 = vmatprep.subr.bf16.mxu1 %v17949_v2  ;;  %14533 = vmatprep.mubr.msk.bf16.mxu0 %vm17950_vm0, %v17949_v2 }
 0x18a   : > { %14559 = vmatprep.subr.bf16.mxu0 %v17949_v2 }
 0x18b   : > { %14164 = vmatpush3.bf16.msra.mxu1 %v17556_v5  ;;  %v2442_v5 = vld [vmem:[%s18034_s6 + $0x97] sm:$0xff] }
 0x18c   : > { %14560 = vmatpush3.bf16.msra.mxu0 %v17557_v8  ;;  %14165 = vmatprep.subr.bf16.mxu1 %v17949_v2  ;;  %v4203_v8 = vld [vmem:[%s18034_s6 + $0x10f] sm:$0xff]  ;;  %v19010_v13 = vpack.c.bf16 %v2443_v6, %v2442_v5 }
 0x18d   : > { %14561 = vmatprep.subr.bf16.mxu0 %v17949_v2  ;;  %v19015_v15 = vpack.c.bf16 %v4203_v8, %v4202_v7  ;;  %v2009_v6 = vld [vmem:[%s22145_s4 + $0x8] sm:$0xff] }
 0x18e   : > { %14138 = vmatmul.mubr.bf16.gmra.mrb[32].mxu1 %v2105_v9  ;;  %v17576_v9 = vld [vmem:[%s22142_s1 + $0xd8] sm:$0xff]  }
 0x18f   : > { %14534 = vmatmul.mubr.bf16.gmra.mrb[32].mxu0 %v3865_v10  ;;  %14141 = vmatprep.mubr.msk.bf16.mxu1 %vm17950_vm0, %v17949_v2 }
 0x190   : > { %14166 = vmatpush3.bf16.msra.mxu1 %v17558_v11  ;;  %14537 = vmatprep.mubr.msk.bf16.mxu0 %vm17950_vm0, %v17949_v2  ;;  %v17577_v11 = vld [vmem:[%s22142_s1 + $0xd8] sm:$0xff]  }
 0x191   : > { %14562 = vmatpush3.bf16.msra.mxu0 %v17559_v12  ;;  %14167 = vmatprep.subr.bf16.mxu1 %v17949_v2 }
 0x192   : > { %14563 = vmatprep.subr.bf16.mxu0 %v17949_v2 }
 0x194   : > { %14168 = vmatpush3.bf16.msra.mxu1 %v17560_v17  ;;  %v17578_v17 = vld [vmem:[%s22142_s1 + $0xe0] sm:$0xff]  }
 0x195   : > { %14564 = vmatpush3.bf16.msra.mxu0 %v17561_v18  ;;  %14169 = vmatprep.subr.bf16.mxu1 %v17949_v2  ;;  %v17579_v18 = vld [vmem:[%s22142_s1 + $0xe0] sm:$0xff]  }
 0x196   : > { %14142 = vmatmul.mubr.bf16.gmra.mrb[36].mxu1 %v2106_v19  ;;  %14565 = vmatprep.subr.bf16.mxu0 %v17949_v2  ;;  %v2444_v19 = vld [vmem:[%s18034_s6 + $0xa7] sm:$0xff] }
 0x197   : > { %14538 = vmatmul.mubr.bf16.gmra.mrb[36].mxu0 %v3866_v20  ;;  %14145 = vmatprep.mubr.msk.bf16.mxu1 %vm17950_vm0, %v17949_v2  ;;  %v2445_v20 = vld [vmem:[%s18034_s6 + $0xaf] sm:$0xff] }
 0x198   : > { %14541 = vmatprep.mubr.msk.bf16.mxu0 %vm17950_vm0, %v17949_v2  ;;  %14170 = vmatpush3.bf16.msra.mxu1 %v17562_v21  ;;  %v4204_v21 = vld [vmem:[%s18034_s6 + $0x117] sm:$0xff] }
 0x199   : > { %14566 = vmatpush3.bf16.msra.mxu0 %v17563_v22  ;;  %14171 = vmatprep.subr.bf16.mxu1 %v17949_v2  ;;  %v4205_v22 = vld [vmem:[%s18034_s6 + $0x11f] sm:$0xff] }
 0x19a   : > { %14567 = vmatprep.subr.bf16.mxu0 %v17949_v2 }
 0x19c   : > { %14172 = vmatpush3.bf16.msra.mxu1 %v17564_v28  ;;  %v19044_v28 = vpack.c.bf16 %v2445_v20, %v2444_v19 }
 0x19d   : > { %14568 = vmatpush3.bf16.msra.mxu0 %v17565_v29  ;;  %14173 = vmatprep.subr.bf16.mxu1 %v17949_v2 }
 0x19e   : > { %14146 = vmatmul.mubr.bf16.gmra.mrb[40].mxu1 %v2107_v30  ;;  %14569 = vmatprep.subr.bf16.mxu0 %v17949_v2  ;;  %v19049_v30 = vpack.c.bf16 %v4205_v22, %v4204_v21  ;;  %v17586_v21 = vld [vmem:[%s22142_s1 + $0x100] sm:$0xff]  }
 0x19f   : > { %14542 = vmatmul.mubr.bf16.gmra.mrb[40].mxu0 %v3867_v31  ;;  %14149 = vmatprep.mubr.msk.bf16.mxu1 %vm17950_vm0, %v17949_v2 }
 0x1a0   : > { %14545 = vmatprep.mubr.msk.bf16.mxu0 %vm17950_vm0, %v17949_v2  ;;  %14174 = vmatpush3.bf16.msra.mxu1 %v17566_v32  ;;  %v17582_v32 = vld [vmem:[%s22142_s1 + $0xf0] sm:$0xff]  }
 0x1a1   : > { %14570 = vmatpush3.bf16.msra.mxu0 %v17567_v33  ;;  %14175 = vmatprep.subr.bf16.mxu1 %v17949_v2  ;;  %v17583_v33 = vld [vmem:[%s22142_s1 + $0xf0] sm:$0xff]  }
 0x1a2   : > { %14571 = vmatprep.subr.bf16.mxu0 %v17949_v2 }
 0x1a4   : > { %14176 = vmatpush3.bf16.msra.mxu1 %v17568_v38  ;;  %v17584_v38 = vld [vmem:[%s22142_s1 + $0xf8] sm:$0xff]  }
 0x1a5   : > { %14572 = vmatpush3.bf16.msra.mxu0 %v17569_v39  ;;  %14205 = vmatprep.subr.bf16.mxu1 %v17949_v2 }
 0x1a6   : > { %14150 = vmatmul.mubr.bf16.gmra.mrb[44].mxu1 %v2108_v40  ;;  %14601 = vmatprep.subr.bf16.mxu0 %v17949_v2  ;;  %v17585_v40 = vld [vmem:[%s22142_s1 + $0xf8] sm:$0xff]  }
 0x1a7   : > { %14546 = vmatmul.mubr.bf16.gmra.mrb[44].mxu0 %v3868_v41  ;;  %14153 = vmatprep.mubr.msk.bf16.mxu1 %vm17950_vm0, %v17949_v2 }
 0x1a8   : > { %14549 = vmatprep.mubr.msk.bf16.mxu0 %vm17950_vm0, %v17949_v2 }
 0x1ae   : > { %14154 = vmatmul.mubr.bf16.gmra.mrb[48].mxu1 %v2109_v46  ;;  %v2448_v46 = vld [vmem:[%s18034_s6 + $0xc7] sm:$0xff] }
 0x1af   : > { %14550 = vmatmul.mubr.bf16.gmra.mrb[48].mxu0 %v3869_v47  ;;  %14157 = vmatprep.mubr.msk.bf16.mxu1 %vm17950_vm0, %v17949_v2  ;;  %v2449_v47 = vld [vmem:[%s18034_s6 + $0xcf] sm:$0xff] }
 0x1b0   : > { %14553 = vmatprep.mubr.msk.bf16.mxu0 %vm17950_vm0, %v17949_v2 }
 0x1b6   : > { %14158 = vmatmul.mubr.bf16.gmra.mrb[52].mxu1 %v2110_v52  ;;  %v19099_v52 = vpack.c.bf16 %v2449_v47, %v2448_v46  ;;  %v2013_v47 = vld [vmem:[%s22145_s4 + $0x28] sm:$0xff] }
 0x1b7   : > { %14554 = vmatmul.mubr.bf16.gmra.mrb[52].mxu0 %v3870_v53  ;;  %14177 = vmatprep.mubr.msk.bf16.mxu1 %vm17950_vm0, %v17949_v2 }
 0x1b8   : > { %14573 = vmatprep.mubr.msk.bf16.mxu0 %vm17950_vm0, %v17949_v2 }
 0x1be   : > { %14178 = vmatmul.mubr.bf16.vlgmr.msra.gmra.mrb[28].mxu1 %v18627_v27  ;;  %v17573_v27 = vld [vmem:[%s22142_s1 + $0xc8] sm:$0xff]  }
 0x1bf   : > { %14206 = vmatpush3.bf16.msra.mxu1 %v17570_v56  ;;  %14574 = vmatmul.mubr.bf16.vlgmr.msra.gmra.mrb[28].mxu0 %v18956_v57  ;;  %v2450_v56 = vld [vmem:[%s18034_s6 + $0xd7] sm:$0xff] }
 0x1c0   : > { %14602 = vmatpush3.bf16.msra.mxu0 %v17571_v58  ;;  %14181 = vmatprep.mubr.msk.bf16.mxu1 %vm17950_vm0, %v17949_v2  ;;  %v2451_v58 = vld [vmem:[%s18034_s6 + $0xdf] sm:$0xff] }
 0x1c1   : > { %14207 = vmatprep.subr.bf16.mxu1 %v17949_v2  ;;  %14577 = vmatprep.mubr.msk.bf16.mxu0 %vm17950_vm0, %v17949_v2  ;;  %v19119_v63 = vpack.c.bf16 %v2451_v58, %v2450_v56 }
 0x1c2   : > { %14603 = vmatprep.subr.bf16.mxu0 %v17949_v2 }
 0x1c3   : > { %14208 = vmatpush3.bf16.msra.mxu1 %v17572_v61 }
 0x1c4   : > { %14604 = vmatpush3.bf16.msra.mxu0 %v17573_v27  ;;  %14209 = vmatprep.subr.bf16.mxu1 %v17949_v2 }
 0x1c5   : > { %14605 = vmatprep.subr.bf16.mxu0 %v17949_v2 }
 0x1c6   : > { %14182 = vmatmul.mubr.bf16.gmra.mrb[32].mxu1 %v18978_v0 }
 0x1c7   : > { %14578 = vmatmul.mubr.bf16.gmra.mrb[32].mxu0 %v18981_v1  ;;  %14185 = vmatprep.mubr.msk.bf16.mxu1 %vm17950_vm0, %v17949_v2 }
 0x1c8   : > { %14210 = vmatpush3.bf16.msra.mxu1 %v17574_v3  ;;  %14581 = vmatprep.mubr.msk.bf16.mxu0 %vm17950_vm0, %v17949_v2 }
 0x1c9   : > { %v19004_v10 = vpop.f32.mrb[0].mxu1  ;;  %14606 = vmatpush3.bf16.msra.mxu0 %v17575_v4  ;;  %14211 = vmatprep.subr.bf16.mxu1 %v17949_v2  ;;  %v19122_v4 = vpack.c.bf16 %v4211_v60, %v4210_v59 }
 0x1ca   : > { %v13827_v12 = vpop.f32.mrb[1].mxu1  ;;  %14607 = vmatprep.subr.bf16.mxu0 %v17949_v2 }
 0x1cb   : > { %v19013_v14 = vpop.f32.mrb[2].mxu1 }
 0x1cc   : > { %v13828_v16 = vpop.f32.mrb[3].mxu1  ;;  %14212 = vmatpush3.bf16.msra.mxu1 %v17576_v9 }
 0x1cd   : > { %14608 = vmatpush3.bf16.msra.mxu0 %v17577_v11  ;;  %14213 = vmatprep.subr.bf16.mxu1 %v17949_v2 }
 0x1ce   : > { %14186 = vmatmul.mubr.bf16.gmra.mrb[36].mxu1 %v19010_v13  ;;  %14609 = vmatprep.subr.bf16.mxu0 %v17949_v2 }
 0x1cf   : > { %14582 = vmatmul.mubr.bf16.gmra.mrb[36].mxu0 %v19015_v15  ;;  %14189 = vmatprep.mubr.msk.bf16.mxu1 %vm17950_vm0, %v17949_v2 }
 0x1d0   : > { %14585 = vmatprep.mubr.msk.bf16.mxu0 %vm17950_vm0, %v17949_v2  ;;  %14214 = vmatpush3.bf16.msra.mxu1 %v17578_v17 }
 0x1d1   : > { %v19038_v24 = vpop.f32.mrb[4].mxu1  ;;  %14610 = vmatpush3.bf16.msra.mxu0 %v17579_v18  ;;  %14215 = vmatprep.subr.bf16.mxu1 %v17949_v2 }
 0x1d2   : > { %v13831_v26 = vpop.f32.mrb[5].mxu1  ;;  %14611 = vmatprep.subr.bf16.mxu0 %v17949_v2 }
 0x1d3   : > { %v19047_v29 = vpop.f32.mrb[6].mxu1 }
 0x1d4   : > { %v13832_v31 = vpop.f32.mrb[7].mxu1  ;;  %14216 = vmatpush3.bf16.msra.mxu1 %v17580_v23  ;;  %v2011_v23 = vld [vmem:[%s22145_s4 + $0x18] sm:$0xff] }
 0x1d5   : > { %14612 = vmatpush3.bf16.msra.mxu0 %v17581_v25  ;;  %14217 = vmatprep.subr.bf16.mxu1 %v17949_v2  ;;  %v17587_v25 = vld [vmem:[%s22142_s1 + $0x100] sm:$0xff]  }
 0x1d6   : > { %14190 = vmatmul.mubr.bf16.gmra.mrb[40].mxu1 %v19044_v28  ;;  %14613 = vmatprep.subr.bf16.mxu0 %v17949_v2 }
 0x1d7   : > { %14586 = vmatmul.mubr.bf16.gmra.mrb[40].mxu0 %v19049_v30  ;;  %14193 = vmatprep.mubr.msk.bf16.mxu1 %vm17950_vm0, %v17949_v2 }
 0x1d8   : > { %14589 = vmatprep.mubr.msk.bf16.mxu0 %vm17950_vm0, %v17949_v2  ;;  %14218 = vmatpush3.bf16.msra.mxu1 %v17582_v32 }
 0x1d9   : > { %v19072_v39 = vpop.f32.mrb[8].mxu1  ;;  %14614 = vmatpush3.bf16.msra.mxu0 %v17583_v33  ;;  %14219 = vmatprep.subr.bf16.mxu1 %v17949_v2 }
 0x1da   : > { %v13835_v41 = vpop.f32.mrb[9].mxu1  ;;  %14615 = vmatprep.subr.bf16.mxu0 %v17949_v2 }
 0x1db   : > { %v19081_v43 = vpop.f32.mrb[10].mxu1 }
 0x1dc   : > { %v13836_v45 = vpop.f32.mrb[11].mxu1  ;;  %14220 = vmatpush3.bf16.msra.mxu1 %v17584_v38  ;;  %v2012_v38 = vld [vmem:[%s22145_s4 + $0x20] sm:$0xff] }
 0x1dd   : > { %14616 = vmatpush3.bf16.msra.mxu0 %v17585_v40  ;;  %14249 = vmatprep.subr.bf16.mxu1 %v17949_v2 }
 0x1de   : > { %14194 = vmatmul.mubr.bf16.gmra.mrb[44].mxu1 %v19078_v42  ;;  %14645 = vmatprep.subr.bf16.mxu0 %v17949_v2 }
 0x1df   : > { %14590 = vmatmul.mubr.bf16.gmra.mrb[44].mxu0 %v19083_v44  ;;  %14197 = vmatprep.mubr.msk.bf16.mxu1 %vm17950_vm0, %v17949_v2 }
 0x1e0   : > { %14593 = vmatprep.mubr.msk.bf16.mxu0 %vm17950_vm0, %v17949_v2 }
 0x1e1   : > { %v19097_v50 = vpop.f32.mrb[12].mxu1 }
 0x1e2   : > { %v13839_v51 = vpop.f32.mrb[13].mxu1 }
 0x1e3   : > { %v19101_v53 = vpop.f32.mrb[14].mxu1 }
 0x1e4   : > { %v13840_v55 = vpop.f32.mrb[15].mxu1 }
 0x1e5   : > { %v17591_v55 = vld [vmem:[%s22142_s1 + $0x110] sm:$0xff]  }
 0x1e6   : > { %14198 = vmatmul.mubr.bf16.gmra.mrb[48].mxu1 %v19099_v52 }
 0x1e7   : > { %14594 = vmatmul.mubr.bf16.gmra.mrb[48].mxu0 %v19103_v54  ;;  %14201 = vmatprep.mubr.msk.bf16.mxu1 %vm17950_vm0, %v17949_v2 }
 0x1e8   : > { %14597 = vmatprep.mubr.msk.bf16.mxu0 %vm17950_vm0, %v17949_v2 }
 0x1ea   : > { %v1923_v61 = vpop.f32.mrb[0].mxu0 }
 0x1eb   : > { %v16069_v27 = vadd.f32 %v1923_v61, %v19004_v10  ;;  %v14047_v3 = vpop.f32.mrb[1].mxu0 }
 0x1ec   : > { %v1926_v5 = vpop.f32.mrb[2].mxu0  ;;  %v2014_v3 = vld [vmem:[%s22145_s4 + $0x30] sm:$0xff] }
 0x1ed   : > { %1994 = vst [vmem:[%s19127_s15] sm:$0xff] %v16069_v27  ;;  %v2022_v7 = vmul.f32 %v16069_v27, %v2008_v62  ;;  %v16070_v8 = vadd.f32 %v1926_v5, %v19013_v14  ;;  %v14048_v9 = vpop.f32.mrb[3].mxu0  ;;  %v2010_v14 = vld [vmem:[%s22145_s4 + $0x10] sm:$0xff] }
 0x1ee   : > { %14202 = vmatmul.mubr.bf16.gmra.mrb[52].mxu1 %v19119_v63 }
 0x1ef   : > { %1995 = vst [vmem:[%s19127_s15 + $0x8] sm:$0xff] %v16070_v8  ;;  %v2023_v10 = vmul.f32 %v16070_v8, %v2009_v6  ;;  %14598 = vmatmul.mubr.bf16.gmra.mrb[52].mxu0 %v19122_v4  ;;  %14221 = vmatprep.mubr.msk.bf16.mxu1 %vm17950_vm0, %v17949_v2  ;;  %v2056_v11 = vmul.f32 %v16069_v27, %v2022_v7 }
 0x1f0   : > { %14617 = vmatprep.mubr.msk.bf16.mxu0 %vm17950_vm0, %v17949_v2 }
 0x1f1   : > { %v2036_v12 = vadd.f32 %v2023_v10, %v2022_v7  ;;  %v2057_v16 = vmul.f32 %v16070_v8, %v2023_v10 }
 0x1f2   : > { %v1931_v17 = vpop.f32.mrb[4].mxu0 }
 0x1f3   : > { %v2070_v18 = vadd.f32 %v2057_v16, %v2056_v11  ;;  %v16071_v19 = vadd.f32 %v1931_v17, %v19038_v24  ;;  %v14051_v20 = vpop.f32.mrb[5].mxu0  ;;  %v2015_v11 = vld [vmem:[%s22145_s4 + $0x38] sm:$0xff]  ;;  %v17594_v16 = vld [vmem:[%s22142_s1 + $0x120] sm:$0xff]  }
 0x1f4   : > { %v1934_v22 = vpop.f32.mrb[6].mxu0 }
 0x1f5   : > { %1996 = vst [vmem:[%s19127_s15 + $0x10] sm:$0xff] %v16071_v19  ;;  %v2024_v26 = vmul.f32 %v16071_v19, %v2010_v14  ;;  %v16072_v31 = vadd.f32 %v1934_v22, %v19047_v29  ;;  %v14052_v32 = vpop.f32.mrb[7].mxu0  ;;  %v17589_v29 = vld [vmem:[%s22142_s1 + $0x108] sm:$0xff]  }
 0x1f6   : > { %14222 = vmatmul.mubr.bf16.vlgmr.msra.gmra.mrb[28].mxu1 %v18978_v0 }
 0x1f7   : > { %v2037_v24 = vadd.f32 %v2036_v12, %v2024_v26  ;;  %v2058_v33 = vmul.f32 %v16071_v19, %v2024_v26  ;;  %1997 = vst [vmem:[%s19127_s15 + $0x18] sm:$0xff] %v16072_v31  ;;  %v2025_v34 = vmul.f32 %v16072_v31, %v2011_v23  ;;  %14250 = vmatpush3.bf16.msra.mxu1 %v17586_v21 }
 0x1f8   : > { %14618 = vmatmul.mubr.bf16.vlgmr.msra.gmra.mrb[28].mxu0 %v18981_v1  ;;  %14225 = vmatprep.mubr.msk.bf16.mxu1 %vm17950_vm0, %v17949_v2 }
 0x1f9   : > { %14646 = vmatpush3.bf16.msra.mxu0 %v17587_v25  ;;  %v2071_v0 = vadd.f32 %v2070_v18, %v2058_v33  ;;  %v2038_v36 = vadd.f32 %v2037_v24, %v2025_v34  ;;  %v2059_v37 = vmul.f32 %v16072_v31, %v2025_v34  ;;  %14251 = vmatprep.subr.bf16.mxu1 %v17949_v2  ;;  %v2016_v31 = vld [vmem:[%s22145_s4 + $0x40] sm:$0xff] }
 0x1fa   : > { %14621 = vmatprep.mubr.msk.bf16.mxu0 %vm17950_vm0, %v17949_v2  ;;  %v1939_v1 = vpop.f32.mrb[8].mxu0  ;;  %14647 = vmatprep.subr.bf16.mxu0 %v17949_v2 }
 0x1fb   : > { %v2072_v40 = vadd.f32 %v2071_v0, %v2059_v37  ;;  %v16073_v41 = vadd.f32 %v1939_v1, %v19072_v39  ;;  %v14055_v45 = vpop.f32.mrb[9].mxu0  ;;  %14252 = vmatpush3.bf16.msra.mxu1 %v17588_v35  ;;  %v2017_v0 = vld [vmem:[%s22145_s4 + $0x48] sm:$0xff]  ;;  %v17598_v37 = vld [vmem:[%s22142_s1 + $0x130] sm:$0xff]  }
 0x1fc   : > { %v1942_v46 = vpop.f32.mrb[10].mxu0  ;;  %14253 = vmatprep.subr.bf16.mxu1 %v17949_v2 }
 0x1fd   : > { %14648 = vmatpush3.bf16.msra.mxu0 %v17589_v29  ;;  %1998 = vst [vmem:[%s19127_s15 + $0x20] sm:$0xff] %v16073_v41  ;;  %v2026_v49 = vmul.f32 %v16073_v41, %v2012_v38  ;;  %v16074_v51 = vadd.f32 %v1942_v46, %v19081_v43  ;;  %v14056_v39 = vpop.f32.mrb[11].mxu0  ;;  %v17592_v43 = vld [vmem:[%s22142_s1 + $0x118] sm:$0xff]  }
 0x1fe   : > { %14649 = vmatprep.subr.bf16.mxu0 %v17949_v2  ;;  %14226 = vmatmul.mubr.bf16.gmra.mrb[32].mxu1 %v19010_v13 }
 0x1ff   : > { %v2039_v56 = vadd.f32 %v2038_v36, %v2026_v49  ;;  %v2060_v58 = vmul.f32 %v16073_v41, %v2026_v49  ;;  %1999 = vst [vmem:[%s19127_s15 + $0x28] sm:$0xff] %v16074_v51  ;;  %v2027_v59 = vmul.f32 %v16074_v51, %v2013_v47  ;;  %14229 = vmatprep.mubr.msk.bf16.mxu1 %vm17950_vm0, %v17949_v2  ;;  %v17599_v41 = vld [vmem:[%s22142_s1 + $0x130] sm:$0xff]  }
 0x200   : > { %14622 = vmatmul.mubr.bf16.gmra.mrb[32].mxu0 %v19015_v15  ;;  %14254 = vmatpush3.bf16.msra.mxu1 %v17590_v48  ;;  %v17593_v15 = vld [vmem:[%s22142_s1 + $0x118] sm:$0xff]  }
 0x201   : > { %14625 = vmatprep.mubr.msk.bf16.mxu0 %vm17950_vm0, %v17949_v2  ;;  %v2073_v60 = vadd.f32 %v2072_v40, %v2060_v58  ;;  %v2040_v61 = vadd.f32 %v2039_v56, %v2027_v59  ;;  %v2061_v13 = vmul.f32 %v16074_v51, %v2027_v59  ;;  %v1199_v62 = vpop.f32.mrb[16].mxu1  ;;  %14650 = vmatpush3.bf16.msra.mxu0 %v17591_v55  ;;  %v17600_v48 = vld [vmem:[%s22142_s1 + $0x138] sm:$0xff]   ;;  %v2018_v56 = vld [vmem:[%s22145_s4 + $0x50] sm:$0xff] }
 0x202   : > { %14255 = vmatprep.subr.bf16.mxu1 %v17949_v2  ;;  %v1947_v27 = vpop.f32.mrb[12].mxu0  ;;  %v13887_v5 = vpop.f32.mrb[17].mxu1  ;;  %14651 = vmatprep.subr.bf16.mxu0 %v17949_v2 }
 0x203   : > { %v2074_v6 = vadd.f32 %v2073_v60, %v2061_v13  ;;  %v16075_v7 = vadd.f32 %v1947_v27, %v19097_v50  ;;  %v14059_v8 = vpop.f32.mrb[13].mxu0  ;;  %v1202_v9 = vpop.f32.mrb[18].mxu1  ;;  %v17595_v50 = vld [vmem:[%s22142_s1 + $0x120] sm:$0xff]  }
 0x204   : > { %v1950_v10 = vpop.f32.mrb[14].mxu0  ;;  %v13888_v12 = vpop.f32.mrb[19].mxu1  ;;  %14256 = vmatpush3.bf16.msra.mxu1 %v17592_v43 }
 0x205   : > { %2000 = vst [vmem:[%s19127_s15 + $0x30] sm:$0xff] %v16075_v7  ;;  %v2028_v17 = vmul.f32 %v16075_v7, %v2014_v3  ;;  %v16076_v14 = vadd.f32 %v1950_v10, %v19101_v53  ;;  %v14060_v18 = vpop.f32.mrb[15].mxu0  ;;  %14652 = vmatpush3.bf16.msra.mxu0 %v17593_v15  ;;  %14257 = vmatprep.subr.bf16.mxu1 %v17949_v2  ;;  %v17596_v53 = vld [vmem:[%s22142_s1 + $0x128] sm:$0xff]   ;;  %v2020_v12 = vld [vmem:[%s22145_s4 + $0x60] sm:$0xff] }
 0x206   : > { %14230 = vmatmul.mubr.bf16.gmra.mrb[36].mxu1 %v19044_v28  ;;  %14653 = vmatprep.subr.bf16.mxu0 %v17949_v2  ;;  %v2021_v18 = vld [vmem:[%s22145_s4 + $0x68] sm:$0xff] }
 0x207   : > { %v2041_v19 = vadd.f32 %v2040_v61, %v2028_v17  ;;  %v2062_v20 = vmul.f32 %v16075_v7, %v2028_v17  ;;  %2001 = vst [vmem:[%s19127_s15 + $0x38] sm:$0xff] %v16076_v14  ;;  %v2029_v21 = vmul.f32 %v16076_v14, %v2015_v11  ;;  %14233 = vmatprep.mubr.msk.bf16.mxu1 %vm17950_vm0, %v17949_v2 }
 0x208   : > { %14626 = vmatmul.mubr.bf16.gmra.mrb[36].mxu0 %v19049_v30  ;;  %14258 = vmatpush3.bf16.msra.mxu1 %v17594_v16  ;;  %v17597_v30 = vld [vmem:[%s22142_s1 + $0x128] sm:$0xff]  }
 0x209   : > { %14629 = vmatprep.mubr.msk.bf16.mxu0 %vm17950_vm0, %v17949_v2  ;;  %v2075_v28 = vadd.f32 %v2074_v6, %v2062_v20  ;;  %v2042_v22 = vadd.f32 %v2041_v19, %v2029_v21  ;;  %v2063_v23 = vmul.f32 %v16076_v14, %v2029_v21  ;;  %v1207_v25 = vpop.f32.mrb[20].mxu1  ;;  %14654 = vmatpush3.bf16.msra.mxu0 %v17595_v50 }
 0x20a   : > { %14259 = vmatprep.subr.bf16.mxu1 %v17949_v2  ;;  %v1955_v26 = vpop.f32.mrb[16].mxu0  ;;  %v13891_v32 = vpop.f32.mrb[21].mxu1  ;;  %14655 = vmatprep.subr.bf16.mxu0 %v17949_v2 }
 0x20b   : > { %v2076_v24 = vadd.f32 %v2075_v28, %v2063_v23  ;;  %v16077_v33 = vadd.f32 %v1955_v26, %v1199_v62  ;;  %v14063_v34 = vpop.f32.mrb[17].mxu0  ;;  %v1210_v35 = vpop.f32.mrb[22].mxu1  ;;  %v2019_v62 = vld [vmem:[%s22145_s4 + $0x58] sm:$0xff]  ;;  %v2815_v32 = vld [vmem:[%s18034_s6 + $0x90] sm:$0xff] }
 0x20c   : > { %v1958_v29 = vpop.f32.mrb[18].mxu0  ;;  %v13892_v36 = vpop.f32.mrb[23].mxu1  ;;  %14260 = vmatpush3.bf16.msra.mxu1 %v17596_v53  ;;  %v4399_v23 = vld [vmem:[%s18034_s6 + $0x15f] sm:$0xff] }
 0x20d   : > { %2002 = vst [vmem:[%s19127_s15 + $0x40] sm:$0xff] %v16077_v33  ;;  %v2030_v1 = vmul.f32 %v16077_v33, %v2016_v31  ;;  %v16078_v38 = vadd.f32 %v1958_v29, %v1202_v9  ;;  %v14064_v40 = vpop.f32.mrb[19].mxu0  ;;  %14656 = vmatpush3.bf16.msra.mxu0 %v17597_v30  ;;  %14261 = vmatprep.subr.bf16.mxu1 %v17949_v2  ;;  %v17603_v29 = vld [vmem:[%s22142_s1 + $0x140] sm:$0xff]  }
 0x20e   : > { %14234 = vmatmul.mubr.bf16.gmra.mrb[40].mxu1 %v19078_v42  ;;  %14657 = vmatprep.subr.bf16.mxu0 %v17949_v2  ;;  %v2817_v36 = vld [vmem:[%s18034_s6 + $0xa0] sm:$0xff]  ;;  %v17605_v40 = vld [vmem:[%s22142_s1 + $0x148] sm:$0xff]  }
 0x20f   : > { %v2043_v45 = vadd.f32 %v2042_v22, %v2030_v1  ;;  %v2064_v46 = vmul.f32 %v16077_v33, %v2030_v1  ;;  %2003 = vst [vmem:[%s19127_s15 + $0x48] sm:$0xff] %v16078_v38  ;;  %v2031_v47 = vmul.f32 %v16078_v38, %v2017_v0  ;;  %14237 = vmatprep.mubr.msk.bf16.mxu1 %vm17950_vm0, %v17949_v2  ;;  %v4398_v22 = vld [vmem:[%s18034_s6 + $0x157] sm:$0xff]  ;;  %v4575_v33 = vld [vmem:[%s18034_s6 + $0x100] sm:$0xff]  ;;  %v4576_v1 = vld [vmem:[%s18034_s6 + $0x108] sm:$0xff] }
 0x210   : > { %14630 = vmatmul.mubr.bf16.gmra.mrb[40].mxu0 %v19083_v44  ;;  %14262 = vmatpush3.bf16.msra.mxu1 %v17598_v37  ;;  %v17601_v44 = vld [vmem:[%s22142_s1 + $0x138] sm:$0xff]   ;;  %v4406_v31 = vpack.c.bf16 %v4399_v23, %v4398_v22  ;;  %v17604_v37 = vld [vmem:[%s22142_s1 + $0x148] sm:$0xff]  }
 0x211   : > { %14633 = vmatprep.mubr.msk.bf16.mxu0 %vm17950_vm0, %v17949_v2  ;;  %v2077_v42 = vadd.f32 %v2076_v24, %v2064_v46  ;;  %v2044_v49 = vadd.f32 %v2043_v45, %v2031_v47  ;;  %v2065_v51 = vmul.f32 %v16078_v38, %v2031_v47  ;;  %v1215_v39 = vpop.f32.mrb[24].mxu1  ;;  %14658 = vmatpush3.bf16.msra.mxu0 %v17599_v41  ;;  %v4574_v24 = vld [vmem:[%s18034_s6 + $0xf8] sm:$0xff]  ;;  %v4577_v38 = vld [vmem:[%s18034_s6 + $0x110] sm:$0xff] }
 0x212   : > { %14263 = vmatprep.subr.bf16.mxu1 %v17949_v2  ;;  %v1963_v55 = vpop.f32.mrb[20].mxu0  ;;  %v13895_v58 = vpop.f32.mrb[25].mxu1  ;;  %14659 = vmatprep.subr.bf16.mxu0 %v17949_v2  ;;  %v2816_v0 = vld [vmem:[%s18034_s6 + $0x98] sm:$0xff]  ;;  %v4589_v45 = vpack.c.bf16 %v4577_v38, %v4576_v1  ;;  %v17606_v46 = vld [vmem:[%s22142_s1 + $0x150] sm:$0xff]  }
 0x213   : > { %v2078_v59 = vadd.f32 %v2077_v42, %v2065_v51  ;;  %v16079_v43 = vadd.f32 %v1963_v55, %v1207_v25  ;;  %v14067_v60 = vpop.f32.mrb[21].mxu0  ;;  %v1218_v61 = vpop.f32.mrb[26].mxu1  ;;  %v2829_v41 = vpack.c.bf16 %v2817_v36, %v2816_v0  ;;  %v17607_v47 = vld [vmem:[%s22142_s1 + $0x150] sm:$0xff]   ;;  %v4579_v51 = vld [vmem:[%s18034_s6 + $0x120] sm:$0xff] }
 0x214   : > { %v1966_v13 = vpop.f32.mrb[22].mxu0  ;;  %v13896_v15 = vpop.f32.mrb[27].mxu1  ;;  %14264 = vmatpush3.bf16.msra.mxu1 %v17600_v48  ;;  %v2818_v48 = vld [vmem:[%s18034_s6 + $0xa8] sm:$0xff]  ;;  %v2819_v42 = vld [vmem:[%s18034_s6 + $0xb0] sm:$0xff]  ;;  %v17610_v58 = vld [vmem:[%s22142_s1 + $0x160] sm:$0xff]  }
 0x215   : > { %2004 = vst [vmem:[%s19127_s15 + $0x50] sm:$0xff] %v16079_v43  ;;  %v2032_v27 = vmul.f32 %v16079_v43, %v2018_v56  ;;  %v16080_v3 = vadd.f32 %v1966_v13, %v1210_v35  ;;  %v14068_v5 = vpop.f32.mrb[23].mxu0  ;;  %14660 = vmatpush3.bf16.msra.mxu0 %v17601_v44  ;;  %14293 = vmatprep.subr.bf16.mxu1 %v17949_v2  ;;  %v17602_v35 = vld [vmem:[%s22142_s1 + $0x140] sm:$0xff]   ;;  %v17609_v44 = vld [vmem:[%s22142_s1 + $0x158] sm:$0xff]   ;;  %v4581_v13 = vld [vmem:[%s18034_s6 + $0x130] sm:$0xff] }
 0x216   : > { %14238 = vmatmul.mubr.bf16.gmra.mrb[44].mxu1 %v19099_v52  ;;  %14689 = vmatprep.subr.bf16.mxu0 %v17949_v2  ;;  %v2830_v55 = vpack.c.bf16 %v2819_v42, %v2818_v48  ;;  %v2821_v60 = vld [vmem:[%s18034_s6 + $0xc0] sm:$0xff]  ;;  %v17613_v15 = vld [vmem:[%s22142_s1 + $0x168] sm:$0xff]   ;;  %v17614_v5 = vld [vmem:[%s22142_s1 + $0x170] sm:$0xff]  }
 0x217   : > { %v2045_v6 = vadd.f32 %v2044_v49, %v2032_v27  ;;  %v2066_v7 = vmul.f32 %v16079_v43, %v2032_v27  ;;  %2005 = vst [vmem:[%s19127_s15 + $0x58] sm:$0xff] %v16080_v3  ;;  %v2033_v8 = vmul.f32 %v16080_v3, %v2019_v62  ;;  %14241 = vmatprep.mubr.msk.bf16.mxu1 %vm17950_vm0, %v17949_v2  ;;  %v4578_v49 = vld [vmem:[%s18034_s6 + $0x118] sm:$0xff]  ;;  %v17612_v62 = vld [vmem:[%s22142_s1 + $0x168] sm:$0xff]  }
 0x218   : > { %14634 = vmatmul.mubr.bf16.gmra.mrb[44].mxu0 %v19103_v54  ;;  %v4590_v56 = vpack.c.bf16 %v4579_v51, %v4578_v49  ;;  %v2820_v43 = vld [vmem:[%s18034_s6 + $0xb8] sm:$0xff]  ;;  %v4764_v0 = vld [vmem:[%s18034_s6 + $0x109] sm:$0xff]  ;;  %v4767_v48 = vld [vmem:[%s18034_s6 + $0x121] sm:$0xff] }
 0x219   : > { %14637 = vmatprep.mubr.msk.bf16.mxu0 %vm17950_vm0, %v17949_v2  ;;  %v2079_v9 = vadd.f32 %v2078_v59, %v2066_v7  ;;  %v2046_v10 = vadd.f32 %v2045_v6, %v2033_v8  ;;  %v2067_v11 = vmul.f32 %v16080_v3, %v2033_v8  ;;  %v17611_v59 = vld [vmem:[%s22142_s1 + $0x160] sm:$0xff]   ;;  %v2831_v27 = vpack.c.bf16 %v2821_v60, %v2820_v43  ;;  %v17615_v6 = vld [vmem:[%s22142_s1 + $0x170] sm:$0xff]   ;;  %v2822_v7 = vld [vmem:[%s18034_s6 + $0xc8] sm:$0xff] }
 0x21a   : > { %v1971_v52 = vpop.f32.mrb[24].mxu0  ;;  %v2823_v8 = vld [vmem:[%s18034_s6 + $0xd0] sm:$0xff]  ;;  %v17624_v42 = vld [vmem:[%s22142_s1 + $0x198] sm:$0xff]   ;;  %v17628_v60 = vld [vmem:[%s22142_s1 + $0x1a8] sm:$0xff]  }
 0x21b   : > { %v2080_v16 = vadd.f32 %v2079_v9, %v2067_v11  ;;  %v16081_v17 = vadd.f32 %v1971_v52, %v1215_v39  ;;  %v14071_v14 = vpop.f32.mrb[25].mxu0  ;;  %v17608_v39 = vld [vmem:[%s22142_s1 + $0x158] sm:$0xff]  }
 0x21c   : > { %v1974_v54 = vpop.f32.mrb[26].mxu0  ;;  %v4582_v9 = vld [vmem:[%s18034_s6 + $0x138] sm:$0xff]  ;;  %v2825_v14 = vld [vmem:[%s18034_s6 + $0xe0] sm:$0xff] }
 0x21d   : > { %2006 = vst [vmem:[%s19127_s15 + $0x60] sm:$0xff] %v16081_v17  ;;  %v2034_v50 = vmul.f32 %v16081_v17, %v2020_v12  ;;  %v16082_v19 = vadd.f32 %v1974_v54, %v1218_v61  ;;  %v14072_v20 = vpop.f32.mrb[27].mxu0  ;;  %v4580_v61 = vld [vmem:[%s18034_s6 + $0x128] sm:$0xff]  ;;  %v17616_v11 = vld [vmem:[%s22142_s1 + $0x178] sm:$0xff]   ;;  %v2832_v12 = vpack.c.bf16 %v2823_v8, %v2822_v7 }
 0x21e   : > { %14242 = vmatmul.mubr.bf16.gmra.mrb[48].mxu1 %v19119_v63  ;;  %v4591_v3 = vpack.c.bf16 %v4581_v13, %v4580_v61  ;;  %v17617_v52 = vld [vmem:[%s22142_s1 + $0x178] sm:$0xff]   ;;  %v4584_v54 = vld [vmem:[%s18034_s6 + $0x148] sm:$0xff] }
 0x21f   : > { %v2047_v21 = vadd.f32 %v2046_v10, %v2034_v50  ;;  %v2068_v53 = vmul.f32 %v16081_v17, %v2034_v50  ;;  %2007 = vst [vmem:[%s19127_s15 + $0x68] sm:$0xff] %v16082_v19  ;;  %v2035_v28 = vmul.f32 %v16082_v19, %v2021_v18  ;;  %14245 = vmatprep.mubr.msk.bf16.mxu1 %vm17950_vm0, %v17949_v2  ;;  %v4583_v10 = vld [vmem:[%s18034_s6 + $0x140] sm:$0xff]  ;;  %v2824_v17 = vld [vmem:[%s18034_s6 + $0xd8] sm:$0xff]  ;;  %v4585_v18 = vld [vmem:[%s18034_s6 + $0x150] sm:$0xff] }
 0x220   : > { %14638 = vmatmul.mubr.bf16.gmra.mrb[48].mxu0 %v19122_v4  ;;  %v2814_v4 = vld [vmem:[%s18034_s6 + $0x88] sm:$0xff]  ;;  %v2833_v50 = vpack.c.bf16 %v2825_v14, %v2824_v17  ;;  %v4765_v36 = vld [vmem:[%s18034_s6 + $0x111] sm:$0xff] }
 0x221   : > { %14641 = vmatprep.mubr.msk.bf16.mxu0 %vm17950_vm0, %v17949_v2  ;;  %v2081_v25 = vadd.f32 %v2080_v16, %v2068_v53  ;;  %v19294_v63 = vadd.f32 %v2047_v21, %v2035_v28  ;;  %v2069_v30 = vmul.f32 %v16082_v19, %v2035_v28  ;;  %v2828_v34 = vpack.c.bf16 %v2815_v32, %v2814_v4  ;;  %v2826_v20 = vld [vmem:[%s18034_s6 + $0xe8] sm:$0xff]  ;;  %v2827_v21 = vld [vmem:[%s18034_s6 + $0xf0] sm:$0xff]  ;;  %v4586_v53 = vld [vmem:[%s18034_s6 + $0x158] sm:$0xff] }
 0x222   : > { %v4592_v16 = vpack.c.bf16 %v4583_v10, %v4582_v9  ;;  %v4593_v19 = vpack.c.bf16 %v4585_v18, %v4584_v54  ;;  %v4587_v28 = vld [vmem:[%s18034_s6 + $0x160] sm:$0xff]  ;;  %v2834_v22 = vpack.c.bf16 %v2827_v21, %v2826_v20  ;;  %v19454_v38 = vpack.c.bf16 %v4765_v36, %v4764_v0  ;;  %v17625_v49 = vld [vmem:[%s22142_s1 + $0x198] sm:$0xff]   ;;  %v17629_v61 = vld [vmem:[%s22142_s1 + $0x1a8] sm:$0xff]  }
 0x223   : > { %v19296_v26 = vadd.f32 %v2081_v25, %v2069_v30  ;;  %v4594_v23 = vpack.c.bf16 %v4587_v28, %v4586_v53  ;;  %v3002_v25 = vld [vmem:[%s18034_s6 + $0x89] sm:$0xff]  ;;  %v3003_v30 = vld [vmem:[%s18034_s6 + $0x91] sm:$0xff]  ;;  %v4763_v4 = vld [vmem:[%s18034_s6 + $0x101] sm:$0xff] }
 0x224   : > { %v3016_v32 = vpack.c.bf16 %v3003_v30, %v3002_v25  ;;  %v4769_v43 = vld [vmem:[%s18034_s6 + $0x131] sm:$0xff]  ;;  %v4771_v7 = vld [vmem:[%s18034_s6 + $0x141] sm:$0xff]  ;;  %v3014_v18 = vld [vmem:[%s18034_s6 + $0xe9] sm:$0xff] }
 0x225   : > { %v17632_v8 = vld [vmem:[%s22142_s1 + $0x1b8] sm:$0xff]   ;;  %v4775_v20 = vld [vmem:[%s18034_s6 + $0x161] sm:$0xff]  ;;  %v17638_v30 = vld [vmem:[%s22142_s1 + $0x1d0] sm:$0xff]  }
 0x226   : > { %14246 = vmatmul.mubr.bf16.gmra.mrb[52].mxu1 %v18956_v57  ;;  %v4588_v57 = vpack.c.bf16 %v4575_v33, %v4574_v24  ;;  %v17618_v24 = vld [vmem:[%s22142_s1 + $0x180] sm:$0xff]   ;;  %v17633_v9 = vld [vmem:[%s22142_s1 + $0x1b8] sm:$0xff]   ;;  %v17637_v25 = vld [vmem:[%s22142_s1 + $0x1c8] sm:$0xff]  }
 0x227   : > { %14265 = vmatprep.mubr.msk.bf16.mxu1 %vm17950_vm0, %v17949_v2  ;;  %v4773_v17 = vld [vmem:[%s18034_s6 + $0x151] sm:$0xff]  ;;  %v17634_v28 = vld [vmem:[%s22142_s1 + $0x1c0] sm:$0xff]  }
 0x228   : > { %14642 = vmatmul.mubr.bf16.gmra.mrb[52].mxu0 %v4406_v31  ;;  %v4762_v31 = vld [vmem:[%s18034_s6 + $0xf9] sm:$0xff]  ;;  %v17647_v0 = vld [vmem:[%s22142_s1 + $0x1f0] sm:$0xff]  }
 0x229   : > { %14661 = vmatprep.mubr.msk.bf16.mxu0 %vm17950_vm0, %v17949_v2  ;;  %v19430_v33 = vpack.c.bf16 %v4763_v4, %v4762_v31  ;;  %v17639_v31 = vld [vmem:[%s22142_s1 + $0x1d0] sm:$0xff]   ;;  %v17640_v4 = vld [vmem:[%s22142_s1 + $0x1d8] sm:$0xff]  }
 0x22a   : > { %v17648_v36 = vld [vmem:[%s22142_s1 + $0x1f8] sm:$0xff]  }
 0x22e   : > { %14266 = vmatmul.mubr.bf16.vlgmr.msra.gmra.mrb[28].mxu1 %v2828_v34  ;;  %v17619_v34 = vld [vmem:[%s22142_s1 + $0x180] sm:$0xff]  }
 0x22f   : > { %14294 = vmatpush3.bf16.msra.mxu1 %v17602_v35  ;;  %14269 = vmatprep.mubr.msk.bf16.mxu1 %vm17950_vm0, %v17949_v2  ;;  %v3004_v35 = vld [vmem:[%s18034_s6 + $0x99] sm:$0xff] }
 0x230   : > { %14662 = vmatmul.mubr.bf16.vlgmr.msra.gmra.mrb[28].mxu0 %v4588_v57  ;;  %14295 = vmatprep.subr.bf16.mxu1 %v17949_v2  ;;  %v3005_v57 = vld [vmem:[%s18034_s6 + $0xa1] sm:$0xff] }
 0x231   : > { %14690 = vmatpush3.bf16.msra.mxu0 %v17603_v29  ;;  %14665 = vmatprep.mubr.msk.bf16.mxu0 %vm17950_vm0, %v17949_v2  ;;  %v17620_v29 = vld [vmem:[%s22142_s1 + $0x188] sm:$0xff]   ;;  %v19451_v1 = vpack.c.bf16 %v3005_v57, %v3004_v35 }
 0x232   : > { %14691 = vmatprep.subr.bf16.mxu0 %v17949_v2  ;;  %v17644_v35 = vld [vmem:[%s22142_s1 + $0x1e8] sm:$0xff]  }
 0x233   : > { %14296 = vmatpush3.bf16.msra.mxu1 %v17604_v37  ;;  %v17621_v37 = vld [vmem:[%s22142_s1 + $0x188] sm:$0xff]  }
 0x234   : > { %14297 = vmatprep.subr.bf16.mxu1 %v17949_v2  ;;  %v17645_v57 = vld [vmem:[%s22142_s1 + $0x1e8] sm:$0xff]  }
 0x235   : > { %14692 = vmatpush3.bf16.msra.mxu0 %v17605_v40  ;;  %v17622_v40 = vld [vmem:[%s22142_s1 + $0x190] sm:$0xff]  }
 0x236   : > { %14693 = vmatprep.subr.bf16.mxu0 %v17949_v2  ;;  %14270 = vmatmul.mubr.bf16.gmra.mrb[32].mxu1 %v2829_v41  ;;  %v17623_v41 = vld [vmem:[%s22142_s1 + $0x190] sm:$0xff]  }
 0x237   : > { %14273 = vmatprep.mubr.msk.bf16.mxu1 %vm17950_vm0, %v17949_v2  ;;  %14298 = vmatpush3.bf16.msra.mxu1 %v17606_v46  ;;  %v3007_v46 = vld [vmem:[%s18034_s6 + $0xb1] sm:$0xff] }
 0x238   : > { %14666 = vmatmul.mubr.bf16.gmra.mrb[32].mxu0 %v4589_v45  ;;  %14299 = vmatprep.subr.bf16.mxu1 %v17949_v2  ;;  %v3006_v45 = vld [vmem:[%s18034_s6 + $0xa9] sm:$0xff] }
 0x239   : > { %14669 = vmatprep.mubr.msk.bf16.mxu0 %vm17950_vm0, %v17949_v2  ;;  %14694 = vmatpush3.bf16.msra.mxu0 %v17607_v47  ;;  %v4766_v47 = vld [vmem:[%s18034_s6 + $0x119] sm:$0xff]  ;;  %v19481_v51 = vpack.c.bf16 %v3007_v46, %v3006_v45  ;;  %v3379_v45 = vld [vmem:[%s18034_s6 + $0xa2] sm:$0xff]  ;;  %v5138_v46 = vld [vmem:[%s18034_s6 + $0x10a] sm:$0xff] }
 0x23a   : > { %14695 = vmatprep.subr.bf16.mxu0 %v17949_v2 }
 0x23b   : > { %14300 = vmatpush3.bf16.msra.mxu1 %v17608_v39  ;;  %v19484_v39 = vpack.c.bf16 %v4767_v48, %v4766_v47  ;;  %v5139_v47 = vld [vmem:[%s18034_s6 + $0x112] sm:$0xff] }
 0x23c   : > { %14301 = vmatprep.subr.bf16.mxu1 %v17949_v2 }
 0x23d   : > { %14696 = vmatpush3.bf16.msra.mxu0 %v17609_v44  ;;  %v17626_v44 = vld [vmem:[%s22142_s1 + $0x1a0] sm:$0xff]  }
 0x23e   : > { %14274 = vmatmul.mubr.bf16.gmra.mrb[36].mxu1 %v2830_v55  ;;  %14697 = vmatprep.subr.bf16.mxu0 %v17949_v2  ;;  %v17627_v55 = vld [vmem:[%s22142_s1 + $0x1a0] sm:$0xff]  }
 0x23f   : > { %14277 = vmatprep.mubr.msk.bf16.mxu1 %vm17950_vm0, %v17949_v2  ;;  %14302 = vmatpush3.bf16.msra.mxu1 %v17610_v58  ;;  %v3009_v58 = vld [vmem:[%s18034_s6 + $0xc1] sm:$0xff] }
 0x240   : > { %14670 = vmatmul.mubr.bf16.gmra.mrb[36].mxu0 %v4590_v56  ;;  %14303 = vmatprep.subr.bf16.mxu1 %v17949_v2  ;;  %v3008_v56 = vld [vmem:[%s18034_s6 + $0xb9] sm:$0xff] }
 0x241   : > { %14673 = vmatprep.mubr.msk.bf16.mxu0 %vm17950_vm0, %v17949_v2  ;;  %14698 = vmatpush3.bf16.msra.mxu0 %v17611_v59  ;;  %v4768_v59 = vld [vmem:[%s18034_s6 + $0x129] sm:$0xff]  ;;  %v19511_v13 = vpack.c.bf16 %v3009_v58, %v3008_v56 }
 0x242   : > { %14699 = vmatprep.subr.bf16.mxu0 %v17949_v2  ;;  %v5141_v56 = vld [vmem:[%s18034_s6 + $0x122] sm:$0xff] }
 0x243   : > { %14304 = vmatpush3.bf16.msra.mxu1 %v17612_v62  ;;  %v19514_v62 = vpack.c.bf16 %v4769_v43, %v4768_v59  ;;  %v17653_v58 = vld [vmem:[%s22142_s1 + $0x208] sm:$0xff]  }
 0x244   : > { %14305 = vmatprep.subr.bf16.mxu1 %v17949_v2 }
 0x245   : > { %14700 = vmatpush3.bf16.msra.mxu0 %v17613_v15  ;;  %v17630_v15 = vld [vmem:[%s22142_s1 + $0x1b0] sm:$0xff]  }
 0x246   : > { %14278 = vmatmul.mubr.bf16.gmra.mrb[40].mxu1 %v2831_v27  ;;  %14701 = vmatprep.subr.bf16.mxu0 %v17949_v2  ;;  %v17631_v27 = vld [vmem:[%s22142_s1 + $0x1b0] sm:$0xff]  }
 0x247   : > { %14281 = vmatprep.mubr.msk.bf16.mxu1 %vm17950_vm0, %v17949_v2  ;;  %14306 = vmatpush3.bf16.msra.mxu1 %v17614_v5  ;;  %v3011_v5 = vld [vmem:[%s18034_s6 + $0xd1] sm:$0xff] }
 0x248   : > { %14674 = vmatmul.mubr.bf16.gmra.mrb[40].mxu0 %v4591_v3  ;;  %14307 = vmatprep.subr.bf16.mxu1 %v17949_v2  ;;  %v3010_v3 = vld [vmem:[%s18034_s6 + $0xc9] sm:$0xff] }
 0x249   : > { %14677 = vmatprep.mubr.msk.bf16.mxu0 %vm17950_vm0, %v17949_v2  ;;  %14702 = vmatpush3.bf16.msra.mxu0 %v17615_v6  ;;  %v4770_v6 = vld [vmem:[%s18034_s6 + $0x139] sm:$0xff]  ;;  %v19541_v10 = vpack.c.bf16 %v3011_v5, %v3010_v3 }
 0x24a   : > { %14703 = vmatprep.subr.bf16.mxu0 %v17949_v2  ;;  %v17656_v3 = vld [vmem:[%s22142_s1 + $0x218] sm:$0xff]  }
 0x24b   : > { %14308 = vmatpush3.bf16.msra.mxu1 %v17616_v11  ;;  %v19544_v11 = vpack.c.bf16 %v4771_v7, %v4770_v6  ;;  %v17657_v5 = vld [vmem:[%s22142_s1 + $0x218] sm:$0xff]  }
 0x24c   : > { %14337 = vmatprep.subr.bf16.mxu1 %v17949_v2 }
 0x24d   : > { %14704 = vmatpush3.bf16.msra.mxu0 %v17617_v52  ;;  %v3012_v52 = vld [vmem:[%s18034_s6 + $0xd9] sm:$0xff] }
 0x24e   : > { %14282 = vmatmul.mubr.bf16.gmra.mrb[44].mxu1 %v2832_v12  ;;  %14733 = vmatprep.subr.bf16.mxu0 %v17949_v2  ;;  %v3013_v12 = vld [vmem:[%s18034_s6 + $0xe1] sm:$0xff] }
 0x24f   : > { %14285 = vmatprep.mubr.msk.bf16.mxu1 %vm17950_vm0, %v17949_v2  ;;  %v19558_v14 = vpack.c.bf16 %v3013_v12, %v3012_v52  ;;  %v5144_v52 = vld [vmem:[%s18034_s6 + $0x13a] sm:$0xff]  ;;  %v5145_v12 = vld [vmem:[%s18034_s6 + $0x142] sm:$0xff] }
 0x250   : > { %14678 = vmatmul.mubr.bf16.gmra.mrb[44].mxu0 %v4592_v16  ;;  %v4772_v16 = vld [vmem:[%s18034_s6 + $0x149] sm:$0xff] }
 0x251   : > { %14681 = vmatprep.mubr.msk.bf16.mxu0 %vm17950_vm0, %v17949_v2  ;;  %v19560_v54 = vpack.c.bf16 %v4773_v17, %v4772_v16  ;;  %v17660_v16 = vld [vmem:[%s22142_s1 + $0x228] sm:$0xff]  }
 0x252   : > { %v17661_v17 = vld [vmem:[%s22142_s1 + $0x228] sm:$0xff]  }
 0x256   : > { %14286 = vmatmul.mubr.bf16.gmra.mrb[48].mxu1 %v2833_v50  ;;  %v3015_v50 = vld [vmem:[%s18034_s6 + $0xf1] sm:$0xff] }
 0x257   : > { %14289 = vmatprep.mubr.msk.bf16.mxu1 %vm17950_vm0, %v17949_v2  ;;  %v19572_v21 = vpack.c.bf16 %v3015_v50, %v3014_v18  ;;  %v17662_v18 = vld [vmem:[%s22142_s1 + $0x230] sm:$0xff]  }
 0x258   : > { %14682 = vmatmul.mubr.bf16.gmra.mrb[48].mxu0 %v4593_v19  ;;  %v4774_v19 = vld [vmem:[%s18034_s6 + $0x159] sm:$0xff]  ;;  %v17663_v50 = vld [vmem:[%s22142_s1 + $0x230] sm:$0xff]  }
 0x259   : > { %14685 = vmatprep.mubr.msk.bf16.mxu0 %vm17950_vm0, %v17949_v2  ;;  %v19574_v53 = vpack.c.bf16 %v4775_v20, %v4774_v19  ;;  %v3386_v19 = vld [vmem:[%s18034_s6 + $0xda] sm:$0xff]  ;;  %v3387_v20 = vld [vmem:[%s18034_s6 + $0xe2] sm:$0xff] }
 0x25e   : > { %14290 = vmatmul.mubr.bf16.gmra.mrb[52].mxu1 %v2834_v22  ;;  %v17635_v22 = vld [vmem:[%s22142_s1 + $0x1c0] sm:$0xff]  }
 0x25f   : > { %14309 = vmatprep.mubr.msk.bf16.mxu1 %vm17950_vm0, %v17949_v2 }
 0x260   : > { %14686 = vmatmul.mubr.bf16.gmra.mrb[52].mxu0 %v4594_v23  ;;  %v17636_v23 = vld [vmem:[%s22142_s1 + $0x1c8] sm:$0xff]  }
 0x261   : > { %14705 = vmatprep.mubr.msk.bf16.mxu0 %vm17950_vm0, %v17949_v2 }
 0x266   : > { %14310 = vmatmul.mubr.bf16.vlgmr.msra.gmra.mrb[28].mxu1 %v3016_v32  ;;  %v17641_v32 = vld [vmem:[%s22142_s1 + $0x1d8] sm:$0xff]  }
 0x267   : > { %14338 = vmatpush3.bf16.msra.mxu1 %v17618_v24  ;;  %14313 = vmatprep.mubr.msk.bf16.mxu1 %vm17950_vm0, %v17949_v2  ;;  %v17642_v24 = vld [vmem:[%s22142_s1 + $0x1e0] sm:$0xff]  }
 0x268   : > { %14706 = vmatmul.mubr.bf16.vlgmr.msra.gmra.mrb[28].mxu0 %v19430_v33  ;;  %14339 = vmatprep.subr.bf16.mxu1 %v17949_v2 }
 0x269   : > { %14734 = vmatpush3.bf16.msra.mxu0 %v17619_v34  ;;  %14709 = vmatprep.mubr.msk.bf16.mxu0 %vm17950_vm0, %v17949_v2  ;;  %v17643_v34 = vld [vmem:[%s22142_s1 + $0x1e0] sm:$0xff]  }
 0x26a   : > { %14735 = vmatprep.subr.bf16.mxu0 %v17949_v2 }
 0x26b   : > { %14340 = vmatpush3.bf16.msra.mxu1 %v17620_v29  ;;  %v17646_v29 = vld [vmem:[%s22142_s1 + $0x1f0] sm:$0xff]  }
 0x26c   : > { %14341 = vmatprep.subr.bf16.mxu1 %v17949_v2 }
 0x26d   : > { %14736 = vmatpush3.bf16.msra.mxu0 %v17621_v37  ;;  %v17649_v37 = vld [vmem:[%s22142_s1 + $0x1f8] sm:$0xff]  }
 0x26e   : > { %14737 = vmatprep.subr.bf16.mxu0 %v17949_v2  ;;  %14314 = vmatmul.mubr.bf16.gmra.mrb[32].mxu1 %v19451_v1 }
 0x26f   : > { %14317 = vmatprep.mubr.msk.bf16.mxu1 %vm17950_vm0, %v17949_v2  ;;  %14342 = vmatpush3.bf16.msra.mxu1 %v17622_v40 }
 0x270   : > { %14710 = vmatmul.mubr.bf16.gmra.mrb[32].mxu0 %v19454_v38  ;;  %14343 = vmatprep.subr.bf16.mxu1 %v17949_v2 }
 0x271   : > { %14713 = vmatprep.mubr.msk.bf16.mxu0 %vm17950_vm0, %v17949_v2  ;;  %14738 = vmatpush3.bf16.msra.mxu0 %v17623_v41  ;;  %v3378_v41 = vld [vmem:[%s18034_s6 + $0x9a] sm:$0xff] }
 0x272   : > { %14739 = vmatprep.subr.bf16.mxu0 %v17949_v2  ;;  %v3392_v48 = vpack.c.bf16 %v3379_v45, %v3378_v41  ;;  %v5327_v41 = vld [vmem:[%s18034_s6 + $0x113] sm:$0xff] }
 0x273   : > { %14344 = vmatpush3.bf16.msra.mxu1 %v17624_v42  ;;  %v17650_v42 = vld [vmem:[%s22142_s1 + $0x200] sm:$0xff]  }
 0x274   : > { %14345 = vmatprep.subr.bf16.mxu1 %v17949_v2 }
 0x275   : > { %14740 = vmatpush3.bf16.msra.mxu0 %v17625_v49  ;;  %v17651_v49 = vld [vmem:[%s22142_s1 + $0x200] sm:$0xff]  }
 0x276   : > { %14318 = vmatmul.mubr.bf16.gmra.mrb[36].mxu1 %v19481_v51  ;;  %14741 = vmatprep.subr.bf16.mxu0 %v17949_v2 }
 0x277   : > { %14321 = vmatprep.mubr.msk.bf16.mxu1 %vm17950_vm0, %v17949_v2  ;;  %14346 = vmatpush3.bf16.msra.mxu1 %v17626_v44  ;;  %v17652_v44 = vld [vmem:[%s22142_s1 + $0x208] sm:$0xff]  }
 0x278   : > { %14714 = vmatmul.mubr.bf16.gmra.mrb[36].mxu0 %v19484_v39  ;;  %14347 = vmatprep.subr.bf16.mxu1 %v17949_v2 }
 0x279   : > { %14717 = vmatprep.mubr.msk.bf16.mxu0 %vm17950_vm0, %v17949_v2  ;;  %14742 = vmatpush3.bf16.msra.mxu0 %v17627_v55  ;;  %v5140_v55 = vld [vmem:[%s18034_s6 + $0x11a] sm:$0xff] }
 0x27a   : > { %14743 = vmatprep.subr.bf16.mxu0 %v17949_v2  ;;  %v5153_v43 = vpack.c.bf16 %v5141_v56, %v5140_v55  ;;  %v5330_v55 = vld [vmem:[%s18034_s6 + $0x12b] sm:$0xff]  ;;  %v5331_v56 = vld [vmem:[%s18034_s6 + $0x133] sm:$0xff] }
 0x27b   : > { %14348 = vmatpush3.bf16.msra.mxu1 %v17628_v60  ;;  %v17654_v60 = vld [vmem:[%s22142_s1 + $0x210] sm:$0xff]  }
 0x27c   : > { %14349 = vmatprep.subr.bf16.mxu1 %v17949_v2 }
 0x27d   : > { %14744 = vmatpush3.bf16.msra.mxu0 %v17629_v61  ;;  %v17655_v61 = vld [vmem:[%s22142_s1 + $0x210] sm:$0xff]  }
 0x27e   : > { %14322 = vmatmul.mubr.bf16.gmra.mrb[40].mxu1 %v19511_v13  ;;  %14745 = vmatprep.subr.bf16.mxu0 %v17949_v2 }
 0x27f   : > { %14325 = vmatprep.mubr.msk.bf16.mxu1 %vm17950_vm0, %v17949_v2  ;;  %14350 = vmatpush3.bf16.msra.mxu1 %v17630_v15  ;;  %v5142_v15 = vld [vmem:[%s18034_s6 + $0x12a] sm:$0xff] }
 0x280   : > { %14718 = vmatmul.mubr.bf16.gmra.mrb[40].mxu0 %v19514_v62  ;;  %14351 = vmatprep.subr.bf16.mxu1 %v17949_v2 }
 0x281   : > { %14721 = vmatprep.mubr.msk.bf16.mxu0 %vm17950_vm0, %v17949_v2  ;;  %14746 = vmatpush3.bf16.msra.mxu0 %v17631_v27  ;;  %v5143_v27 = vld [vmem:[%s18034_s6 + $0x132] sm:$0xff] }
 0x282   : > { %14747 = vmatprep.subr.bf16.mxu0 %v17949_v2  ;;  %v5154_v7 = vpack.c.bf16 %v5143_v27, %v5142_v15  ;;  %v3574_v27 = vld [vmem:[%s18034_s6 + $0xdb] sm:$0xff] }
 0x283   : > { %14352 = vmatpush3.bf16.msra.mxu1 %v17632_v8  ;;  %v17658_v8 = vld [vmem:[%s22142_s1 + $0x220] sm:$0xff]  }
 0x284   : > { %14381 = vmatprep.subr.bf16.mxu1 %v17949_v2 }
 0x285   : > { %14748 = vmatpush3.bf16.msra.mxu0 %v17633_v9  ;;  %v17659_v9 = vld [vmem:[%s22142_s1 + $0x220] sm:$0xff]  }
 0x286   : > { %14326 = vmatmul.mubr.bf16.gmra.mrb[44].mxu1 %v19541_v10  ;;  %14777 = vmatprep.subr.bf16.mxu0 %v17949_v2 }
 0x287   : > { %14329 = vmatprep.mubr.msk.bf16.mxu1 %vm17950_vm0, %v17949_v2 }
 0x288   : > { %14722 = vmatmul.mubr.bf16.gmra.mrb[44].mxu0 %v19544_v11 }
 0x289   : > { %14725 = vmatprep.mubr.msk.bf16.mxu0 %vm17950_vm0, %v17949_v2 }
 0x28e   : > { %14330 = vmatmul.mubr.bf16.gmra.mrb[48].mxu1 %v19558_v14 }
 0x28f   : > { %14333 = vmatprep.mubr.msk.bf16.mxu1 %vm17950_vm0, %v17949_v2 }
 0x290   : > { %14726 = vmatmul.mubr.bf16.gmra.mrb[48].mxu0 %v19560_v54 }
 0x291   : > { %14729 = vmatprep.mubr.msk.bf16.mxu0 %vm17950_vm0, %v17949_v2 }
 0x296   : > { %14334 = vmatmul.mubr.bf16.gmra.mrb[52].mxu1 %v19572_v21 }
 0x297   : > { %14353 = vmatprep.mubr.msk.bf16.mxu1 %vm17950_vm0, %v17949_v2 }
 0x298   : > { %14730 = vmatmul.mubr.bf16.gmra.mrb[52].mxu0 %v19574_v53 }
 0x299   : > { %14749 = vmatprep.mubr.msk.bf16.mxu0 %vm17950_vm0, %v17949_v2 }
 0x29e   : > { %14354 = vmatmul.mubr.bf16.vlgmr.msra.gmra.mrb[28].mxu1 %v19451_v1  ;;  %v4962_v1 = vld [vmem:[%s18034_s6 + $0x169] sm:$0xff] }
 0x29f   : > { %14382 = vmatpush3.bf16.msra.mxu1 %v17634_v28  ;;  %14357 = vmatprep.mubr.msk.bf16.mxu1 %vm17950_vm0, %v17949_v2  ;;  %v17664_v28 = vld [vmem:[%s22142_s1 + $0x238] sm:$0xff]  }
 0x2a0   : > { %14750 = vmatmul.mubr.bf16.vlgmr.msra.gmra.mrb[28].mxu0 %v19454_v38  ;;  %14383 = vmatprep.subr.bf16.mxu1 %v17949_v2  ;;  %v4963_v38 = vld [vmem:[%s18034_s6 + $0x171] sm:$0xff] }
 0x2a1   : > { %14778 = vmatpush3.bf16.msra.mxu0 %v17635_v22  ;;  %14753 = vmatprep.mubr.msk.bf16.mxu0 %vm17950_vm0, %v17949_v2  ;;  %v4970_v40 = vpack.c.bf16 %v4963_v38, %v4962_v1  ;;  %v17665_v22 = vld [vmem:[%s22142_s1 + $0x238] sm:$0xff]   ;;  %v3567_v38 = vld [vmem:[%s18034_s6 + $0xa3] sm:$0xff] }
 0x2a2   : > { %14779 = vmatprep.subr.bf16.mxu0 %v17949_v2  ;;  %v3566_v1 = vld [vmem:[%s18034_s6 + $0x9b] sm:$0xff] }
 0x2a3   : > { %14384 = vmatpush3.bf16.msra.mxu1 %v17636_v23  ;;  %v3396_v23 = vpack.c.bf16 %v3387_v20, %v3386_v19  ;;  %v3580_v45 = vpack.c.bf16 %v3567_v38, %v3566_v1  ;;  %v3768_v20 = vld [vmem:[%s22145_s4 + $0x70] sm:$0xff] }
 0x2a4   : > { %14385 = vmatprep.subr.bf16.mxu1 %v17949_v2 }
 0x2a5   : > { %14780 = vmatpush3.bf16.msra.mxu0 %v17637_v25 }
 0x2a6   : > { %14781 = vmatprep.subr.bf16.mxu0 %v17949_v2  ;;  %14358 = vmatmul.mubr.bf16.gmra.mrb[32].mxu1 %v19481_v51  ;;  %v3380_v51 = vld [vmem:[%s18034_s6 + $0xaa] sm:$0xff] }
 0x2a7   : > { %14361 = vmatprep.mubr.msk.bf16.mxu1 %vm17950_vm0, %v17949_v2  ;;  %14386 = vmatpush3.bf16.msra.mxu1 %v17638_v30  ;;  %v3388_v30 = vld [vmem:[%s18034_s6 + $0xea] sm:$0xff] }
 0x2a8   : > { %14754 = vmatmul.mubr.bf16.gmra.mrb[32].mxu0 %v19484_v39  ;;  %14387 = vmatprep.subr.bf16.mxu1 %v17949_v2  ;;  %v3381_v39 = vld [vmem:[%s18034_s6 + $0xb2] sm:$0xff] }
 0x2a9   : > { %14757 = vmatprep.mubr.msk.bf16.mxu0 %vm17950_vm0, %v17949_v2  ;;  %14782 = vmatpush3.bf16.msra.mxu0 %v17639_v31  ;;  %v3393_v59 = vpack.c.bf16 %v3381_v39, %v3380_v51  ;;  %v3389_v31 = vld [vmem:[%s18034_s6 + $0xf2] sm:$0xff]  ;;  %v3570_v39 = vld [vmem:[%s18034_s6 + $0xbb] sm:$0xff] }
 0x2aa   : > { %14783 = vmatprep.subr.bf16.mxu0 %v17949_v2 }
 0x2ab   : > { %14388 = vmatpush3.bf16.msra.mxu1 %v17640_v4  ;;  %v5148_v4 = vld [vmem:[%s18034_s6 + $0x15a] sm:$0xff] }
 0x2ac   : > { %14389 = vmatprep.subr.bf16.mxu1 %v17949_v2 }
 0x2ad   : > { %14784 = vmatpush3.bf16.msra.mxu0 %v17641_v32  ;;  %v5149_v32 = vld [vmem:[%s18034_s6 + $0x162] sm:$0xff] }
 0x2ae   : > { %14362 = vmatmul.mubr.bf16.gmra.mrb[36].mxu1 %v19511_v13  ;;  %14785 = vmatprep.subr.bf16.mxu0 %v17949_v2  ;;  %v3382_v13 = vld [vmem:[%s18034_s6 + $0xba] sm:$0xff] }
 0x2af   : > { %14365 = vmatprep.mubr.msk.bf16.mxu1 %vm17950_vm0, %v17949_v2  ;;  %14390 = vmatpush3.bf16.msra.mxu1 %v17642_v24  ;;  %v3397_v24 = vpack.c.bf16 %v3389_v31, %v3388_v30 }
 0x2b0   : > { %14758 = vmatmul.mubr.bf16.gmra.mrb[36].mxu0 %v19514_v62  ;;  %14391 = vmatprep.subr.bf16.mxu1 %v17949_v2  ;;  %v3383_v62 = vld [vmem:[%s18034_s6 + $0xc2] sm:$0xff] }
 0x2b1   : > { %14761 = vmatprep.mubr.msk.bf16.mxu0 %vm17950_vm0, %v17949_v2  ;;  %14786 = vmatpush3.bf16.msra.mxu0 %v17643_v34  ;;  %v3394_v6 = vpack.c.bf16 %v3383_v62, %v3382_v13  ;;  %v5157_v34 = vpack.c.bf16 %v5149_v32, %v5148_v4  ;;  %v5333_v13 = vld [vmem:[%s18034_s6 + $0x143] sm:$0xff] }
 0x2b2   : > { %14787 = vmatprep.subr.bf16.mxu0 %v17949_v2 }
 0x2b3   : > { %14392 = vmatpush3.bf16.msra.mxu1 %v17644_v35  ;;  %v3390_v35 = vld [vmem:[%s18034_s6 + $0xfa] sm:$0xff] }
 0x2b4   : > { %14393 = vmatprep.subr.bf16.mxu1 %v17949_v2 }
 0x2b5   : > { %14788 = vmatpush3.bf16.msra.mxu0 %v17645_v57  ;;  %v3391_v57 = vld [vmem:[%s18034_s6 + $0x102] sm:$0xff] }
 0x2b6   : > { %14366 = vmatmul.mubr.bf16.gmra.mrb[40].mxu1 %v19541_v10  ;;  %14789 = vmatprep.subr.bf16.mxu0 %v17949_v2  ;;  %v3384_v10 = vld [vmem:[%s18034_s6 + $0xca] sm:$0xff] }
 0x2b7   : > { %14369 = vmatprep.mubr.msk.bf16.mxu1 %vm17950_vm0, %v17949_v2  ;;  %14394 = vmatpush3.bf16.msra.mxu1 %v17646_v29  ;;  %v5150_v29 = vld [vmem:[%s18034_s6 + $0x16a] sm:$0xff] }
 0x2b8   : > { %14762 = vmatmul.mubr.bf16.gmra.mrb[40].mxu0 %v19544_v11  ;;  %14395 = vmatprep.subr.bf16.mxu1 %v17949_v2  ;;  %v3385_v11 = vld [vmem:[%s18034_s6 + $0xd2] sm:$0xff] }
 0x2b9   : > { %14765 = vmatprep.mubr.msk.bf16.mxu0 %vm17950_vm0, %v17949_v2  ;;  %14790 = vmatpush3.bf16.msra.mxu0 %v17647_v0  ;;  %v5151_v0 = vld [vmem:[%s18034_s6 + $0x172] sm:$0xff] }
 0x2ba   : > { %14791 = vmatprep.subr.bf16.mxu0 %v17949_v2 }
 0x2bb   : > { %14396 = vmatpush3.bf16.msra.mxu1 %v17648_v36  ;;  %v3398_v36 = vpack.c.bf16 %v3391_v57, %v3390_v35 }
 0x2bc   : > { %14425 = vmatprep.subr.bf16.mxu1 %v17949_v2 }
 0x2bd   : > { %14792 = vmatpush3.bf16.msra.mxu0 %v17649_v37  ;;  %v5158_v37 = vpack.c.bf16 %v5151_v0, %v5150_v29 }
 0x2be   : > { %14370 = vmatmul.mubr.bf16.gmra.mrb[44].mxu1 %v19558_v14  ;;  %14821 = vmatprep.subr.bf16.mxu0 %v17949_v2  ;;  %v3395_v14 = vpack.c.bf16 %v3385_v11, %v3384_v10  ;;  %v3577_v10 = vld [vmem:[%s18034_s6 + $0xf3] sm:$0xff]  ;;  %v5336_v11 = vld [vmem:[%s18034_s6 + $0x15b] sm:$0xff] }
 0x2bf   : > { %14373 = vmatprep.mubr.msk.bf16.mxu1 %vm17950_vm0, %v17949_v2 }
 0x2c0   : > { %14766 = vmatmul.mubr.bf16.gmra.mrb[44].mxu0 %v19560_v54  ;;  %v5155_v54 = vpack.c.bf16 %v5145_v12, %v5144_v52  ;;  %v5337_v52 = vld [vmem:[%s18034_s6 + $0x163] sm:$0xff] }
 0x2c1   : > { %14769 = vmatprep.mubr.msk.bf16.mxu0 %vm17950_vm0, %v17949_v2 }
 0x2c6   : > { %14374 = vmatmul.mubr.bf16.gmra.mrb[48].mxu1 %v19572_v21  ;;  %v5146_v21 = vld [vmem:[%s18034_s6 + $0x14a] sm:$0xff] }
 0x2c7   : > { %14377 = vmatprep.mubr.msk.bf16.mxu1 %vm17950_vm0, %v17949_v2 }
 0x2c8   : > { %14770 = vmatmul.mubr.bf16.gmra.mrb[48].mxu0 %v19574_v53  ;;  %v5147_v53 = vld [vmem:[%s18034_s6 + $0x152] sm:$0xff] }
 0x2c9   : > { %14773 = vmatprep.mubr.msk.bf16.mxu0 %vm17950_vm0, %v17949_v2  ;;  %v5156_v25 = vpack.c.bf16 %v5147_v53, %v5146_v21  ;;  %v5528_v21 = vld [vmem:[%s22145_s4 + $0xe0] sm:$0xff] }
 0x2ce   : > { %14378 = vmatmul.mubr.bf16.gmra.mrb[52].mxu1 %v19430_v33  ;;  %v5152_v33 = vpack.c.bf16 %v5139_v47, %v5138_v46  ;;  %v3568_v47 = vld [vmem:[%s18034_s6 + $0xab] sm:$0xff] }
 0x2cf   : > { %14397 = vmatprep.mubr.msk.bf16.mxu1 %vm17950_vm0, %v17949_v2 }
 0x2d0   : > { %14774 = vmatmul.mubr.bf16.gmra.mrb[52].mxu0 %v4970_v40  ;;  %v5326_v40 = vld [vmem:[%s18034_s6 + $0x10b] sm:$0xff] }
 0x2d1   : > { %14793 = vmatprep.mubr.msk.bf16.mxu0 %vm17950_vm0, %v17949_v2  ;;  %v5340_v46 = vpack.c.bf16 %v5327_v41, %v5326_v40  ;;  %v3770_v40 = vld [vmem:[%s22145_s4 + $0x80] sm:$0xff] }
 0x2d6   : > { %14398 = vmatmul.mubr.bf16.vlgmr.msra.gmra.mrb[28].mxu1 %v3392_v48  ;;  %v3569_v48 = vld [vmem:[%s18034_s6 + $0xb3] sm:$0xff] }
 0x2d7   : > { %14426 = vmatpush3.bf16.msra.mxu1 %v17650_v42  ;;  %14401 = vmatprep.mubr.msk.bf16.mxu1 %vm17950_vm0, %v17949_v2  ;;  %v5328_v42 = vld [vmem:[%s18034_s6 + $0x11b] sm:$0xff] }
 0x2d8   : > { %14794 = vmatmul.mubr.bf16.vlgmr.msra.gmra.mrb[28].mxu0 %v5152_v33  ;;  %14427 = vmatprep.subr.bf16.mxu1 %v17949_v2  ;;  %v5329_v33 = vld [vmem:[%s18034_s6 + $0x123] sm:$0xff] }
 0x2d9   : > { %14822 = vmatpush3.bf16.msra.mxu0 %v17651_v49  ;;  %14797 = vmatprep.mubr.msk.bf16.mxu0 %vm17950_vm0, %v17949_v2  ;;  %v3581_v49 = vpack.c.bf16 %v3569_v48, %v3568_v47  ;;  %v5341_v51 = vpack.c.bf16 %v5329_v33, %v5328_v42  ;;  %v3771_v48 = vld [vmem:[%s22145_s4 + $0x88] sm:$0xff] }
 0x2da   : > { %14823 = vmatprep.subr.bf16.mxu0 %v17949_v2 }
 0x2db   : > { %14428 = vmatpush3.bf16.msra.mxu1 %v17652_v44  ;;  %v3571_v44 = vld [vmem:[%s18034_s6 + $0xc3] sm:$0xff] }
 0x2dc   : > { %14429 = vmatprep.subr.bf16.mxu1 %v17949_v2 }
 0x2dd   : > { %14824 = vmatpush3.bf16.msra.mxu0 %v17653_v58  ;;  %v3582_v58 = vpack.c.bf16 %v3571_v44, %v3570_v39 }
 0x2de   : > { %14825 = vmatprep.subr.bf16.mxu0 %v17949_v2  ;;  %14402 = vmatmul.mubr.bf16.gmra.mrb[32].mxu1 %v3393_v59  ;;  %v5342_v59 = vpack.c.bf16 %v5331_v56, %v5330_v55 }
 0x2df   : > { %14405 = vmatprep.mubr.msk.bf16.mxu1 %vm17950_vm0, %v17949_v2  ;;  %14430 = vmatpush3.bf16.msra.mxu1 %v17654_v60  ;;  %v3573_v60 = vld [vmem:[%s18034_s6 + $0xd3] sm:$0xff] }
 0x2e0   : > { %14798 = vmatmul.mubr.bf16.gmra.mrb[32].mxu0 %v5153_v43  ;;  %14431 = vmatprep.subr.bf16.mxu1 %v17949_v2  ;;  %v3572_v43 = vld [vmem:[%s18034_s6 + $0xcb] sm:$0xff] }
 0x2e1   : > { %14801 = vmatprep.mubr.msk.bf16.mxu0 %vm17950_vm0, %v17949_v2  ;;  %14826 = vmatpush3.bf16.msra.mxu0 %v17655_v61  ;;  %v5332_v61 = vld [vmem:[%s18034_s6 + $0x13b] sm:$0xff]  ;;  %v3583_v62 = vpack.c.bf16 %v3573_v60, %v3572_v43 }
 0x2e2   : > { %14827 = vmatprep.subr.bf16.mxu0 %v17949_v2  ;;  %v5343_v15 = vpack.c.bf16 %v5333_v13, %v5332_v61 }
 0x2e3   : > { %14432 = vmatpush3.bf16.msra.mxu1 %v17656_v3  ;;  %v3575_v3 = vld [vmem:[%s18034_s6 + $0xe3] sm:$0xff] }
 0x2e4   : > { %14433 = vmatprep.subr.bf16.mxu1 %v17949_v2 }
 0x2e5   : > { %14828 = vmatpush3.bf16.msra.mxu0 %v17657_v5  ;;  %v5334_v5 = vld [vmem:[%s18034_s6 + $0x14b] sm:$0xff] }
 0x2e6   : > { %14406 = vmatmul.mubr.bf16.gmra.mrb[36].mxu1 %v3394_v6  ;;  %14829 = vmatprep.subr.bf16.mxu0 %v17949_v2  ;;  %v5335_v6 = vld [vmem:[%s18034_s6 + $0x153] sm:$0xff] }
 0x2e7   : > { %14409 = vmatprep.mubr.msk.bf16.mxu1 %vm17950_vm0, %v17949_v2  ;;  %14434 = vmatpush3.bf16.msra.mxu1 %v17658_v8  ;;  %v5344_v8 = vpack.c.bf16 %v5335_v6, %v5334_v5 }
 0x2e8   : > { %14802 = vmatmul.mubr.bf16.gmra.mrb[36].mxu0 %v5154_v7  ;;  %14435 = vmatprep.subr.bf16.mxu1 %v17949_v2  ;;  %v3584_v7 = vpack.c.bf16 %v3575_v3, %v3574_v27 }
 0x2e9   : > { %14805 = vmatprep.mubr.msk.bf16.mxu0 %vm17950_vm0, %v17949_v2  ;;  %14830 = vmatpush3.bf16.msra.mxu0 %v17659_v9  ;;  %v3576_v9 = vld [vmem:[%s18034_s6 + $0xeb] sm:$0xff] }
 0x2ea   : > { %14831 = vmatprep.subr.bf16.mxu0 %v17949_v2  ;;  %v3585_v12 = vpack.c.bf16 %v3577_v10, %v3576_v9  ;;  %v3772_v9 = vld [vmem:[%s22145_s4 + $0x90] sm:$0xff] }
 0x2eb   : > { %14436 = vmatpush3.bf16.msra.mxu1 %v17660_v16  ;;  %v5345_v16 = vpack.c.bf16 %v5337_v52, %v5336_v11  ;;  %v5532_v11 = vld [vmem:[%s22145_s4 + $0x100] sm:$0xff] }
 0x2ec   : > { %14437 = vmatprep.subr.bf16.mxu1 %v17949_v2 }
 0x2ed   : > { %14832 = vmatpush3.bf16.msra.mxu0 %v17661_v17  ;;  %v3578_v17 = vld [vmem:[%s18034_s6 + $0xfb] sm:$0xff] }
 0x2ee   : > { %14410 = vmatmul.mubr.bf16.gmra.mrb[40].mxu1 %v3395_v14  ;;  %14833 = vmatprep.subr.bf16.mxu0 %v17949_v2  ;;  %v3579_v14 = vld [vmem:[%s18034_s6 + $0x103] sm:$0xff] }
 0x2ef   : > { %14413 = vmatprep.mubr.msk.bf16.mxu1 %vm17950_vm0, %v17949_v2  ;;  %14438 = vmatpush3.bf16.msra.mxu1 %v17662_v18  ;;  %v5339_v18 = vld [vmem:[%s18034_s6 + $0x173] sm:$0xff] }
 0x2f0   : > { %14806 = vmatmul.mubr.bf16.gmra.mrb[40].mxu0 %v5155_v54  ;;  %14439 = vmatprep.subr.bf16.mxu1 %v17949_v2  ;;  %v5338_v54 = vld [vmem:[%s18034_s6 + $0x16b] sm:$0xff] }
 0x2f1   : > { %14809 = vmatprep.mubr.msk.bf16.mxu0 %vm17950_vm0, %v17949_v2  ;;  %14834 = vmatpush3.bf16.msra.mxu0 %v17663_v50  ;;  %v3586_v50 = vpack.c.bf16 %v3579_v14, %v3578_v17  ;;  %v5346_v19 = vpack.c.bf16 %v5339_v18, %v5338_v54  ;;  %v5533_v18 = vld [vmem:[%s22145_s4 + $0x108] sm:$0xff] }
 0x2f2   : > { %14835 = vmatprep.subr.bf16.mxu0 %v17949_v2 }
 0x2f3   : > { %14440 = vmatpush3.bf16.msra.mxu1 %v17664_v28 }
 0x2f5   : > { %14836 = vmatpush3.bf16.msra.mxu0 %v17665_v22 }
 0x2f6   : > { %14414 = vmatmul.mubr.bf16.gmra.mrb[44].mxu1 %v3396_v23 }
 0x2f7   : > { %14417 = vmatprep.mubr.msk.bf16.mxu1 %vm17950_vm0, %v17949_v2 }
 0x2f8   : > { %14810 = vmatmul.mubr.bf16.gmra.mrb[44].mxu0 %v5156_v25  ;;  %v5529_v25 = vld [vmem:[%s22145_s4 + $0xe8] sm:$0xff] }
 0x2f9   : > { %14813 = vmatprep.mubr.msk.bf16.mxu0 %vm17950_vm0, %v17949_v2 }
 0x2fe   : > { %14418 = vmatmul.mubr.bf16.gmra.mrb[48].mxu1 %v3397_v24 }
 0x2ff   : > { %14421 = vmatprep.mubr.msk.bf16.mxu1 %vm17950_vm0, %v17949_v2 }
 0x300   : > { %14814 = vmatmul.mubr.bf16.gmra.mrb[48].mxu0 %v5157_v34 }
 0x301   : > { %14817 = vmatprep.mubr.msk.bf16.mxu0 %vm17950_vm0, %v17949_v2 }
 0x306   : > { %14422 = vmatmul.mubr.bf16.gmra.mrb[52].mxu1 %v3398_v36 }
 0x307   : > { %14441 = vmatprep.mubr.msk.bf16.mxu1 %vm17950_vm0, %v17949_v2 }
 0x308   : > { %14818 = vmatmul.mubr.bf16.gmra.mrb[52].mxu0 %v5158_v37 }
 0x309   : > { %14837 = vmatprep.mubr.msk.bf16.mxu0 %vm17950_vm0, %v17949_v2 }
 0x30e   : > { %14442 = vmatmul.mubr.bf16.vlgmr.msra.gmra.mrb[28].mxu1 %v3580_v45  ;;  %v5530_v45 = vld [vmem:[%s22145_s4 + $0xf0] sm:$0xff] }
 0x30f   : > { %14445 = vmatprep.mubr.msk.bf16.mxu1 %vm17950_vm0, %v17949_v2 }
 0x310   : > { %14838 = vmatmul.mubr.bf16.vlgmr.msra.gmra.mrb[28].mxu0 %v5340_v46 }
 0x311   : > { %14841 = vmatprep.mubr.msk.bf16.mxu0 %vm17950_vm0, %v17949_v2 }
 0x316   : > { %14446 = vmatmul.mubr.bf16.gmra.mrb[32].mxu1 %v3581_v49 }
 0x317   : > { %14449 = vmatprep.mubr.msk.bf16.mxu1 %vm17950_vm0, %v17949_v2 }
 0x318   : > { %14842 = vmatmul.mubr.bf16.gmra.mrb[32].mxu0 %v5341_v51  ;;  %v5531_v51 = vld [vmem:[%s22145_s4 + $0xf8] sm:$0xff] }
 0x319   : > { %14845 = vmatprep.mubr.msk.bf16.mxu0 %vm17950_vm0, %v17949_v2 }
 0x31e   : > { %14450 = vmatmul.mubr.bf16.gmra.mrb[36].mxu1 %v3582_v58 }
 0x31f   : > { %14453 = vmatprep.mubr.msk.bf16.mxu1 %vm17950_vm0, %v17949_v2 }
 0x320   : > { %14846 = vmatmul.mubr.bf16.gmra.mrb[36].mxu0 %v5342_v59 }
 0x321   : > { %14849 = vmatprep.mubr.msk.bf16.mxu0 %vm17950_vm0, %v17949_v2 }
 0x326   : > { %14454 = vmatmul.mubr.bf16.gmra.mrb[40].mxu1 %v3583_v62 }
 0x327   : > { %14457 = vmatprep.mubr.msk.bf16.mxu1 %vm17950_vm0, %v17949_v2 }
 0x328   : > { %14850 = vmatmul.mubr.bf16.gmra.mrb[40].mxu0 %v5343_v15 }
 0x329   : > { %14853 = vmatprep.mubr.msk.bf16.mxu0 %vm17950_vm0, %v17949_v2 }
 0x32e   : > { %14458 = vmatmul.mubr.bf16.gmra.mrb[44].mxu1 %v3584_v7 }
 0x32f   : > { %14461 = vmatprep.mubr.msk.bf16.mxu1 %vm17950_vm0, %v17949_v2 }
 0x330   : > { %14854 = vmatmul.mubr.bf16.gmra.mrb[44].mxu0 %v5344_v8 }
 0x331   : > { %14857 = vmatprep.mubr.msk.bf16.mxu0 %vm17950_vm0, %v17949_v2 }
 0x336   : > { %14462 = vmatmul.mubr.bf16.gmra.mrb[48].mxu1 %v3585_v12 }
 0x337   : > { %14465 = vmatprep.mubr.msk.bf16.mxu1 %vm17950_vm0, %v17949_v2 }
 0x338   : > { %14858 = vmatmul.mubr.bf16.gmra.mrb[48].mxu0 %v5345_v16  ;;  %v3773_v16 = vld [vmem:[%s22145_s4 + $0x98] sm:$0xff] }
 0x339   : > { %14861 = vmatprep.mubr.msk.bf16.mxu0 %vm17950_vm0, %v17949_v2  ;;  %v3769_v2 = vld [vmem:[%s22145_s4 + $0x78] sm:$0xff] }
 0x33e   : > { %14466 = vmatmul.mubr.bf16.gmra.mrb[52].mxu1 %v3586_v50 }
 0x340   : > { %14862 = vmatmul.mubr.bf16.gmra.mrb[52].mxu0 %v5346_v19 }
 0x3e1   : > { %v3685_v53 = vpop.f32.mrb[28].mxu1 }
 0x3e2   : > { %3754 = vst [vmem:[%s19127_s15 + $0x70] sm:$0xff] %v3685_v53  ;;  %v3782_v28 = vmul.f32 %v3768_v20, %v3685_v53  ;;  %v14443_v22 = vpop.f32.mrb[29].mxu1 }
 0x3e3   : > { %v5445_v23 = vpop.f32.mrb[28].mxu0  ;;  %v3688_v31 = vpop.f32.mrb[30].mxu1 }
 0x3e4   : > { %5514 = vst [vmem:[%s19127_s15 + $0xe0] sm:$0xff] %v5445_v23  ;;  %v5542_v30 = vmul.f32 %v5528_v21, %v5445_v23  ;;  %v14839_v4 = vpop.f32.mrb[29].mxu0  ;;  %3755 = vst [vmem:[%s19127_s15 + $0x78] sm:$0xff] %v3688_v31  ;;  %v3783_v32 = vmul.f32 %v3769_v2, %v3688_v31  ;;  %v14444_v24 = vpop.f32.mrb[31].mxu1  ;;  %v3816_v29 = vmul.f32 %v3782_v28, %v3685_v53 }
 0x3e5   : > { %v5448_v34 = vpop.f32.mrb[30].mxu0 }
 0x3e6   : > { %5515 = vst [vmem:[%s19127_s15 + $0xe8] sm:$0xff] %v5448_v34  ;;  %v5543_v35 = vmul.f32 %v5529_v25, %v5448_v34  ;;  %v14840_v57 = vpop.f32.mrb[31].mxu0  ;;  %v3796_v0 = vadd.f32 %v3783_v32, %v3782_v28  ;;  %v3817_v36 = vmul.f32 %v3783_v32, %v3688_v31  ;;  %v5576_v37 = vmul.f32 %v5542_v30, %v5445_v23 }
 0x3e8   : > { %v5556_v1 = vadd.f32 %v5543_v35, %v5542_v30  ;;  %v5577_v38 = vmul.f32 %v5543_v35, %v5448_v34  ;;  %v3830_v41 = vadd.f32 %v3817_v36, %v3816_v29  ;;  %v3774_v29 = vld [vmem:[%s22145_s4 + $0xa0] sm:$0xff]  ;;  %v5534_v36 = vld [vmem:[%s22145_s4 + $0x110] sm:$0xff] }
 0x3e9   : > { %v3693_v47 = vpop.f32.mrb[32].mxu1 }
 0x3ea   : > { %v5590_v46 = vadd.f32 %v5577_v38, %v5576_v37  ;;  %3756 = vst [vmem:[%s19127_s15 + $0x80] sm:$0xff] %v3693_v47  ;;  %v3784_v42 = vmul.f32 %v3770_v40, %v3693_v47  ;;  %v14447_v33 = vpop.f32.mrb[33].mxu1  ;;  %v3775_v38 = vld [vmem:[%s22145_s4 + $0xa8] sm:$0xff] }
 0x3eb   : > { %v5453_v49 = vpop.f32.mrb[32].mxu0  ;;  %v3696_v44 = vpop.f32.mrb[34].mxu1 }
 0x3ec   : > { %5516 = vst [vmem:[%s19127_s15 + $0xf0] sm:$0xff] %v5453_v49  ;;  %v5544_v39 = vmul.f32 %v5530_v45, %v5453_v49  ;;  %v14843_v55 = vpop.f32.mrb[33].mxu0  ;;  %v3797_v56 = vadd.f32 %v3796_v0, %v3784_v42  ;;  %v3818_v58 = vmul.f32 %v3784_v42, %v3693_v47  ;;  %3757 = vst [vmem:[%s19127_s15 + $0x88] sm:$0xff] %v3696_v44  ;;  %v14448_v43 = vpop.f32.mrb[35].mxu1 }
 0x3ed   : > { %v3785_v59 = vmul.f32 %v3771_v48, %v3696_v44  ;;  %v5456_v60 = vpop.f32.mrb[34].mxu0 }
 0x3ee   : > { %v5557_v61 = vadd.f32 %v5556_v1, %v5544_v39  ;;  %v5578_v13 = vmul.f32 %v5544_v39, %v5453_v49  ;;  %5517 = vst [vmem:[%s19127_s15 + $0xf8] sm:$0xff] %v5456_v60  ;;  %v5545_v62 = vmul.f32 %v5531_v51, %v5456_v60  ;;  %v14844_v15 = vpop.f32.mrb[35].mxu0  ;;  %v3831_v27 = vadd.f32 %v3830_v41, %v3818_v58 }
 0x3ef   : > { %v3798_v3 = vadd.f32 %v3797_v56, %v3785_v59  ;;  %v3819_v5 = vmul.f32 %v3785_v59, %v3696_v44 }
 0x3f0   : > { %v5591_v6 = vadd.f32 %v5590_v46, %v5578_v13  ;;  %v5558_v7 = vadd.f32 %v5557_v61, %v5545_v62  ;;  %v5579_v8 = vmul.f32 %v5545_v62, %v5456_v60  ;;  %v5535_v46 = vld [vmem:[%s22145_s4 + $0x118] sm:$0xff] }
 0x3f1   : > { %v3832_v10 = vadd.f32 %v3831_v27, %v3819_v5  ;;  %v3701_v12 = vpop.f32.mrb[36].mxu1  ;;  %v3776_v27 = vld [vmem:[%s22145_s4 + $0xb0] sm:$0xff]  ;;  %v5536_v5 = vld [vmem:[%s22145_s4 + $0x120] sm:$0xff] }
 0x3f2   : > { %v5592_v52 = vadd.f32 %v5591_v6, %v5579_v8  ;;  %3758 = vst [vmem:[%s19127_s15 + $0x90] sm:$0xff] %v3701_v12  ;;  %v3786_v17 = vmul.f32 %v3772_v9, %v3701_v12  ;;  %v14451_v14 = vpop.f32.mrb[37].mxu1  ;;  %v3777_v8 = vld [vmem:[%s22145_s4 + $0xb8] sm:$0xff] }
 0x3f3   : > { %v5461_v54 = vpop.f32.mrb[36].mxu0  ;;  %v3704_v19 = vpop.f32.mrb[38].mxu1 }
 0x3f4   : > { %5518 = vst [vmem:[%s19127_s15 + $0x100] sm:$0xff] %v5461_v54  ;;  %v5546_v50 = vmul.f32 %v5532_v11, %v5461_v54  ;;  %v14847_v20 = vpop.f32.mrb[37].mxu0  ;;  %v3799_v21 = vadd.f32 %v3798_v3, %v3786_v17  ;;  %v3820_v53 = vmul.f32 %v3786_v17, %v3701_v12  ;;  %3759 = vst [vmem:[%s19127_s15 + $0x98] sm:$0xff] %v3704_v19  ;;  %v14452_v28 = vpop.f32.mrb[39].mxu1 }
 0x3f5   : > { %v3787_v2 = vmul.f32 %v3773_v16, %v3704_v19  ;;  %v5464_v22 = vpop.f32.mrb[38].mxu0 }
 0x3f6   : > { %v5559_v23 = vadd.f32 %v5558_v7, %v5546_v50  ;;  %v5580_v25 = vmul.f32 %v5546_v50, %v5461_v54  ;;  %5519 = vst [vmem:[%s19127_s15 + $0x108] sm:$0xff] %v5464_v22  ;;  %v5547_v30 = vmul.f32 %v5533_v18, %v5464_v22  ;;  %v14848_v31 = vpop.f32.mrb[39].mxu0  ;;  %v3833_v4 = vadd.f32 %v3832_v10, %v3820_v53 }
 0x3f7   : > { %v3800_v32 = vadd.f32 %v3799_v21, %v3787_v2  ;;  %v3821_v24 = vmul.f32 %v3787_v2, %v3704_v19 }
 0x3f8   : > { %v5593_v34 = vadd.f32 %v5592_v52, %v5580_v25  ;;  %v5560_v35 = vadd.f32 %v5559_v23, %v5547_v30  ;;  %v5581_v57 = vmul.f32 %v5547_v30, %v5464_v22  ;;  %v5537_v52 = vld [vmem:[%s22145_s4 + $0x128] sm:$0xff] }
 0x3f9   : > { %v3834_v0 = vadd.f32 %v3833_v4, %v3821_v24  ;;  %v3709_v1 = vpop.f32.mrb[40].mxu1  ;;  %v3778_v4 = vld [vmem:[%s22145_s4 + $0xc0] sm:$0xff]  ;;  %v5538_v24 = vld [vmem:[%s22145_s4 + $0x130] sm:$0xff] }
 0x3fa   : > { %v5594_v37 = vadd.f32 %v5593_v34, %v5581_v57  ;;  %3760 = vst [vmem:[%s19127_s15 + $0xa0] sm:$0xff] %v3709_v1  ;;  %v3788_v40 = vmul.f32 %v3774_v29, %v3709_v1  ;;  %v14455_v41 = vpop.f32.mrb[41].mxu1  ;;  %v3779_v57 = vld [vmem:[%s22145_s4 + $0xc8] sm:$0xff] }
 0x3fb   : > { %v5469_v45 = vpop.f32.mrb[40].mxu0  ;;  %v3712_v48 = vpop.f32.mrb[42].mxu1 }
 0x3fc   : > { %5520 = vst [vmem:[%s19127_s15 + $0x110] sm:$0xff] %v5469_v45  ;;  %v5548_v47 = vmul.f32 %v5534_v36, %v5469_v45  ;;  %v14851_v42 = vpop.f32.mrb[41].mxu0  ;;  %v3801_v33 = vadd.f32 %v3800_v32, %v3788_v40  ;;  %v3822_v49 = vmul.f32 %v3788_v40, %v3709_v1  ;;  %3761 = vst [vmem:[%s19127_s15 + $0xa8] sm:$0xff] %v3712_v48  ;;  %v14456_v39 = vpop.f32.mrb[43].mxu1 }
 0x3fd   : > { %v3789_v51 = vmul.f32 %v3775_v38, %v3712_v48  ;;  %v5472_v44 = vpop.f32.mrb[42].mxu0  ;;  %v2049_v39 = vrot.slane %v19294_v63, 4 }
 0x3fe   : > { %v5561_v55 = vadd.f32 %v5560_v35, %v5548_v47  ;;  %v5582_v56 = vmul.f32 %v5548_v47, %v5469_v45  ;;  %5521 = vst [vmem:[%s19127_s15 + $0x118] sm:$0xff] %v5472_v44  ;;  %v5549_v58 = vmul.f32 %v5535_v46, %v5472_v44  ;;  %v14852_v59 = vpop.f32.mrb[43].mxu0  ;;  %v3835_v43 = vadd.f32 %v3834_v0, %v3822_v49 }
 0x3ff   : > { %v3802_v60 = vadd.f32 %v3801_v33, %v3789_v51  ;;  %v3823_v61 = vmul.f32 %v3789_v51, %v3712_v48 }
 0x400   : > { %v5595_v13 = vadd.f32 %v5594_v37, %v5582_v56  ;;  %v5562_v62 = vadd.f32 %v5561_v55, %v5549_v58  ;;  %v5583_v15 = vmul.f32 %v5549_v58, %v5472_v44  ;;  %v5539_v37 = vld [vmem:[%s22145_s4 + $0x138] sm:$0xff] }
 0x401   : > { %v3836_v3 = vadd.f32 %v3835_v43, %v3823_v61  ;;  %v3717_v7 = vpop.f32.mrb[44].mxu1  ;;  %v2083_v61 = vrot.slane %v19296_v26, 4 }
 0x402   : > { %v5596_v6 = vadd.f32 %v5595_v13, %v5583_v15  ;;  %3762 = vst [vmem:[%s19127_s15 + $0xb0] sm:$0xff] %v3717_v7  ;;  %v3790_v9 = vmul.f32 %v3776_v27, %v3717_v7  ;;  %v14459_v10 = vpop.f32.mrb[45].mxu1 }
 0x403   : > { %v5477_v11 = vpop.f32.mrb[44].mxu0  ;;  %v3720_v16 = vpop.f32.mrb[46].mxu1 }
 0x404   : > { %5522 = vst [vmem:[%s19127_s15 + $0x120] sm:$0xff] %v5477_v11  ;;  %v5550_v12 = vmul.f32 %v5536_v5, %v5477_v11  ;;  %v14855_v17 = vpop.f32.mrb[45].mxu0  ;;  %v3803_v14 = vadd.f32 %v3802_v60, %v3790_v9  ;;  %v3824_v54 = vmul.f32 %v3790_v9, %v3717_v7  ;;  %3763 = vst [vmem:[%s19127_s15 + $0xb8] sm:$0xff] %v3720_v16  ;;  %v14460_v50 = vpop.f32.mrb[47].mxu1  ;;  %v3780_v60 = vld [vmem:[%s22145_s4 + $0xd0] sm:$0xff]  ;;  %v5541_v9 = vld [vmem:[%s22145_s4 + $0x148] sm:$0xff] }
 0x405   : > { %v3791_v18 = vmul.f32 %v3777_v8, %v3720_v16  ;;  %v5480_v19 = vpop.f32.mrb[46].mxu0  ;;  %v2050_v5 = vadd.f32 %v2049_v39, %v19294_v63 }
 0x406   : > { %v5563_v20 = vadd.f32 %v5562_v62, %v5550_v12  ;;  %v5584_v21 = vmul.f32 %v5550_v12, %v5477_v11  ;;  %5523 = vst [vmem:[%s19127_s15 + $0x128] sm:$0xff] %v5480_v19  ;;  %v5551_v53 = vmul.f32 %v5537_v52, %v5480_v19  ;;  %v14856_v2 = vpop.f32.mrb[47].mxu0  ;;  %v3837_v28 = vadd.f32 %v3836_v3, %v3824_v54  ;;  %v5540_v62 = vld [vmem:[%s22145_s4 + $0x140] sm:$0xff]  ;;  %v3781_v3 = vld [vmem:[%s22145_s4 + $0xd8] sm:$0xff] }
 0x407   : > { %v3804_v22 = vadd.f32 %v3803_v14, %v3791_v18  ;;  %v3825_v23 = vmul.f32 %v3791_v18, %v3720_v16  ;;  %v2084_v12 = vadd.f32 %v2083_v61, %v19296_v26 }
 0x408   : > { %v5597_v25 = vadd.f32 %v5596_v6, %v5584_v21  ;;  %v5564_v30 = vadd.f32 %v5563_v20, %v5551_v53  ;;  %v5585_v31 = vmul.f32 %v5551_v53, %v5480_v19  ;;  %v2051_v21 = vrot.slane %v2050_v5, 2 }
 0x409   : > { %v3838_v32 = vadd.f32 %v3837_v28, %v3825_v23  ;;  %v3725_v35 = vpop.f32.mrb[48].mxu1 }
 0x40a   : > { %v5598_v34 = vadd.f32 %v5597_v25, %v5585_v31  ;;  %3764 = vst [vmem:[%s19127_s15 + $0xc0] sm:$0xff] %v3725_v35  ;;  %v3792_v29 = vmul.f32 %v3778_v4, %v3725_v35  ;;  %v14463_v0 = vpop.f32.mrb[49].mxu1 }
 0x40b   : > { %v5485_v36 = vpop.f32.mrb[48].mxu0  ;;  %v3728_v38 = vpop.f32.mrb[50].mxu1 }
 0x40c   : > { %5524 = vst [vmem:[%s19127_s15 + $0x130] sm:$0xff] %v5485_v36  ;;  %v5552_v1 = vmul.f32 %v5538_v24, %v5485_v36  ;;  %v14859_v40 = vpop.f32.mrb[49].mxu0  ;;  %v3805_v41 = vadd.f32 %v3804_v22, %v3792_v29  ;;  %v3826_v45 = vmul.f32 %v3792_v29, %v3725_v35  ;;  %3765 = vst [vmem:[%s19127_s15 + $0xc8] sm:$0xff] %v3728_v38  ;;  %v14464_v47 = vpop.f32.mrb[51].mxu1 }
 0x40d   : > { %v3793_v46 = vmul.f32 %v3779_v57, %v3728_v38  ;;  %v5488_v48 = vpop.f32.mrb[50].mxu0  ;;  %v2052_v24 = vadd.f32 %v2051_v21, %v2050_v5 }
 0x40e   : > { %v5565_v42 = vadd.f32 %v5564_v30, %v5552_v1  ;;  %v5586_v33 = vmul.f32 %v5552_v1, %v5485_v36  ;;  %5525 = vst [vmem:[%s19127_s15 + $0x138] sm:$0xff] %v5488_v48  ;;  %v5553_v49 = vmul.f32 %v5539_v37, %v5488_v48  ;;  %v14860_v51 = vpop.f32.mrb[51].mxu0  ;;  %v3839_v44 = vadd.f32 %v3838_v32, %v3826_v45 }
 0x40f   : > { %v3806_v55 = vadd.f32 %v3805_v41, %v3793_v46  ;;  %v3827_v56 = vmul.f32 %v3793_v46, %v3728_v38  ;;  %v2085_v30 = vrot.slane %v2084_v12, 2  ;;  %v2053_v40 = vrot.slane %v2052_v24, 1 }
 0x410   : > { %v5599_v58 = vadd.f32 %v5598_v34, %v5586_v33  ;;  %v5566_v59 = vadd.f32 %v5565_v42, %v5553_v49  ;;  %v5587_v43 = vmul.f32 %v5553_v49, %v5488_v48 }
 0x411   : > { %v3840_v13 = vadd.f32 %v3839_v44, %v3827_v56  ;;  %v3733_v27 = vpop.f32.mrb[52].mxu1  ;;  %v2086_v0 = vadd.f32 %v2085_v30, %v2084_v12  ;;  %v2054_v39 = vadd.f32 %v2053_v40, %v2052_v24 }
 0x412   : > { %v5600_v15 = vadd.f32 %v5599_v58, %v5587_v43  ;;  %3766 = vst [vmem:[%s19127_s15 + $0xd0] sm:$0xff] %v3733_v27  ;;  %v3794_v6 = vmul.f32 %v3780_v60, %v3733_v27  ;;  %v14467_v7 = vpop.f32.mrb[53].mxu1 }
 0x413   : > { %v5493_v8 = vpop.f32.mrb[52].mxu0  ;;  %v3736_v11 = vpop.f32.mrb[54].mxu1  ;;  %v2087_v48 = vrot.slane %v2086_v0, 1 }
 0x414   : > { %5526 = vst [vmem:[%s19127_s15 + $0x140] sm:$0xff] %v5493_v8  ;;  %v5554_v10 = vmul.f32 %v5540_v62, %v5493_v8  ;;  %v14863_v52 = vpop.f32.mrb[53].mxu0  ;;  %v3807_v16 = vadd.f32 %v3806_v55, %v3794_v6  ;;  %v3828_v17 = vmul.f32 %v3794_v6, %v3733_v27  ;;  %3767 = vst [vmem:[%s19127_s15 + $0xd8] sm:$0xff] %v3736_v11  ;;  %v14468_v63 = vpop.f32.mrb[55].mxu1  ;;  %v5613_v27 = vld [vmem:[#allocation4 + $0x1] sm:$0x1] }
 0x415   : > { %v3795_v14 = vmul.f32 %v3781_v3, %v3736_v11  ;;  %v5496_v54 = vpop.f32.mrb[54].mxu0 }
 0x416   : > { %v5567_v18 = vadd.f32 %v5566_v59, %v5554_v10  ;;  %v5588_v50 = vmul.f32 %v5554_v10, %v5493_v8  ;;  %5527 = vst [vmem:[%s19127_s15 + $0x148] sm:$0xff] %v5496_v54  ;;  %v5555_v19 = vmul.f32 %v5541_v9, %v5496_v54  ;;  %v14864_v20 = vpop.f32.mrb[55].mxu0  ;;  %v3841_v53 = vadd.f32 %v3840_v13, %v3828_v17  ;;  %v5610_v13 = vld [vmem:[#allocation4] sm:$0x1] }
 0x417   : > { %v3808_v2 = vadd.f32 %v3807_v16, %v3795_v14  ;;  %v3829_v28 = vmul.f32 %v3795_v14, %v3736_v11  ;;  %v2088_v59 = vadd.f32 %v2087_v48, %v2086_v0 }
 0x418   : > { %v5601_v22 = vadd.f32 %v5600_v15, %v5588_v50  ;;  %v5568_v23 = vadd.f32 %v5567_v18, %v5555_v19  ;;  %v5589_v25 = vmul.f32 %v5555_v19, %v5496_v54 }
 0x419   : > { %v3809_v26 = vrot.slane %v3808_v2, 4  ;;  %v3842_v31 = vadd.f32 %v3841_v53, %v3829_v28 }
 0x41a   : > { %v5569_v4 = vrot.slane %v5568_v23, 4  ;;  %v5602_v32 = vadd.f32 %v5601_v22, %v5589_v25 }
 0x41b   : > { %v3810_v34 = vadd.f32 %v3809_v26, %v3808_v2  ;;  %v3843_v35 = vrot.slane %v3842_v31, 4 }
 0x41c   : > { %v5570_v57 = vadd.f32 %v5569_v4, %v5568_v23  ;;  %v5603_v29 = vrot.slane %v5602_v32, 4 }
 0x41d   : > { %v3811_v36 = vrot.slane %v3810_v34, 2  ;;  %v3844_v37 = vadd.f32 %v3843_v35, %v3842_v31 }
 0x41e   : > { %v5571_v1 = vrot.slane %v5570_v57, 2  ;;  %v5604_v38 = vadd.f32 %v5603_v29, %v5602_v32 }
 0x41f   : > { %v3812_v41 = vadd.f32 %v3811_v36, %v3810_v34  ;;  %v3845_v45 = vrot.slane %v3844_v37, 2 }
 0x420   : > { %v5572_v46 = vadd.f32 %v5571_v1, %v5570_v57  ;;  %v5605_v47 = vrot.slane %v5604_v38, 2 }
 0x421   : > { %v3813_v42 = vrot.slane %v3812_v41, 1  ;;  %v3846_v33 = vadd.f32 %v3845_v45, %v3844_v37 }
 0x422   : > { %v5573_v49 = vrot.slane %v5572_v46, 1  ;;  %v5606_v51 = vadd.f32 %v5605_v47, %v5604_v38 }
 0x423   : > { %v3814_v44 = vadd.f32 %v3813_v42, %v3812_v41  ;;  %v3847_v55 = vrot.slane %v3846_v33, 1 }
 0x424   : > { %v5574_v56 = vadd.f32 %v5573_v49, %v5572_v46  ;;  %v5607_v58 = vrot.slane %v5606_v51, 1 }
 0x425   : > { %v3815_v43 = vadd.f32 %v3814_v44, %v2054_v39  ;;  %v3848_v60 = vadd.f32 %v3847_v55, %v3846_v33 }
 0x426   : > { %v5608_v61 = vadd.f32 %v5607_v58, %v5606_v51 }
 0x427   : > { %v3849_v62 = vadd.f32 %v3848_v60, %v2088_v59  ;;  %v5575_v15 = vadd.f32 %v5574_v56, %v3815_v43 }
 0x429   : > { %v5609_v3 = vadd.f32 %v5608_v61, %v3849_v62  ;;  %v5611_v5 = vadd.f32 %v5610_v13, %v5575_v15 }
 0x42b   : > { %5612 = vst [vmem:[#allocation4] sm:$0x1] %v5611_v5  ;;  %v5614_v6 = vadd.f32 %v5613_v27, %v5609_v3 }
 0x42d   : > { %5615 = vst [vmem:[#allocation4 + $0x1] sm:$0x1] %v5614_v6 }
 0x42e PF: > { %p5617_p13 = pnand %p263_p8, %p243_p5 }
 0x42f   : > { %v17951_v11 = vmov (!%p5617_p13), 0.0   ;;  %v5628_v14 = vld [vmem:[%s22144_s3] sm:$0x1] (!%p5617_p13)  ;;  %v5633_v18 = vld [vmem:[%s22144_s3 + $0x1] sm:$0x1] (!%p5617_p13) }
 0x430   : > { %5620 = sbr.rel (%p5617_p13) target bundleno = 1103 (0x44f), region = 52 }
 0x432   : > { %v5621_v7 = vld [vmem:[#allocation4] sm:$0x1] (!%p5617_p13) }
 0x433   : > { %v5622_v9 = vmul.f32 (!%p5617_p13), 0.001953125, %v5621_v7 }
 0x434   : > { %v5623_v8 = vld [vmem:[#allocation4 + $0x1] sm:$0x1] (!%p5617_p13) }
 0x435   : > { %v5624_v10 = vmul.f32 (!%p5617_p13), 0.001953125, %v5623_v8  ;;  %5637 = vst [vmem:[#allocation4] sm:$0x3] (!%p5617_p13), %v17951_v11  ;;  %v5625_v52 = vmul.f32 (!%p5617_p13), %v5622_v9, %v5622_v9 }
 0x437   : > { %v5626_v12 = vsub.f32 %v5624_v10, %v5625_v52 }
 0x439   : > { %v5627_v16 = vmax.f32 %v5626_v12, 0.0 }
 0x43b   : > { %v5629_v17 = vadd.f32 1e-05, %v5627_v16 }
 0x43d   : > { %17674 = vrsqrt.f32 %v5629_v17 }
 0x447   : > { %v17675_v63 = vpop.eup %17674 }
 0x448   : > { %v5631_v54 = vmul.f32 %v17675_v63, %v5628_v14 }
 0x44a   : > { %5632 = vst [vmem:[#allocation5] sm:$0x1] %v5631_v54  ;;  %v5634_v50 = vmul.f32 %v5631_v54, %v5622_v9 }
 0x44c   : > { %v5635_v19 = vsub.f32 %v5633_v18, %v5634_v50 }
 0x44e   : > { %5636 = vst [vmem:[#allocation5 + $0x1] sm:$0x1] %v5635_v19 }
 0x44f PF: > { %p12259_p0 = scmp.ne.s32.totalorder %s17934_s19, 1 }
 0x450   : > { %v17676_v20 = vld [vmem:[%s22143_s2 + $0x40] sm:$0xff] (!%p12259_p0)   ;;  %v17952_v21 = vmov (!%p12259_p0), 0.0   ;;  %v17678_v2 = vld [vmem:[%s22143_s2 + $0x48] sm:$0xff] (!%p12259_p0)   ;;  %vm17953_vm1 = vmmov (!%p12259_p0), 0   ;;  %v17680_v22 = vld [vmem:[%s22143_s2 + $0x50] sm:$0xff] (!%p12259_p0)   ;;  %s5643_s17 = smul.u32 (!%p12259_p0), 336, %s17930_s18 }
 0x451   : > { %5640 = sbr.rel (%p12259_p0) target bundleno = 2129 (0x851), region = 56  ;;  %14865 = vmatprep.subr.bf16.mxu1 (!%p12259_p0), %v17952_v21  ;;  %15041 = vmatprep.subr.bf16.mxu0 (!%p12259_p0), %v17952_v21  ;;  %v17677_v53 = vld [vmem:[%s22143_s2 + $0x100] sm:$0xff] (!%p12259_p0)   ;;  %v17679_v28 = vld [vmem:[%s22143_s2 + $0x108] sm:$0xff] (!%p12259_p0)   ;;  %v17681_v23 = vld [vmem:[%s22143_s2 + $0x110] sm:$0xff] (!%p12259_p0)  }
 0x452   : > { %14866 = vmatpush3.bf16.msra.mxu1 (!%p12259_p0), %v17676_v20  ;;  %14881 = vmatprep.mubr.msk.bf16.mxu1 (!%p12259_p0), %vm17953_vm1, %v17952_v21  ;;  %v17682_v25 = vld [vmem:[%s22143_s2 + $0x58] sm:$0xff] (!%p12259_p0)   ;;  %v17684_v26 = vld [vmem:[%s22143_s2 + $0x60] sm:$0xff] (!%p12259_p0)   ;;  %s20035_s7 = scalar_lea.vmem (!%p12259_p0), [#allocation2], %s5643_s17  ;;  %v17686_v35 = vld [vmem:[%s22143_s2 + $0x68] sm:$0xff] (!%p12259_p0)  }
 0x453   : > { %15042 = vmatpush3.bf16.msra.mxu0 (!%p12259_p0), %v17677_v53  ;;  %14867 = vmatprep.subr.bf16.mxu1 (!%p12259_p0), %v17952_v21  ;;  %v17683_v30 = vld [vmem:[%s22143_s2 + $0x118] sm:$0xff] (!%p12259_p0)   ;;  %v17685_v31 = vld [vmem:[%s22143_s2 + $0x120] sm:$0xff] (!%p12259_p0)   ;;  %v5646_v34 = vld [vmem:[%s20035_s7 + $0x8] sm:$0xff] (!%p12259_p0) }
 0x454   : > { %15043 = vmatprep.subr.bf16.mxu0 (!%p12259_p0), %v17952_v21  ;;  %15057 = vmatprep.mubr.msk.bf16.mxu0 (!%p12259_p0), %vm17953_vm1, %v17952_v21  ;;  %v20031_v4 = vld [vmem:[#allocation5] ss:$0 sm:$0xff] (!%p12259_p0)  ;;  %v17687_v0 = vld [vmem:[%s22143_s2 + $0x128] sm:$0xff] (!%p12259_p0)   ;;  %v17688_v40 = vld [vmem:[%s22143_s2 + $0x70] sm:$0xff] (!%p12259_p0)  }
 0x455   : > { %v20033_v32 = vld [vmem:[#allocation5 + $0x1] ss:$0 sm:$0xff] (!%p12259_p0)  ;;  %v5664_v29 = vmul.f32 (!%p12259_p0), %v20031_v4, %v5646_v34  ;;  %v5710_v38 = vld [vmem:[%s22145_s4 + $0x8] sm:$0xff] (!%p12259_p0)  ;;  %v5647_v46 = vld [vmem:[%s20035_s7 + $0x10] sm:$0xff] (!%p12259_p0) }
 0x456   : > { %14868 = vmatpush3.bf16.msra.mxu1 (!%p12259_p0), %v17678_v2  ;;  %v5645_v24 = vld [vmem:[%s20035_s7] sm:$0xff] (!%p12259_p0)  ;;  %v17689_v47 = vld [vmem:[%s22143_s2 + $0x130] sm:$0xff] (!%p12259_p0)   ;;  %v5648_v48 = vld [vmem:[%s20035_s7 + $0x18] sm:$0xff] (!%p12259_p0)  ;;  %v5665_v42 = vmul.f32 (!%p12259_p0), %v20031_v4, %v5647_v46 }
 0x457   : > { %15044 = vmatpush3.bf16.msra.mxu0 (!%p12259_p0), %v17679_v28  ;;  %14869 = vmatprep.subr.bf16.mxu1 (!%p12259_p0), %v17952_v21  ;;  %v5663_v57 = vmul.f32 (!%p12259_p0), %v20031_v4, %v5645_v24  ;;  %v5682_v37 = vadd.f32 (!%p12259_p0), %v20033_v32, %v5664_v29  ;;  %v5709_v1 = vld [vmem:[%s22145_s4] sm:$0xff] (!%p12259_p0)  ;;  %v17690_v33 = vld [vmem:[%s22143_s2 + $0x78] sm:$0xff] (!%p12259_p0)   ;;  %v5666_v44 = vmul.f32 (!%p12259_p0), %v20031_v4, %v5648_v48  ;;  %v5985_v56 = vld [vmem:[#allocation3 + $0xe] sm:$0xff] (!%p12259_p0) }
 0x458   : > { %15045 = vmatprep.subr.bf16.mxu0 %v17952_v21  ;;  %v5984_v49 = vld [vmem:[#allocation3 + $0x6] sm:$0xff]  ;;  %v17691_v55 = vld [vmem:[%s22143_s2 + $0x138] sm:$0xff]   ;;  %v5683_v58 = vadd.f32 %v20033_v32, %v5665_v42  ;;  %v5711_v43 = vld [vmem:[%s22145_s4 + $0x10] sm:$0xff] }
 0x459   : > { %v5681_v36 = vadd.f32 %v20033_v32, %v5663_v57  ;;  %v5696_v45 = vmax.f32 %v5682_v37, 0.0  ;;  %v5684_v59 = vadd.f32 %v20033_v32, %v5666_v44  ;;  %v5712_v61 = vld [vmem:[%s22145_s4 + $0x18] sm:$0xff]  ;;  %v5649_v13 = vld [vmem:[%s20035_s7 + $0x20] sm:$0xff]  ;;  %v5650_v62 = vld [vmem:[%s20035_s7 + $0x28] sm:$0xff]  ;;  %v5998_v6 = vpack.c.bf16 %v5985_v56, %v5984_v49 }
 0x45a   : > { %14870 = vmatpush3.bf16.msra.mxu1 %v17680_v22  ;;  %v5697_v60 = vmax.f32 %v5683_v58, 0.0  ;;  %v17692_v15 = vld [vmem:[%s22143_s2] sm:$0xff]   ;;  %v5667_v3 = vmul.f32 %v20031_v4, %v5649_v13  ;;  %v5668_v5 = vmul.f32 %v20031_v4, %v5650_v62  ;;  %v5714_v16 = vld [vmem:[%s22145_s4 + $0x28] sm:$0xff]  ;;  %v5651_v17 = vld [vmem:[%s20035_s7 + $0x30] sm:$0xff] }
 0x45b   : > { %15046 = vmatpush3.bf16.msra.mxu0 %v17681_v23  ;;  %14871 = vmatprep.subr.bf16.mxu1 %v17952_v21  ;;  %v5695_v41 = vmax.f32 %v5681_v36, 0.0  ;;  %v5724_v39 = vmul.f32 %v5710_v38, %v5696_v45  ;;  %v5698_v27 = vmax.f32 %v5684_v59, 0.0  ;;  %v17693_v7 = vld [vmem:[%s22143_s2 + $0x140] sm:$0xff]   ;;  %v5652_v14 = vld [vmem:[%s20035_s7 + $0x38] sm:$0xff]  ;;  %v5669_v18 = vmul.f32 %v20031_v4, %v5651_v17  ;;  %v17695_v19 = vld [vmem:[%s22143_s2 + $0x8] sm:$0xff]  }
 0x45c   : > { %15047 = vmatprep.subr.bf16.mxu0 %v17952_v21  ;;  %v5725_v8 = vmul.f32 %v5711_v43, %v5697_v60  ;;  %v5685_v11 = vadd.f32 %v20033_v32, %v5667_v3  ;;  %v5686_v52 = vadd.f32 %v20033_v32, %v5668_v5  ;;  %v5713_v12 = vld [vmem:[%s22145_s4 + $0x20] sm:$0xff]  ;;  %v5670_v20 = vmul.f32 %v20031_v4, %v5652_v14  ;;  %v17694_v22 = vld [vmem:[%s22143_s2 + $0x148] sm:$0xff]   ;;  %v17696_v57 = vld [vmem:[%s22143_s2 + $0x150] sm:$0xff]  }
 0x45d   : > { %v5723_v51 = vmul.f32 %v5709_v1, %v5695_v41  ;;  %5738 = vst [vmem:[#allocation3 + $0x20] sm:$0xff] %v5724_v39  ;;  %v5726_v10 = vmul.f32 %v5712_v61, %v5698_v27  ;;  %v5687_v23 = vadd.f32 %v20033_v32, %v5669_v18  ;;  %v17698_v29 = vld [vmem:[%s22143_s2 + $0x10] sm:$0xff]   ;;  %v5653_v37 = vld [vmem:[%s20035_s7 + $0x40] sm:$0xff]  ;;  %v5654_v1 = vld [vmem:[%s20035_s7 + $0x48] sm:$0xff] }
 0x45e   : > { %14872 = vmatpush3.bf16.msra.mxu1 %v17682_v25  ;;  %5739 = vst [vmem:[#allocation3 + $0x28] sm:$0xff] %v5725_v8  ;;  %v5699_v63 = vmax.f32 %v5685_v11, 0.0  ;;  %v5700_v54 = vmax.f32 %v5686_v52, 0.0  ;;  %v5688_v25 = vadd.f32 %v20033_v32, %v5670_v20  ;;  %v5671_v38 = vmul.f32 %v20031_v4, %v5653_v37  ;;  %v17701_v48 = vld [vmem:[%s22143_s2 + $0x18] sm:$0xff]   ;;  %v17699_v61 = vld [vmem:[%s22143_s2 + $0x160] sm:$0xff]   ;;  %v5719_v3 = vld [vmem:[%s22145_s4 + $0x50] sm:$0xff] }
 0x45f   : > { %15048 = vmatpush3.bf16.msra.mxu0 %v17683_v30  ;;  %14873 = vmatprep.subr.bf16.mxu1 %v17952_v21  ;;  %5737 = vst [vmem:[#allocation3 + $0x18] sm:$0xff] %v5723_v51  ;;  %v6688_v9 = vpack.c.bf16 %v5724_v39, %v5723_v51  ;;  %5740 = vst [vmem:[#allocation3 + $0x30] sm:$0xff] %v5726_v10  ;;  %v5715_v30 = vld [vmem:[%s22145_s4 + $0x30] sm:$0xff]  ;;  %v5701_v24 = vmax.f32 %v5687_v23, 0.0  ;;  %v5672_v41 = vmul.f32 %v20031_v4, %v5654_v1  ;;  %v5718_v51 = vld [vmem:[%s22145_s4 + $0x48] sm:$0xff] }
 0x460   : > { %15049 = vmatprep.subr.bf16.mxu0 %v17952_v21  ;;  %v20112_v2 = vmul.f32 %v5713_v12, %v5699_v63  ;;  %v20114_v28 = vmul.f32 %v5714_v16, %v5700_v54  ;;  %v5702_v34 = vmax.f32 %v5688_v25, 0.0  ;;  %v5689_v46 = vadd.f32 %v20033_v32, %v5671_v38  ;;  %v5655_v39 = vld [vmem:[%s20035_s7 + $0x50] sm:$0xff]  ;;  %v5656_v44 = vld [vmem:[%s20035_s7 + $0x58] sm:$0xff]  ;;  %v17703_v27 = vld [vmem:[%s22143_s2 + $0x20] sm:$0xff]  }
 0x461   : > { %v5690_v42 = vadd.f32 %v20033_v32, %v5672_v41  ;;  %v5673_v58 = vmul.f32 %v20031_v4, %v5655_v39  ;;  %v5674_v59 = vmul.f32 %v20031_v4, %v5656_v44  ;;  %v5720_v5 = vld [vmem:[%s22145_s4 + $0x58] sm:$0xff]  ;;  %v17706_v12 = vld [vmem:[%s22143_s2 + $0x28] sm:$0xff]   ;;  %v17702_v14 = vld [vmem:[%s22143_s2 + $0x170] sm:$0xff]  }
 0x462   : > { %14874 = vmatpush3.bf16.msra.mxu1 %v17684_v26  ;;  %5741 = vst [vmem:[#allocation3 + $0x38] sm:$0xff] %v20112_v2  ;;  %5742 = vst [vmem:[#allocation3 + $0x40] sm:$0xff] %v20114_v28  ;;  %v5716_v26 = vld [vmem:[%s22145_s4 + $0x38] sm:$0xff]  ;;  %v5703_v49 = vmax.f32 %v5689_v46, 0.0  ;;  %v6690_v43 = vpack.c.bf16 %v20114_v28, %v20112_v2  ;;  %v17708_v63 = vld [vmem:[%s22143_s2 + $0x30] sm:$0xff]  }
 0x463   : > { %15050 = vmatpush3.bf16.msra.mxu0 %v17685_v31  ;;  %14875 = vmatprep.subr.bf16.mxu1 %v17952_v21  ;;  %v20144_v36 = vmul.f32 %v5716_v26, %v5702_v34  ;;  %v5704_v56 = vmax.f32 %v5690_v42, 0.0  ;;  %v5691_v62 = vadd.f32 %v20033_v32, %v5673_v58  ;;  %v17704_v54 = vld [vmem:[%s22143_s2 + $0x178] sm:$0xff]   ;;  %v5721_v26 = vld [vmem:[%s22145_s4 + $0x60] sm:$0xff]  ;;  %v5722_v41 = vld [vmem:[%s22145_s4 + $0x68] sm:$0xff] }
 0x464   : > { %15051 = vmatprep.subr.bf16.mxu0 %v17952_v21  ;;  %v17710_v2 = vld [vmem:[%s22143_s2 + $0x38] sm:$0xff]  }
 0x465   : > { %5744 = vst [vmem:[#allocation3 + $0x50] sm:$0xff] %v20144_v36  ;;  %v5732_v13 = vmul.f32 %v5718_v51, %v5704_v56  ;;  %v6864_v20 = vld [vmem:[#allocation3 + $0x21] sm:$0xff]  ;;  %v17709_v51 = vld [vmem:[%s22143_s2 + $0x190] sm:$0xff]  }
 0x466   : > { %14876 = vmatpush3.bf16.msra.mxu1 %v17686_v35  ;;  %v5986_v50 = vld [vmem:[#allocation3 + $0x16] sm:$0xff]  ;;  %v5987_v53 = vld [vmem:[#allocation3 + $0x1e] sm:$0xff]  ;;  %v6689_v35 = vpack.c.bf16 %v5726_v10, %v5725_v8  ;;  %v5989_v45 = vld [vmem:[#allocation3 + $0x2e] sm:$0xff] }
 0x467   : > { %15052 = vmatpush3.bf16.msra.mxu0 %v17687_v0  ;;  %14877 = vmatprep.subr.bf16.mxu1 %v17952_v21  ;;  %v5999_v31 = vpack.c.bf16 %v5987_v53, %v5986_v50  ;;  %v20142_v0 = vmul.f32 %v5715_v30, %v5701_v24  ;;  %5746 = vst [vmem:[#allocation3 + $0x60] sm:$0xff] %v5732_v13  ;;  %v17700_v10 = vld [vmem:[%s22143_s2 + $0x168] sm:$0xff]   ;;  %v5657_v53 = vld [vmem:[%s20035_s7 + $0x60] sm:$0xff] }
 0x468   : > { %15053 = vmatprep.subr.bf16.mxu0 %v17952_v21  ;;  %v5675_v28 = vmul.f32 %v20031_v4, %v5657_v53  ;;  %v17705_v30 = vld [vmem:[%s22143_s2 + $0x180] sm:$0xff]  }
 0x469   : > { %5743 = vst [vmem:[#allocation3 + $0x48] sm:$0xff] %v20142_v0  ;;  %v5990_v8 = vld [vmem:[#allocation3 + $0x36] sm:$0xff]  ;;  %v6691_v17 = vpack.c.bf16 %v20144_v36, %v20142_v0  ;;  %v17707_v0 = vld [vmem:[%s22143_s2 + $0x188] sm:$0xff]  }
 0x46a   : > { %14878 = vmatpush3.bf16.msra.mxu1 %v17688_v40  ;;  %v5988_v40 = vld [vmem:[#allocation3 + $0x26] sm:$0xff]  ;;  %v5693_v25 = vadd.f32 %v20033_v32, %v5675_v28 }
 0x46b   : > { %15054 = vmatpush3.bf16.msra.mxu0 %v17689_v47  ;;  %14879 = vmatprep.subr.bf16.mxu1 %v17952_v21  ;;  %v17697_v47 = vld [vmem:[%s22143_s2 + $0x158] sm:$0xff]   ;;  %v5947_v13 = vld [vmem:[#allocation3 + $0x5] sm:$0xff] }
 0x46c   : > { %15055 = vmatprep.subr.bf16.mxu0 %v17952_v21  ;;  %v5707_v24 = vmax.f32 %v5693_v25, 0.0  ;;  %v5951_v25 = vld [vmem:[#allocation3 + $0x25] sm:$0xff] }
 0x46e   : > { %14880 = vmatpush3.bf16.msra.mxu1 %v17690_v33  ;;  %v5717_v33 = vld [vmem:[%s22145_s4 + $0x40] sm:$0xff]  ;;  %v5735_v1 = vmul.f32 %v5721_v26, %v5707_v24 }
 0x46f   : > { %15056 = vmatpush3.bf16.msra.mxu0 %v17691_v55  ;;  %14909 = vmatprep.subr.bf16.mxu1 %v17952_v21  ;;  %v6000_v55 = vpack.c.bf16 %v5989_v45, %v5988_v40  ;;  %v5731_v60 = vmul.f32 %v5717_v33, %v5703_v49  ;;  %v6866_v40 = vld [vmem:[#allocation3 + $0x31] sm:$0xff] }
 0x470   : > { %15085 = vmatprep.subr.bf16.mxu0 %v17952_v21  ;;  %v5992_v18 = vld [vmem:[#allocation3 + $0x46] sm:$0xff]  ;;  %v5993_v50 = vld [vmem:[#allocation3 + $0x4e] sm:$0xff]  ;;  %5749 = vst [vmem:[#allocation3 + $0x78] sm:$0xff] %v5735_v1 }
 0x471   : > { %14882 = vmatmul.mubr.bf16.vlgmr.msra.gmra.mrb[0].mxu1 %v5998_v6  ;;  %5745 = vst [vmem:[#allocation3 + $0x58] sm:$0xff] %v5731_v60  ;;  %v5705_v6 = vmax.f32 %v5691_v62, 0.0  ;;  %v6868_v56 = vld [vmem:[#allocation3 + $0x41] sm:$0xff]  ;;  %v5948_v62 = vld [vmem:[#allocation3 + $0xd] sm:$0xff] }
 0x472   : > { %15058 = vmatmul.mubr.bf16.vlgmr.msra.gmra.mrb[0].mxu0 %v6688_v9  ;;  %14910 = vmatpush3.bf16.msra.mxu1 %v17692_v15  ;;  %v5692_v15 = vadd.f32 %v20033_v32, %v5674_v59  ;;  %v5991_v9 = vld [vmem:[#allocation3 + $0x3e] sm:$0xff] }
 0x473   : > { %15086 = vmatpush3.bf16.msra.mxu0 %v17693_v7  ;;  %14885 = vmatprep.mubr.msk.bf16.mxu1 %vm17953_vm1, %v17952_v21  ;;  %v5733_v11 = vmul.f32 %v5719_v3, %v5705_v6  ;;  %v6001_v16 = vpack.c.bf16 %v5991_v9, %v5990_v8  ;;  %v17711_v59 = vld [vmem:[%s22143_s2 + $0x198] sm:$0xff]   ;;  %v17715_v3 = vld [vmem:[%s22143_s2 + $0x1a8] sm:$0xff]   ;;  %v5753_v9 = vld [vmem:[%s20035_s7 + $0x80] sm:$0xff] }
 0x474   : > { %15087 = vmatprep.subr.bf16.mxu0 %v17952_v21  ;;  %14911 = vmatprep.subr.bf16.mxu1 %v17952_v21  ;;  %v5706_v7 = vmax.f32 %v5692_v15, 0.0  ;;  %v6869_v15 = vld [vmem:[#allocation3 + $0x49] sm:$0xff]  ;;  %v5752_v8 = vld [vmem:[%s20035_s7 + $0x78] sm:$0xff] }
 0x475   : > { %15061 = vmatprep.mubr.msk.bf16.mxu0 %vm17953_vm1, %v17952_v21  ;;  %5747 = vst [vmem:[#allocation3 + $0x68] sm:$0xff] %v5733_v11  ;;  %v5949_v11 = vld [vmem:[#allocation3 + $0x15] sm:$0xff] }
 0x476   : > { %14912 = vmatpush3.bf16.msra.mxu1 %v17695_v19  ;;  %v5734_v52 = vmul.f32 %v5720_v5, %v5706_v7  ;;  %v6863_v19 = vld [vmem:[#allocation3 + $0x19] sm:$0xff]  ;;  %v5961_v5 = vpack.c.bf16 %v5948_v62, %v5947_v13  ;;  %v17731_v13 = vld [vmem:[%s22143_s2 + $0x1e8] sm:$0xff]  }
 0x477   : > { %15088 = vmatpush3.bf16.msra.mxu0 %v17694_v22  ;;  %14913 = vmatprep.subr.bf16.mxu1 %v17952_v21  ;;  %v6002_v22 = vpack.c.bf16 %v5993_v50, %v5992_v18  ;;  %v6877_v23 = vpack.c.bf16 %v6864_v20, %v6863_v19  ;;  %v17712_v7 = vld [vmem:[%s22143_s2 + $0x80] sm:$0xff]   ;;  %v5808_v50 = vld [vmem:[%s22145_s4 + $0x78] sm:$0xff] }
 0x478   : > { %15089 = vmatprep.subr.bf16.mxu0 %v17952_v21  ;;  %5748 = vst [vmem:[#allocation3 + $0x70] sm:$0xff] %v5734_v52  ;;  %v5995_v37 = vld [vmem:[#allocation3 + $0x5e] sm:$0xff] }
 0x479   : > { %14886 = vmatmul.mubr.bf16.gmra.mrb[4].mxu1 %v5999_v31  ;;  %v5658_v31 = vld [vmem:[%s20035_s7 + $0x68] sm:$0xff]  ;;  %v5950_v52 = vld [vmem:[#allocation3 + $0x1d] sm:$0xff] }
 0x47a   : > { %15062 = vmatmul.mubr.bf16.gmra.mrb[4].mxu0 %v6689_v35  ;;  %14889 = vmatprep.mubr.msk.bf16.mxu1 %vm17953_vm1, %v17952_v21  ;;  %v5676_v34 = vmul.f32 %v20031_v4, %v5658_v31  ;;  %v5751_v35 = vld [vmem:[%s20035_s7 + $0x70] sm:$0xff]  ;;  %v5809_v19 = vld [vmem:[%s22145_s4 + $0x80] sm:$0xff]  ;;  %v5962_v53 = vpack.c.bf16 %v5950_v52, %v5949_v11  ;;  %v17718_v31 = vld [vmem:[%s22143_s2 + $0x98] sm:$0xff]  }
 0x47b   : > { %15090 = vmatpush3.bf16.msra.mxu0 %v17696_v57  ;;  %14914 = vmatpush3.bf16.msra.mxu1 %v17698_v29  ;;  %v5994_v57 = vld [vmem:[#allocation3 + $0x56] sm:$0xff]  ;;  %v6865_v29 = vld [vmem:[#allocation3 + $0x29] sm:$0xff]  ;;  %v5765_v36 = vmul.f32 %v20031_v4, %v5751_v35 }
 0x47c   : > { %15091 = vmatprep.subr.bf16.mxu0 %v17952_v21  ;;  %15065 = vmatprep.mubr.msk.bf16.mxu0 %vm17953_vm1, %v17952_v21  ;;  %v5694_v38 = vadd.f32 %v20033_v32, %v5676_v34  ;;  %v20260_v33 = vpack.c.bf16 %v6866_v40, %v6865_v29  ;;  %v5996_v44 = vld [vmem:[#allocation3 + $0x66] sm:$0xff]  ;;  %v5953_v29 = vld [vmem:[#allocation3 + $0x35] sm:$0xff] }
 0x47d   : > { %14915 = vmatprep.subr.bf16.mxu1 %v17952_v21  ;;  %v5779_v45 = vadd.f32 %v20033_v32, %v5765_v36 }
 0x47e   : > { %v5708_v46 = vmax.f32 %v5694_v38, 0.0 }
 0x47f   : > { %15092 = vmatpush3.bf16.msra.mxu0 %v17697_v47  ;;  %14916 = vmatpush3.bf16.msra.mxu1 %v17701_v48  ;;  %v5807_v47 = vld [vmem:[%s22145_s4 + $0x70] sm:$0xff]  ;;  %v6003_v48 = vpack.c.bf16 %v5995_v37, %v5994_v57  ;;  %v5793_v42 = vmax.f32 %v5779_v45, 0.0  ;;  %v17720_v57 = vld [vmem:[%s22143_s2 + $0xa0] sm:$0xff]   ;;  %v17722_v37 = vld [vmem:[%s22143_s2 + $0xa8] sm:$0xff]  }
 0x480   : > { %15093 = vmatprep.subr.bf16.mxu0 %v17952_v21  ;;  %14917 = vmatprep.subr.bf16.mxu1 %v17952_v21  ;;  %v5736_v49 = vmul.f32 %v5722_v41, %v5708_v46  ;;  %v5997_v58 = vld [vmem:[#allocation3 + $0x6e] sm:$0xff]  ;;  %v5955_v45 = vld [vmem:[#allocation3 + $0x45] sm:$0xff] }
 0x481   : > { %14890 = vmatmul.mubr.bf16.gmra.mrb[8].mxu1 %v6000_v55  ;;  %v5821_v39 = vmul.f32 %v5807_v47, %v5793_v42  ;;  %v6867_v55 = vld [vmem:[#allocation3 + $0x39] sm:$0xff]  ;;  %v6873_v26 = vld [vmem:[#allocation3 + $0x69] sm:$0xff]  ;;  %v6874_v24 = vld [vmem:[#allocation3 + $0x71] sm:$0xff] }
 0x482   : > { %15066 = vmatmul.mubr.bf16.gmra.mrb[8].mxu0 %v6690_v43  ;;  %14893 = vmatprep.mubr.msk.bf16.mxu1 %vm17953_vm1, %v17952_v21  ;;  %5750 = vst [vmem:[#allocation3 + $0x80] sm:$0xff] %v5736_v49  ;;  %v6004_v43 = vpack.c.bf16 %v5997_v58, %v5996_v44  ;;  %v20275_v60 = vpack.c.bf16 %v6868_v56, %v6867_v55  ;;  %v17724_v41 = vld [vmem:[%s22143_s2 + $0xb0] sm:$0xff]   ;;  %v17726_v47 = vld [vmem:[%s22143_s2 + $0xb8] sm:$0xff]   ;;  %v17721_v42 = vld [vmem:[%s22143_s2 + $0x1c0] sm:$0xff]  }
 0x483   : > { %15094 = vmatpush3.bf16.msra.mxu0 %v17699_v61  ;;  %15069 = vmatprep.mubr.msk.bf16.mxu0 %vm17953_vm1, %v17952_v21  ;;  %5835 = vst [vmem:[#allocation3 + $0x88] sm:$0xff] %v5821_v39  ;;  %v17713_v61 = vld [vmem:[%s22143_s2 + $0x1a0] sm:$0xff]   ;;  %v20340_v35 = vpack.c.bf16 %v6874_v24, %v6873_v26  ;;  %v5956_v46 = vld [vmem:[#allocation3 + $0x4d] sm:$0xff]  ;;  %v5957_v49 = vld [vmem:[#allocation3 + $0x55] sm:$0xff] }
 0x484   : > { %15095 = vmatprep.subr.bf16.mxu0 %v17952_v21  ;;  %14918 = vmatpush3.bf16.msra.mxu1 %v17703_v27  ;;  %v6870_v27 = vld [vmem:[#allocation3 + $0x51] sm:$0xff]  ;;  %v17723_v39 = vld [vmem:[%s22143_s2 + $0x1c8] sm:$0xff]  }
 0x485   : > { %14919 = vmatprep.subr.bf16.mxu1 %v17952_v21  ;;  %v20290_v6 = vpack.c.bf16 %v6870_v27, %v6869_v15  ;;  %v5959_v55 = vld [vmem:[#allocation3 + $0x65] sm:$0xff]  ;;  %v5960_v56 = vld [vmem:[#allocation3 + $0x6d] sm:$0xff]  ;;  %v17727_v58 = vld [vmem:[%s22143_s2 + $0x1d8] sm:$0xff]  }
 0x486   : > { %v17728_v15 = vld [vmem:[%s22143_s2 + $0xc0] sm:$0xff]   ;;  %v5762_v27 = vld [vmem:[%s20035_s7 + $0xc8] sm:$0xff] }
 0x487   : > { %15096 = vmatpush3.bf16.msra.mxu0 %v17700_v10  ;;  %v5766_v10 = vmul.f32 %v20031_v4, %v5752_v8  ;;  %v5763_v8 = vld [vmem:[%s20035_s7 + $0xd0] sm:$0xff] }
 0x488   : > { %15097 = vmatprep.subr.bf16.mxu0 %v17952_v21  ;;  %14920 = vmatpush3.bf16.msra.mxu1 %v17706_v12  ;;  %v17717_v12 = vld [vmem:[%s22143_s2 + $0x1b0] sm:$0xff]  }
 0x489   : > { %14894 = vmatmul.mubr.bf16.gmra.mrb[12].mxu1 %v6001_v16  ;;  %14921 = vmatprep.subr.bf16.mxu1 %v17952_v21  ;;  %v5767_v16 = vmul.f32 %v20031_v4, %v5753_v9  ;;  %v6875_v36 = vld [vmem:[#allocation3 + $0x79] sm:$0xff]  ;;  %v6301_v26 = vld [vmem:[#allocation3 + $0x2f] sm:$0xff] }
 0x48a   : > { %15070 = vmatmul.mubr.bf16.gmra.mrb[12].mxu0 %v6691_v17  ;;  %14897 = vmatprep.mubr.msk.bf16.mxu1 %vm17953_vm1, %v17952_v21  ;;  %v17714_v17 = vld [vmem:[%s22143_s2 + $0x88] sm:$0xff]   ;;  %v5764_v9 = vld [vmem:[%s20035_s7 + $0xd8] sm:$0xff] }
 0x48b   : > { %15098 = vmatpush3.bf16.msra.mxu0 %v17702_v14  ;;  %15101 = vmatprep.mubr.msk.bf16.mxu0 %vm17953_vm1, %v17952_v21  ;;  %v5780_v14 = vadd.f32 %v20033_v32, %v5766_v10  ;;  %v5781_v18 = vadd.f32 %v20033_v32, %v5767_v16  ;;  %v17719_v32 = vld [vmem:[%s22143_s2 + $0x1b8] sm:$0xff]   ;;  %v6876_v1 = vld [vmem:[#allocation3 + $0x81] sm:$0xff] }
 0x48c   : > { %15099 = vmatprep.subr.bf16.mxu0 %v17952_v21  ;;  %14922 = vmatpush3.bf16.msra.mxu1 %v17708_v63  ;;  %v6871_v63 = vld [vmem:[#allocation3 + $0x59] sm:$0xff]  ;;  %v20355_v40 = vpack.c.bf16 %v6876_v1, %v6875_v36  ;;  %v20422_v10 = vld [vmem:[#allocation5] ss:$0 sm:$0xff]  ;;  %v20428_v16 = vld [vmem:[#allocation5 + $0x1] ss:$0 sm:$0xff] }
 0x48d   : > { %14923 = vmatprep.subr.bf16.mxu1 %v17952_v21  ;;  %v5794_v4 = vmax.f32 %v5780_v14, 0.0  ;;  %v5795_v20 = vmax.f32 %v5781_v18, 0.0  ;;  %v5776_v11 = vmul.f32 %v20422_v10, %v5762_v27  ;;  %v5777_v52 = vmul.f32 %v20422_v10, %v5763_v8  ;;  %v5905_v1 = vld [vmem:[%s22145_s4 + $0xe0] sm:$0xff] }
 0x48f   : > { %15100 = vmatpush3.bf16.msra.mxu0 %v17704_v54  ;;  %v6872_v54 = vld [vmem:[#allocation3 + $0x61] sm:$0xff]  ;;  %v5791_v14 = vadd.f32 %v20428_v16, %v5777_v52  ;;  %v17740_v52 = vld [vmem:[%s22143_s2 + $0xf0] sm:$0xff]  }
 0x490   : > { %15129 = vmatprep.subr.bf16.mxu0 %v17952_v21  ;;  %14924 = vmatpush3.bf16.msra.mxu1 %v17710_v2  ;;  %v5822_v2 = vmul.f32 %v5808_v50, %v5794_v4  ;;  %v20324_v28 = vpack.c.bf16 %v6872_v54, %v6871_v63  ;;  %v17735_v54 = vld [vmem:[%s22143_s2 + $0x1f8] sm:$0xff]  }
 0x491   : > { %14898 = vmatmul.mubr.bf16.gmra.mrb[16].mxu1 %v6002_v22  ;;  %14953 = vmatprep.subr.bf16.mxu1 %v17952_v21  ;;  %v5823_v22 = vmul.f32 %v5809_v19, %v5795_v20  ;;  %v5805_v4 = vmax.f32 %v5791_v14, 0.0  ;;  %v5819_v20 = vld [vmem:[%s22145_s4 + $0xd0] sm:$0xff]  ;;  %v5853_v14 = vld [vmem:[%s20035_s7 + $0x100] sm:$0xff] }
 0x492   : > { %15102 = vmatmul.mubr.bf16.vlgmr.msra.gmra.mrb[0].mxu0 %v6877_v23  ;;  %14901 = vmatprep.mubr.msk.bf16.mxu1 %vm17953_vm1, %v17952_v21  ;;  %v17716_v23 = vld [vmem:[%s22143_s2 + $0x90] sm:$0xff]   ;;  %5836 = vst [vmem:[#allocation3 + $0x90] sm:$0xff] %v5822_v2 }
 0x493   : > { %15130 = vmatpush3.bf16.msra.mxu0 %v17705_v30  ;;  %15105 = vmatprep.mubr.msk.bf16.mxu0 %vm17953_vm1, %v17952_v21  ;;  %5837 = vst [vmem:[#allocation3 + $0x98] sm:$0xff] %v5823_v22  ;;  %v5952_v30 = vld [vmem:[#allocation3 + $0x2d] sm:$0xff]  ;;  %v5833_v22 = vmul.f32 %v5819_v20, %v5805_v4 }
 0x494   : > { %15131 = vmatprep.subr.bf16.mxu0 %v17952_v21  ;;  %v5963_v34 = vpack.c.bf16 %v5952_v30, %v5951_v25  ;;  %v5849_v25 = vld [vmem:[%s20035_s7 + $0xe0] sm:$0xff]  ;;  %v6305_v20 = vld [vmem:[#allocation3 + $0x4f] sm:$0xff] }
 0x495   : > { %v6300_v30 = vld [vmem:[#allocation3 + $0x27] sm:$0xff]  ;;  %v5863_v24 = vmul.f32 %v20422_v10, %v5849_v25  ;;  %5847 = vst [vmem:[#allocation3 + $0xe8] sm:$0xff] %v5833_v22  ;;  %v7242_v22 = vld [vmem:[#allocation3 + $0x32] sm:$0xff] }
 0x496   : > { %v20474_v36 = vpack.c.bf16 %v6301_v26, %v6300_v30  ;;  %v6304_v4 = vld [vmem:[#allocation3 + $0x47] sm:$0xff]  ;;  %v5811_v26 = vld [vmem:[%s22145_s4 + $0x90] sm:$0xff] }
 0x497   : > { %15132 = vmatpush3.bf16.msra.mxu0 %v17707_v0  ;;  %v5954_v0 = vld [vmem:[#allocation3 + $0x3d] sm:$0xff] }
 0x498   : > { %15133 = vmatprep.subr.bf16.mxu0 %v17952_v21  ;;  %v5964_v38 = vpack.c.bf16 %v5954_v0, %v5953_v29  ;;  %v17734_v29 = vld [vmem:[%s22143_s2 + $0xd8] sm:$0xff]  }
 0x499   : > { %14902 = vmatmul.mubr.bf16.gmra.mrb[20].mxu1 %v6003_v48  ;;  %v5965_v48 = vpack.c.bf16 %v5956_v46, %v5955_v45  ;;  %v5754_v46 = vld [vmem:[%s20035_s7 + $0x88] sm:$0xff] }
 0x49a   : > { %15106 = vmatmul.mubr.bf16.gmra.mrb[4].mxu0 %v20260_v33  ;;  %14905 = vmatprep.mubr.msk.bf16.mxu1 %vm17953_vm1, %v17952_v21 }
 0x49b   : > { %15109 = vmatprep.mubr.msk.bf16.mxu0 %vm17953_vm1, %v17952_v21  ;;  %15134 = vmatpush3.bf16.msra.mxu0 %v17709_v51  ;;  %v5958_v51 = vld [vmem:[#allocation3 + $0x5d] sm:$0xff] }
 0x49c   : > { %15135 = vmatprep.subr.bf16.mxu0 %v17952_v21  ;;  %v5966_v44 = vpack.c.bf16 %v5958_v51, %v5957_v49  ;;  %v5852_v49 = vld [vmem:[%s20035_s7 + $0xf8] sm:$0xff] }
 0x49d   : > { %v6302_v51 = vld [vmem:[#allocation3 + $0x37] sm:$0xff] }
 0x49f   : > { %15136 = vmatpush3.bf16.msra.mxu0 %v17711_v59  ;;  %v5967_v59 = vpack.c.bf16 %v5960_v56, %v5959_v55  ;;  %v17738_v55 = vld [vmem:[%s22143_s2 + $0xe8] sm:$0xff]  }
 0x4a0   : > { %15137 = vmatprep.subr.bf16.mxu0 %v17952_v21 }
 0x4a1   : > { %14906 = vmatmul.mubr.bf16.gmra.mrb[24].mxu1 %v6004_v43  ;;  %v17729_v43 = vld [vmem:[%s22143_s2 + $0x1e0] sm:$0xff]  }
 0x4a2   : > { %15110 = vmatmul.mubr.bf16.gmra.mrb[8].mxu0 %v20275_v60  ;;  %14925 = vmatprep.mubr.msk.bf16.mxu1 %vm17953_vm1, %v17952_v21 }
 0x4a3   : > { %15113 = vmatprep.mubr.msk.bf16.mxu0 %vm17953_vm1, %v17952_v21  ;;  %15138 = vmatpush3.bf16.msra.mxu0 %v17713_v61  ;;  %v6297_v61 = vld [vmem:[#allocation3 + $0xf] sm:$0xff] }
 0x4a4   : > { %15139 = vmatprep.subr.bf16.mxu0 %v17952_v21 }
 0x4a7   : > { %15140 = vmatpush3.bf16.msra.mxu0 %v17715_v3  ;;  %v6298_v3 = vld [vmem:[#allocation3 + $0x17] sm:$0xff] }
 0x4a8   : > { %15141 = vmatprep.subr.bf16.mxu0 %v17952_v21 }
 0x4a9   : > { %14926 = vmatmul.mubr.bf16.vlgmr.msra.gmra.mrb[0].mxu1 %v5961_v5  ;;  %v6299_v5 = vld [vmem:[#allocation3 + $0x1f] sm:$0xff] }
 0x4aa   : > { %15114 = vmatmul.mubr.bf16.gmra.mrb[12].mxu0 %v20290_v6  ;;  %14954 = vmatpush3.bf16.msra.mxu1 %v17712_v7  ;;  %v17733_v7 = vld [vmem:[%s22143_s2 + $0x1f0] sm:$0xff]   ;;  %v20441_v50 = vpack.c.bf16 %v6299_v5, %v6298_v3  ;;  %v5908_v5 = vld [vmem:[%s22145_s4 + $0xf8] sm:$0xff] }
 0x4ab   : > { %14929 = vmatprep.mubr.msk.bf16.mxu1 %vm17953_vm1, %v17952_v21  ;;  %14955 = vmatprep.subr.bf16.mxu1 %v17952_v21  ;;  %v5907_v3 = vld [vmem:[%s22145_s4 + $0xf0] sm:$0xff] }
 0x4ac   : > { %15117 = vmatprep.mubr.msk.bf16.mxu0 %vm17953_vm1, %v17952_v21  ;;  %15142 = vmatpush3.bf16.msra.mxu0 %v17717_v12  ;;  %v5778_v12 = vmul.f32 %v20422_v10, %v5764_v9  ;;  %v5755_v9 = vld [vmem:[%s20035_s7 + $0x90] sm:$0xff] }
 0x4ad   : > { %15143 = vmatprep.subr.bf16.mxu0 %v17952_v21 }
 0x4ae   : > { %14956 = vmatpush3.bf16.msra.mxu1 %v17714_v17  ;;  %v5790_v17 = vadd.f32 %v20428_v16, %v5776_v11  ;;  %v5792_v63 = vadd.f32 %v20428_v16, %v5778_v12  ;;  %v5756_v11 = vld [vmem:[%s20035_s7 + $0x98] sm:$0xff]  ;;  %v5769_v12 = vmul.f32 %v20422_v10, %v5755_v9 }
 0x4af   : > { %14957 = vmatprep.subr.bf16.mxu1 %v17952_v21 }
 0x4b0   : > { %15144 = vmatpush3.bf16.msra.mxu0 %v17719_v32  ;;  %v5804_v18 = vmax.f32 %v5790_v17, 0.0  ;;  %v5806_v19 = vmax.f32 %v5792_v63, 0.0  ;;  %v5818_v32 = vld [vmem:[%s22145_s4 + $0xc8] sm:$0xff]  ;;  %v5770_v17 = vmul.f32 %v20422_v10, %v5756_v11  ;;  %v5911_v11 = vld [vmem:[%s22145_s4 + $0x110] sm:$0xff] }
 0x4b1   : > { %14930 = vmatmul.mubr.bf16.gmra.mrb[4].mxu1 %v5962_v53  ;;  %15173 = vmatprep.subr.bf16.mxu0 %v17952_v21  ;;  %v5820_v53 = vld [vmem:[%s22145_s4 + $0xd8] sm:$0xff]  ;;  %v5854_v63 = vld [vmem:[%s20035_s7 + $0x108] sm:$0xff] }
 0x4b2   : > { %15118 = vmatmul.mubr.bf16.gmra.mrb[16].mxu0 %v20324_v28  ;;  %14933 = vmatprep.mubr.msk.bf16.mxu1 %vm17953_vm1, %v17952_v21  ;;  %v5832_v2 = vmul.f32 %v5818_v32, %v5804_v18  ;;  %v5868_v18 = vmul.f32 %v20422_v10, %v5854_v63  ;;  %v5784_v32 = vadd.f32 %v20428_v16, %v5770_v17  ;;  %v17741_v63 = vld [vmem:[%s22143_s2 + $0x210] sm:$0xff]  }
 0x4b3   : > { %14958 = vmatpush3.bf16.msra.mxu1 %v17716_v23  ;;  %15121 = vmatprep.mubr.msk.bf16.mxu0 %vm17953_vm1, %v17952_v21  ;;  %v5834_v23 = vmul.f32 %v5820_v53, %v5806_v19  ;;  %v5783_v19 = vadd.f32 %v20428_v16, %v5769_v12  ;;  %v7241_v53 = vld [vmem:[#allocation3 + $0x2a] sm:$0xff] }
 0x4b4   : > { %14959 = vmatprep.subr.bf16.mxu1 %v17952_v21  ;;  %5846 = vst [vmem:[#allocation3 + $0xe0] sm:$0xff] %v5832_v2  ;;  %v5798_v30 = vmax.f32 %v5784_v32, 0.0 }
 0x4b5   : > { %5848 = vst [vmem:[#allocation3 + $0xf0] sm:$0xff] %v5834_v23  ;;  %v17742_v23 = vld [vmem:[%s22143_s2 + $0xf8] sm:$0xff]   ;;  %v5797_v25 = vmax.f32 %v5783_v19, 0.0  ;;  %v6308_v19 = vld [vmem:[#allocation3 + $0x67] sm:$0xff] }
 0x4b7   : > { %14960 = vmatpush3.bf16.msra.mxu1 %v17718_v31  ;;  %v5850_v31 = vld [vmem:[%s20035_s7 + $0xe8] sm:$0xff] }
 0x4b8   : > { %14961 = vmatprep.subr.bf16.mxu1 %v17952_v21 }
 0x4b9   : > { %14934 = vmatmul.mubr.bf16.gmra.mrb[8].mxu1 %v5963_v34  ;;  %v5864_v34 = vmul.f32 %v20422_v10, %v5850_v31  ;;  %v5812_v31 = vld [vmem:[%s22145_s4 + $0x98] sm:$0xff] }
 0x4ba   : > { %15122 = vmatmul.mubr.bf16.gmra.mrb[20].mxu0 %v20340_v35  ;;  %14937 = vmatprep.mubr.msk.bf16.mxu1 %vm17953_vm1, %v17952_v21 }
 0x4bb   : > { %15125 = vmatprep.mubr.msk.bf16.mxu0 %vm17953_vm1, %v17952_v21  ;;  %14962 = vmatpush3.bf16.msra.mxu1 %v17720_v57  ;;  %v5877_v57 = vadd.f32 %v20428_v16, %v5863_v24  ;;  %v5878_v0 = vadd.f32 %v20428_v16, %v5864_v34 }
 0x4bc   : > { %14963 = vmatprep.subr.bf16.mxu1 %v17952_v21 }
 0x4bf   : > { %14964 = vmatpush3.bf16.msra.mxu1 %v17722_v37  ;;  %v5892_v37 = vmax.f32 %v5878_v0, 0.0  ;;  %v5826_v0 = vmul.f32 %v5812_v31, %v5798_v30  ;;  %v7246_v30 = vld [vmem:[#allocation3 + $0x52] sm:$0xff] }
 0x4c0   : > { %14965 = vmatprep.subr.bf16.mxu1 %v17952_v21  ;;  %v17743_v31 = vld [vmem:[%s22143_s2 + $0x218] sm:$0xff]  }
 0x4c1   : > { %14938 = vmatmul.mubr.bf16.gmra.mrb[12].mxu1 %v5964_v38  ;;  %v5906_v38 = vld [vmem:[%s22145_s4 + $0xe8] sm:$0xff]  ;;  %5840 = vst [vmem:[#allocation3 + $0xb0] sm:$0xff] %v5826_v0 }
 0x4c2   : > { %15126 = vmatmul.mubr.bf16.gmra.mrb[24].mxu0 %v20355_v40  ;;  %14941 = vmatprep.mubr.msk.bf16.mxu1 %vm17953_vm1, %v17952_v21 }
 0x4c3   : > { %15145 = vmatprep.mubr.msk.bf16.mxu0 %vm17953_vm1, %v17952_v21  ;;  %14966 = vmatpush3.bf16.msra.mxu1 %v17724_v41  ;;  %v17736_v41 = vld [vmem:[%s22143_s2 + $0xe0] sm:$0xff]  }
 0x4c4   : > { %14967 = vmatprep.subr.bf16.mxu1 %v17952_v21 }
 0x4c7   : > { %14968 = vmatpush3.bf16.msra.mxu1 %v17726_v47  ;;  %v5920_v47 = vmul.f32 %v5906_v38, %v5892_v37  ;;  %v5910_v37 = vld [vmem:[%s22145_s4 + $0x108] sm:$0xff] }
 0x4c8   : > { %14997 = vmatprep.subr.bf16.mxu1 %v17952_v21 }
 0x4c9   : > { %14942 = vmatmul.mubr.bf16.gmra.mrb[16].mxu1 %v5965_v48  ;;  %v5768_v48 = vmul.f32 %v20422_v10, %v5754_v46  ;;  %5934 = vst [vmem:[#allocation3 + $0x100] sm:$0xff] %v5920_v47  ;;  %v5758_v46 = vld [vmem:[%s20035_s7 + $0xa8] sm:$0xff]  ;;  %v17737_v47 = vld [vmem:[%s22143_s2 + $0x200] sm:$0xff]  }
 0x4ca   : > { %15146 = vmatmul.mubr.bf16.vlgmr.msra.gmra.mrb[0].mxu0 %v20260_v33  ;;  %14945 = vmatprep.mubr.msk.bf16.mxu1 %vm17953_vm1, %v17952_v21  ;;  %v17725_v33 = vld [vmem:[%s22143_s2 + $0x1d0] sm:$0xff]  }
 0x4cb   : > { %15174 = vmatpush3.bf16.msra.mxu0 %v17721_v42  ;;  %15149 = vmatprep.mubr.msk.bf16.mxu0 %vm17953_vm1, %v17952_v21  ;;  %v5851_v42 = vld [vmem:[%s20035_s7 + $0xf0] sm:$0xff]  ;;  %v5782_v56 = vadd.f32 %v20428_v16, %v5768_v48 }
 0x4cc   : > { %15175 = vmatprep.subr.bf16.mxu0 %v17952_v21 }
 0x4cf   : > { %15176 = vmatpush3.bf16.msra.mxu0 %v17723_v39  ;;  %v6303_v39 = vld [vmem:[#allocation3 + $0x3f] sm:$0xff] }
 0x4d0   : > { %15177 = vmatprep.subr.bf16.mxu0 %v17952_v21 }
 0x4d1   : > { %14946 = vmatmul.mubr.bf16.gmra.mrb[20].mxu1 %v5966_v44  ;;  %v5865_v44 = vmul.f32 %v20422_v10, %v5851_v42  ;;  %v5772_v42 = vmul.f32 %v20422_v10, %v5758_v46  ;;  %v5913_v46 = vld [vmem:[%s22145_s4 + $0x120] sm:$0xff] }
 0x4d2   : > { %15150 = vmatmul.mubr.bf16.gmra.mrb[4].mxu0 %v20275_v60  ;;  %14949 = vmatprep.mubr.msk.bf16.mxu1 %vm17953_vm1, %v17952_v21  ;;  %v6296_v60 = vld [vmem:[#allocation3 + $0x7] sm:$0xff] }
 0x4d3   : > { %15153 = vmatprep.mubr.msk.bf16.mxu0 %vm17953_vm1, %v17952_v21  ;;  %15178 = vmatpush3.bf16.msra.mxu0 %v17725_v33  ;;  %v6310_v62 = vpack.c.bf16 %v6297_v61, %v6296_v60  ;;  %v5866_v33 = vmul.f32 %v20422_v10, %v5852_v49  ;;  %v7065_v60 = vld [vmem:[#allocation3 + $0x91] sm:$0xff]  ;;  %v5796_v61 = vmax.f32 %v5782_v56, 0.0 }
 0x4d4   : > { %15179 = vmatprep.subr.bf16.mxu0 %v17952_v21  ;;  %v5855_v49 = vld [vmem:[%s20035_s7 + $0x110] sm:$0xff] }
 0x4d7   : > { %15180 = vmatpush3.bf16.msra.mxu0 %v17727_v58  ;;  %v7064_v58 = vld [vmem:[#allocation3 + $0x89] sm:$0xff] }
 0x4d8   : > { %15181 = vmatprep.subr.bf16.mxu0 %v17952_v21 }
 0x4d9   : > { %14950 = vmatmul.mubr.bf16.gmra.mrb[24].mxu1 %v5967_v59  ;;  %v5879_v59 = vadd.f32 %v20428_v16, %v5865_v44  ;;  %v5856_v44 = vld [vmem:[%s20035_s7 + $0x118] sm:$0xff] }
 0x4da   : > { %15154 = vmatmul.mubr.bf16.gmra.mrb[8].mxu0 %v20290_v6  ;;  %14969 = vmatprep.mubr.msk.bf16.mxu1 %vm17953_vm1, %v17952_v21  ;;  %v17730_v6 = vld [vmem:[%s22143_s2 + $0xc8] sm:$0xff]  }
 0x4db   : > { %15157 = vmatprep.mubr.msk.bf16.mxu0 %vm17953_vm1, %v17952_v21  ;;  %15182 = vmatpush3.bf16.msra.mxu0 %v17729_v43  ;;  %v5880_v43 = vadd.f32 %v20428_v16, %v5866_v33  ;;  %v5869_v33 = vmul.f32 %v20422_v10, %v5855_v49  ;;  %v5761_v49 = vld [vmem:[%s20035_s7 + $0xc0] sm:$0xff] }
 0x4dc   : > { %15183 = vmatprep.subr.bf16.mxu0 %v17952_v21 }
 0x4df   : > { %15184 = vmatpush3.bf16.msra.mxu0 %v17731_v13  ;;  %v5893_v13 = vmax.f32 %v5879_v59, 0.0  ;;  %v5870_v59 = vmul.f32 %v20422_v10, %v5856_v44 }
 0x4e0   : > { %15185 = vmatprep.subr.bf16.mxu0 %v17952_v21 }
 0x4e1   : > { %14970 = vmatmul.mubr.bf16.vlgmr.msra.gmra.mrb[0].mxu1 %v6310_v62  ;;  %v5894_v62 = vmax.f32 %v5880_v43, 0.0  ;;  %v7244_v43 = vld [vmem:[#allocation3 + $0x42] sm:$0xff] }
 0x4e2   : > { %15158 = vmatmul.mubr.bf16.gmra.mrb[12].mxu0 %v20324_v28  ;;  %14998 = vmatpush3.bf16.msra.mxu1 %v17728_v15  ;;  %v17732_v28 = vld [vmem:[%s22143_s2 + $0xd0] sm:$0xff]   ;;  %v20508_v15 = vpack.c.bf16 %v6303_v39, %v6302_v51  ;;  %v6307_v39 = vld [vmem:[#allocation3 + $0x5f] sm:$0xff] }
 0x4e3   : > { %14973 = vmatprep.mubr.msk.bf16.mxu1 %vm17953_vm1, %v17952_v21  ;;  %14999 = vmatprep.subr.bf16.mxu1 %v17952_v21  ;;  %v5922_v8 = vmul.f32 %v5908_v5, %v5894_v62  ;;  %v6306_v51 = vld [vmem:[#allocation3 + $0x57] sm:$0xff]  ;;  %v5884_v62 = vadd.f32 %v20428_v16, %v5870_v59 }
 0x4e4   : > { %15161 = vmatprep.mubr.msk.bf16.mxu0 %vm17953_vm1, %v17952_v21  ;;  %15186 = vmatpush3.bf16.msra.mxu0 %v17733_v7  ;;  %v5921_v7 = vmul.f32 %v5907_v3, %v5893_v13  ;;  %v5814_v3 = vld [vmem:[%s22145_s4 + $0xa8] sm:$0xff] }
 0x4e5   : > { %15187 = vmatprep.subr.bf16.mxu0 %v17952_v21  ;;  %5936 = vst [vmem:[#allocation3 + $0x110] sm:$0xff] %v5922_v8  ;;  %v5898_v9 = vmax.f32 %v5884_v62, 0.0 }
 0x4e6   : > { %15000 = vmatpush3.bf16.msra.mxu1 %v17730_v6  ;;  %v7072_v6 = vpack.c.bf16 %v7065_v60, %v7064_v58  ;;  %5935 = vst [vmem:[#allocation3 + $0x108] sm:$0xff] %v5921_v7  ;;  %v5786_v58 = vadd.f32 %v20428_v16, %v5772_v42  ;;  %v17739_v60 = vld [vmem:[%s22143_s2 + $0x208] sm:$0xff]  }
 0x4e7   : > { %15001 = vmatprep.subr.bf16.mxu1 %v17952_v21 }
 0x4e8   : > { %15188 = vmatpush3.bf16.msra.mxu0 %v17735_v54  ;;  %v5867_v54 = vmul.f32 %v20422_v10, %v5853_v14  ;;  %v5800_v13 = vmax.f32 %v5786_v58, 0.0  ;;  %v5759_v14 = vld [vmem:[%s20035_s7 + $0xb0] sm:$0xff] }
 0x4e9   : > { %14974 = vmatmul.mubr.bf16.gmra.mrb[4].mxu1 %v20441_v50  ;;  %15217 = vmatprep.subr.bf16.mxu0 %v17952_v21 }
 0x4ea   : > { %15162 = vmatmul.mubr.bf16.gmra.mrb[16].mxu0 %v20340_v35  ;;  %14977 = vmatprep.mubr.msk.bf16.mxu1 %vm17953_vm1, %v17952_v21  ;;  %v5891_v35 = vmax.f32 %v5877_v57, 0.0  ;;  %v5881_v2 = vadd.f32 %v20428_v16, %v5867_v54  ;;  %v20547_v57 = vpack.c.bf16 %v6305_v20, %v6304_v4  ;;  %v5828_v8 = vmul.f32 %v5814_v3, %v5800_v13  ;;  %v5857_v20 = vld [vmem:[%s20035_s7 + $0x120] sm:$0xff] }
 0x4eb   : > { %15002 = vmatpush3.bf16.msra.mxu1 %v17732_v28  ;;  %15165 = vmatprep.mubr.msk.bf16.mxu0 %vm17953_vm1, %v17952_v21  ;;  %v5882_v28 = vadd.f32 %v20428_v16, %v5868_v18  ;;  %v5760_v18 = vld [vmem:[%s20035_s7 + $0xb8] sm:$0xff]  ;;  %v5773_v4 = vmul.f32 %v20422_v10, %v5759_v14  ;;  %v17894_v14 = vld [vmem:[%s22143_s2 + $0x100] sm:$0xff]  }
 0x4ec   : > { %15003 = vmatprep.subr.bf16.mxu1 %v17952_v21  ;;  %v5919_v45 = vmul.f32 %v5905_v1, %v5891_v35  ;;  %v5895_v24 = vmax.f32 %v5881_v2, 0.0  ;;  %v5909_v35 = vld [vmem:[%s22145_s4 + $0x100] sm:$0xff]  ;;  %v7255_v1 = vpack.c.bf16 %v7242_v22, %v7241_v53  ;;  %5842 = vst [vmem:[#allocation3 + $0xc0] sm:$0xff] %v5828_v8  ;;  %v5774_v32 = vmul.f32 %v20422_v10, %v5760_v18  ;;  %v5858_v53 = vld [vmem:[%s20035_s7 + $0x128] sm:$0xff]  ;;  %v5916_v8 = vld [vmem:[%s22145_s4 + $0x138] sm:$0xff] }
 0x4ed   : > { %v5896_v34 = vmax.f32 %v5882_v28, 0.0  ;;  %v6309_v2 = vld [vmem:[#allocation3 + $0x6f] sm:$0xff]  ;;  %v5787_v28 = vadd.f32 %v20428_v16, %v5773_v4  ;;  %v5871_v22 = vmul.f32 %v20422_v10, %v5857_v20  ;;  %v7251_v4 = vld [vmem:[#allocation3 + $0x7a] sm:$0xff] }
 0x4ee   : > { %5933 = vst [vmem:[#allocation3 + $0xf8] sm:$0xff] %v5919_v45  ;;  %v5923_v38 = vmul.f32 %v5909_v35, %v5895_v24  ;;  %v5757_v45 = vld [vmem:[%s20035_s7 + $0xa0] sm:$0xff]  ;;  %v5815_v35 = vld [vmem:[%s22145_s4 + $0xb0] sm:$0xff] }
 0x4ef   : > { %15004 = vmatpush3.bf16.msra.mxu1 %v17734_v29  ;;  %v5825_v29 = vmul.f32 %v5811_v26, %v5797_v25  ;;  %v5771_v48 = vmul.f32 %v20422_v10, %v5757_v45  ;;  %v7245_v25 = vld [vmem:[#allocation3 + $0x4a] sm:$0xff]  ;;  %v5788_v26 = vadd.f32 %v20428_v16, %v5774_v32  ;;  %v5801_v24 = vmax.f32 %v5787_v28, 0.0  ;;  %v7252_v32 = vld [vmem:[#allocation3 + $0x82] sm:$0xff] }
 0x4f0   : > { %15005 = vmatprep.subr.bf16.mxu1 %v17952_v21  ;;  %5937 = vst [vmem:[#allocation3 + $0x118] sm:$0xff] %v5923_v38  ;;  %v7260_v20 = vpack.c.bf16 %v7252_v32, %v7251_v4  ;;  %v17898_v28 = vld [vmem:[%s22143_s2 + $0x120] sm:$0xff]  }
 0x4f1   : > { %14978 = vmatmul.mubr.bf16.gmra.mrb[8].mxu1 %v20474_v36  ;;  %5839 = vst [vmem:[#allocation3 + $0xa8] sm:$0xff] %v5825_v29  ;;  %v5785_v56 = vadd.f32 %v20428_v16, %v5771_v48  ;;  %v5802_v0 = vmax.f32 %v5788_v26, 0.0  ;;  %v5829_v38 = vmul.f32 %v5815_v35, %v5801_v24  ;;  %v7257_v48 = vpack.c.bf16 %v7246_v30, %v7245_v25  ;;  %v7431_v25 = vld [vmem:[#allocation3 + $0x33] sm:$0xff]  ;;  %v7432_v24 = vld [vmem:[#allocation3 + $0x3b] sm:$0xff]  ;;  %v9512_v4 = vld [vmem:[#allocation3 + $0xe6] sm:$0xff] }
 0x4f2   : > { %15166 = vmatmul.mubr.bf16.gmra.mrb[20].mxu0 %v20355_v40  ;;  %14981 = vmatprep.mubr.msk.bf16.mxu1 %vm17953_vm1, %v17952_v21  ;;  %v5810_v40 = vld [vmem:[%s22145_s4 + $0x88] sm:$0xff]  ;;  %v17900_v30 = vld [vmem:[%s22143_s2 + $0x130] sm:$0xff]  }
 0x4f3   : > { %15169 = vmatprep.mubr.msk.bf16.mxu0 %vm17953_vm1, %v17952_v21  ;;  %15006 = vmatpush3.bf16.msra.mxu1 %v17736_v41  ;;  %v5824_v27 = vmul.f32 %v5810_v40, %v5796_v61  ;;  %v5924_v41 = vmul.f32 %v5910_v37, %v5896_v34  ;;  %v5883_v61 = vadd.f32 %v20428_v16, %v5869_v33  ;;  %v5799_v40 = vmax.f32 %v5785_v56, 0.0  ;;  %v5816_v37 = vld [vmem:[%s22145_s4 + $0xb8] sm:$0xff] }
 0x4f4   : > { %15007 = vmatprep.subr.bf16.mxu1 %v17952_v21  ;;  %v5885_v34 = vadd.f32 %v20428_v16, %v5871_v22  ;;  %v5830_v42 = vmul.f32 %v5816_v37, %v5802_v0  ;;  %5843 = vst [vmem:[#allocation3 + $0xc8] sm:$0xff] %v5829_v38  ;;  %v5775_v33 = vmul.f32 %v20422_v10, %v5761_v49  ;;  %v5860_v56 = vld [vmem:[%s20035_s7 + $0x138] sm:$0xff]  ;;  %v7434_v38 = vld [vmem:[#allocation3 + $0x4b] sm:$0xff] }
 0x4f5   : > { %5838 = vst [vmem:[#allocation3 + $0xa0] sm:$0xff] %v5824_v27  ;;  %5938 = vst [vmem:[#allocation3 + $0x120] sm:$0xff] %v5924_v41  ;;  %v5813_v27 = vld [vmem:[%s22145_s4 + $0xa0] sm:$0xff]  ;;  %v5897_v5 = vmax.f32 %v5883_v61, 0.0  ;;  %v5874_v59 = vmul.f32 %v20422_v10, %v5860_v56  ;;  %v6497_v35 = vld [vmem:[#allocation3 + $0x77] sm:$0xff] }
 0x4f6   : > { %v5827_v7 = vmul.f32 %v5813_v27, %v5799_v40  ;;  %v5899_v41 = vmax.f32 %v5885_v34, 0.0  ;;  %5844 = vst [vmem:[#allocation3 + $0xd0] sm:$0xff] %v5830_v42  ;;  %v7248_v61 = vld [vmem:[#allocation3 + $0x62] sm:$0xff]  ;;  %v17760_v56 = vld [vmem:[%s22143_s2 + $0x70] sm:$0xff]  }
 0x4f7   : > { %15008 = vmatpush3.bf16.msra.mxu1 %v17738_v55  ;;  %v7243_v55 = vld [vmem:[#allocation3 + $0x3a] sm:$0xff]  ;;  %v5925_v17 = vmul.f32 %v5911_v11, %v5897_v5  ;;  %v5888_v13 = vadd.f32 %v20428_v16, %v5874_v59  ;;  %v7433_v34 = vld [vmem:[#allocation3 + $0x43] sm:$0xff] }
 0x4f8   : > { %15009 = vmatprep.subr.bf16.mxu1 %v17952_v21  ;;  %v7256_v12 = vpack.c.bf16 %v7244_v43, %v7243_v55  ;;  %5841 = vst [vmem:[#allocation3 + $0xb8] sm:$0xff] %v5827_v7  ;;  %v5859_v55 = vld [vmem:[%s20035_s7 + $0x130] sm:$0xff]  ;;  %v5789_v43 = vadd.f32 %v20428_v16, %v5775_v33  ;;  %v5817_v27 = vld [vmem:[%s22145_s4 + $0xc0] sm:$0xff]  ;;  %v7445_v0 = vpack.c.bf16 %v7433_v34, %v7432_v24  ;;  %v6684_v59 = vld [vmem:[#allocation3 + $0x68] sm:$0xff] }
 0x4f9   : > { %14982 = vmatmul.mubr.bf16.gmra.mrb[12].mxu1 %v20508_v15  ;;  %5939 = vst [vmem:[#allocation3 + $0x128] sm:$0xff] %v5925_v17  ;;  %v5873_v58 = vmul.f32 %v20422_v10, %v5859_v55  ;;  %v5902_v5 = vmax.f32 %v5888_v13, 0.0  ;;  %v7249_v17 = vld [vmem:[#allocation3 + $0x6a] sm:$0xff]  ;;  %v6498_v37 = vld [vmem:[#allocation3 + $0x7f] sm:$0xff]  ;;  %v7756_v24 = vld [vmem:[#allocation3 + $0x96] sm:$0xff] }
 0x4fa   : > { %15170 = vmatmul.mubr.bf16.gmra.mrb[24].mxu0 %v7072_v6  ;;  %14985 = vmatprep.mubr.msk.bf16.mxu1 %vm17953_vm1, %v17952_v21  ;;  %v20586_v6 = vpack.c.bf16 %v6307_v39, %v6306_v51  ;;  %v17744_v51 = vld [vmem:[%s22143_s2 + $0x220] sm:$0xff]   ;;  %v5927_v39 = vmul.f32 %v5913_v46, %v5899_v41  ;;  %v5803_v62 = vmax.f32 %v5789_v43, 0.0  ;;  %v7435_v41 = vld [vmem:[#allocation3 + $0x53] sm:$0xff]  ;;  %v6505_v46 = vpack.c.bf16 %v6498_v37, %v6497_v35 }
 0x4fb   : > { %15189 = vmatprep.mubr.msk.bf16.mxu0 %vm17953_vm1, %v17952_v21  ;;  %15010 = vmatpush3.bf16.msra.mxu1 %v17740_v52  ;;  %v5912_v52 = vld [vmem:[%s22145_s4 + $0x118] sm:$0xff]  ;;  %v5887_v40 = vadd.f32 %v20428_v16, %v5873_v58  ;;  %v6683_v42 = vld [vmem:[#allocation3 + $0x60] sm:$0xff]  ;;  %v17753_v58 = vld [vmem:[%s22143_s2 + $0x48] sm:$0xff]  }
 0x4fc   : > { %15011 = vmatprep.subr.bf16.mxu1 %v17952_v21  ;;  %v5926_v54 = vmul.f32 %v5912_v52, %v5898_v9  ;;  %5941 = vst [vmem:[#allocation3 + $0x138] sm:$0xff] %v5927_v39  ;;  %v5831_v7 = vmul.f32 %v5817_v27, %v5803_v62  ;;  %v5930_v52 = vmul.f32 %v5916_v8, %v5902_v5  ;;  %v7436_v49 = vld [vmem:[#allocation3 + $0x5b] sm:$0xff]  ;;  %v17757_v39 = vld [vmem:[%s22143_s2 + $0x68] sm:$0xff]   ;;  %v6685_v43 = vld [vmem:[#allocation3 + $0x70] sm:$0xff] }
 0x4fd   : > { %v5901_v3 = vmax.f32 %v5887_v40, 0.0  ;;  %v17762_v40 = vld [vmem:[%s22143_s2 + $0x78] sm:$0xff]   ;;  %v6693_v13 = vpack.c.bf16 %v6685_v43, %v6684_v59  ;;  %v17755_v62 = vld [vmem:[%s22143_s2 + $0x50] sm:$0xff]   ;;  %v7441_v5 = vld [vmem:[#allocation3 + $0x83] sm:$0xff] }
 0x4fe   : > { %5940 = vst [vmem:[#allocation3 + $0x130] sm:$0xff] %v5926_v54  ;;  %5845 = vst [vmem:[#allocation3 + $0xd8] sm:$0xff] %v5831_v7  ;;  %v17747_v54 = vld [vmem:[%s22143_s2 + $0x238] sm:$0xff]  }
 0x4ff   : > { %15012 = vmatpush3.bf16.msra.mxu1 %v17742_v23  ;;  %v5872_v23 = vmul.f32 %v20422_v10, %v5858_v53  ;;  %v17745_v10 = vld [vmem:[%s22143_s2 + $0x228] sm:$0xff]   ;;  %5944 = vst [vmem:[#allocation3 + $0x150] sm:$0xff] %v5930_v52  ;;  %v17756_v27 = vld [vmem:[%s22143_s2 + $0x58] sm:$0xff]  }
 0x500   : > { %16727 = vmatprep.subr.bf16.mxu1 %v17952_v21  ;;  %v7253_v53 = vld [vmem:[#allocation3 + $0x8a] sm:$0xff]  ;;  %v17902_v7 = vld [vmem:[#allocation3 + $0x78] sm:$0xff] }
 0x501   : > { %14986 = vmatmul.mubr.bf16.gmra.mrb[16].mxu1 %v20547_v57  ;;  %v5886_v29 = vadd.f32 %v20428_v16, %v5872_v23  ;;  %v5915_v16 = vld [vmem:[%s22145_s4 + $0x130] sm:$0xff]  ;;  %v17759_v52 = vld [vmem:[%s22143_s2 + $0x68] sm:$0xff]   ;;  %v7757_v34 = vld [vmem:[#allocation3 + $0x9e] sm:$0xff] }
 0x502   : > { %15190 = vmatmul.mubr.bf16.vlgmr.msra.gmra.mrb[0].mxu0 %v7255_v1  ;;  %14989 = vmatprep.mubr.msk.bf16.mxu1 %vm17953_vm1, %v17952_v21  ;;  %v20625_v1 = vpack.c.bf16 %v6309_v2, %v6308_v19  ;;  %v5929_v11 = vmul.f32 %v5915_v16, %v5901_v3  ;;  %v17896_v19 = vld [vmem:[%s22143_s2 + $0x110] sm:$0xff]   ;;  %v7440_v3 = vld [vmem:[#allocation3 + $0x7b] sm:$0xff]  ;;  %v7768_v37 = vpack.c.bf16 %v7757_v34, %v7756_v24 }
 0x503   : > { %15218 = vmatpush3.bf16.msra.mxu0 %v17737_v47  ;;  %15193 = vmatprep.mubr.msk.bf16.mxu0 %vm17953_vm1, %v17952_v21  ;;  %v5900_v45 = vmax.f32 %v5886_v29, 0.0  ;;  %v5914_v47 = vld [vmem:[%s22145_s4 + $0x128] sm:$0xff]  ;;  %v7254_v2 = vld [vmem:[#allocation3 + $0x92] sm:$0xff]  ;;  %v17903_v16 = vld [vmem:[#allocation3 + $0x80] sm:$0xff] }
 0x504   : > { %15219 = vmatprep.subr.bf16.mxu0 %v17952_v21  ;;  %5943 = vst [vmem:[#allocation3 + $0x148] sm:$0xff] %v5929_v11  ;;  %v7261_v22 = vpack.c.bf16 %v7254_v2, %v7253_v53  ;;  %v7430_v23 = vld [vmem:[#allocation3 + $0x2b] sm:$0xff]  ;;  %v6694_v8 = vpack.c.bf16 %v17903_v16, %v17902_v7  ;;  %v17758_v11 = vld [vmem:[%s22143_s2 + $0x60] sm:$0xff]   ;;  %v17771_v35 = vld [vmem:[%s22143_s2 + $0x18] sm:$0xff]  }
 0x505   : > { %v5928_v44 = vmul.f32 %v5914_v47, %v5900_v45  ;;  %v7444_v26 = vpack.c.bf16 %v7431_v25, %v7430_v23  ;;  %v17749_v29 = vld [vmem:[%s22143_s2 + $0x48] sm:$0xff]   ;;  %v17751_v45 = vld [vmem:[%s22143_s2 + $0x58] sm:$0xff]   ;;  %v17754_v47 = vld [vmem:[%s22143_s2 + $0x60] sm:$0xff]  }
 0x506   : > { %v17765_v53 = vld [vmem:[%s22143_s2] sm:$0xff]   ;;  %v17767_v25 = vld [vmem:[%s22143_s2 + $0x8] sm:$0xff]   ;;  %v17778_v43 = vld [vmem:[%s22143_s2 + $0x38] sm:$0xff]  }
 0x507   : > { %15220 = vmatpush3.bf16.msra.mxu0 %v17739_v60  ;;  %5942 = vst [vmem:[#allocation3 + $0x140] sm:$0xff] %v5928_v44  ;;  %v7247_v60 = vld [vmem:[#allocation3 + $0x5a] sm:$0xff]  ;;  %v7754_v2 = vld [vmem:[#allocation3 + $0x86] sm:$0xff]  ;;  %v9521_v59 = vld [vmem:[#allocation3 + $0x12e] sm:$0xff] }
 0x508   : > { %15221 = vmatprep.subr.bf16.mxu0 %v17952_v21  ;;  %v7258_v9 = vpack.c.bf16 %v7248_v61, %v7247_v60  ;;  %v17752_v44 = vld [vmem:[%s22143_s2 + $0x40] sm:$0xff]   ;;  %v7438_v60 = vld [vmem:[#allocation3 + $0x6b] sm:$0xff]  ;;  %v7439_v61 = vld [vmem:[#allocation3 + $0x73] sm:$0xff] }
 0x509   : > { %14990 = vmatmul.mubr.bf16.gmra.mrb[20].mxu1 %v20586_v6  ;;  %v9515_v23 = vld [vmem:[#allocation3 + $0xfe] sm:$0xff]  ;;  %v7764_v7 = vld [vmem:[#allocation3 + $0xd6] sm:$0xff] }
 0x50a   : > { %15194 = vmatmul.mubr.bf16.gmra.mrb[4].mxu0 %v7256_v12  ;;  %14993 = vmatprep.mubr.msk.bf16.mxu1 %vm17953_vm1, %v17952_v21  ;;  %v17746_v12 = vld [vmem:[%s22143_s2 + $0x230] sm:$0xff]   ;;  %v7765_v16 = vld [vmem:[#allocation3 + $0xde] sm:$0xff] }
 0x50b   : > { %15197 = vmatprep.mubr.msk.bf16.mxu0 %vm17953_vm1, %v17952_v21  ;;  %15222 = vmatpush3.bf16.msra.mxu0 %v17741_v63  ;;  %v7250_v63 = vld [vmem:[#allocation3 + $0x72] sm:$0xff] }
 0x50c   : > { %15223 = vmatprep.subr.bf16.mxu0 %v17952_v21  ;;  %v7259_v18 = vpack.c.bf16 %v7250_v63, %v7249_v17  ;;  %v7443_v17 = vld [vmem:[#allocation3 + $0x93] sm:$0xff] }
 0x50d   : > { %v17761_v63 = vld [vmem:[%s22143_s2 + $0x70] sm:$0xff]   ;;  %v17787_v24 = vld [vmem:[%s22143_s2 + $0x98] sm:$0xff]  }
 0x50f   : > { %15224 = vmatpush3.bf16.msra.mxu0 %v17743_v31  ;;  %v17901_v31 = vld [vmem:[%s22143_s2 + $0x138] sm:$0xff]  }
 0x510   : > { %15225 = vmatprep.subr.bf16.mxu0 %v17952_v21 }
 0x511   : > { %14994 = vmatmul.mubr.bf16.gmra.mrb[24].mxu1 %v20625_v1 }
 0x512   : > { %15198 = vmatmul.mubr.bf16.gmra.mrb[8].mxu0 %v7257_v48  ;;  %15013 = vmatprep.mubr.msk.bf16.mxu1 %vm17953_vm1, %v17952_v21  ;;  %v6682_v48 = vld [vmem:[#allocation3 + $0x58] sm:$0xff] }
 0x513   : > { %15201 = vmatprep.mubr.msk.bf16.mxu0 %vm17953_vm1, %v17952_v21  ;;  %15226 = vmatpush3.bf16.msra.mxu0 %v17744_v51  ;;  %v7437_v51 = vld [vmem:[#allocation3 + $0x63] sm:$0xff]  ;;  %v6692_v33 = vpack.c.bf16 %v6683_v42, %v6682_v48 }
 0x514   : > { %15227 = vmatprep.subr.bf16.mxu0 %v17952_v21  ;;  %v7447_v55 = vpack.c.bf16 %v7437_v51, %v7436_v49  ;;  %v9519_v48 = vld [vmem:[#allocation3 + $0x11e] sm:$0xff]  ;;  %v17774_v42 = vld [vmem:[%s22143_s2 + $0x28] sm:$0xff]  }
 0x515   : > { %v17775_v49 = vld [vmem:[%s22143_s2 + $0x28] sm:$0xff]  }
 0x517   : > { %15228 = vmatpush3.bf16.msra.mxu0 %v17745_v10  ;;  %v7448_v10 = vpack.c.bf16 %v7439_v61, %v7438_v60  ;;  %v17779_v60 = vld [vmem:[%s22143_s2 + $0x38] sm:$0xff]  }
 0x518   : > { %15229 = vmatprep.subr.bf16.mxu0 %v17952_v21 }
 0x519   : > { %15014 = vmatmul.mubr.bf16.vlgmr.msra.gmra.mrb[0].mxu1 %v20441_v50  ;;  %v17895_v50 = vld [vmem:[%s22143_s2 + $0x108] sm:$0xff]  }
 0x51a   : > { %15202 = vmatmul.mubr.bf16.gmra.mrb[12].mxu0 %v7258_v9  ;;  %16735 = vmatpush3.bf16.msra.mxu1 %v17894_v14  ;;  %v7449_v9 = vpack.c.bf16 %v7441_v5, %v7440_v3 }
 0x51b   : > { %15017 = vmatprep.mubr.msk.bf16.mxu1 %vm17953_vm1, %v17952_v21  ;;  %16728 = vmatprep.subr.bf16.mxu1 %v17952_v21 }
 0x51c   : > { %15205 = vmatprep.mubr.msk.bf16.mxu0 %vm17953_vm1, %v17952_v21  ;;  %15230 = vmatpush3.bf16.msra.mxu0 %v17746_v12  ;;  %v7442_v12 = vld [vmem:[#allocation3 + $0x8b] sm:$0xff] }
 0x51d   : > { %15231 = vmatprep.subr.bf16.mxu0 %v17952_v21  ;;  %v7450_v14 = vpack.c.bf16 %v7443_v17, %v7442_v12  ;;  %v7715_v12 = vld [vmem:[#allocation3 + $0x75] sm:$0xff]  ;;  %v7716_v17 = vld [vmem:[#allocation3 + $0x7d] sm:$0xff] }
 0x51e   : > { %16736 = vmatpush3.bf16.msra.mxu1 %v17895_v50  ;;  %v7752_v50 = vld [vmem:[#allocation3 + $0x76] sm:$0xff] }
 0x51f   : > { %16729 = vmatprep.subr.bf16.mxu1 %v17952_v21 }
 0x520   : > { %15232 = vmatpush3.bf16.msra.mxu0 %v17747_v54  ;;  %v17763_v54 = vld [vmem:[%s22143_s2 + $0x78] sm:$0xff]  }
 0x521   : > { %15018 = vmatmul.mubr.bf16.gmra.mrb[4].mxu1 %v20474_v36  ;;  %15657 = vmatprep.subr.bf16.mxu0 %v17952_v21  ;;  %v17897_v36 = vld [vmem:[%s22143_s2 + $0x118] sm:$0xff]  }
 0x522   : > { %15206 = vmatmul.mubr.bf16.gmra.mrb[16].mxu0 %v7259_v18  ;;  %15021 = vmatprep.mubr.msk.bf16.mxu1 %vm17953_vm1, %v17952_v21  ;;  %v7753_v18 = vld [vmem:[#allocation3 + $0x7e] sm:$0xff] }
 0x523   : > { %16737 = vmatpush3.bf16.msra.mxu1 %v17896_v19  ;;  %15209 = vmatprep.mubr.msk.bf16.mxu0 %vm17953_vm1, %v17952_v21  ;;  %v9513_v19 = vld [vmem:[#allocation3 + $0xee] sm:$0xff]  ;;  %v7766_v32 = vpack.c.bf16 %v7753_v18, %v7752_v50  ;;  %v17780_v50 = vld [vmem:[%s22143_s2 + $0x80] sm:$0xff]  }
 0x524   : > { %16730 = vmatprep.subr.bf16.mxu1 %v17952_v21 }
 0x527   : > { %16738 = vmatpush3.bf16.msra.mxu1 %v17897_v36  ;;  %v9526_v36 = vpack.c.bf16 %v9513_v19, %v9512_v4  ;;  %v17781_v4 = vld [vmem:[%s22143_s2 + $0x80] sm:$0xff]  }
 0x528   : > { %16731 = vmatprep.subr.bf16.mxu1 %v17952_v21  ;;  %v7717_v19 = vld [vmem:[#allocation3 + $0x85] sm:$0xff] }
 0x529   : > { %15022 = vmatmul.mubr.bf16.gmra.mrb[8].mxu1 %v20508_v15  ;;  %v17899_v15 = vld [vmem:[%s22143_s2 + $0x128] sm:$0xff]  }
 0x52a   : > { %15210 = vmatmul.mubr.bf16.gmra.mrb[20].mxu0 %v7260_v20  ;;  %15025 = vmatprep.mubr.msk.bf16.mxu1 %vm17953_vm1, %v17952_v21  ;;  %v17764_v20 = vld [vmem:[%s22143_s2] sm:$0xff]  }
 0x52b   : > { %15213 = vmatprep.mubr.msk.bf16.mxu0 %vm17953_vm1, %v17952_v21  ;;  %16739 = vmatpush3.bf16.msra.mxu1 %v17898_v28  ;;  %v7755_v28 = vld [vmem:[#allocation3 + $0x8e] sm:$0xff] }
 0x52c   : > { %16732 = vmatprep.subr.bf16.mxu1 %v17952_v21 }
 0x52f   : > { %16740 = vmatpush3.bf16.msra.mxu1 %v17899_v15  ;;  %v9514_v15 = vld [vmem:[#allocation3 + $0xf6] sm:$0xff] }
 0x530   : > { %16733 = vmatprep.subr.bf16.mxu1 %v17952_v21 }
 0x531   : > { %15026 = vmatmul.mubr.bf16.gmra.mrb[12].mxu1 %v20547_v57  ;;  %v17748_v57 = vld [vmem:[%s22143_s2 + $0x40] sm:$0xff]  }
 0x532   : > { %15214 = vmatmul.mubr.bf16.gmra.mrb[24].mxu0 %v7261_v22  ;;  %15029 = vmatprep.mubr.msk.bf16.mxu1 %vm17953_vm1, %v17952_v21  ;;  %v17766_v22 = vld [vmem:[%s22143_s2 + $0x8] sm:$0xff]  }
 0x533   : > { %15233 = vmatprep.mubr.msk.bf16.mxu0 %vm17953_vm1, %v17952_v21  ;;  %16741 = vmatpush3.bf16.msra.mxu1 %v17900_v30  ;;  %v7767_v30 = vpack.c.bf16 %v7755_v28, %v7754_v2  ;;  %v17783_v2 = vld [vmem:[%s22143_s2 + $0x88] sm:$0xff]  }
 0x534   : > { %16734 = vmatprep.subr.bf16.mxu1 %v17952_v21 }
 0x537   : > { %16742 = vmatpush3.bf16.msra.mxu1 %v17901_v31  ;;  %v17769_v31 = vld [vmem:[%s22143_s2 + $0x10] sm:$0xff]  }
 0x538   : > { %15261 = vmatprep.subr.bf16.mxu1 %v17952_v21 }
 0x539   : > { %15030 = vmatmul.mubr.bf16.gmra.mrb[16].mxu1 %v20586_v6  ;;  %v17750_v6 = vld [vmem:[%s22143_s2 + $0x50] sm:$0xff]  }
 0x53a   : > { %15234 = vmatmul.mubr.bf16.vlgmr.msra.gmra.mrb[0].mxu0 %v7444_v26  ;;  %15033 = vmatprep.mubr.msk.bf16.mxu1 %vm17953_vm1, %v17952_v21  ;;  %v9527_v26 = vpack.c.bf16 %v9515_v23, %v9514_v15  ;;  %v17784_v15 = vld [vmem:[%s22143_s2 + $0x90] sm:$0xff]  }
 0x53b   : > { %15658 = vmatpush3.bf16.msra.mxu0 %v17748_v57  ;;  %15237 = vmatprep.mubr.msk.bf16.mxu0 %vm17953_vm1, %v17952_v21  ;;  %v17768_v57 = vld [vmem:[%s22143_s2 + $0x10] sm:$0xff]  }
 0x53c   : > { %15659 = vmatprep.subr.bf16.mxu0 %v17952_v21  ;;  %v17785_v23 = vld [vmem:[%s22143_s2 + $0x90] sm:$0xff]  }
 0x53f   : > { %15660 = vmatpush3.bf16.msra.mxu0 %v17749_v29  ;;  %v9516_v29 = vld [vmem:[#allocation3 + $0x106] sm:$0xff] }
 0x540   : > { %15661 = vmatprep.subr.bf16.mxu0 %v17952_v21 }
 0x541   : > { %15034 = vmatmul.mubr.bf16.gmra.mrb[20].mxu1 %v20625_v1  ;;  %v7446_v1 = vpack.c.bf16 %v7435_v41, %v7434_v38  ;;  %v17772_v41 = vld [vmem:[%s22143_s2 + $0x20] sm:$0xff]  }
 0x542   : > { %15238 = vmatmul.mubr.bf16.gmra.mrb[4].mxu0 %v7445_v0  ;;  %15037 = vmatprep.mubr.msk.bf16.mxu1 %vm17953_vm1, %v17952_v21  ;;  %v9517_v0 = vld [vmem:[#allocation3 + $0x10e] sm:$0xff] }
 0x543   : > { %15241 = vmatprep.mubr.msk.bf16.mxu0 %vm17953_vm1, %v17952_v21  ;;  %15662 = vmatpush3.bf16.msra.mxu0 %v17750_v6  ;;  %v17770_v6 = vld [vmem:[%s22143_s2 + $0x18] sm:$0xff]   ;;  %v9528_v38 = vpack.c.bf16 %v9517_v0, %v9516_v29  ;;  %v17788_v0 = vld [vmem:[%s22143_s2 + $0xa0] sm:$0xff]  }
 0x544   : > { %15663 = vmatprep.subr.bf16.mxu0 %v17952_v21 }
 0x547   : > { %15664 = vmatpush3.bf16.msra.mxu0 %v17751_v45  ;;  %v17773_v45 = vld [vmem:[%s22143_s2 + $0x20] sm:$0xff]  }
 0x548   : > { %15665 = vmatprep.subr.bf16.mxu0 %v17952_v21 }
 0x549   : > { %15038 = vmatmul.mubr.bf16.gmra.mrb[24].mxu1 %v6505_v46  ;;  %v7758_v46 = vld [vmem:[#allocation3 + $0xa6] sm:$0xff] }
 0x54a   : > { %15242 = vmatmul.mubr.bf16.gmra.mrb[8].mxu0 %v7446_v1  ;;  %15073 = vmatprep.mubr.msk.bf16.mxu1 %vm17953_vm1, %v17952_v21  ;;  %v7759_v1 = vld [vmem:[#allocation3 + $0xae] sm:$0xff] }
 0x54b   : > { %15245 = vmatprep.mubr.msk.bf16.mxu0 %vm17953_vm1, %v17952_v21  ;;  %15666 = vmatpush3.bf16.msra.mxu0 %v17754_v47  ;;  %v9518_v47 = vld [vmem:[#allocation3 + $0x116] sm:$0xff]  ;;  %v7769_v51 = vpack.c.bf16 %v7759_v1, %v7758_v46  ;;  %v7721_v46 = vld [vmem:[#allocation3 + $0xa5] sm:$0xff]  ;;  %v7722_v1 = vld [vmem:[#allocation3 + $0xad] sm:$0xff] }
 0x54c   : > { %15667 = vmatprep.subr.bf16.mxu0 %v17952_v21 }
 0x54f   : > { %15668 = vmatpush3.bf16.msra.mxu0 %v17757_v39  ;;  %v9529_v39 = vpack.c.bf16 %v9519_v48, %v9518_v47  ;;  %v17905_v47 = vld [vmem:[#allocation5 + $0x1] ss:$0 sm:$0xff] }
 0x550   : > { %15669 = vmatprep.subr.bf16.mxu0 %v17952_v21 }
 0x551   : > { %15074 = vmatmul.mubr.bf16.vlgmr.msra.gmra.mrb[16].mxu1 %v6692_v33  ;;  %v17777_v33 = vld [vmem:[%s22143_s2 + $0x30] sm:$0xff]  }
 0x552   : > { %15246 = vmatmul.mubr.bf16.gmra.mrb[12].mxu0 %v7447_v55  ;;  %15262 = vmatpush3.bf16.msra.mxu1 %v17752_v44  ;;  %v17776_v44 = vld [vmem:[%s22143_s2 + $0x30] sm:$0xff]  }
 0x553   : > { %15263 = vmatprep.subr.bf16.mxu1 %v17952_v21  ;;  %15077 = vmatprep.mubr.msk.bf16.mxu1 %vm17953_vm1, %v17952_v21  ;;  %v7760_v55 = vld [vmem:[#allocation3 + $0xb6] sm:$0xff] }
 0x554   : > { %15249 = vmatprep.mubr.msk.bf16.mxu0 %vm17953_vm1, %v17952_v21  ;;  %15670 = vmatpush3.bf16.msra.mxu0 %v17760_v56  ;;  %v7761_v56 = vld [vmem:[#allocation3 + $0xbe] sm:$0xff] }
 0x555   : > { %15671 = vmatprep.subr.bf16.mxu0 %v17952_v21  ;;  %v7770_v61 = vpack.c.bf16 %v7761_v56, %v7760_v55  ;;  %v7732_v56 = vpack.c.bf16 %v7722_v1, %v7721_v46  ;;  %v17803_v46 = vld [vmem:[%s22143_s2 + $0xd8] sm:$0xff]  }
 0x556   : > { %15264 = vmatpush3.bf16.msra.mxu1 %v17753_v58  ;;  %v9520_v58 = vld [vmem:[#allocation3 + $0x126] sm:$0xff] }
 0x557   : > { %15265 = vmatprep.subr.bf16.mxu1 %v17952_v21 }
 0x558   : > { %15672 = vmatpush3.bf16.msra.mxu0 %v17762_v40  ;;  %v9530_v40 = vpack.c.bf16 %v9521_v59, %v9520_v58  ;;  %v5917_v58 = vld [vmem:[%s22145_s4 + $0x140] sm:$0xff]  ;;  %v5918_v59 = vld [vmem:[%s22145_s4 + $0x148] sm:$0xff] }
 0x559   : > { %15078 = vmatmul.mubr.bf16.gmra.mrb[20].mxu1 %v6693_v13  ;;  %15701 = vmatprep.subr.bf16.mxu0 %v17952_v21  ;;  %v7762_v13 = vld [vmem:[#allocation3 + $0xc6] sm:$0xff] }
 0x55a   : > { %15250 = vmatmul.mubr.bf16.gmra.mrb[16].mxu0 %v7448_v10  ;;  %15266 = vmatpush3.bf16.msra.mxu1 %v17755_v62  ;;  %v7763_v10 = vld [vmem:[#allocation3 + $0xce] sm:$0xff]  ;;  %v9522_v62 = vld [vmem:[#allocation3 + $0x136] sm:$0xff] }
 0x55b   : > { %15267 = vmatprep.subr.bf16.mxu1 %v17952_v21  ;;  %15081 = vmatprep.mubr.msk.bf16.mxu1 %vm17953_vm1, %v17952_v21  ;;  %v7771_v3 = vpack.c.bf16 %v7763_v10, %v7762_v13  ;;  %v17793_v13 = vld [vmem:[%s22143_s2 + $0xb0] sm:$0xff]  }
 0x55c   : > { %15253 = vmatprep.mubr.msk.bf16.mxu0 %vm17953_vm1, %v17952_v21  ;;  %v7723_v10 = vld [vmem:[#allocation3 + $0xb5] sm:$0xff] }
 0x55e   : > { %15268 = vmatpush3.bf16.msra.mxu1 %v17756_v27  ;;  %v9523_v27 = vld [vmem:[#allocation3 + $0x13e] sm:$0xff] }
 0x55f   : > { %15269 = vmatprep.subr.bf16.mxu1 %v17952_v21  ;;  %v9531_v5 = vpack.c.bf16 %v9523_v27, %v9522_v62  ;;  %v7724_v62 = vld [vmem:[#allocation3 + $0xbd] sm:$0xff]  ;;  %v9483_v27 = vld [vmem:[#allocation3 + $0x125] sm:$0xff] }
 0x561   : > { %15082 = vmatmul.mubr.bf16.gmra.mrb[24].mxu1 %v6694_v8  ;;  %v9524_v8 = vld [vmem:[#allocation3 + $0x146] sm:$0xff] }
 0x562   : > { %15254 = vmatmul.mubr.bf16.gmra.mrb[20].mxu0 %v7449_v9  ;;  %15270 = vmatpush3.bf16.msra.mxu1 %v17758_v11  ;;  %v9525_v9 = vld [vmem:[#allocation3 + $0x14e] sm:$0xff]  ;;  %v7772_v11 = vpack.c.bf16 %v7765_v16, %v7764_v7  ;;  %v17795_v7 = vld [vmem:[%s22143_s2 + $0xb8] sm:$0xff]   ;;  %v7733_v16 = vpack.c.bf16 %v7724_v62, %v7723_v10 }
 0x563   : > { %15271 = vmatprep.subr.bf16.mxu1 %v17952_v21  ;;  %15257 = vmatprep.mubr.msk.bf16.mxu0 %vm17953_vm1, %v17952_v21 }
 0x564   : > { %15277 = vmatprep.mubr.msk.bf16.mxu1 %vm17953_vm1, %v17952_v21 }
 0x566   : > { %15272 = vmatpush3.bf16.msra.mxu1 %v17759_v52  ;;  %v9532_v52 = vpack.c.bf16 %v9525_v9, %v9524_v8  ;;  %v7725_v9 = vld [vmem:[#allocation3 + $0xc5] sm:$0xff] }
 0x567   : > { %15273 = vmatprep.subr.bf16.mxu1 %v17952_v21 }
 0x56a   : > { %15258 = vmatmul.mubr.bf16.gmra.mrb[24].mxu0 %v7450_v14  ;;  %15274 = vmatpush3.bf16.msra.mxu1 %v17761_v63  ;;  %v9475_v14 = vld [vmem:[#allocation3 + $0xe5] sm:$0xff]  ;;  %v9476_v63 = vld [vmem:[#allocation3 + $0xed] sm:$0xff] }
 0x56b   : > { %15275 = vmatprep.subr.bf16.mxu1 %v17952_v21  ;;  %15673 = vmatprep.mubr.msk.bf16.mxu0 %vm17953_vm1, %v17952_v21  ;;  %v9489_v18 = vpack.c.bf16 %v9476_v63, %v9475_v14  ;;  %v7727_v63 = vld [vmem:[#allocation3 + $0xd5] sm:$0xff] }
 0x56e   : > { %15276 = vmatpush3.bf16.msra.mxu1 %v17763_v54  ;;  %v7729_v54 = vpack.c.bf16 %v7716_v17, %v7715_v12  ;;  %v9486_v12 = vld [vmem:[#allocation3 + $0x13d] sm:$0xff] }
 0x56f   : > { %15305 = vmatprep.subr.bf16.mxu1 %v17952_v21 }
 0x571   : > { %15278 = vmatmul.mubr.bf16.vlgmr.msra.gmra.mrb[28].mxu1 %v7766_v32  ;;  %v7718_v32 = vld [vmem:[#allocation3 + $0x8d] sm:$0xff] }
 0x572   : > { %15306 = vmatpush3.bf16.msra.mxu1 %v17764_v20  ;;  %15674 = vmatmul.mubr.bf16.vlgmr.msra.gmra.mrb[28].mxu0 %v9526_v36  ;;  %v17782_v20 = vld [vmem:[%s22143_s2 + $0x88] sm:$0xff]   ;;  %v9477_v36 = vld [vmem:[#allocation3 + $0xf5] sm:$0xff]  ;;  %v7730_v28 = vpack.c.bf16 %v7718_v32, %v7717_v19 }
 0x573   : > { %15702 = vmatpush3.bf16.msra.mxu0 %v17765_v53  ;;  %15281 = vmatprep.mubr.msk.bf16.mxu1 %vm17953_vm1, %v17952_v21  ;;  %v9478_v53 = vld [vmem:[#allocation3 + $0xfd] sm:$0xff] }
 0x574   : > { %15307 = vmatprep.subr.bf16.mxu1 %v17952_v21  ;;  %15677 = vmatprep.mubr.msk.bf16.mxu0 %vm17953_vm1, %v17952_v21  ;;  %v8063_v32 = vld [vmem:[#allocation3 + $0x77] sm:$0xff] }
 0x575   : > { %15703 = vmatprep.subr.bf16.mxu0 %v17952_v21 }
 0x576   : > { %15308 = vmatpush3.bf16.msra.mxu1 %v17766_v22  ;;  %v9490_v22 = vpack.c.bf16 %v9478_v53, %v9477_v36  ;;  %v9823_v36 = vld [vmem:[#allocation3 + $0xe7] sm:$0xff]  ;;  %v9824_v53 = vld [vmem:[#allocation3 + $0xef] sm:$0xff] }
 0x577   : > { %15704 = vmatpush3.bf16.msra.mxu0 %v17767_v25  ;;  %15309 = vmatprep.subr.bf16.mxu1 %v17952_v21  ;;  %v7719_v25 = vld [vmem:[#allocation3 + $0x95] sm:$0xff] }
 0x578   : > { %15705 = vmatprep.subr.bf16.mxu0 %v17952_v21 }
 0x579   : > { %15282 = vmatmul.mubr.bf16.gmra.mrb[32].mxu1 %v7767_v30  ;;  %v7720_v30 = vld [vmem:[#allocation3 + $0x9d] sm:$0xff] }
 0x57a   : > { %15678 = vmatmul.mubr.bf16.gmra.mrb[32].mxu0 %v9527_v26  ;;  %15285 = vmatprep.mubr.msk.bf16.mxu1 %vm17953_vm1, %v17952_v21  ;;  %v9479_v26 = vld [vmem:[#allocation3 + $0x105] sm:$0xff]  ;;  %v7731_v34 = vpack.c.bf16 %v7720_v30, %v7719_v25  ;;  %v8066_v25 = vld [vmem:[#allocation3 + $0x8f] sm:$0xff] }
 0x57b   : > { %15310 = vmatpush3.bf16.msra.mxu1 %v17768_v57  ;;  %15681 = vmatprep.mubr.msk.bf16.mxu0 %vm17953_vm1, %v17952_v21  ;;  %v9480_v57 = vld [vmem:[#allocation3 + $0x10d] sm:$0xff] }
 0x57c   : > { %15706 = vmatpush3.bf16.msra.mxu0 %v17769_v31  ;;  %15311 = vmatprep.subr.bf16.mxu1 %v17952_v21  ;;  %v17786_v31 = vld [vmem:[%s22143_s2 + $0x98] sm:$0xff]   ;;  %v9491_v29 = vpack.c.bf16 %v9480_v57, %v9479_v26  ;;  %v17798_v30 = vld [vmem:[%s22143_s2 + $0xc8] sm:$0xff]  }
 0x57d   : > { %15707 = vmatprep.subr.bf16.mxu0 %v17952_v21  ;;  %v9825_v26 = vld [vmem:[#allocation3 + $0xf7] sm:$0xff]  ;;  %v9826_v57 = vld [vmem:[#allocation3 + $0xff] sm:$0xff] }
 0x57f   : > { %15312 = vmatpush3.bf16.msra.mxu1 %v17770_v6  ;;  %v5861_v6 = vld [vmem:[%s20035_s7 + $0x140] sm:$0xff] }
 0x580   : > { %15708 = vmatpush3.bf16.msra.mxu0 %v17771_v35  ;;  %15313 = vmatprep.subr.bf16.mxu1 %v17952_v21  ;;  %v5862_v35 = vld [vmem:[%s20035_s7 + $0x148] sm:$0xff] }
 0x581   : > { %15286 = vmatmul.mubr.bf16.gmra.mrb[36].mxu1 %v7768_v37  ;;  %15709 = vmatprep.subr.bf16.mxu0 %v17952_v21  ;;  %v17789_v37 = vld [vmem:[%s22143_s2 + $0xa0] sm:$0xff]  }
 0x582   : > { %15682 = vmatmul.mubr.bf16.gmra.mrb[36].mxu0 %v9528_v38  ;;  %15289 = vmatprep.mubr.msk.bf16.mxu1 %vm17953_vm1, %v17952_v21  ;;  %v17904_v38 = vld [vmem:[#allocation5] ss:$0 sm:$0xff] }
 0x583   : > { %15685 = vmatprep.mubr.msk.bf16.mxu0 %vm17953_vm1, %v17952_v21  ;;  %15314 = vmatpush3.bf16.msra.mxu1 %v17772_v41  ;;  %v5875_v41 = vmul.f32 %v17904_v38, %v5861_v6  ;;  %v8067_v6 = vld [vmem:[#allocation3 + $0x97] sm:$0xff] }
 0x584   : > { %15710 = vmatpush3.bf16.msra.mxu0 %v17773_v45  ;;  %15315 = vmatprep.subr.bf16.mxu1 %v17952_v21  ;;  %v5876_v45 = vmul.f32 %v17904_v38, %v5862_v35  ;;  %v8068_v35 = vld [vmem:[#allocation3 + $0x9f] sm:$0xff]  ;;  %v9828_v38 = vld [vmem:[#allocation3 + $0x10f] sm:$0xff] }
 0x585   : > { %15711 = vmatprep.subr.bf16.mxu0 %v17952_v21  ;;  %v5889_v48 = vadd.f32 %v17905_v47, %v5875_v41  ;;  %v17802_v41 = vld [vmem:[%s22143_s2 + $0xd8] sm:$0xff]  }
 0x587   : > { %15316 = vmatpush3.bf16.msra.mxu1 %v17774_v42  ;;  %v5890_v42 = vadd.f32 %v17905_v47, %v5876_v45  ;;  %v21063_v47 = vpack.c.bf16 %v8068_v35, %v8067_v6 }
 0x588   : > { %15712 = vmatpush3.bf16.msra.mxu0 %v17775_v49  ;;  %15317 = vmatprep.subr.bf16.mxu1 %v17952_v21  ;;  %v9481_v49 = vld [vmem:[#allocation3 + $0x115] sm:$0xff] }
 0x589   : > { %15290 = vmatmul.mubr.bf16.gmra.mrb[40].mxu1 %v7769_v51  ;;  %15713 = vmatprep.subr.bf16.mxu0 %v17952_v21  ;;  %v9482_v51 = vld [vmem:[#allocation3 + $0x11d] sm:$0xff]  ;;  %v5904_v55 = vmax.f32 %v5890_v42, 0.0 }
 0x58a   : > { %15686 = vmatmul.mubr.bf16.gmra.mrb[40].mxu0 %v9529_v39  ;;  %15293 = vmatprep.mubr.msk.bf16.mxu1 %vm17953_vm1, %v17952_v21  ;;  %v17790_v39 = vld [vmem:[%s22143_s2 + $0xa8] sm:$0xff]  }
 0x58b   : > { %15689 = vmatprep.mubr.msk.bf16.mxu0 %vm17953_vm1, %v17952_v21  ;;  %15318 = vmatpush3.bf16.msra.mxu1 %v17776_v44  ;;  %v17791_v44 = vld [vmem:[%s22143_s2 + $0xa8] sm:$0xff]  }
 0x58c   : > { %15714 = vmatpush3.bf16.msra.mxu0 %v17777_v33  ;;  %15319 = vmatprep.subr.bf16.mxu1 %v17952_v21  ;;  %v5903_v33 = vmax.f32 %v5889_v48, 0.0 }
 0x58d   : > { %15715 = vmatprep.subr.bf16.mxu0 %v17952_v21 }
 0x58f   : > { %15320 = vmatpush3.bf16.msra.mxu1 %v17778_v43  ;;  %v9492_v43 = vpack.c.bf16 %v9482_v51, %v9481_v49  ;;  %v17804_v51 = vld [vmem:[%s22143_s2 + $0xe0] sm:$0xff]  }
 0x590   : > { %15716 = vmatpush3.bf16.msra.mxu0 %v17779_v60  ;;  %15349 = vmatprep.subr.bf16.mxu1 %v17952_v21  ;;  %v20975_v60 = vmul.f32 %v5917_v58, %v5903_v33  ;;  %v8070_v33 = vld [vmem:[#allocation3 + $0xaf] sm:$0xff] }
 0x591   : > { %15294 = vmatmul.mubr.bf16.gmra.mrb[44].mxu1 %v7770_v61  ;;  %15745 = vmatprep.subr.bf16.mxu0 %v17952_v21  ;;  %v20977_v61 = vmul.f32 %v5918_v59, %v5904_v55  ;;  %v9829_v55 = vld [vmem:[#allocation3 + $0x117] sm:$0xff]  ;;  %v17806_v58 = vld [vmem:[%s22143_s2 + $0xe8] sm:$0xff]  }
 0x592   : > { %15690 = vmatmul.mubr.bf16.gmra.mrb[44].mxu0 %v9530_v40  ;;  %15297 = vmatprep.mubr.msk.bf16.mxu1 %vm17953_vm1, %v17952_v21  ;;  %v17792_v40 = vld [vmem:[%s22143_s2 + $0xb0] sm:$0xff]   ;;  %5945 = vst [vmem:[#allocation3 + $0x158] sm:$0xff] %v20975_v60 }
 0x593   : > { %15693 = vmatprep.mubr.msk.bf16.mxu0 %vm17953_vm1, %v17952_v21  ;;  %5946 = vst [vmem:[#allocation3 + $0x160] sm:$0xff] %v20977_v61 }
 0x599   : > { %15298 = vmatmul.mubr.bf16.gmra.mrb[48].mxu1 %v7771_v3  ;;  %v9484_v3 = vld [vmem:[#allocation3 + $0x12d] sm:$0xff] }
 0x59a   : > { %15694 = vmatmul.mubr.bf16.gmra.mrb[48].mxu0 %v9531_v5  ;;  %15301 = vmatprep.mubr.msk.bf16.mxu1 %vm17953_vm1, %v17952_v21  ;;  %v17794_v5 = vld [vmem:[%s22143_s2 + $0xb8] sm:$0xff]   ;;  %v9493_v8 = vpack.c.bf16 %v9484_v3, %v9483_v27  ;;  %v17808_v3 = vld [vmem:[%s22143_s2 + $0xf0] sm:$0xff]  }
 0x59b   : > { %15697 = vmatprep.mubr.msk.bf16.mxu0 %vm17953_vm1, %v17952_v21 }
 0x5a1   : > { %15302 = vmatmul.mubr.bf16.gmra.mrb[52].mxu1 %v7772_v11  ;;  %v7726_v11 = vld [vmem:[#allocation3 + $0xcd] sm:$0xff] }
 0x5a2   : > { %15698 = vmatmul.mubr.bf16.gmra.mrb[52].mxu0 %v9532_v52  ;;  %15321 = vmatprep.mubr.msk.bf16.mxu1 %vm17953_vm1, %v17952_v21  ;;  %v9485_v52 = vld [vmem:[#allocation3 + $0x135] sm:$0xff]  ;;  %v7734_v17 = vpack.c.bf16 %v7726_v11, %v7725_v9 }
 0x5a3   : > { %15717 = vmatprep.mubr.msk.bf16.mxu0 %vm17953_vm1, %v17952_v21  ;;  %v9494_v14 = vpack.c.bf16 %v9486_v12, %v9485_v52  ;;  %v9832_v9 = vld [vmem:[#allocation3 + $0x12f] sm:$0xff]  ;;  %v17810_v11 = vld [vmem:[%s22143_s2 + $0xf8] sm:$0xff]  }
 0x5a4   : > { %v17811_v12 = vld [vmem:[%s22143_s2 + $0xf8] sm:$0xff]  }
 0x5a9   : > { %15322 = vmatmul.mubr.bf16.vlgmr.msra.gmra.mrb[28].mxu1 %v7729_v54  ;;  %v7728_v54 = vld [vmem:[#allocation3 + $0xdd] sm:$0xff] }
 0x5aa   : > { %15350 = vmatpush3.bf16.msra.mxu1 %v17780_v50  ;;  %15718 = vmatmul.mubr.bf16.vlgmr.msra.gmra.mrb[28].mxu0 %v9489_v18  ;;  %v9487_v50 = vld [vmem:[#allocation3 + $0x145] sm:$0xff]  ;;  %v9488_v18 = vld [vmem:[#allocation3 + $0x14d] sm:$0xff] }
 0x5ab   : > { %15746 = vmatpush3.bf16.msra.mxu0 %v17781_v4  ;;  %15325 = vmatprep.mubr.msk.bf16.mxu1 %vm17953_vm1, %v17952_v21  ;;  %v7735_v4 = vpack.c.bf16 %v7728_v54, %v7727_v63  ;;  %v9495_v19 = vpack.c.bf16 %v9488_v18, %v9487_v50  ;;  %v10219_v18 = vpack.c.bf16 %v20977_v61, %v20975_v60  ;;  %v17845_v60 = vld [vmem:[%s22143_s2 + $0x180] sm:$0xff]  }
 0x5ac   : > { %15351 = vmatprep.subr.bf16.mxu1 %v17952_v21  ;;  %15721 = vmatprep.mubr.msk.bf16.mxu0 %vm17953_vm1, %v17952_v21  ;;  %v8629_v61 = vld [vmem:[#allocation3 + $0x99] sm:$0xff] }
 0x5ad   : > { %15747 = vmatprep.subr.bf16.mxu0 %v17952_v21 }
 0x5ae   : > { %15352 = vmatpush3.bf16.msra.mxu1 %v17782_v20  ;;  %v8064_v20 = vld [vmem:[#allocation3 + $0x7f] sm:$0xff] }
 0x5af   : > { %15748 = vmatpush3.bf16.msra.mxu0 %v17783_v2  ;;  %15353 = vmatprep.subr.bf16.mxu1 %v17952_v21  ;;  %v8077_v2 = vpack.c.bf16 %v8064_v20, %v8063_v32  ;;  %v9833_v32 = vld [vmem:[#allocation3 + $0x137] sm:$0xff]  ;;  %v9834_v20 = vld [vmem:[#allocation3 + $0x13f] sm:$0xff] }
 0x5b0   : > { %15749 = vmatprep.subr.bf16.mxu0 %v17952_v21 }
 0x5b1   : > { %15326 = vmatmul.mubr.bf16.gmra.mrb[32].mxu1 %v7730_v28  ;;  %v17796_v28 = vld [vmem:[%s22143_s2 + $0xc0] sm:$0xff]  }
 0x5b2   : > { %15722 = vmatmul.mubr.bf16.gmra.mrb[32].mxu0 %v9490_v22  ;;  %15329 = vmatprep.mubr.msk.bf16.mxu1 %vm17953_vm1, %v17952_v21  ;;  %v21018_v22 = vpack.c.bf16 %v9824_v53, %v9823_v36 }
 0x5b3   : > { %15354 = vmatpush3.bf16.msra.mxu1 %v17784_v15  ;;  %15725 = vmatprep.mubr.msk.bf16.mxu0 %vm17953_vm1, %v17952_v21  ;;  %v17797_v15 = vld [vmem:[%s22143_s2 + $0xc0] sm:$0xff]  }
 0x5b4   : > { %15750 = vmatpush3.bf16.msra.mxu0 %v17785_v23  ;;  %15355 = vmatprep.subr.bf16.mxu1 %v17952_v21  ;;  %v8065_v23 = vld [vmem:[#allocation3 + $0x87] sm:$0xff] }
 0x5b5   : > { %15751 = vmatprep.subr.bf16.mxu0 %v17952_v21 }
 0x5b7   : > { %15356 = vmatpush3.bf16.msra.mxu1 %v17786_v31  ;;  %v17799_v31 = vld [vmem:[%s22143_s2 + $0xc8] sm:$0xff]  }
 0x5b8   : > { %15752 = vmatpush3.bf16.msra.mxu0 %v17787_v24  ;;  %15357 = vmatprep.subr.bf16.mxu1 %v17952_v21  ;;  %v21035_v24 = vpack.c.bf16 %v8066_v25, %v8065_v23  ;;  %v8075_v25 = vld [vmem:[#allocation3 + $0xd7] sm:$0xff] }
 0x5b9   : > { %15330 = vmatmul.mubr.bf16.gmra.mrb[36].mxu1 %v7731_v34  ;;  %15753 = vmatprep.subr.bf16.mxu0 %v17952_v21  ;;  %v21038_v34 = vpack.c.bf16 %v9826_v57, %v9825_v26  ;;  %v9835_v26 = vld [vmem:[#allocation3 + $0x147] sm:$0xff]  ;;  %v9836_v57 = vld [vmem:[#allocation3 + $0x14f] sm:$0xff] }
 0x5ba   : > { %15726 = vmatmul.mubr.bf16.gmra.mrb[36].mxu0 %v9491_v29  ;;  %15333 = vmatprep.mubr.msk.bf16.mxu1 %vm17953_vm1, %v17952_v21  ;;  %v17800_v29 = vld [vmem:[%s22143_s2 + $0xd0] sm:$0xff]  }
 0x5bb   : > { %15729 = vmatprep.mubr.msk.bf16.mxu0 %vm17953_vm1, %v17952_v21  ;;  %15358 = vmatpush3.bf16.msra.mxu1 %v17788_v0  ;;  %v17801_v0 = vld [vmem:[%s22143_s2 + $0xd0] sm:$0xff]  }
 0x5bc   : > { %15754 = vmatpush3.bf16.msra.mxu0 %v17789_v37  ;;  %15359 = vmatprep.subr.bf16.mxu1 %v17952_v21  ;;  %v9827_v37 = vld [vmem:[#allocation3 + $0x107] sm:$0xff] }
 0x5bd   : > { %15755 = vmatprep.subr.bf16.mxu0 %v17952_v21  ;;  %v21068_v42 = vpack.c.bf16 %v9828_v38, %v9827_v37  ;;  %v21160_v37 = vpack.c.bf16 %v9836_v57, %v9835_v26  ;;  %v17817_v26 = vld [vmem:[%s22143_s2 + $0x110] sm:$0xff]  }
 0x5bf   : > { %15360 = vmatpush3.bf16.msra.mxu1 %v17790_v39  ;;  %v17805_v39 = vld [vmem:[%s22143_s2 + $0xe0] sm:$0xff]  }
 0x5c0   : > { %15756 = vmatpush3.bf16.msra.mxu0 %v17791_v44  ;;  %15361 = vmatprep.subr.bf16.mxu1 %v17952_v21  ;;  %v8069_v44 = vld [vmem:[#allocation3 + $0xa7] sm:$0xff] }
 0x5c1   : > { %15334 = vmatmul.mubr.bf16.gmra.mrb[40].mxu1 %v7732_v56  ;;  %15757 = vmatprep.subr.bf16.mxu0 %v17952_v21  ;;  %v9830_v56 = vld [vmem:[#allocation3 + $0x11f] sm:$0xff] }
 0x5c2   : > { %15730 = vmatmul.mubr.bf16.gmra.mrb[40].mxu0 %v9492_v43  ;;  %15337 = vmatprep.mubr.msk.bf16.mxu1 %vm17953_vm1, %v17952_v21  ;;  %v17807_v43 = vld [vmem:[%s22143_s2 + $0xe8] sm:$0xff]   ;;  %v21098_v62 = vpack.c.bf16 %v9830_v56, %v9829_v55 }
 0x5c3   : > { %15733 = vmatprep.mubr.msk.bf16.mxu0 %vm17953_vm1, %v17952_v21  ;;  %15362 = vmatpush3.bf16.msra.mxu1 %v17792_v40 }
 0x5c4   : > { %15758 = vmatpush3.bf16.msra.mxu0 %v17793_v13  ;;  %15363 = vmatprep.subr.bf16.mxu1 %v17952_v21  ;;  %v21093_v13 = vpack.c.bf16 %v8070_v33, %v8069_v44 }
 0x5c5   : > { %15759 = vmatprep.subr.bf16.mxu0 %v17952_v21 }
 0x5c7   : > { %15364 = vmatpush3.bf16.msra.mxu1 %v17794_v5  ;;  %v17809_v5 = vld [vmem:[%s22143_s2 + $0xf0] sm:$0xff]  }
 0x5c8   : > { %15760 = vmatpush3.bf16.msra.mxu0 %v17795_v7  ;;  %15393 = vmatprep.subr.bf16.mxu1 %v17952_v21  ;;  %v8071_v7 = vld [vmem:[#allocation3 + $0xb7] sm:$0xff] }
 0x5c9   : > { %15338 = vmatmul.mubr.bf16.gmra.mrb[44].mxu1 %v7733_v16  ;;  %15789 = vmatprep.subr.bf16.mxu0 %v17952_v21  ;;  %v8072_v16 = vld [vmem:[#allocation3 + $0xbf] sm:$0xff] }
 0x5ca   : > { %15734 = vmatmul.mubr.bf16.gmra.mrb[44].mxu0 %v9493_v8  ;;  %15341 = vmatprep.mubr.msk.bf16.mxu1 %vm17953_vm1, %v17952_v21  ;;  %v9831_v8 = vld [vmem:[#allocation3 + $0x127] sm:$0xff] }
 0x5cb   : > { %15737 = vmatprep.mubr.msk.bf16.mxu0 %vm17953_vm1, %v17952_v21  ;;  %v21128_v54 = vpack.c.bf16 %v9832_v9, %v9831_v8 }
 0x5d1   : > { %15342 = vmatmul.mubr.bf16.gmra.mrb[48].mxu1 %v7734_v17 }
 0x5d2   : > { %15738 = vmatmul.mubr.bf16.gmra.mrb[48].mxu0 %v9494_v14  ;;  %15345 = vmatprep.mubr.msk.bf16.mxu1 %vm17953_vm1, %v17952_v21  ;;  %v21123_v14 = vpack.c.bf16 %v8072_v16, %v8071_v7 }
 0x5d3   : > { %15741 = vmatprep.mubr.msk.bf16.mxu0 %vm17953_vm1, %v17952_v21 }
 0x5d9   : > { %15346 = vmatmul.mubr.bf16.gmra.mrb[52].mxu1 %v7735_v4  ;;  %v8073_v4 = vld [vmem:[#allocation3 + $0xc7] sm:$0xff] }
 0x5da   : > { %15742 = vmatmul.mubr.bf16.gmra.mrb[52].mxu0 %v9495_v19  ;;  %15365 = vmatprep.mubr.msk.bf16.mxu1 %vm17953_vm1, %v17952_v21  ;;  %v8074_v19 = vld [vmem:[#allocation3 + $0xcf] sm:$0xff] }
 0x5db   : > { %15761 = vmatprep.mubr.msk.bf16.mxu0 %vm17953_vm1, %v17952_v21 }
 0x5e1   : > { %15366 = vmatmul.mubr.bf16.vlgmr.msra.gmra.mrb[28].mxu1 %v8077_v2  ;;  %v21142_v2 = vpack.c.bf16 %v8074_v19, %v8073_v4 }
 0x5e2   : > { %15394 = vmatpush3.bf16.msra.mxu1 %v17796_v28  ;;  %15762 = vmatmul.mubr.bf16.vlgmr.msra.gmra.mrb[28].mxu0 %v21018_v22 }
 0x5e3   : > { %15790 = vmatpush3.bf16.msra.mxu0 %v17797_v15  ;;  %15369 = vmatprep.mubr.msk.bf16.mxu1 %vm17953_vm1, %v17952_v21  ;;  %v21146_v15 = vpack.c.bf16 %v9834_v20, %v9833_v32 }
 0x5e4   : > { %15395 = vmatprep.subr.bf16.mxu1 %v17952_v21  ;;  %15765 = vmatprep.mubr.msk.bf16.mxu0 %vm17953_vm1, %v17952_v21 }
 0x5e5   : > { %15791 = vmatprep.subr.bf16.mxu0 %v17952_v21 }
 0x5e6   : > { %15396 = vmatpush3.bf16.msra.mxu1 %v17798_v30  ;;  %v8076_v30 = vld [vmem:[#allocation3 + $0xdf] sm:$0xff] }
 0x5e7   : > { %15792 = vmatpush3.bf16.msra.mxu0 %v17799_v31  ;;  %15397 = vmatprep.subr.bf16.mxu1 %v17952_v21 }
 0x5e8   : > { %15793 = vmatprep.subr.bf16.mxu0 %v17952_v21 }
 0x5e9   : > { %15370 = vmatmul.mubr.bf16.gmra.mrb[32].mxu1 %v21035_v24 }
 0x5ea   : > { %15766 = vmatmul.mubr.bf16.gmra.mrb[32].mxu0 %v21038_v34  ;;  %15373 = vmatprep.mubr.msk.bf16.mxu1 %vm17953_vm1, %v17952_v21 }
 0x5eb   : > { %15398 = vmatpush3.bf16.msra.mxu1 %v17800_v29  ;;  %15769 = vmatprep.mubr.msk.bf16.mxu0 %vm17953_vm1, %v17952_v21  ;;  %v7633_v29 = vld [vmem:[%s22145_s4] sm:$0xff] }
 0x5ec   : > { %v21057_v45 = vpop.f32.mrb[0].mxu1  ;;  %15794 = vmatpush3.bf16.msra.mxu0 %v17801_v0  ;;  %15399 = vmatprep.subr.bf16.mxu1 %v17952_v21  ;;  %v21157_v0 = vpack.c.bf16 %v8076_v30, %v8075_v25 }
 0x5ed   : > { %v15015_v1 = vpop.f32.mrb[1].mxu1  ;;  %15795 = vmatprep.subr.bf16.mxu0 %v17952_v21 }
 0x5ee   : > { %v21066_v48 = vpop.f32.mrb[2].mxu1 }
 0x5ef   : > { %v15016_v49 = vpop.f32.mrb[3].mxu1  ;;  %15400 = vmatpush3.bf16.msra.mxu1 %v17802_v41  ;;  %v7634_v41 = vld [vmem:[%s22145_s4 + $0x8] sm:$0xff] }
 0x5f0   : > { %15796 = vmatpush3.bf16.msra.mxu0 %v17803_v46  ;;  %15401 = vmatprep.subr.bf16.mxu1 %v17952_v21 }
 0x5f1   : > { %15374 = vmatmul.mubr.bf16.gmra.mrb[36].mxu1 %v21063_v47  ;;  %15797 = vmatprep.subr.bf16.mxu0 %v17952_v21 }
 0x5f2   : > { %15770 = vmatmul.mubr.bf16.gmra.mrb[36].mxu0 %v21068_v42  ;;  %15377 = vmatprep.mubr.msk.bf16.mxu1 %vm17953_vm1, %v17952_v21 }
 0x5f3   : > { %15773 = vmatprep.mubr.msk.bf16.mxu0 %vm17953_vm1, %v17952_v21  ;;  %15402 = vmatpush3.bf16.msra.mxu1 %v17804_v51 }
 0x5f4   : > { %v21087_v59 = vpop.f32.mrb[4].mxu1  ;;  %15798 = vmatpush3.bf16.msra.mxu0 %v17805_v39  ;;  %15403 = vmatprep.subr.bf16.mxu1 %v17952_v21 }
 0x5f5   : > { %v15019_v40 = vpop.f32.mrb[5].mxu1  ;;  %15799 = vmatprep.subr.bf16.mxu0 %v17952_v21 }
 0x5f6   : > { %v21096_v10 = vpop.f32.mrb[6].mxu1 }
 0x5f7   : > { %v15020_v27 = vpop.f32.mrb[7].mxu1  ;;  %15404 = vmatpush3.bf16.msra.mxu1 %v17806_v58 }
 0x5f8   : > { %15800 = vmatpush3.bf16.msra.mxu0 %v17807_v43  ;;  %15405 = vmatprep.subr.bf16.mxu1 %v17952_v21  ;;  %v17812_v43 = vld [vmem:[%s22143_s2 + $0x100] sm:$0xff]   ;;  %v7636_v27 = vld [vmem:[%s22145_s4 + $0x18] sm:$0xff] }
 0x5f9   : > { %15378 = vmatmul.mubr.bf16.gmra.mrb[40].mxu1 %v21093_v13  ;;  %15801 = vmatprep.subr.bf16.mxu0 %v17952_v21 }
 0x5fa   : > { %15774 = vmatmul.mubr.bf16.gmra.mrb[40].mxu0 %v21098_v62  ;;  %15381 = vmatprep.mubr.msk.bf16.mxu1 %vm17953_vm1, %v17952_v21 }
 0x5fb   : > { %15777 = vmatprep.mubr.msk.bf16.mxu0 %vm17953_vm1, %v17952_v21  ;;  %15406 = vmatpush3.bf16.msra.mxu1 %v17808_v3  ;;  %v17813_v3 = vld [vmem:[%s22143_s2 + $0x100] sm:$0xff]  }
 0x5fc   : > { %v21117_v52 = vpop.f32.mrb[8].mxu1  ;;  %15802 = vmatpush3.bf16.msra.mxu0 %v17809_v5  ;;  %15407 = vmatprep.subr.bf16.mxu1 %v17952_v21 }
 0x5fd   : > { %v15023_v17 = vpop.f32.mrb[9].mxu1  ;;  %15803 = vmatprep.subr.bf16.mxu0 %v17952_v21 }
 0x5fe   : > { %v21126_v63 = vpop.f32.mrb[10].mxu1 }
 0x5ff   : > { %v15024_v50 = vpop.f32.mrb[11].mxu1  ;;  %15408 = vmatpush3.bf16.msra.mxu1 %v17810_v11  ;;  %v17814_v11 = vld [vmem:[%s22143_s2 + $0x108] sm:$0xff]  }
 0x600   : > { %15804 = vmatpush3.bf16.msra.mxu0 %v17811_v12  ;;  %15437 = vmatprep.subr.bf16.mxu1 %v17952_v21  ;;  %v7637_v50 = vld [vmem:[%s22145_s4 + $0x20] sm:$0xff] }
 0x601   : > { %15382 = vmatmul.mubr.bf16.gmra.mrb[44].mxu1 %v21123_v14  ;;  %15833 = vmatprep.subr.bf16.mxu0 %v17952_v21 }
 0x602   : > { %15778 = vmatmul.mubr.bf16.gmra.mrb[44].mxu0 %v21128_v54  ;;  %15385 = vmatprep.mubr.msk.bf16.mxu1 %vm17953_vm1, %v17952_v21 }
 0x603   : > { %15781 = vmatprep.mubr.msk.bf16.mxu0 %vm17953_vm1, %v17952_v21 }
 0x604   : > { %v21140_v36 = vpop.f32.mrb[12].mxu1 }
 0x605   : > { %v15027_v53 = vpop.f32.mrb[13].mxu1 }
 0x606   : > { %v21144_v28 = vpop.f32.mrb[14].mxu1  ;;  %v7638_v53 = vld [vmem:[%s22145_s4 + $0x28] sm:$0xff] }
 0x607   : > { %v15028_v23 = vpop.f32.mrb[15].mxu1 }
 0x608   : > { %v17816_v23 = vld [vmem:[%s22143_s2 + $0x110] sm:$0xff]  }
 0x609   : > { %15386 = vmatmul.mubr.bf16.gmra.mrb[48].mxu1 %v21142_v2 }
 0x60a   : > { %15782 = vmatmul.mubr.bf16.gmra.mrb[48].mxu0 %v21146_v15  ;;  %15389 = vmatprep.mubr.msk.bf16.mxu1 %vm17953_vm1, %v17952_v21 }
 0x60b   : > { %15785 = vmatprep.mubr.msk.bf16.mxu0 %vm17953_vm1, %v17952_v21 }
 0x60d   : > { %v7550_v31 = vpop.f32.mrb[0].mxu0 }
 0x60e   : > { %v16743_v6 = vadd.f32 %v7550_v31, %v21057_v45  ;;  %v15235_v35 = vpop.f32.mrb[1].mxu0 }
 0x60f   : > { %v7553_v38 = vpop.f32.mrb[2].mxu0 }
 0x610   : > { %7619 = vst [vmem:[%s20035_s7] sm:$0xff] %v16743_v6  ;;  %v7647_v46 = vmul.f32 %v16743_v6, %v7633_v29  ;;  %v16744_v1 = vadd.f32 %v7553_v38, %v21066_v48  ;;  %v15236_v49 = vpop.f32.mrb[3].mxu0  ;;  %v7635_v48 = vld [vmem:[%s22145_s4 + $0x10] sm:$0xff] }
 0x611   : > { %15390 = vmatmul.mubr.bf16.gmra.mrb[52].mxu1 %v21157_v0 }
 0x612   : > { %7620 = vst [vmem:[%s20035_s7 + $0x8] sm:$0xff] %v16744_v1  ;;  %v7648_v51 = vmul.f32 %v16744_v1, %v7634_v41  ;;  %15786 = vmatmul.mubr.bf16.gmra.mrb[52].mxu0 %v21160_v37  ;;  %15409 = vmatprep.mubr.msk.bf16.mxu1 %vm17953_vm1, %v17952_v21  ;;  %v7681_v45 = vmul.f32 %v16743_v6, %v7647_v46 }
 0x613   : > { %15805 = vmatprep.mubr.msk.bf16.mxu0 %vm17953_vm1, %v17952_v21 }
 0x614   : > { %v7661_v39 = vadd.f32 %v7648_v51, %v7647_v46  ;;  %v7682_v44 = vmul.f32 %v16744_v1, %v7648_v51  ;;  %v7639_v46 = vld [vmem:[%s22145_s4 + $0x30] sm:$0xff] }
 0x615   : > { %v7558_v33 = vpop.f32.mrb[4].mxu0 }
 0x616   : > { %v7695_v55 = vadd.f32 %v7682_v44, %v7681_v45  ;;  %v16745_v56 = vadd.f32 %v7558_v33, %v21087_v59  ;;  %v15239_v58 = vpop.f32.mrb[5].mxu0  ;;  %v7640_v33 = vld [vmem:[%s22145_s4 + $0x38] sm:$0xff] }
 0x617   : > { %v7561_v40 = vpop.f32.mrb[6].mxu0 }
 0x618   : > { %7621 = vst [vmem:[%s20035_s7 + $0x10] sm:$0xff] %v16745_v56  ;;  %v7649_v5 = vmul.f32 %v16745_v56, %v7635_v48  ;;  %v16746_v7 = vadd.f32 %v7561_v40, %v21096_v10  ;;  %v15240_v16 = vpop.f32.mrb[7].mxu0  ;;  %v17815_v10 = vld [vmem:[%s22143_s2 + $0x108] sm:$0xff]  }
 0x619   : > { %15410 = vmatmul.mubr.bf16.vlgmr.msra.gmra.mrb[28].mxu1 %v21035_v24 }
 0x61a   : > { %v7662_v59 = vadd.f32 %v7661_v39, %v7649_v5  ;;  %v7683_v8 = vmul.f32 %v16745_v56, %v7649_v5  ;;  %7622 = vst [vmem:[%s20035_s7 + $0x18] sm:$0xff] %v16746_v7  ;;  %v7650_v9 = vmul.f32 %v16746_v7, %v7636_v27  ;;  %15438 = vmatpush3.bf16.msra.mxu1 %v17812_v43 }
 0x61b   : > { %15806 = vmatmul.mubr.bf16.vlgmr.msra.gmra.mrb[28].mxu0 %v21038_v34  ;;  %15413 = vmatprep.mubr.msk.bf16.mxu1 %vm17953_vm1, %v17952_v21 }
 0x61c   : > { %15834 = vmatpush3.bf16.msra.mxu0 %v17813_v3  ;;  %v7696_v24 = vadd.f32 %v7695_v55, %v7683_v8  ;;  %v7663_v12 = vadd.f32 %v7662_v59, %v7650_v9  ;;  %v7684_v17 = vmul.f32 %v16746_v7, %v7650_v9  ;;  %15439 = vmatprep.subr.bf16.mxu1 %v17952_v21  ;;  %v17820_v55 = vld [vmem:[%s22143_s2 + $0x120] sm:$0xff]  }
 0x61d   : > { %15809 = vmatprep.mubr.msk.bf16.mxu0 %vm17953_vm1, %v17952_v21  ;;  %v7566_v34 = vpop.f32.mrb[8].mxu0  ;;  %15835 = vmatprep.subr.bf16.mxu0 %v17952_v21  ;;  %v7641_v8 = vld [vmem:[%s22145_s4 + $0x40] sm:$0xff] }
 0x61e   : > { %v7697_v4 = vadd.f32 %v7696_v24, %v7684_v17  ;;  %v16747_v19 = vadd.f32 %v7566_v34, %v21117_v52  ;;  %v15243_v32 = vpop.f32.mrb[9].mxu0  ;;  %15440 = vmatpush3.bf16.msra.mxu1 %v17814_v11  ;;  %v7642_v34 = vld [vmem:[%s22145_s4 + $0x48] sm:$0xff] }
 0x61f   : > { %v7569_v20 = vpop.f32.mrb[10].mxu0  ;;  %15441 = vmatprep.subr.bf16.mxu1 %v17952_v21 }
 0x620   : > { %15836 = vmatpush3.bf16.msra.mxu0 %v17815_v10  ;;  %7623 = vst [vmem:[%s20035_s7 + $0x20] sm:$0xff] %v16747_v19  ;;  %v7651_v25 = vmul.f32 %v16747_v19, %v7637_v50  ;;  %v16748_v30 = vadd.f32 %v7569_v20, %v21126_v63  ;;  %v15244_v52 = vpop.f32.mrb[11].mxu0  ;;  %v17818_v63 = vld [vmem:[%s22143_s2 + $0x118] sm:$0xff]  }
 0x621   : > { %15837 = vmatprep.subr.bf16.mxu0 %v17952_v21  ;;  %15414 = vmatmul.mubr.bf16.gmra.mrb[32].mxu1 %v21063_v47  ;;  %v17826_v52 = vld [vmem:[%s22143_s2 + $0x138] sm:$0xff]  }
 0x622   : > { %v7664_v57 = vadd.f32 %v7663_v12, %v7651_v25  ;;  %v7685_v31 = vmul.f32 %v16747_v19, %v7651_v25  ;;  %7624 = vst [vmem:[%s20035_s7 + $0x28] sm:$0xff] %v16748_v30  ;;  %v7652_v29 = vmul.f32 %v16748_v30, %v7638_v53  ;;  %15417 = vmatprep.mubr.msk.bf16.mxu1 %vm17953_vm1, %v17952_v21  ;;  %v17825_v53 = vld [vmem:[%s22143_s2 + $0x130] sm:$0xff]  }
 0x623   : > { %15810 = vmatmul.mubr.bf16.gmra.mrb[32].mxu0 %v21068_v42  ;;  %15442 = vmatpush3.bf16.msra.mxu1 %v17816_v23  ;;  %v17819_v42 = vld [vmem:[%s22143_s2 + $0x118] sm:$0xff]  }
 0x624   : > { %15813 = vmatprep.mubr.msk.bf16.mxu0 %vm17953_vm1, %v17952_v21  ;;  %v7698_v6 = vadd.f32 %v7697_v4, %v7685_v31  ;;  %v7665_v35 = vadd.f32 %v7664_v57, %v7652_v29  ;;  %v7686_v47 = vmul.f32 %v16748_v30, %v7652_v29  ;;  %v6826_v38 = vpop.f32.mrb[16].mxu1  ;;  %15838 = vmatpush3.bf16.msra.mxu0 %v17817_v26  ;;  %v17824_v4 = vld [vmem:[%s22143_s2 + $0x130] sm:$0xff]  }
 0x625   : > { %15443 = vmatprep.subr.bf16.mxu1 %v17952_v21  ;;  %v7574_v41 = vpop.f32.mrb[12].mxu0  ;;  %v15075_v1 = vpop.f32.mrb[17].mxu1  ;;  %15839 = vmatprep.subr.bf16.mxu0 %v17952_v21 }
 0x626   : > { %v7699_v49 = vadd.f32 %v7698_v6, %v7686_v47  ;;  %v16749_v51 = vadd.f32 %v7574_v41, %v21140_v36  ;;  %v15247_v45 = vpop.f32.mrb[13].mxu0  ;;  %v6829_v39 = vpop.f32.mrb[18].mxu1  ;;  %v17821_v36 = vld [vmem:[%s22143_s2 + $0x120] sm:$0xff]  }
 0x627   : > { %v7577_v44 = vpop.f32.mrb[14].mxu0  ;;  %v15076_v48 = vpop.f32.mrb[19].mxu1  ;;  %15444 = vmatpush3.bf16.msra.mxu1 %v17818_v63  ;;  %v7643_v63 = vld [vmem:[%s22145_s4 + $0x50] sm:$0xff] }
 0x628   : > { %7625 = vst [vmem:[%s20035_s7 + $0x30] sm:$0xff] %v16749_v51  ;;  %v7653_v56 = vmul.f32 %v16749_v51, %v7639_v46  ;;  %v16750_v58 = vadd.f32 %v7577_v44, %v21144_v28  ;;  %v15248_v43 = vpop.f32.mrb[15].mxu0  ;;  %15840 = vmatpush3.bf16.msra.mxu0 %v17819_v42  ;;  %15445 = vmatprep.subr.bf16.mxu1 %v17952_v21  ;;  %v17822_v28 = vld [vmem:[%s22143_s2 + $0x128] sm:$0xff]   ;;  %v7644_v46 = vld [vmem:[%s22145_s4 + $0x58] sm:$0xff] }
 0x629   : > { %15418 = vmatmul.mubr.bf16.gmra.mrb[36].mxu1 %v21093_v13  ;;  %15841 = vmatprep.subr.bf16.mxu0 %v17952_v21 }
 0x62a   : > { %v7666_v40 = vadd.f32 %v7665_v35, %v7653_v56  ;;  %v7687_v27 = vmul.f32 %v16749_v51, %v7653_v56  ;;  %7626 = vst [vmem:[%s20035_s7 + $0x38] sm:$0xff] %v16750_v58  ;;  %v7654_v3 = vmul.f32 %v16750_v58, %v7640_v33  ;;  %15421 = vmatprep.mubr.msk.bf16.mxu1 %vm17953_vm1, %v17952_v21 }
 0x62b   : > { %15814 = vmatmul.mubr.bf16.gmra.mrb[36].mxu0 %v21098_v62  ;;  %15446 = vmatpush3.bf16.msra.mxu1 %v17820_v55  ;;  %v17823_v62 = vld [vmem:[%s22143_s2 + $0x128] sm:$0xff]  }
 0x62c   : > { %15817 = vmatprep.mubr.msk.bf16.mxu0 %vm17953_vm1, %v17952_v21  ;;  %v7700_v13 = vadd.f32 %v7699_v49, %v7687_v27  ;;  %v7667_v5 = vadd.f32 %v7666_v40, %v7654_v3  ;;  %v7688_v7 = vmul.f32 %v16750_v58, %v7654_v3  ;;  %v6834_v16 = vpop.f32.mrb[20].mxu1  ;;  %15842 = vmatpush3.bf16.msra.mxu0 %v17821_v36  ;;  %v7645_v58 = vld [vmem:[%s22145_s4 + $0x60] sm:$0xff] }
 0x62d   : > { %15447 = vmatprep.subr.bf16.mxu1 %v17952_v21  ;;  %v7582_v59 = vpop.f32.mrb[16].mxu0  ;;  %v15079_v9 = vpop.f32.mrb[21].mxu1  ;;  %15843 = vmatprep.subr.bf16.mxu0 %v17952_v21 }
 0x62e   : > { %v7701_v11 = vadd.f32 %v7700_v13, %v7688_v7  ;;  %v16751_v10 = vadd.f32 %v7582_v59, %v6826_v38  ;;  %v15251_v24 = vpop.f32.mrb[17].mxu0  ;;  %v6837_v12 = vpop.f32.mrb[22].mxu1  ;;  %v10024_v59 = vld [vmem:[#allocation3 + $0x15f] sm:$0xff] }
 0x62f   : > { %v7585_v17 = vpop.f32.mrb[18].mxu0  ;;  %v15080_v50 = vpop.f32.mrb[23].mxu1  ;;  %15448 = vmatpush3.bf16.msra.mxu1 %v17822_v28  ;;  %v8440_v24 = vld [vmem:[#allocation3 + $0x90] sm:$0xff] }
 0x630   : > { %7627 = vst [vmem:[%s20035_s7 + $0x40] sm:$0xff] %v16751_v10  ;;  %v7655_v19 = vmul.f32 %v16751_v10, %v7641_v8  ;;  %v16752_v32 = vadd.f32 %v7585_v17, %v6829_v39  ;;  %v15252_v20 = vpop.f32.mrb[19].mxu0  ;;  %15844 = vmatpush3.bf16.msra.mxu0 %v17823_v62  ;;  %15449 = vmatprep.subr.bf16.mxu1 %v17952_v21  ;;  %v10023_v62 = vld [vmem:[#allocation3 + $0x157] sm:$0xff]  ;;  %v10200_v17 = vld [vmem:[#allocation3 + $0x100] sm:$0xff] }
 0x631   : > { %15422 = vmatmul.mubr.bf16.gmra.mrb[40].mxu1 %v21123_v14  ;;  %15845 = vmatprep.subr.bf16.mxu0 %v17952_v21  ;;  %v17828_v50 = vld [vmem:[%s22143_s2 + $0x140] sm:$0xff]   ;;  %v17830_v20 = vld [vmem:[%s22143_s2 + $0x148] sm:$0xff]  }
 0x632   : > { %v7668_v23 = vadd.f32 %v7667_v5, %v7655_v19  ;;  %v7689_v25 = vmul.f32 %v16751_v10, %v7655_v19  ;;  %7628 = vst [vmem:[%s20035_s7 + $0x48] sm:$0xff] %v16752_v32  ;;  %v7656_v30 = vmul.f32 %v16752_v32, %v7642_v34  ;;  %15425 = vmatprep.mubr.msk.bf16.mxu1 %vm17953_vm1, %v17952_v21  ;;  %v8441_v19 = vld [vmem:[#allocation3 + $0x98] sm:$0xff] }
 0x633   : > { %15818 = vmatmul.mubr.bf16.gmra.mrb[40].mxu0 %v21128_v54  ;;  %15450 = vmatpush3.bf16.msra.mxu1 %v17824_v4  ;;  %v17827_v54 = vld [vmem:[%s22143_s2 + $0x138] sm:$0xff]  }
 0x634   : > { %15821 = vmatprep.mubr.msk.bf16.mxu0 %vm17953_vm1, %v17952_v21  ;;  %v7702_v14 = vadd.f32 %v7701_v11, %v7689_v25  ;;  %v7669_v26 = vadd.f32 %v7668_v23, %v7656_v30  ;;  %v7690_v57 = vmul.f32 %v16752_v32, %v7656_v30  ;;  %v6842_v31 = vpop.f32.mrb[24].mxu1  ;;  %15846 = vmatpush3.bf16.msra.mxu0 %v17825_v53  ;;  %v8442_v32 = vld [vmem:[#allocation3 + $0xa0] sm:$0xff]  ;;  %v10201_v53 = vld [vmem:[#allocation3 + $0x108] sm:$0xff]  ;;  %v10202_v23 = vld [vmem:[#allocation3 + $0x110] sm:$0xff] }
 0x635   : > { %15451 = vmatprep.subr.bf16.mxu1 %v17952_v21  ;;  %v7590_v29 = vpop.f32.mrb[20].mxu0  ;;  %v15083_v6 = vpop.f32.mrb[25].mxu1  ;;  %15847 = vmatprep.subr.bf16.mxu0 %v17952_v21  ;;  %v17831_v25 = vld [vmem:[%s22143_s2 + $0x148] sm:$0xff]   ;;  %v8454_v30 = vpack.c.bf16 %v8442_v32, %v8441_v19 }
 0x636   : > { %v7703_v35 = vadd.f32 %v7702_v14, %v7690_v57  ;;  %v16753_v47 = vadd.f32 %v7590_v29, %v6834_v16  ;;  %v15255_v38 = vpop.f32.mrb[21].mxu0  ;;  %v6845_v42 = vpop.f32.mrb[26].mxu1  ;;  %v17832_v14 = vld [vmem:[%s22143_s2 + $0x150] sm:$0xff]   ;;  %v8443_v57 = vld [vmem:[#allocation3 + $0xa8] sm:$0xff]  ;;  %v10204_v29 = vld [vmem:[#allocation3 + $0x120] sm:$0xff] }
 0x637   : > { %v7593_v41 = vpop.f32.mrb[22].mxu0  ;;  %v15084_v1 = vpop.f32.mrb[27].mxu1  ;;  %15452 = vmatpush3.bf16.msra.mxu1 %v17826_v52  ;;  %v10214_v52 = vpack.c.bf16 %v10202_v23, %v10201_v53  ;;  %v17835_v6 = vld [vmem:[%s22143_s2 + $0x158] sm:$0xff]   ;;  %v17836_v38 = vld [vmem:[%s22143_s2 + $0x160] sm:$0xff]   ;;  %v17849_v53 = vld [vmem:[%s22143_s2 + $0x190] sm:$0xff]  }
 0x638   : > { %7629 = vst [vmem:[%s20035_s7 + $0x50] sm:$0xff] %v16753_v47  ;;  %v7657_v49 = vmul.f32 %v16753_v47, %v7643_v63  ;;  %v16754_v51 = vadd.f32 %v7593_v41, %v6837_v12  ;;  %v15256_v45 = vpop.f32.mrb[23].mxu0  ;;  %15848 = vmatpush3.bf16.msra.mxu0 %v17827_v54  ;;  %15481 = vmatprep.subr.bf16.mxu1 %v17952_v21  ;;  %v10199_v12 = vld [vmem:[#allocation3 + $0xf8] sm:$0xff]  ;;  %v10205_v1 = vld [vmem:[#allocation3 + $0x128] sm:$0xff] }
 0x639   : > { %15426 = vmatmul.mubr.bf16.gmra.mrb[44].mxu1 %v21142_v2  ;;  %15877 = vmatprep.subr.bf16.mxu0 %v17952_v21  ;;  %v10213_v4 = vpack.c.bf16 %v10200_v17, %v10199_v12  ;;  %v10203_v54 = vld [vmem:[#allocation3 + $0x118] sm:$0xff]  ;;  %v17839_v45 = vld [vmem:[%s22143_s2 + $0x168] sm:$0xff]   ;;  %v17844_v12 = vld [vmem:[%s22143_s2 + $0x180] sm:$0xff]  }
 0x63a   : > { %v7670_v39 = vadd.f32 %v7669_v26, %v7657_v49  ;;  %v7691_v44 = vmul.f32 %v16753_v47, %v7657_v49  ;;  %7630 = vst [vmem:[%s20035_s7 + $0x58] sm:$0xff] %v16754_v51  ;;  %v7658_v33 = vmul.f32 %v16754_v51, %v7644_v46  ;;  %15429 = vmatprep.mubr.msk.bf16.mxu1 %vm17953_vm1, %v17952_v21  ;;  %v17833_v26 = vld [vmem:[%s22143_s2 + $0x150] sm:$0xff]   ;;  %v17834_v63 = vld [vmem:[%s22143_s2 + $0x158] sm:$0xff]   ;;  %v8446_v46 = vld [vmem:[#allocation3 + $0xc0] sm:$0xff] }
 0x63b   : > { %15822 = vmatmul.mubr.bf16.gmra.mrb[44].mxu0 %v21146_v15  ;;  %v7646_v15 = vld [vmem:[%s22145_s4 + $0x68] sm:$0xff]  ;;  %v10215_v47 = vpack.c.bf16 %v10204_v29, %v10203_v54  ;;  %v8445_v41 = vld [vmem:[#allocation3 + $0xb8] sm:$0xff]  ;;  %v10206_v49 = vld [vmem:[#allocation3 + $0x130] sm:$0xff] }
 0x63c   : > { %15825 = vmatprep.mubr.msk.bf16.mxu0 %vm17953_vm1, %v17952_v21  ;;  %v7704_v48 = vadd.f32 %v7703_v35, %v7691_v44  ;;  %v7671_v55 = vadd.f32 %v7670_v39, %v7658_v33  ;;  %v7692_v56 = vmul.f32 %v16754_v51, %v7658_v33  ;;  %v17838_v51 = vld [vmem:[%s22143_s2 + $0x168] sm:$0xff]   ;;  %v8456_v39 = vpack.c.bf16 %v8446_v46, %v8445_v41  ;;  %v17840_v33 = vld [vmem:[%s22143_s2 + $0x170] sm:$0xff]   ;;  %v17852_v54 = vld [vmem:[%s22143_s2 + $0x1a0] sm:$0xff]  }
 0x63d   : > { %v7598_v2 = vpop.f32.mrb[24].mxu0  ;;  %v10216_v44 = vpack.c.bf16 %v10206_v49, %v10205_v1  ;;  %v8631_v23 = vld [vmem:[#allocation3 + $0xa9] sm:$0xff]  ;;  %v17853_v29 = vld [vmem:[%s22143_s2 + $0x1a0] sm:$0xff]  }
 0x63e   : > { %v7705_v43 = vadd.f32 %v7704_v48, %v7692_v56  ;;  %v16755_v36 = vadd.f32 %v7598_v2, %v6842_v31  ;;  %v15259_v40 = vpop.f32.mrb[25].mxu0  ;;  %v8444_v31 = vld [vmem:[#allocation3 + $0xb0] sm:$0xff]  ;;  %v10207_v2 = vld [vmem:[#allocation3 + $0x138] sm:$0xff] }
 0x63f   : > { %v7601_v27 = vpop.f32.mrb[26].mxu0  ;;  %v8455_v35 = vpack.c.bf16 %v8444_v31, %v8443_v57  ;;  %v17841_v48 = vld [vmem:[%s22143_s2 + $0x170] sm:$0xff]  }
 0x640   : > { %7631 = vst [vmem:[%s20035_s7 + $0x60] sm:$0xff] %v16755_v36  ;;  %v7659_v3 = vmul.f32 %v16755_v36, %v7645_v58  ;;  %v16756_v28 = vadd.f32 %v7601_v27, %v6845_v42  ;;  %v15260_v13 = vpop.f32.mrb[27].mxu0  ;;  %v17837_v42 = vld [vmem:[%s22143_s2 + $0x160] sm:$0xff]   ;;  %v8448_v56 = vld [vmem:[#allocation3 + $0xd0] sm:$0xff] }
 0x641   : > { %15430 = vmatmul.mubr.bf16.gmra.mrb[48].mxu1 %v21157_v0  ;;  %v10031_v0 = vpack.c.bf16 %v10024_v59, %v10023_v62  ;;  %v10208_v58 = vld [vmem:[#allocation3 + $0x140] sm:$0xff]  ;;  %v10210_v13 = vld [vmem:[#allocation3 + $0x150] sm:$0xff] }
 0x642   : > { %v7672_v5 = vadd.f32 %v7671_v55, %v7659_v3  ;;  %v7693_v7 = vmul.f32 %v16755_v36, %v7659_v3  ;;  %7632 = vst [vmem:[%s20035_s7 + $0x68] sm:$0xff] %v16756_v28  ;;  %v7660_v16 = vmul.f32 %v16756_v28, %v7646_v15  ;;  %15433 = vmatprep.mubr.msk.bf16.mxu1 %vm17953_vm1, %v17952_v21  ;;  %v8447_v55 = vld [vmem:[#allocation3 + $0xc8] sm:$0xff]  ;;  %v17843_v36 = vld [vmem:[%s22143_s2 + $0x178] sm:$0xff]   ;;  %v8450_v3 = vld [vmem:[#allocation3 + $0xe0] sm:$0xff] }
 0x643   : > { %15826 = vmatmul.mubr.bf16.gmra.mrb[48].mxu0 %v21160_v37  ;;  %v8439_v37 = vld [vmem:[#allocation3 + $0x88] sm:$0xff]  ;;  %v8457_v40 = vpack.c.bf16 %v8448_v56, %v8447_v55  ;;  %v10217_v27 = vpack.c.bf16 %v10208_v58, %v10207_v2  ;;  %v8449_v15 = vld [vmem:[#allocation3 + $0xd8] sm:$0xff]  ;;  %v8452_v62 = vld [vmem:[#allocation3 + $0xf0] sm:$0xff] }
 0x644   : > { %15829 = vmatprep.mubr.msk.bf16.mxu0 %vm17953_vm1, %v17952_v21  ;;  %v7706_v8 = vadd.f32 %v7705_v43, %v7693_v7  ;;  %v21328_v9 = vadd.f32 %v7672_v5, %v7660_v16  ;;  %v7694_v11 = vmul.f32 %v16756_v28, %v7660_v16  ;;  %v8453_v34 = vpack.c.bf16 %v8440_v24, %v8439_v37  ;;  %v17842_v43 = vld [vmem:[%s22143_s2 + $0x178] sm:$0xff]   ;;  %v10209_v28 = vld [vmem:[#allocation3 + $0x148] sm:$0xff]  ;;  %v17856_v1 = vld [vmem:[%s22143_s2 + $0x1b0] sm:$0xff]  }
 0x645   : > { %v8458_v5 = vpack.c.bf16 %v8450_v3, %v8449_v15  ;;  %v10218_v7 = vpack.c.bf16 %v10210_v13, %v10209_v28  ;;  %v8451_v16 = vld [vmem:[#allocation3 + $0xe8] sm:$0xff]  ;;  %v17857_v49 = vld [vmem:[%s22143_s2 + $0x1b0] sm:$0xff]   ;;  %v8637_v2 = vld [vmem:[#allocation3 + $0xd9] sm:$0xff] }
 0x646   : > { %v21330_v10 = vadd.f32 %v7706_v8, %v7694_v11  ;;  %v8459_v59 = vpack.c.bf16 %v8452_v62, %v8451_v16  ;;  %v8627_v8 = vld [vmem:[#allocation3 + $0x89] sm:$0xff]  ;;  %v8628_v11 = vld [vmem:[#allocation3 + $0x91] sm:$0xff]  ;;  %v10388_v37 = vld [vmem:[#allocation3 + $0x101] sm:$0xff] }
 0x647   : > { %v8641_v24 = vpack.c.bf16 %v8628_v11, %v8627_v8  ;;  %v8638_v58 = vld [vmem:[#allocation3 + $0xe1] sm:$0xff]  ;;  %v8639_v15 = vld [vmem:[#allocation3 + $0xe9] sm:$0xff]  ;;  %v8640_v3 = vld [vmem:[#allocation3 + $0xf1] sm:$0xff] }
 0x648   : > { %v10399_v28 = vld [vmem:[#allocation3 + $0x159] sm:$0xff]  ;;  %v10400_v13 = vld [vmem:[#allocation3 + $0x161] sm:$0xff]  ;;  %v17864_v11 = vld [vmem:[%s22143_s2 + $0x1d0] sm:$0xff]  }
 0x649   : > { %15434 = vmatmul.mubr.bf16.gmra.mrb[52].mxu1 %v21018_v22  ;;  %v17829_v22 = vld [vmem:[%s22143_s2 + $0x140] sm:$0xff]   ;;  %v17863_v8 = vld [vmem:[%s22143_s2 + $0x1c8] sm:$0xff]  }
 0x64a   : > { %15453 = vmatprep.mubr.msk.bf16.mxu1 %vm17953_vm1, %v17952_v21  ;;  %v17860_v16 = vld [vmem:[%s22143_s2 + $0x1c0] sm:$0xff]  }
 0x64b   : > { %15830 = vmatmul.mubr.bf16.gmra.mrb[52].mxu0 %v10031_v0  ;;  %v10387_v0 = vld [vmem:[#allocation3 + $0xf9] sm:$0xff] }
 0x64c   : > { %15849 = vmatprep.mubr.msk.bf16.mxu0 %vm17953_vm1, %v17952_v21  ;;  %v21435_v17 = vpack.c.bf16 %v10388_v37, %v10387_v0  ;;  %v17861_v62 = vld [vmem:[%s22143_s2 + $0x1c0] sm:$0xff]   ;;  %v17865_v0 = vld [vmem:[%s22143_s2 + $0x1d0] sm:$0xff]   ;;  %v17866_v37 = vld [vmem:[%s22143_s2 + $0x1d8] sm:$0xff]  }
 0x651   : > { %15454 = vmatmul.mubr.bf16.vlgmr.msra.gmra.mrb[28].mxu1 %v8453_v34  ;;  %v17846_v34 = vld [vmem:[%s22143_s2 + $0x188] sm:$0xff]  }
 0x652   : > { %15482 = vmatpush3.bf16.msra.mxu1 %v17828_v50  ;;  %15457 = vmatprep.mubr.msk.bf16.mxu1 %vm17953_vm1, %v17952_v21  ;;  %v10389_v50 = vld [vmem:[#allocation3 + $0x109] sm:$0xff] }
 0x653   : > { %15850 = vmatmul.mubr.bf16.vlgmr.msra.gmra.mrb[28].mxu0 %v10213_v4  ;;  %15483 = vmatprep.subr.bf16.mxu1 %v17952_v21  ;;  %v10390_v4 = vld [vmem:[#allocation3 + $0x111] sm:$0xff] }
 0x654   : > { %15878 = vmatpush3.bf16.msra.mxu0 %v17829_v22  ;;  %15853 = vmatprep.mubr.msk.bf16.mxu0 %vm17953_vm1, %v17952_v21  ;;  %v17847_v22 = vld [vmem:[%s22143_s2 + $0x188] sm:$0xff]   ;;  %v21455_v32 = vpack.c.bf16 %v10390_v4, %v10389_v50  ;;  %v17873_v50 = vld [vmem:[%s22143_s2 + $0x1f0] sm:$0xff]   ;;  %v17874_v4 = vld [vmem:[%s22143_s2 + $0x1f8] sm:$0xff]  }
 0x655   : > { %15879 = vmatprep.subr.bf16.mxu0 %v17952_v21 }
 0x656   : > { %15484 = vmatpush3.bf16.msra.mxu1 %v17830_v20  ;;  %v17848_v20 = vld [vmem:[%s22143_s2 + $0x190] sm:$0xff]  }
 0x657   : > { %15485 = vmatprep.subr.bf16.mxu1 %v17952_v21 }
 0x658   : > { %15880 = vmatpush3.bf16.msra.mxu0 %v17831_v25  ;;  %v8632_v25 = vld [vmem:[#allocation3 + $0xb1] sm:$0xff] }
 0x659   : > { %15881 = vmatprep.subr.bf16.mxu0 %v17952_v21  ;;  %15458 = vmatmul.mubr.bf16.gmra.mrb[32].mxu1 %v8454_v30  ;;  %v10391_v30 = vld [vmem:[#allocation3 + $0x119] sm:$0xff]  ;;  %v21478_v57 = vpack.c.bf16 %v8632_v25, %v8631_v23  ;;  %v9004_v23 = vld [vmem:[#allocation3 + $0xa2] sm:$0xff]  ;;  %v10763_v25 = vld [vmem:[#allocation3 + $0x10a] sm:$0xff] }
 0x65a   : > { %15461 = vmatprep.mubr.msk.bf16.mxu1 %vm17953_vm1, %v17952_v21  ;;  %15486 = vmatpush3.bf16.msra.mxu1 %v17832_v14  ;;  %v17850_v14 = vld [vmem:[%s22143_s2 + $0x198] sm:$0xff]  }
 0x65b   : > { %15854 = vmatmul.mubr.bf16.gmra.mrb[32].mxu0 %v10214_v52  ;;  %15487 = vmatprep.subr.bf16.mxu1 %v17952_v21  ;;  %v10392_v52 = vld [vmem:[#allocation3 + $0x121] sm:$0xff] }
 0x65c   : > { %15857 = vmatprep.mubr.msk.bf16.mxu0 %vm17953_vm1, %v17952_v21  ;;  %15882 = vmatpush3.bf16.msra.mxu0 %v17833_v26  ;;  %v17851_v26 = vld [vmem:[%s22143_s2 + $0x198] sm:$0xff]   ;;  %v21481_v31 = vpack.c.bf16 %v10392_v52, %v10391_v30 }
 0x65d   : > { %15883 = vmatprep.subr.bf16.mxu0 %v17952_v21  ;;  %v10764_v30 = vld [vmem:[#allocation3 + $0x112] sm:$0xff] }
 0x65e   : > { %15488 = vmatpush3.bf16.msra.mxu1 %v17834_v63  ;;  %v8633_v63 = vld [vmem:[#allocation3 + $0xb9] sm:$0xff] }
 0x65f   : > { %15489 = vmatprep.subr.bf16.mxu1 %v17952_v21 }
 0x660   : > { %15884 = vmatpush3.bf16.msra.mxu0 %v17835_v6  ;;  %v8634_v6 = vld [vmem:[#allocation3 + $0xc1] sm:$0xff] }
 0x661   : > { %15462 = vmatmul.mubr.bf16.gmra.mrb[36].mxu1 %v8455_v35  ;;  %15885 = vmatprep.subr.bf16.mxu0 %v17952_v21  ;;  %v10393_v35 = vld [vmem:[#allocation3 + $0x129] sm:$0xff]  ;;  %v21504_v41 = vpack.c.bf16 %v8634_v6, %v8633_v63 }
 0x662   : > { %15465 = vmatprep.mubr.msk.bf16.mxu1 %vm17953_vm1, %v17952_v21  ;;  %15490 = vmatpush3.bf16.msra.mxu1 %v17836_v38  ;;  %v17854_v38 = vld [vmem:[%s22143_s2 + $0x1a8] sm:$0xff]  }
 0x663   : > { %15858 = vmatmul.mubr.bf16.gmra.mrb[36].mxu0 %v10215_v47  ;;  %15491 = vmatprep.subr.bf16.mxu1 %v17952_v21  ;;  %v10394_v47 = vld [vmem:[#allocation3 + $0x131] sm:$0xff]  ;;  %v10766_v63 = vld [vmem:[#allocation3 + $0x122] sm:$0xff] }
 0x664   : > { %15861 = vmatprep.mubr.msk.bf16.mxu0 %vm17953_vm1, %v17952_v21  ;;  %15886 = vmatpush3.bf16.msra.mxu0 %v17837_v42  ;;  %v17855_v42 = vld [vmem:[%s22143_s2 + $0x1a8] sm:$0xff]   ;;  %v21507_v46 = vpack.c.bf16 %v10394_v47, %v10393_v35 }
 0x665   : > { %15887 = vmatprep.subr.bf16.mxu0 %v17952_v21  ;;  %v17879_v6 = vld [vmem:[%s22143_s2 + $0x208] sm:$0xff]  }
 0x666   : > { %15492 = vmatpush3.bf16.msra.mxu1 %v17838_v51  ;;  %v8635_v51 = vld [vmem:[#allocation3 + $0xc9] sm:$0xff] }
 0x667   : > { %15493 = vmatprep.subr.bf16.mxu1 %v17952_v21 }
 0x668   : > { %15888 = vmatpush3.bf16.msra.mxu0 %v17839_v45  ;;  %v8636_v45 = vld [vmem:[#allocation3 + $0xd1] sm:$0xff] }
 0x669   : > { %15466 = vmatmul.mubr.bf16.gmra.mrb[40].mxu1 %v8456_v39  ;;  %15889 = vmatprep.subr.bf16.mxu0 %v17952_v21  ;;  %v10395_v39 = vld [vmem:[#allocation3 + $0x139] sm:$0xff]  ;;  %v21530_v55 = vpack.c.bf16 %v8636_v45, %v8635_v51 }
 0x66a   : > { %15469 = vmatprep.mubr.msk.bf16.mxu1 %vm17953_vm1, %v17952_v21  ;;  %15494 = vmatpush3.bf16.msra.mxu1 %v17840_v33  ;;  %v17858_v33 = vld [vmem:[%s22143_s2 + $0x1b8] sm:$0xff]  }
 0x66b   : > { %15862 = vmatmul.mubr.bf16.gmra.mrb[40].mxu0 %v10216_v44  ;;  %15495 = vmatprep.subr.bf16.mxu1 %v17952_v21  ;;  %v10396_v44 = vld [vmem:[#allocation3 + $0x141] sm:$0xff]  ;;  %v17882_v51 = vld [vmem:[%s22143_s2 + $0x218] sm:$0xff]  }
 0x66c   : > { %15865 = vmatprep.mubr.msk.bf16.mxu0 %vm17953_vm1, %v17952_v21  ;;  %15890 = vmatpush3.bf16.msra.mxu0 %v17841_v48  ;;  %v17859_v48 = vld [vmem:[%s22143_s2 + $0x1b8] sm:$0xff]   ;;  %v21533_v56 = vpack.c.bf16 %v10396_v44, %v10395_v39 }
 0x66d   : > { %15891 = vmatprep.subr.bf16.mxu0 %v17952_v21  ;;  %v17883_v45 = vld [vmem:[%s22143_s2 + $0x218] sm:$0xff]  }
 0x66e   : > { %15496 = vmatpush3.bf16.msra.mxu1 %v17842_v43  ;;  %v10397_v43 = vld [vmem:[#allocation3 + $0x149] sm:$0xff] }
 0x66f   : > { %15525 = vmatprep.subr.bf16.mxu1 %v17952_v21 }
 0x670   : > { %15892 = vmatpush3.bf16.msra.mxu0 %v17843_v36  ;;  %v10398_v36 = vld [vmem:[#allocation3 + $0x151] sm:$0xff] }
 0x671   : > { %15470 = vmatmul.mubr.bf16.gmra.mrb[44].mxu1 %v8457_v40  ;;  %15921 = vmatprep.subr.bf16.mxu0 %v17952_v21  ;;  %v21543_v40 = vpack.c.bf16 %v8638_v58, %v8637_v2  ;;  %v10769_v2 = vld [vmem:[#allocation3 + $0x13a] sm:$0xff]  ;;  %v10770_v58 = vld [vmem:[#allocation3 + $0x142] sm:$0xff] }
 0x672   : > { %15473 = vmatprep.mubr.msk.bf16.mxu1 %vm17953_vm1, %v17952_v21 }
 0x673   : > { %15866 = vmatmul.mubr.bf16.gmra.mrb[44].mxu0 %v10217_v27  ;;  %v21545_v27 = vpack.c.bf16 %v10398_v36, %v10397_v43  ;;  %v17886_v43 = vld [vmem:[%s22143_s2 + $0x228] sm:$0xff]  }
 0x674   : > { %15869 = vmatprep.mubr.msk.bf16.mxu0 %vm17953_vm1, %v17952_v21  ;;  %v17887_v36 = vld [vmem:[%s22143_s2 + $0x228] sm:$0xff]  }
 0x679   : > { %15474 = vmatmul.mubr.bf16.gmra.mrb[48].mxu1 %v8458_v5  ;;  %v21553_v5 = vpack.c.bf16 %v8640_v3, %v8639_v15  ;;  %v17888_v15 = vld [vmem:[%s22143_s2 + $0x230] sm:$0xff]  }
 0x67a   : > { %15477 = vmatprep.mubr.msk.bf16.mxu1 %vm17953_vm1, %v17952_v21  ;;  %v17889_v3 = vld [vmem:[%s22143_s2 + $0x230] sm:$0xff]  }
 0x67b   : > { %15870 = vmatmul.mubr.bf16.gmra.mrb[48].mxu0 %v10218_v7  ;;  %v21555_v7 = vpack.c.bf16 %v10400_v13, %v10399_v28  ;;  %v9011_v28 = vld [vmem:[#allocation3 + $0xda] sm:$0xff]  ;;  %v9012_v13 = vld [vmem:[#allocation3 + $0xe2] sm:$0xff] }
 0x67c   : > { %15873 = vmatprep.mubr.msk.bf16.mxu0 %vm17953_vm1, %v17952_v21 }
 0x681   : > { %15478 = vmatmul.mubr.bf16.gmra.mrb[52].mxu1 %v8459_v59  ;;  %v17862_v59 = vld [vmem:[%s22143_s2 + $0x1c8] sm:$0xff]  }
 0x682   : > { %15497 = vmatprep.mubr.msk.bf16.mxu1 %vm17953_vm1, %v17952_v21 }
 0x683   : > { %15874 = vmatmul.mubr.bf16.gmra.mrb[52].mxu0 %v10219_v18  ;;  %v8630_v18 = vld [vmem:[#allocation3 + $0xa1] sm:$0xff] }
 0x684   : > { %15893 = vmatprep.mubr.msk.bf16.mxu0 %vm17953_vm1, %v17952_v21  ;;  %v21452_v19 = vpack.c.bf16 %v8630_v18, %v8629_v61  ;;  %v17870_v61 = vld [vmem:[%s22143_s2 + $0x1e8] sm:$0xff]  }
 0x685   : > { %v17871_v18 = vld [vmem:[%s22143_s2 + $0x1e8] sm:$0xff]  }
 0x689   : > { %15498 = vmatmul.mubr.bf16.vlgmr.msra.gmra.mrb[28].mxu1 %v8641_v24  ;;  %v17867_v24 = vld [vmem:[%s22143_s2 + $0x1d8] sm:$0xff]  }
 0x68a   : > { %15526 = vmatpush3.bf16.msra.mxu1 %v17844_v12  ;;  %15501 = vmatprep.mubr.msk.bf16.mxu1 %vm17953_vm1, %v17952_v21  ;;  %v17868_v12 = vld [vmem:[%s22143_s2 + $0x1e0] sm:$0xff]  }
 0x68b   : > { %15894 = vmatmul.mubr.bf16.vlgmr.msra.gmra.mrb[28].mxu0 %v21435_v17  ;;  %15527 = vmatprep.subr.bf16.mxu1 %v17952_v21 }
 0x68c   : > { %15922 = vmatpush3.bf16.msra.mxu0 %v17845_v60  ;;  %15897 = vmatprep.mubr.msk.bf16.mxu0 %vm17953_vm1, %v17952_v21  ;;  %v17869_v60 = vld [vmem:[%s22143_s2 + $0x1e0] sm:$0xff]  }
 0x68d   : > { %15923 = vmatprep.subr.bf16.mxu0 %v17952_v21 }
 0x68e   : > { %15528 = vmatpush3.bf16.msra.mxu1 %v17846_v34  ;;  %v17872_v34 = vld [vmem:[%s22143_s2 + $0x1f0] sm:$0xff]  }
 0x68f   : > { %15529 = vmatprep.subr.bf16.mxu1 %v17952_v21 }
 0x690   : > { %15924 = vmatpush3.bf16.msra.mxu0 %v17847_v22  ;;  %v17875_v22 = vld [vmem:[%s22143_s2 + $0x1f8] sm:$0xff]  }
 0x691   : > { %15925 = vmatprep.subr.bf16.mxu0 %v17952_v21  ;;  %15502 = vmatmul.mubr.bf16.gmra.mrb[32].mxu1 %v21452_v19 }
 0x692   : > { %15505 = vmatprep.mubr.msk.bf16.mxu1 %vm17953_vm1, %v17952_v21  ;;  %15530 = vmatpush3.bf16.msra.mxu1 %v17848_v20 }
 0x693   : > { %15898 = vmatmul.mubr.bf16.gmra.mrb[32].mxu0 %v21455_v32  ;;  %15531 = vmatprep.subr.bf16.mxu1 %v17952_v21 }
 0x694   : > { %15901 = vmatprep.mubr.msk.bf16.mxu0 %vm17953_vm1, %v17952_v21  ;;  %15926 = vmatpush3.bf16.msra.mxu0 %v17849_v53  ;;  %v9003_v53 = vld [vmem:[#allocation3 + $0x9a] sm:$0xff] }
 0x695   : > { %15927 = vmatprep.subr.bf16.mxu0 %v17952_v21  ;;  %v9017_v52 = vpack.c.bf16 %v9004_v23, %v9003_v53  ;;  %v10952_v53 = vld [vmem:[#allocation3 + $0x113] sm:$0xff] }
 0x696   : > { %15532 = vmatpush3.bf16.msra.mxu1 %v17850_v14  ;;  %v17876_v14 = vld [vmem:[%s22143_s2 + $0x200] sm:$0xff]  }
 0x697   : > { %15533 = vmatprep.subr.bf16.mxu1 %v17952_v21 }
 0x698   : > { %15928 = vmatpush3.bf16.msra.mxu0 %v17851_v26  ;;  %v10777_v26 = vpack.c.bf16 %v10764_v30, %v10763_v25  ;;  %v9193_v30 = vld [vmem:[#allocation3 + $0xab] sm:$0xff] }
 0x699   : > { %15506 = vmatmul.mubr.bf16.gmra.mrb[36].mxu1 %v21478_v57  ;;  %15929 = vmatprep.subr.bf16.mxu0 %v17952_v21 }
 0x69a   : > { %15509 = vmatprep.mubr.msk.bf16.mxu1 %vm17953_vm1, %v17952_v21  ;;  %15534 = vmatpush3.bf16.msra.mxu1 %v17852_v54  ;;  %v17878_v54 = vld [vmem:[%s22143_s2 + $0x208] sm:$0xff]  }
 0x69b   : > { %15902 = vmatmul.mubr.bf16.gmra.mrb[36].mxu0 %v21481_v31  ;;  %15535 = vmatprep.subr.bf16.mxu1 %v17952_v21 }
 0x69c   : > { %15905 = vmatprep.mubr.msk.bf16.mxu0 %vm17953_vm1, %v17952_v21  ;;  %15930 = vmatpush3.bf16.msra.mxu0 %v17853_v29  ;;  %v10765_v29 = vld [vmem:[#allocation3 + $0x11a] sm:$0xff] }
 0x69d   : > { %15931 = vmatprep.subr.bf16.mxu0 %v17952_v21  ;;  %v10778_v47 = vpack.c.bf16 %v10766_v63, %v10765_v29  ;;  %v10955_v29 = vld [vmem:[#allocation3 + $0x12b] sm:$0xff]  ;;  %v10956_v63 = vld [vmem:[#allocation3 + $0x133] sm:$0xff] }
 0x69e   : > { %15536 = vmatpush3.bf16.msra.mxu1 %v17854_v38  ;;  %v17880_v38 = vld [vmem:[%s22143_s2 + $0x210] sm:$0xff]  }
 0x69f   : > { %15537 = vmatprep.subr.bf16.mxu1 %v17952_v21 }
 0x6a0   : > { %15932 = vmatpush3.bf16.msra.mxu0 %v17855_v42  ;;  %v17881_v42 = vld [vmem:[%s22143_s2 + $0x210] sm:$0xff]  }
 0x6a1   : > { %15510 = vmatmul.mubr.bf16.gmra.mrb[40].mxu1 %v21504_v41  ;;  %15933 = vmatprep.subr.bf16.mxu0 %v17952_v21 }
 0x6a2   : > { %15513 = vmatprep.mubr.msk.bf16.mxu1 %vm17953_vm1, %v17952_v21  ;;  %15538 = vmatpush3.bf16.msra.mxu1 %v17856_v1  ;;  %v10767_v1 = vld [vmem:[#allocation3 + $0x12a] sm:$0xff] }
 0x6a3   : > { %15906 = vmatmul.mubr.bf16.gmra.mrb[40].mxu0 %v21507_v46  ;;  %15539 = vmatprep.subr.bf16.mxu1 %v17952_v21 }
 0x6a4   : > { %15909 = vmatprep.mubr.msk.bf16.mxu0 %vm17953_vm1, %v17952_v21  ;;  %15934 = vmatpush3.bf16.msra.mxu0 %v17857_v49  ;;  %v10768_v49 = vld [vmem:[#allocation3 + $0x132] sm:$0xff] }
 0x6a5   : > { %15935 = vmatprep.subr.bf16.mxu0 %v17952_v21  ;;  %v10779_v44 = vpack.c.bf16 %v10768_v49, %v10767_v1  ;;  %v9199_v49 = vld [vmem:[#allocation3 + $0xdb] sm:$0xff] }
 0x6a6   : > { %15540 = vmatpush3.bf16.msra.mxu1 %v17858_v33  ;;  %v17884_v33 = vld [vmem:[%s22143_s2 + $0x220] sm:$0xff]  }
 0x6a7   : > { %15569 = vmatprep.subr.bf16.mxu1 %v17952_v21 }
 0x6a8   : > { %15936 = vmatpush3.bf16.msra.mxu0 %v17859_v48  ;;  %v17885_v48 = vld [vmem:[%s22143_s2 + $0x220] sm:$0xff]  }
 0x6a9   : > { %15514 = vmatmul.mubr.bf16.gmra.mrb[44].mxu1 %v21530_v55  ;;  %15965 = vmatprep.subr.bf16.mxu0 %v17952_v21 }
 0x6aa   : > { %15517 = vmatprep.mubr.msk.bf16.mxu1 %vm17953_vm1, %v17952_v21 }
 0x6ab   : > { %15910 = vmatmul.mubr.bf16.gmra.mrb[44].mxu0 %v21533_v56 }
 0x6ac   : > { %15913 = vmatprep.mubr.msk.bf16.mxu0 %vm17953_vm1, %v17952_v21 }
 0x6b1   : > { %15518 = vmatmul.mubr.bf16.gmra.mrb[48].mxu1 %v21543_v40 }
 0x6b2   : > { %15521 = vmatprep.mubr.msk.bf16.mxu1 %vm17953_vm1, %v17952_v21 }
 0x6b3   : > { %15914 = vmatmul.mubr.bf16.gmra.mrb[48].mxu0 %v21545_v27 }
 0x6b4   : > { %15917 = vmatprep.mubr.msk.bf16.mxu0 %vm17953_vm1, %v17952_v21 }
 0x6b9   : > { %15522 = vmatmul.mubr.bf16.gmra.mrb[52].mxu1 %v21553_v5 }
 0x6ba   : > { %15541 = vmatprep.mubr.msk.bf16.mxu1 %vm17953_vm1, %v17952_v21 }
 0x6bb   : > { %15918 = vmatmul.mubr.bf16.gmra.mrb[52].mxu0 %v21555_v7 }
 0x6bc   : > { %15937 = vmatprep.mubr.msk.bf16.mxu0 %vm17953_vm1, %v17952_v21 }
 0x6c1   : > { %15542 = vmatmul.mubr.bf16.vlgmr.msra.gmra.mrb[28].mxu1 %v21452_v19  ;;  %v10587_v19 = vld [vmem:[#allocation3 + $0x169] sm:$0xff] }
 0x6c2   : > { %15570 = vmatpush3.bf16.msra.mxu1 %v17860_v16  ;;  %15545 = vmatprep.mubr.msk.bf16.mxu1 %vm17953_vm1, %v17952_v21  ;;  %v17890_v16 = vld [vmem:[%s22143_s2 + $0x238] sm:$0xff]  }
 0x6c3   : > { %15938 = vmatmul.mubr.bf16.vlgmr.msra.gmra.mrb[28].mxu0 %v21455_v32  ;;  %15571 = vmatprep.subr.bf16.mxu1 %v17952_v21  ;;  %v10588_v32 = vld [vmem:[#allocation3 + $0x171] sm:$0xff] }
 0x6c4   : > { %15966 = vmatpush3.bf16.msra.mxu0 %v17861_v62  ;;  %15941 = vmatprep.mubr.msk.bf16.mxu0 %vm17953_vm1, %v17952_v21  ;;  %v10595_v20 = vpack.c.bf16 %v10588_v32, %v10587_v19  ;;  %v17891_v62 = vld [vmem:[%s22143_s2 + $0x238] sm:$0xff]   ;;  %v9192_v32 = vld [vmem:[#allocation3 + $0xa3] sm:$0xff] }
 0x6c5   : > { %15967 = vmatprep.subr.bf16.mxu0 %v17952_v21  ;;  %v9191_v19 = vld [vmem:[#allocation3 + $0x9b] sm:$0xff] }
 0x6c6   : > { %15572 = vmatpush3.bf16.msra.mxu1 %v17862_v59  ;;  %v9021_v59 = vpack.c.bf16 %v9012_v13, %v9011_v28  ;;  %v9205_v23 = vpack.c.bf16 %v9192_v32, %v9191_v19  ;;  %v9393_v13 = vld [vmem:[%s22145_s4 + $0x70] sm:$0xff] }
 0x6c7   : > { %15573 = vmatprep.subr.bf16.mxu1 %v17952_v21 }
 0x6c8   : > { %15968 = vmatpush3.bf16.msra.mxu0 %v17863_v8 }
 0x6c9   : > { %15969 = vmatprep.subr.bf16.mxu0 %v17952_v21  ;;  %15546 = vmatmul.mubr.bf16.gmra.mrb[32].mxu1 %v21478_v57  ;;  %v9005_v57 = vld [vmem:[#allocation3 + $0xaa] sm:$0xff] }
 0x6ca   : > { %15549 = vmatprep.mubr.msk.bf16.mxu1 %vm17953_vm1, %v17952_v21  ;;  %15574 = vmatpush3.bf16.msra.mxu1 %v17864_v11  ;;  %v9013_v11 = vld [vmem:[#allocation3 + $0xea] sm:$0xff] }
 0x6cb   : > { %15942 = vmatmul.mubr.bf16.gmra.mrb[32].mxu0 %v21481_v31  ;;  %15575 = vmatprep.subr.bf16.mxu1 %v17952_v21  ;;  %v9006_v31 = vld [vmem:[#allocation3 + $0xb2] sm:$0xff] }
 0x6cc   : > { %15945 = vmatprep.mubr.msk.bf16.mxu0 %vm17953_vm1, %v17952_v21  ;;  %15970 = vmatpush3.bf16.msra.mxu0 %v17865_v0  ;;  %v9018_v35 = vpack.c.bf16 %v9006_v31, %v9005_v57  ;;  %v9014_v0 = vld [vmem:[#allocation3 + $0xf2] sm:$0xff]  ;;  %v9195_v31 = vld [vmem:[#allocation3 + $0xbb] sm:$0xff] }
 0x6cd   : > { %15971 = vmatprep.subr.bf16.mxu0 %v17952_v21 }
 0x6ce   : > { %15576 = vmatpush3.bf16.msra.mxu1 %v17866_v37  ;;  %v10773_v37 = vld [vmem:[#allocation3 + $0x15a] sm:$0xff] }
 0x6cf   : > { %15577 = vmatprep.subr.bf16.mxu1 %v17952_v21 }
 0x6d0   : > { %15972 = vmatpush3.bf16.msra.mxu0 %v17867_v24  ;;  %v10774_v24 = vld [vmem:[#allocation3 + $0x162] sm:$0xff] }
 0x6d1   : > { %15550 = vmatmul.mubr.bf16.gmra.mrb[36].mxu1 %v21504_v41  ;;  %15973 = vmatprep.subr.bf16.mxu0 %v17952_v21  ;;  %v9007_v41 = vld [vmem:[#allocation3 + $0xba] sm:$0xff] }
 0x6d2   : > { %15553 = vmatprep.mubr.msk.bf16.mxu1 %vm17953_vm1, %v17952_v21  ;;  %15578 = vmatpush3.bf16.msra.mxu1 %v17868_v12  ;;  %v9022_v12 = vpack.c.bf16 %v9014_v0, %v9013_v11 }
 0x6d3   : > { %15946 = vmatmul.mubr.bf16.gmra.mrb[36].mxu0 %v21507_v46  ;;  %15579 = vmatprep.subr.bf16.mxu1 %v17952_v21  ;;  %v9008_v46 = vld [vmem:[#allocation3 + $0xc2] sm:$0xff] }
 0x6d4   : > { %15949 = vmatprep.mubr.msk.bf16.mxu0 %vm17953_vm1, %v17952_v21  ;;  %15974 = vmatpush3.bf16.msra.mxu0 %v17869_v60  ;;  %v9019_v39 = vpack.c.bf16 %v9008_v46, %v9007_v41  ;;  %v10782_v60 = vpack.c.bf16 %v10774_v24, %v10773_v37  ;;  %v10958_v41 = vld [vmem:[#allocation3 + $0x143] sm:$0xff] }
 0x6d5   : > { %15975 = vmatprep.subr.bf16.mxu0 %v17952_v21 }
 0x6d6   : > { %15580 = vmatpush3.bf16.msra.mxu1 %v17870_v61  ;;  %v9015_v61 = vld [vmem:[#allocation3 + $0xfa] sm:$0xff] }
 0x6d7   : > { %15581 = vmatprep.subr.bf16.mxu1 %v17952_v21 }
 0x6d8   : > { %15976 = vmatpush3.bf16.msra.mxu0 %v17871_v18  ;;  %v9016_v18 = vld [vmem:[#allocation3 + $0x102] sm:$0xff] }
 0x6d9   : > { %15554 = vmatmul.mubr.bf16.gmra.mrb[40].mxu1 %v21530_v55  ;;  %15977 = vmatprep.subr.bf16.mxu0 %v17952_v21  ;;  %v9009_v55 = vld [vmem:[#allocation3 + $0xca] sm:$0xff] }
 0x6da   : > { %15557 = vmatprep.mubr.msk.bf16.mxu1 %vm17953_vm1, %v17952_v21  ;;  %15582 = vmatpush3.bf16.msra.mxu1 %v17872_v34  ;;  %v10775_v34 = vld [vmem:[#allocation3 + $0x16a] sm:$0xff] }
 0x6db   : > { %15950 = vmatmul.mubr.bf16.gmra.mrb[40].mxu0 %v21533_v56  ;;  %15583 = vmatprep.subr.bf16.mxu1 %v17952_v21  ;;  %v9010_v56 = vld [vmem:[#allocation3 + $0xd2] sm:$0xff] }
 0x6dc   : > { %15953 = vmatprep.mubr.msk.bf16.mxu0 %vm17953_vm1, %v17952_v21  ;;  %15978 = vmatpush3.bf16.msra.mxu0 %v17873_v50  ;;  %v10776_v50 = vld [vmem:[#allocation3 + $0x172] sm:$0xff] }
 0x6dd   : > { %15979 = vmatprep.subr.bf16.mxu0 %v17952_v21 }
 0x6de   : > { %15584 = vmatpush3.bf16.msra.mxu1 %v17874_v4  ;;  %v9023_v4 = vpack.c.bf16 %v9016_v18, %v9015_v61 }
 0x6df   : > { %15613 = vmatprep.subr.bf16.mxu1 %v17952_v21 }
 0x6e0   : > { %15980 = vmatpush3.bf16.msra.mxu0 %v17875_v22  ;;  %v10783_v22 = vpack.c.bf16 %v10776_v50, %v10775_v34 }
 0x6e1   : > { %15558 = vmatmul.mubr.bf16.gmra.mrb[44].mxu1 %v21543_v40  ;;  %16009 = vmatprep.subr.bf16.mxu0 %v17952_v21  ;;  %v9020_v40 = vpack.c.bf16 %v9010_v56, %v9009_v55  ;;  %v9202_v55 = vld [vmem:[#allocation3 + $0xf3] sm:$0xff]  ;;  %v10961_v56 = vld [vmem:[#allocation3 + $0x15b] sm:$0xff] }
 0x6e2   : > { %15561 = vmatprep.mubr.msk.bf16.mxu1 %vm17953_vm1, %v17952_v21 }
 0x6e3   : > { %15954 = vmatmul.mubr.bf16.gmra.mrb[44].mxu0 %v21545_v27  ;;  %v10780_v27 = vpack.c.bf16 %v10770_v58, %v10769_v2  ;;  %v10962_v2 = vld [vmem:[#allocation3 + $0x163] sm:$0xff] }
 0x6e4   : > { %15957 = vmatprep.mubr.msk.bf16.mxu0 %vm17953_vm1, %v17952_v21 }
 0x6e9   : > { %15562 = vmatmul.mubr.bf16.gmra.mrb[48].mxu1 %v21553_v5  ;;  %v10771_v5 = vld [vmem:[#allocation3 + $0x14a] sm:$0xff] }
 0x6ea   : > { %15565 = vmatprep.mubr.msk.bf16.mxu1 %vm17953_vm1, %v17952_v21 }
 0x6eb   : > { %15958 = vmatmul.mubr.bf16.gmra.mrb[48].mxu0 %v21555_v7  ;;  %v10772_v7 = vld [vmem:[#allocation3 + $0x152] sm:$0xff] }
 0x6ec   : > { %15961 = vmatprep.mubr.msk.bf16.mxu0 %vm17953_vm1, %v17952_v21  ;;  %v10781_v8 = vpack.c.bf16 %v10772_v7, %v10771_v5  ;;  %v11153_v5 = vld [vmem:[%s22145_s4 + $0xe0] sm:$0xff] }
 0x6f1   : > { %15566 = vmatmul.mubr.bf16.gmra.mrb[52].mxu1 %v21435_v17  ;;  %v17877_v17 = vld [vmem:[%s22143_s2 + $0x200] sm:$0xff]  }
 0x6f2   : > { %15585 = vmatprep.mubr.msk.bf16.mxu1 %vm17953_vm1, %v17952_v21 }
 0x6f3   : > { %15962 = vmatmul.mubr.bf16.gmra.mrb[52].mxu0 %v10595_v20  ;;  %v10951_v20 = vld [vmem:[#allocation3 + $0x10b] sm:$0xff] }
 0x6f4   : > { %15981 = vmatprep.mubr.msk.bf16.mxu0 %vm17953_vm1, %v17952_v21  ;;  %v10965_v25 = vpack.c.bf16 %v10952_v53, %v10951_v20  ;;  %v9395_v20 = vld [vmem:[%s22145_s4 + $0x80] sm:$0xff] }
 0x6f9   : > { %15586 = vmatmul.mubr.bf16.vlgmr.msra.gmra.mrb[28].mxu1 %v9017_v52  ;;  %v9194_v52 = vld [vmem:[#allocation3 + $0xb3] sm:$0xff] }
 0x6fa   : > { %15614 = vmatpush3.bf16.msra.mxu1 %v17876_v14  ;;  %15589 = vmatprep.mubr.msk.bf16.mxu1 %vm17953_vm1, %v17952_v21  ;;  %v10953_v14 = vld [vmem:[#allocation3 + $0x11b] sm:$0xff] }
 0x6fb   : > { %15982 = vmatmul.mubr.bf16.vlgmr.msra.gmra.mrb[28].mxu0 %v10777_v26  ;;  %15615 = vmatprep.subr.bf16.mxu1 %v17952_v21  ;;  %v10954_v26 = vld [vmem:[#allocation3 + $0x123] sm:$0xff] }
 0x6fc   : > { %16010 = vmatpush3.bf16.msra.mxu0 %v17877_v17  ;;  %15985 = vmatprep.mubr.msk.bf16.mxu0 %vm17953_vm1, %v17952_v21  ;;  %v9206_v17 = vpack.c.bf16 %v9194_v52, %v9193_v30  ;;  %v10966_v57 = vpack.c.bf16 %v10954_v26, %v10953_v14  ;;  %v9396_v52 = vld [vmem:[%s22145_s4 + $0x88] sm:$0xff] }
 0x6fd   : > { %16011 = vmatprep.subr.bf16.mxu0 %v17952_v21 }
 0x6fe   : > { %15616 = vmatpush3.bf16.msra.mxu1 %v17878_v54  ;;  %v9196_v54 = vld [vmem:[#allocation3 + $0xc3] sm:$0xff] }
 0x6ff   : > { %15617 = vmatprep.subr.bf16.mxu1 %v17952_v21 }
 0x700   : > { %16012 = vmatpush3.bf16.msra.mxu0 %v17879_v6  ;;  %v9207_v6 = vpack.c.bf16 %v9196_v54, %v9195_v31 }
 0x701   : > { %16013 = vmatprep.subr.bf16.mxu0 %v17952_v21  ;;  %15590 = vmatmul.mubr.bf16.gmra.mrb[32].mxu1 %v9018_v35  ;;  %v10967_v35 = vpack.c.bf16 %v10956_v63, %v10955_v29 }
 0x702   : > { %15593 = vmatprep.mubr.msk.bf16.mxu1 %vm17953_vm1, %v17952_v21  ;;  %15618 = vmatpush3.bf16.msra.mxu1 %v17880_v38  ;;  %v9198_v38 = vld [vmem:[#allocation3 + $0xd3] sm:$0xff] }
 0x703   : > { %15986 = vmatmul.mubr.bf16.gmra.mrb[32].mxu0 %v10778_v47  ;;  %15619 = vmatprep.subr.bf16.mxu1 %v17952_v21  ;;  %v9197_v47 = vld [vmem:[#allocation3 + $0xcb] sm:$0xff] }
 0x704   : > { %15989 = vmatprep.mubr.msk.bf16.mxu0 %vm17953_vm1, %v17952_v21  ;;  %16014 = vmatpush3.bf16.msra.mxu0 %v17881_v42  ;;  %v10957_v42 = vld [vmem:[#allocation3 + $0x13b] sm:$0xff]  ;;  %v9208_v46 = vpack.c.bf16 %v9198_v38, %v9197_v47 }
 0x705   : > { %16015 = vmatprep.subr.bf16.mxu0 %v17952_v21  ;;  %v10968_v1 = vpack.c.bf16 %v10958_v41, %v10957_v42 }
 0x706   : > { %15620 = vmatpush3.bf16.msra.mxu1 %v17882_v51  ;;  %v9200_v51 = vld [vmem:[#allocation3 + $0xe3] sm:$0xff] }
 0x707   : > { %15621 = vmatprep.subr.bf16.mxu1 %v17952_v21 }
 0x708   : > { %16016 = vmatpush3.bf16.msra.mxu0 %v17883_v45  ;;  %v10959_v45 = vld [vmem:[#allocation3 + $0x14b] sm:$0xff] }
 0x709   : > { %15594 = vmatmul.mubr.bf16.gmra.mrb[36].mxu1 %v9019_v39  ;;  %16017 = vmatprep.subr.bf16.mxu0 %v17952_v21  ;;  %v10960_v39 = vld [vmem:[#allocation3 + $0x153] sm:$0xff] }
 0x70a   : > { %15597 = vmatprep.mubr.msk.bf16.mxu1 %vm17953_vm1, %v17952_v21  ;;  %15622 = vmatpush3.bf16.msra.mxu1 %v17884_v33  ;;  %v10969_v33 = vpack.c.bf16 %v10960_v39, %v10959_v45 }
 0x70b   : > { %15990 = vmatmul.mubr.bf16.gmra.mrb[36].mxu0 %v10779_v44  ;;  %15623 = vmatprep.subr.bf16.mxu1 %v17952_v21  ;;  %v9209_v44 = vpack.c.bf16 %v9200_v51, %v9199_v49 }
 0x70c   : > { %15993 = vmatprep.mubr.msk.bf16.mxu0 %vm17953_vm1, %v17952_v21  ;;  %16018 = vmatpush3.bf16.msra.mxu0 %v17885_v48  ;;  %v9201_v48 = vld [vmem:[#allocation3 + $0xeb] sm:$0xff] }
 0x70d   : > { %16019 = vmatprep.subr.bf16.mxu0 %v17952_v21  ;;  %v9210_v58 = vpack.c.bf16 %v9202_v55, %v9201_v48  ;;  %v9397_v48 = vld [vmem:[%s22145_s4 + $0x90] sm:$0xff] }
 0x70e   : > { %15624 = vmatpush3.bf16.msra.mxu1 %v17886_v43  ;;  %v10970_v43 = vpack.c.bf16 %v10962_v2, %v10961_v56  ;;  %v11157_v56 = vld [vmem:[%s22145_s4 + $0x100] sm:$0xff] }
 0x70f   : > { %15625 = vmatprep.subr.bf16.mxu1 %v17952_v21 }
 0x710   : > { %16020 = vmatpush3.bf16.msra.mxu0 %v17887_v36  ;;  %v9203_v36 = vld [vmem:[#allocation3 + $0xfb] sm:$0xff] }
 0x711   : > { %15598 = vmatmul.mubr.bf16.gmra.mrb[40].mxu1 %v9020_v40  ;;  %16021 = vmatprep.subr.bf16.mxu0 %v17952_v21  ;;  %v9204_v40 = vld [vmem:[#allocation3 + $0x103] sm:$0xff] }
 0x712   : > { %15601 = vmatprep.mubr.msk.bf16.mxu1 %vm17953_vm1, %v17952_v21  ;;  %15626 = vmatpush3.bf16.msra.mxu1 %v17888_v15  ;;  %v10964_v15 = vld [vmem:[#allocation3 + $0x173] sm:$0xff] }
 0x713   : > { %15994 = vmatmul.mubr.bf16.gmra.mrb[40].mxu0 %v10780_v27  ;;  %15627 = vmatprep.subr.bf16.mxu1 %v17952_v21  ;;  %v10963_v27 = vld [vmem:[#allocation3 + $0x16b] sm:$0xff] }
 0x714   : > { %15997 = vmatprep.mubr.msk.bf16.mxu0 %vm17953_vm1, %v17952_v21  ;;  %16022 = vmatpush3.bf16.msra.mxu0 %v17889_v3  ;;  %v9211_v3 = vpack.c.bf16 %v9204_v40, %v9203_v36  ;;  %v10971_v28 = vpack.c.bf16 %v10964_v15, %v10963_v27  ;;  %v11158_v15 = vld [vmem:[%s22145_s4 + $0x108] sm:$0xff] }
 0x715   : > { %16023 = vmatprep.subr.bf16.mxu0 %v17952_v21 }
 0x716   : > { %15628 = vmatpush3.bf16.msra.mxu1 %v17890_v16 }
 0x718   : > { %16024 = vmatpush3.bf16.msra.mxu0 %v17891_v62 }
 0x719   : > { %15602 = vmatmul.mubr.bf16.gmra.mrb[44].mxu1 %v9021_v59 }
 0x71a   : > { %15605 = vmatprep.mubr.msk.bf16.mxu1 %vm17953_vm1, %v17952_v21 }
 0x71b   : > { %15998 = vmatmul.mubr.bf16.gmra.mrb[44].mxu0 %v10781_v8  ;;  %v11154_v8 = vld [vmem:[%s22145_s4 + $0xe8] sm:$0xff] }
 0x71c   : > { %16001 = vmatprep.mubr.msk.bf16.mxu0 %vm17953_vm1, %v17952_v21 }
 0x721   : > { %15606 = vmatmul.mubr.bf16.gmra.mrb[48].mxu1 %v9022_v12 }
 0x722   : > { %15609 = vmatprep.mubr.msk.bf16.mxu1 %vm17953_vm1, %v17952_v21 }
 0x723   : > { %16002 = vmatmul.mubr.bf16.gmra.mrb[48].mxu0 %v10782_v60 }
 0x724   : > { %16005 = vmatprep.mubr.msk.bf16.mxu0 %vm17953_vm1, %v17952_v21 }
 0x729   : > { %15610 = vmatmul.mubr.bf16.gmra.mrb[52].mxu1 %v9023_v4 }
 0x72a   : > { %15629 = vmatprep.mubr.msk.bf16.mxu1 %vm17953_vm1, %v17952_v21 }
 0x72b   : > { %16006 = vmatmul.mubr.bf16.gmra.mrb[52].mxu0 %v10783_v22 }
 0x72c   : > { %16025 = vmatprep.mubr.msk.bf16.mxu0 %vm17953_vm1, %v17952_v21 }
 0x731   : > { %15630 = vmatmul.mubr.bf16.vlgmr.msra.gmra.mrb[28].mxu1 %v9205_v23  ;;  %v11155_v23 = vld [vmem:[%s22145_s4 + $0xf0] sm:$0xff] }
 0x732   : > { %15633 = vmatprep.mubr.msk.bf16.mxu1 %vm17953_vm1, %v17952_v21 }
 0x733   : > { %16026 = vmatmul.mubr.bf16.vlgmr.msra.gmra.mrb[28].mxu0 %v10965_v25 }
 0x734   : > { %16029 = vmatprep.mubr.msk.bf16.mxu0 %vm17953_vm1, %v17952_v21 }
 0x739   : > { %15634 = vmatmul.mubr.bf16.gmra.mrb[32].mxu1 %v9206_v17 }
 0x73a   : > { %15637 = vmatprep.mubr.msk.bf16.mxu1 %vm17953_vm1, %v17952_v21 }
 0x73b   : > { %16030 = vmatmul.mubr.bf16.gmra.mrb[32].mxu0 %v10966_v57  ;;  %v11156_v57 = vld [vmem:[%s22145_s4 + $0xf8] sm:$0xff] }
 0x73c   : > { %16033 = vmatprep.mubr.msk.bf16.mxu0 %vm17953_vm1, %v17952_v21 }
 0x741   : > { %15638 = vmatmul.mubr.bf16.gmra.mrb[36].mxu1 %v9207_v6 }
 0x742   : > { %15641 = vmatprep.mubr.msk.bf16.mxu1 %vm17953_vm1, %v17952_v21 }
 0x743   : > { %16034 = vmatmul.mubr.bf16.gmra.mrb[36].mxu0 %v10967_v35 }
 0x744   : > { %16037 = vmatprep.mubr.msk.bf16.mxu0 %vm17953_vm1, %v17952_v21 }
 0x749   : > { %15642 = vmatmul.mubr.bf16.gmra.mrb[40].mxu1 %v9208_v46 }
 0x74a   : > { %15645 = vmatprep.mubr.msk.bf16.mxu1 %vm17953_vm1, %v17952_v21 }
 0x74b   : > { %16038 = vmatmul.mubr.bf16.gmra.mrb[40].mxu0 %v10968_v1 }
 0x74c   : > { %16041 = vmatprep.mubr.msk.bf16.mxu0 %vm17953_vm1, %v17952_v21 }
 0x751   : > { %15646 = vmatmul.mubr.bf16.gmra.mrb[44].mxu1 %v9209_v44 }
 0x752   : > { %15649 = vmatprep.mubr.msk.bf16.mxu1 %vm17953_vm1, %v17952_v21 }
 0x753   : > { %16042 = vmatmul.mubr.bf16.gmra.mrb[44].mxu0 %v10969_v33 }
 0x754   : > { %16045 = vmatprep.mubr.msk.bf16.mxu0 %vm17953_vm1, %v17952_v21 }
 0x759   : > { %15650 = vmatmul.mubr.bf16.gmra.mrb[48].mxu1 %v9210_v58 }
 0x75a   : > { %15653 = vmatprep.mubr.msk.bf16.mxu1 %vm17953_vm1, %v17952_v21 }
 0x75b   : > { %16046 = vmatmul.mubr.bf16.gmra.mrb[48].mxu0 %v10970_v43  ;;  %v9398_v43 = vld [vmem:[%s22145_s4 + $0x98] sm:$0xff] }
 0x75c   : > { %16049 = vmatprep.mubr.msk.bf16.mxu0 %vm17953_vm1, %v17952_v21  ;;  %v9394_v21 = vld [vmem:[%s22145_s4 + $0x78] sm:$0xff] }
 0x761   : > { %15654 = vmatmul.mubr.bf16.gmra.mrb[52].mxu1 %v9211_v3 }
 0x763   : > { %16050 = vmatmul.mubr.bf16.gmra.mrb[52].mxu0 %v10971_v28 }
 0x804   : > { %v9310_v7 = vpop.f32.mrb[28].mxu1 }
 0x805   : > { %9379 = vst [vmem:[%s20035_s7 + $0x70] sm:$0xff] %v9310_v7  ;;  %v9407_v16 = vmul.f32 %v9393_v13, %v9310_v7  ;;  %v15631_v62 = vpop.f32.mrb[29].mxu1 }
 0x806   : > { %v11070_v59 = vpop.f32.mrb[28].mxu0  ;;  %v9313_v0 = vpop.f32.mrb[30].mxu1 }
 0x807   : > { %11139 = vst [vmem:[%s20035_s7 + $0xe0] sm:$0xff] %v11070_v59  ;;  %v11167_v11 = vmul.f32 %v11153_v5, %v11070_v59  ;;  %v16027_v37 = vpop.f32.mrb[29].mxu0  ;;  %9380 = vst [vmem:[%s20035_s7 + $0x78] sm:$0xff] %v9313_v0  ;;  %v9408_v24 = vmul.f32 %v9394_v21, %v9313_v0  ;;  %v15632_v12 = vpop.f32.mrb[31].mxu1  ;;  %v9441_v34 = vmul.f32 %v9407_v16, %v9310_v7 }
 0x808   : > { %v11073_v60 = vpop.f32.mrb[30].mxu0 }
 0x809   : > { %11140 = vst [vmem:[%s20035_s7 + $0xe8] sm:$0xff] %v11073_v60  ;;  %v11168_v61 = vmul.f32 %v11154_v8, %v11073_v60  ;;  %v16028_v18 = vpop.f32.mrb[31].mxu0  ;;  %v9421_v50 = vadd.f32 %v9408_v24, %v9407_v16  ;;  %v9442_v4 = vmul.f32 %v9408_v24, %v9313_v0  ;;  %v11201_v22 = vmul.f32 %v11167_v11, %v11070_v59 }
 0x80b   : > { %v11181_v19 = vadd.f32 %v11168_v61, %v11167_v11  ;;  %v11202_v32 = vmul.f32 %v11168_v61, %v11073_v60  ;;  %v9455_v53 = vadd.f32 %v9442_v4, %v9441_v34  ;;  %v9399_v34 = vld [vmem:[%s22145_s4 + $0xa0] sm:$0xff]  ;;  %v11159_v4 = vld [vmem:[%s22145_s4 + $0x110] sm:$0xff] }
 0x80c   : > { %v9318_v30 = vpop.f32.mrb[32].mxu1 }
 0x80d   : > { %v11215_v25 = vadd.f32 %v11202_v32, %v11201_v22  ;;  %9381 = vst [vmem:[%s20035_s7 + $0x80] sm:$0xff] %v9318_v30  ;;  %v9409_v14 = vmul.f32 %v9395_v20, %v9318_v30  ;;  %v15635_v26 = vpop.f32.mrb[33].mxu1  ;;  %v9400_v32 = vld [vmem:[%s22145_s4 + $0xa8] sm:$0xff] }
 0x80e   : > { %v11078_v17 = vpop.f32.mrb[32].mxu0  ;;  %v9321_v54 = vpop.f32.mrb[34].mxu1 }
 0x80f   : > { %11141 = vst [vmem:[%s20035_s7 + $0xf0] sm:$0xff] %v11078_v17  ;;  %v11169_v31 = vmul.f32 %v11155_v23, %v11078_v17  ;;  %v16031_v29 = vpop.f32.mrb[33].mxu0  ;;  %v9422_v63 = vadd.f32 %v9421_v50, %v9409_v14  ;;  %v9443_v6 = vmul.f32 %v9409_v14, %v9318_v30  ;;  %9382 = vst [vmem:[%s20035_s7 + $0x88] sm:$0xff] %v9321_v54  ;;  %v15636_v47 = vpop.f32.mrb[35].mxu1 }
 0x810   : > { %v9410_v35 = vmul.f32 %v9396_v52, %v9321_v54  ;;  %v11081_v38 = vpop.f32.mrb[34].mxu0 }
 0x811   : > { %v11182_v42 = vadd.f32 %v11181_v19, %v11169_v31  ;;  %v11203_v41 = vmul.f32 %v11169_v31, %v11078_v17  ;;  %11142 = vst [vmem:[%s20035_s7 + $0xf8] sm:$0xff] %v11081_v38  ;;  %v11170_v46 = vmul.f32 %v11156_v57, %v11081_v38  ;;  %v16032_v1 = vpop.f32.mrb[35].mxu0  ;;  %v9456_v49 = vadd.f32 %v9455_v53, %v9443_v6 }
 0x812   : > { %v9423_v51 = vadd.f32 %v9422_v63, %v9410_v35  ;;  %v9444_v45 = vmul.f32 %v9410_v35, %v9321_v54 }
 0x813   : > { %v11216_v39 = vadd.f32 %v11215_v25, %v11203_v41  ;;  %v11183_v44 = vadd.f32 %v11182_v42, %v11170_v46  ;;  %v11204_v33 = vmul.f32 %v11170_v46, %v11081_v38  ;;  %v11160_v25 = vld [vmem:[%s22145_s4 + $0x118] sm:$0xff] }
 0x814   : > { %v9457_v55 = vadd.f32 %v9456_v49, %v9444_v45  ;;  %v9326_v58 = vpop.f32.mrb[36].mxu1  ;;  %v9401_v49 = vld [vmem:[%s22145_s4 + $0xb0] sm:$0xff]  ;;  %v11161_v45 = vld [vmem:[%s22145_s4 + $0x120] sm:$0xff] }
 0x815   : > { %v11217_v2 = vadd.f32 %v11216_v39, %v11204_v33  ;;  %9383 = vst [vmem:[%s20035_s7 + $0x90] sm:$0xff] %v9326_v58  ;;  %v9411_v36 = vmul.f32 %v9397_v48, %v9326_v58  ;;  %v15639_v40 = vpop.f32.mrb[37].mxu1  ;;  %v9402_v33 = vld [vmem:[%s22145_s4 + $0xb8] sm:$0xff] }
 0x816   : > { %v11086_v27 = vpop.f32.mrb[36].mxu0  ;;  %v9329_v28 = vpop.f32.mrb[38].mxu1 }
 0x817   : > { %11143 = vst [vmem:[%s20035_s7 + $0x100] sm:$0xff] %v11086_v27  ;;  %v11171_v3 = vmul.f32 %v11157_v56, %v11086_v27  ;;  %v16035_v13 = vpop.f32.mrb[37].mxu0  ;;  %v9424_v5 = vadd.f32 %v9423_v51, %v9411_v36  ;;  %v9445_v7 = vmul.f32 %v9411_v36, %v9326_v58  ;;  %9384 = vst [vmem:[%s20035_s7 + $0x98] sm:$0xff] %v9329_v28  ;;  %v15640_v16 = vpop.f32.mrb[39].mxu1 }
 0x818   : > { %v9412_v21 = vmul.f32 %v9398_v43, %v9329_v28  ;;  %v11089_v62 = vpop.f32.mrb[38].mxu0 }
 0x819   : > { %v11184_v59 = vadd.f32 %v11183_v44, %v11171_v3  ;;  %v11205_v8 = vmul.f32 %v11171_v3, %v11086_v27  ;;  %11144 = vst [vmem:[%s20035_s7 + $0x108] sm:$0xff] %v11089_v62  ;;  %v11172_v11 = vmul.f32 %v11158_v15, %v11089_v62  ;;  %v16036_v0 = vpop.f32.mrb[39].mxu0  ;;  %v9458_v37 = vadd.f32 %v9457_v55, %v9445_v7 }
 0x81a   : > { %v9425_v24 = vadd.f32 %v9424_v5, %v9412_v21  ;;  %v9446_v12 = vmul.f32 %v9412_v21, %v9329_v28 }
 0x81b   : > { %v11218_v60 = vadd.f32 %v11217_v2, %v11205_v8  ;;  %v11185_v61 = vadd.f32 %v11184_v59, %v11172_v11  ;;  %v11206_v18 = vmul.f32 %v11172_v11, %v11089_v62  ;;  %v11162_v2 = vld [vmem:[%s22145_s4 + $0x128] sm:$0xff] }
 0x81c   : > { %v9459_v50 = vadd.f32 %v9458_v37, %v9446_v12  ;;  %v9334_v19 = vpop.f32.mrb[40].mxu1  ;;  %v9403_v37 = vld [vmem:[%s22145_s4 + $0xc0] sm:$0xff]  ;;  %v11163_v12 = vld [vmem:[%s22145_s4 + $0x130] sm:$0xff] }
 0x81d   : > { %v11219_v22 = vadd.f32 %v11218_v60, %v11206_v18  ;;  %9385 = vst [vmem:[%s20035_s7 + $0xa0] sm:$0xff] %v9334_v19  ;;  %v9413_v20 = vmul.f32 %v9399_v34, %v9334_v19  ;;  %v15643_v53 = vpop.f32.mrb[41].mxu1  ;;  %v9404_v18 = vld [vmem:[%s22145_s4 + $0xc8] sm:$0xff] }
 0x81e   : > { %v11094_v23 = vpop.f32.mrb[40].mxu0  ;;  %v9337_v52 = vpop.f32.mrb[42].mxu1 }
 0x81f   : > { %11145 = vst [vmem:[%s20035_s7 + $0x110] sm:$0xff] %v11094_v23  ;;  %v11173_v30 = vmul.f32 %v11159_v4, %v11094_v23  ;;  %v16039_v14 = vpop.f32.mrb[41].mxu0  ;;  %v9426_v26 = vadd.f32 %v9425_v24, %v9413_v20  ;;  %v9447_v17 = vmul.f32 %v9413_v20, %v9334_v19  ;;  %9386 = vst [vmem:[%s20035_s7 + $0xa8] sm:$0xff] %v9337_v52  ;;  %v15644_v31 = vpop.f32.mrb[43].mxu1 }
 0x820   : > { %v9414_v57 = vmul.f32 %v9400_v32, %v9337_v52  ;;  %v11097_v54 = vpop.f32.mrb[42].mxu0  ;;  %v7674_v31 = vrot.slane %v21328_v9, 4 }
 0x821   : > { %v11186_v29 = vadd.f32 %v11185_v61, %v11173_v30  ;;  %v11207_v63 = vmul.f32 %v11173_v30, %v11094_v23  ;;  %11146 = vst [vmem:[%s20035_s7 + $0x118] sm:$0xff] %v11097_v54  ;;  %v11174_v6 = vmul.f32 %v11160_v25, %v11097_v54  ;;  %v16040_v35 = vpop.f32.mrb[43].mxu0  ;;  %v9460_v47 = vadd.f32 %v9459_v50, %v9447_v17 }
 0x822   : > { %v9427_v38 = vadd.f32 %v9426_v26, %v9414_v57  ;;  %v9448_v42 = vmul.f32 %v9414_v57, %v9337_v52 }
 0x823   : > { %v11220_v41 = vadd.f32 %v11219_v22, %v11207_v63  ;;  %v11187_v46 = vadd.f32 %v11186_v29, %v11174_v6  ;;  %v11208_v1 = vmul.f32 %v11174_v6, %v11097_v54  ;;  %v11164_v22 = vld [vmem:[%s22145_s4 + $0x138] sm:$0xff] }
 0x824   : > { %v9461_v51 = vadd.f32 %v9460_v47, %v9448_v42  ;;  %v9342_v44 = vpop.f32.mrb[44].mxu1  ;;  %v7708_v42 = vrot.slane %v21330_v10, 4 }
 0x825   : > { %v11221_v39 = vadd.f32 %v11220_v41, %v11208_v1  ;;  %9387 = vst [vmem:[%s20035_s7 + $0xb0] sm:$0xff] %v9342_v44  ;;  %v9415_v48 = vmul.f32 %v9401_v49, %v9342_v44  ;;  %v15647_v55 = vpop.f32.mrb[45].mxu1 }
 0x826   : > { %v11102_v56 = vpop.f32.mrb[44].mxu0  ;;  %v9345_v43 = vpop.f32.mrb[46].mxu1 }
 0x827   : > { %11147 = vst [vmem:[%s20035_s7 + $0x120] sm:$0xff] %v11102_v56  ;;  %v11175_v58 = vmul.f32 %v11161_v45, %v11102_v56  ;;  %v16043_v36 = vpop.f32.mrb[45].mxu0  ;;  %v9428_v40 = vadd.f32 %v9427_v38, %v9415_v48  ;;  %v9449_v27 = vmul.f32 %v9415_v48, %v9342_v44  ;;  %9388 = vst [vmem:[%s20035_s7 + $0xb8] sm:$0xff] %v9345_v43  ;;  %v15648_v3 = vpop.f32.mrb[47].mxu1  ;;  %v9405_v38 = vld [vmem:[%s22145_s4 + $0xd0] sm:$0xff]  ;;  %v11166_v48 = vld [vmem:[%s22145_s4 + $0x148] sm:$0xff] }
 0x828   : > { %v9416_v15 = vmul.f32 %v9402_v33, %v9345_v43  ;;  %v11105_v28 = vpop.f32.mrb[46].mxu0  ;;  %v7675_v45 = vadd.f32 %v7674_v31, %v21328_v9 }
 0x829   : > { %v11188_v13 = vadd.f32 %v11187_v46, %v11175_v58  ;;  %v11209_v5 = vmul.f32 %v11175_v58, %v11102_v56  ;;  %11148 = vst [vmem:[%s20035_s7 + $0x128] sm:$0xff] %v11105_v28  ;;  %v11176_v7 = vmul.f32 %v11162_v2, %v11105_v28  ;;  %v16044_v21 = vpop.f32.mrb[47].mxu0  ;;  %v9462_v16 = vadd.f32 %v9461_v51, %v9449_v27  ;;  %v11165_v46 = vld [vmem:[%s22145_s4 + $0x140] sm:$0xff]  ;;  %v9406_v51 = vld [vmem:[%s22145_s4 + $0xd8] sm:$0xff] }
 0x82a   : > { %v9429_v62 = vadd.f32 %v9428_v40, %v9416_v15  ;;  %v9450_v59 = vmul.f32 %v9416_v15, %v9345_v43  ;;  %v7709_v58 = vadd.f32 %v7708_v42, %v21330_v10 }
 0x82b   : > { %v11222_v8 = vadd.f32 %v11221_v39, %v11209_v5  ;;  %v11189_v11 = vadd.f32 %v11188_v13, %v11176_v7  ;;  %v11210_v0 = vmul.f32 %v11176_v7, %v11105_v28  ;;  %v7676_v5 = vrot.slane %v7675_v45, 2 }
 0x82c   : > { %v9463_v24 = vadd.f32 %v9462_v16, %v9450_v59  ;;  %v9350_v61 = vpop.f32.mrb[48].mxu1 }
 0x82d   : > { %v11223_v60 = vadd.f32 %v11222_v8, %v11210_v0  ;;  %9389 = vst [vmem:[%s20035_s7 + $0xc0] sm:$0xff] %v9350_v61  ;;  %v9417_v34 = vmul.f32 %v9403_v37, %v9350_v61  ;;  %v15651_v50 = vpop.f32.mrb[49].mxu1 }
 0x82e   : > { %v11110_v4 = vpop.f32.mrb[48].mxu0  ;;  %v9353_v32 = vpop.f32.mrb[50].mxu1 }
 0x82f   : > { %11149 = vst [vmem:[%s20035_s7 + $0x130] sm:$0xff] %v11110_v4  ;;  %v11177_v19 = vmul.f32 %v11163_v12, %v11110_v4  ;;  %v16047_v20 = vpop.f32.mrb[49].mxu0  ;;  %v9430_v53 = vadd.f32 %v9429_v62, %v9417_v34  ;;  %v9451_v23 = vmul.f32 %v9417_v34, %v9350_v61  ;;  %9390 = vst [vmem:[%s20035_s7 + $0xc8] sm:$0xff] %v9353_v32  ;;  %v15652_v30 = vpop.f32.mrb[51].mxu1 }
 0x830   : > { %v9418_v25 = vmul.f32 %v9404_v18, %v9353_v32  ;;  %v11113_v52 = vpop.f32.mrb[50].mxu0  ;;  %v7677_v12 = vadd.f32 %v7676_v5, %v7675_v45 }
 0x831   : > { %v11190_v14 = vadd.f32 %v11189_v11, %v11177_v19  ;;  %v11211_v26 = vmul.f32 %v11177_v19, %v11110_v4  ;;  %11150 = vst [vmem:[%s20035_s7 + $0x138] sm:$0xff] %v11113_v52  ;;  %v11178_v17 = vmul.f32 %v11164_v22, %v11113_v52  ;;  %v16048_v57 = vpop.f32.mrb[51].mxu0  ;;  %v9464_v54 = vadd.f32 %v9463_v24, %v9451_v23 }
 0x832   : > { %v9431_v29 = vadd.f32 %v9430_v53, %v9418_v25  ;;  %v9452_v63 = vmul.f32 %v9418_v25, %v9353_v32  ;;  %v7710_v11 = vrot.slane %v7709_v58, 2  ;;  %v7678_v20 = vrot.slane %v7677_v12, 1 }
 0x833   : > { %v11224_v6 = vadd.f32 %v11223_v60, %v11211_v26  ;;  %v11191_v35 = vadd.f32 %v11190_v14, %v11178_v17  ;;  %v11212_v47 = vmul.f32 %v11178_v17, %v11113_v52 }
 0x834   : > { %v9465_v41 = vadd.f32 %v9464_v54, %v9452_v63  ;;  %v9358_v49 = vpop.f32.mrb[52].mxu1  ;;  %v7711_v50 = vadd.f32 %v7710_v11, %v7709_v58  ;;  %v7679_v31 = vadd.f32 %v7678_v20, %v7677_v12 }
 0x835   : > { %v11225_v1 = vadd.f32 %v11224_v6, %v11212_v47  ;;  %9391 = vst [vmem:[%s20035_s7 + $0xd0] sm:$0xff] %v9358_v49  ;;  %v9419_v39 = vmul.f32 %v9405_v38, %v9358_v49  ;;  %v15655_v44 = vpop.f32.mrb[53].mxu1 }
 0x836   : > { %v11118_v33 = vpop.f32.mrb[52].mxu0  ;;  %v9361_v56 = vpop.f32.mrb[54].mxu1  ;;  %v7712_v52 = vrot.slane %v7711_v50, 1 }
 0x837   : > { %11151 = vst [vmem:[%s20035_s7 + $0x140] sm:$0xff] %v11118_v33  ;;  %v11179_v55 = vmul.f32 %v11165_v46, %v11118_v33  ;;  %v16051_v2 = vpop.f32.mrb[53].mxu0  ;;  %v9432_v43 = vadd.f32 %v9431_v29, %v9419_v39  ;;  %v9453_v36 = vmul.f32 %v9419_v39, %v9358_v49  ;;  %9392 = vst [vmem:[%s20035_s7 + $0xd8] sm:$0xff] %v9361_v56  ;;  %v15656_v9 = vpop.f32.mrb[55].mxu1  ;;  %v11238_v49 = vld [vmem:[#allocation4 + $0x1] sm:$0x1] }
 0x838   : > { %v9420_v40 = vmul.f32 %v9406_v51, %v9361_v56  ;;  %v11121_v27 = vpop.f32.mrb[54].mxu0 }
 0x839   : > { %v11192_v15 = vadd.f32 %v11191_v35, %v11179_v55  ;;  %v11213_v3 = vmul.f32 %v11179_v55, %v11118_v33  ;;  %11152 = vst [vmem:[%s20035_s7 + $0x148] sm:$0xff] %v11121_v27  ;;  %v11180_v28 = vmul.f32 %v11166_v48, %v11121_v27  ;;  %v16052_v13 = vpop.f32.mrb[55].mxu0  ;;  %v9466_v7 = vadd.f32 %v9465_v41, %v9453_v36  ;;  %v11235_v41 = vld [vmem:[#allocation4] sm:$0x1] }
 0x83a   : > { %v9433_v21 = vadd.f32 %v9432_v43, %v9420_v40  ;;  %v9454_v16 = vmul.f32 %v9420_v40, %v9361_v56  ;;  %v7713_v35 = vadd.f32 %v7712_v52, %v7711_v50 }
 0x83b   : > { %v11226_v62 = vadd.f32 %v11225_v1, %v11213_v3  ;;  %v11193_v59 = vadd.f32 %v11192_v15, %v11180_v28  ;;  %v11214_v8 = vmul.f32 %v11180_v28, %v11121_v27 }
 0x83c   : > { %v9434_v10 = vrot.slane %v9433_v21, 4  ;;  %v9467_v0 = vadd.f32 %v9466_v7, %v9454_v16 }
 0x83d   : > { %v11194_v37 = vrot.slane %v11193_v59, 4  ;;  %v11227_v24 = vadd.f32 %v11226_v62, %v11214_v8 }
 0x83e   : > { %v9435_v60 = vadd.f32 %v9434_v10, %v9433_v21  ;;  %v9468_v61 = vrot.slane %v9467_v0, 4 }
 0x83f   : > { %v11195_v18 = vadd.f32 %v11194_v37, %v11193_v59  ;;  %v11228_v34 = vrot.slane %v11227_v24, 4 }
 0x840   : > { %v9436_v4 = vrot.slane %v9435_v60, 2  ;;  %v9469_v22 = vadd.f32 %v9468_v61, %v9467_v0 }
 0x841   : > { %v11196_v19 = vrot.slane %v11195_v18, 2  ;;  %v11229_v32 = vadd.f32 %v11228_v34, %v11227_v24 }
 0x842   : > { %v9437_v53 = vadd.f32 %v9436_v4, %v9435_v60  ;;  %v9470_v23 = vrot.slane %v9469_v22, 2 }
 0x843   : > { %v11197_v25 = vadd.f32 %v11196_v19, %v11195_v18  ;;  %v11230_v30 = vrot.slane %v11229_v32, 2 }
 0x844   : > { %v9438_v14 = vrot.slane %v9437_v53, 1  ;;  %v9471_v26 = vadd.f32 %v9470_v23, %v9469_v22 }
 0x845   : > { %v11198_v17 = vrot.slane %v11197_v25, 1  ;;  %v11231_v57 = vadd.f32 %v11230_v30, %v11229_v32 }
 0x846   : > { %v9439_v54 = vadd.f32 %v9438_v14, %v9437_v53  ;;  %v9472_v29 = vrot.slane %v9471_v26, 1 }
 0x847   : > { %v11199_v63 = vadd.f32 %v11198_v17, %v11197_v25  ;;  %v11232_v6 = vrot.slane %v11231_v57, 1 }
 0x848   : > { %v9440_v47 = vadd.f32 %v9439_v54, %v7679_v31  ;;  %v9473_v38 = vadd.f32 %v9472_v29, %v9471_v26 }
 0x849   : > { %v11233_v42 = vadd.f32 %v11232_v6, %v11231_v57 }
 0x84a   : > { %v9474_v46 = vadd.f32 %v9473_v38, %v7713_v35  ;;  %v11200_v1 = vadd.f32 %v11199_v63, %v9440_v47 }
 0x84c   : > { %v11234_v51 = vadd.f32 %v11233_v42, %v9474_v46  ;;  %v11236_v45 = vadd.f32 %v11235_v41, %v11200_v1 }
 0x84e   : > { %11237 = vst [vmem:[#allocation4] sm:$0x1] %v11236_v45  ;;  %v11239_v39 = vadd.f32 %v11238_v49, %v11234_v51 }
 0x850   : > { %11240 = vst [vmem:[#allocation4 + $0x1] sm:$0x1] %v11239_v39 }
 0x851 PF: > { %p11242_p1 = pnand %p263_p8, %p252_p6 }
 0x852   : > { %v17954_v56 = vmov (!%p11242_p1), 0.0   ;;  %v11253_v40 = vld [vmem:[%s22144_s3 + $0x2] sm:$0x1] (!%p11242_p1)  ;;  %v11258_v15 = vld [vmem:[%s22144_s3 + $0x3] sm:$0x1] (!%p11242_p1) }
 0x853   : > { %11245 = sbr.rel (%p11242_p1) target bundleno = 2162 (0x872), region = 60 }
 0x855   : > { %v11246_v44 = vld [vmem:[#allocation4] sm:$0x1] (!%p11242_p1) }
 0x856   : > { %v11247_v48 = vmul.f32 (!%p11242_p1), 0.001953125, %v11246_v44 }
 0x857   : > { %v11248_v33 = vld [vmem:[#allocation4 + $0x1] sm:$0x1] (!%p11242_p1) }
 0x858   : > { %v11249_v55 = vmul.f32 (!%p11242_p1), 0.001953125, %v11248_v33  ;;  %11262 = vst [vmem:[#allocation4] sm:$0x3] (!%p11242_p1), %v17954_v56  ;;  %v11250_v2 = vmul.f32 (!%p11242_p1), %v11247_v48, %v11247_v48 }
 0x85a   : > { %v11251_v58 = vsub.f32 %v11249_v55, %v11250_v2 }
 0x85c   : > { %v11252_v43 = vmax.f32 %v11251_v58, 0.0 }
 0x85e   : > { %v11254_v36 = vadd.f32 1e-05, %v11252_v43 }
 0x860   : > { %17906 = vrsqrt.f32 %v11254_v36 }
 0x86a   : > { %v17907_v9 = vpop.eup %17906 }
 0x86b   : > { %v11256_v27 = vmul.f32 %v17907_v9, %v11253_v40 }
 0x86d   : > { %11257 = vst [vmem:[#allocation5] sm:$0x1] %v11256_v27  ;;  %v11259_v3 = vmul.f32 %v11256_v27, %v11247_v48 }
 0x86f   : > { %v11260_v28 = vsub.f32 %v11258_v15, %v11259_v3 }
 0x871   : > { %11261 = vst [vmem:[#allocation5 + $0x1] sm:$0x1] %v11260_v28 }
 0x872 PF: > { %p12862_p2 = scmp.ne.s32.totalorder %s17934_s19, 2 }
 0x873   : > { %s11268_s30 = smul.u32 (!%p12862_p2), 336, %s17930_s18  ;;  %v11320_v21 = vld [vmem:[%s18034_s6 + $0x18] sm:$0xff] (!%p12862_p2)  ;;  %v11321_v62 = vld [vmem:[%s18034_s6 + $0x20] sm:$0xff] (!%p12862_p2)  ;;  %v11322_v12 = vld [vmem:[%s18034_s6 + $0x28] sm:$0xff] (!%p12862_p2) }
 0x874   : > { %11265 = sbr.rel (%p12862_p2) target bundleno = 2216 (0x8a8), region = 64  ;;  %v21910_v13 = vld [vmem:[#allocation5] ss:$0 sm:$0xff] (!%p12862_p2)  ;;  %v11323_v32 = vld [vmem:[%s18034_s6 + $0x30] sm:$0xff] (!%p12862_p2)  ;;  %v11324_v20 = vld [vmem:[%s18034_s6 + $0x38] sm:$0xff] (!%p12862_p2) }
 0x875   : > { %s21914_s8 = scalar_lea.vmem (!%p12862_p2), [#allocation2], %s11268_s30  ;;  %v11325_v53 = vld [vmem:[%s18034_s6 + $0x40] sm:$0xff] (!%p12862_p2)  ;;  %v11326_v14 = vld [vmem:[%s18034_s6 + $0x48] sm:$0xff] (!%p12862_p2)  ;;  %v11327_v29 = vld [vmem:[%s18034_s6 + $0x50] sm:$0xff] (!%p12862_p2) }
 0x876   : > { %v11270_v7 = vld [vmem:[%s21914_s8] sm:$0xff] (!%p12862_p2)  ;;  %v11271_v16 = vld [vmem:[%s21914_s8 + $0x8] sm:$0xff] (!%p12862_p2)  ;;  %v11272_v59 = vld [vmem:[%s21914_s8 + $0x10] sm:$0xff] (!%p12862_p2) }
 0x877   : > { %v11288_v8 = vmul.f32 (!%p12862_p2), %v21910_v13, %v11270_v7  ;;  %v11289_v11 = vmul.f32 (!%p12862_p2), %v21910_v13, %v11271_v16  ;;  %v11290_v10 = vmul.f32 (!%p12862_p2), %v21910_v13, %v11272_v59  ;;  %v11273_v0 = vld [vmem:[%s21914_s8 + $0x18] sm:$0xff] (!%p12862_p2)  ;;  %v11274_v37 = vld [vmem:[%s21914_s8 + $0x20] sm:$0xff] (!%p12862_p2)  ;;  %v11275_v24 = vld [vmem:[%s21914_s8 + $0x28] sm:$0xff] (!%p12862_p2) }
 0x878   : > { %v21912_v5 = vld [vmem:[#allocation5 + $0x1] ss:$0 sm:$0xff] (!%p12862_p2)  ;;  %v11291_v60 = vmul.f32 (!%p12862_p2), %v21910_v13, %v11273_v0  ;;  %v11292_v61 = vmul.f32 (!%p12862_p2), %v21910_v13, %v11274_v37  ;;  %v11293_v18 = vmul.f32 (!%p12862_p2), %v21910_v13, %v11275_v24  ;;  %v11276_v34 = vld [vmem:[%s21914_s8 + $0x30] sm:$0xff] (!%p12862_p2)  ;;  %v11277_v50 = vld [vmem:[%s21914_s8 + $0x38] sm:$0xff] (!%p12862_p2) }
 0x879   : > { %v11306_v4 = vadd.f32 (!%p12862_p2), %v21912_v5, %v11288_v8  ;;  %v11307_v22 = vadd.f32 (!%p12862_p2), %v21912_v5, %v11289_v11  ;;  %v11308_v19 = vadd.f32 (!%p12862_p2), %v21912_v5, %v11290_v10  ;;  %v11294_v23 = vmul.f32 (!%p12862_p2), %v21910_v13, %v11276_v34  ;;  %v11278_v38 = vld [vmem:[%s21914_s8 + $0x40] sm:$0xff] (!%p12862_p2)  ;;  %v11279_v42 = vld [vmem:[%s21914_s8 + $0x48] sm:$0xff] (!%p12862_p2)  ;;  %v11280_v41 = vld [vmem:[%s21914_s8 + $0x50] sm:$0xff] (!%p12862_p2) }
 0x87a   : > { %v11309_v25 = vadd.f32 (!%p12862_p2), %v21912_v5, %v11291_v60  ;;  %v11310_v30 = vadd.f32 (!%p12862_p2), %v21912_v5, %v11292_v61  ;;  %v11311_v52 = vadd.f32 (!%p12862_p2), %v21912_v5, %v11293_v18  ;;  %v11295_v26 = vmul.f32 (!%p12862_p2), %v21910_v13, %v11277_v50  ;;  %v11281_v45 = vld [vmem:[%s21914_s8 + $0x58] sm:$0xff] (!%p12862_p2)  ;;  %v11282_v39 = vld [vmem:[%s21914_s8 + $0x60] sm:$0xff] (!%p12862_p2)  ;;  %v11283_v44 = vld [vmem:[%s21914_s8 + $0x68] sm:$0xff] (!%p12862_p2) }
 0x87b   : > { %v11334_v17 = vadd.f32 %v11320_v21, %v11306_v4  ;;  %v11335_v57 = vadd.f32 %v11321_v62, %v11307_v22  ;;  %v11336_v31 = vadd.f32 %v11322_v12, %v11308_v19  ;;  %v11312_v54 = vadd.f32 %v21912_v5, %v11294_v23  ;;  %v11376_v2 = vld [vmem:[%s21914_s8 + $0x70] sm:$0xff]  ;;  %v11377_v9 = vld [vmem:[%s21914_s8 + $0x78] sm:$0xff]  ;;  %v11329_v3 = vld [vmem:[%s18034_s6 + $0x60] sm:$0xff] }
 0x87c   : > { %v11337_v63 = vadd.f32 %v11323_v32, %v11309_v25  ;;  %v11338_v6 = vadd.f32 %v11324_v20, %v11310_v30  ;;  %v11339_v35 = vadd.f32 %v11325_v53, %v11311_v52  ;;  %v11313_v47 = vadd.f32 %v21912_v5, %v11295_v26  ;;  %v11328_v15 = vld [vmem:[%s18034_s6 + $0x58] sm:$0xff]  ;;  %v11330_v28 = vld [vmem:[%s18034_s6 + $0x68] sm:$0xff]  ;;  %v11331_v11 = vld [vmem:[%s18034_s6 + $0x70] sm:$0xff] }
 0x87d   : > { %v11348_v46 = vmax.f32 %v11334_v17, 0.0  ;;  %v11349_v1 = vmax.f32 %v11335_v57, 0.0  ;;  %v11350_v49 = vmax.f32 %v11336_v31, 0.0  ;;  %v11340_v51 = vadd.f32 %v11326_v14, %v11312_v54  ;;  %v11332_v10 = vld [vmem:[%s18034_s6 + $0x78] sm:$0xff]  ;;  %v11333_v0 = vld [vmem:[%s18034_s6 + $0x80] sm:$0xff]  ;;  %v11418_v61 = vld [vmem:[%s18034_s6 + $0x88] sm:$0xff] }
 0x87e   : > { %v11351_v33 = vmax.f32 %v11337_v63, 0.0  ;;  %v11352_v48 = vmax.f32 %v11338_v6, 0.0  ;;  %v11353_v55 = vmax.f32 %v11339_v35, 0.0  ;;  %v11341_v56 = vadd.f32 %v11327_v29, %v11313_v47  ;;  %v11419_v19 = vld [vmem:[%s18034_s6 + $0x90] sm:$0xff]  ;;  %v11378_v25 = vld [vmem:[%s21914_s8 + $0x80] sm:$0xff]  ;;  %v11379_v30 = vld [vmem:[%s21914_s8 + $0x88] sm:$0xff] }
 0x87f   : > { %11362 = vst [vmem:[%s18039_s9] sm:$0xff] %v11348_v46  ;;  %11363 = vst [vmem:[%s18039_s9 + $0x8] sm:$0xff] %v11349_v1  ;;  %v11354_v58 = vmax.f32 %v11340_v51, 0.0  ;;  %v11296_v43 = vmul.f32 %v21910_v13, %v11278_v38  ;;  %v11297_v36 = vmul.f32 %v21910_v13, %v11279_v42  ;;  %v11298_v40 = vmul.f32 %v21910_v13, %v11280_v41  ;;  %v11380_v52 = vld [vmem:[%s21914_s8 + $0x90] sm:$0xff]  ;;  %v11381_v31 = vld [vmem:[%s21914_s8 + $0x98] sm:$0xff] }
 0x880   : > { %11364 = vst [vmem:[%s18039_s9 + $0x10] sm:$0xff] %v11350_v49  ;;  %11365 = vst [vmem:[%s18039_s9 + $0x18] sm:$0xff] %v11351_v33  ;;  %v11355_v27 = vmax.f32 %v11341_v56, 0.0  ;;  %v11299_v7 = vmul.f32 %v21910_v13, %v11281_v45  ;;  %v11300_v21 = vmul.f32 %v21910_v13, %v11282_v39  ;;  %v11301_v16 = vmul.f32 %v21910_v13, %v11283_v44  ;;  %v11382_v54 = vld [vmem:[%s21914_s8 + $0xa0] sm:$0xff]  ;;  %v11383_v29 = vld [vmem:[%s21914_s8 + $0xa8] sm:$0xff] }
 0x881   : > { %11366 = vst [vmem:[%s18039_s9 + $0x20] sm:$0xff] %v11352_v48  ;;  %11367 = vst [vmem:[%s18039_s9 + $0x28] sm:$0xff] %v11353_v55  ;;  %v11314_v62 = vadd.f32 %v21912_v5, %v11296_v43  ;;  %v11315_v59 = vadd.f32 %v21912_v5, %v11297_v36  ;;  %v11316_v8 = vadd.f32 %v21912_v5, %v11298_v40  ;;  %v11384_v38 = vld [vmem:[%s21914_s8 + $0xb0] sm:$0xff]  ;;  %v11385_v49 = vld [vmem:[%s21914_s8 + $0xb8] sm:$0xff] }
 0x882   : > { %11368 = vst [vmem:[%s18039_s9 + $0x30] sm:$0xff] %v11354_v58  ;;  %v11390_v37 = vmul.f32 %v21910_v13, %v11376_v2  ;;  %11369 = vst [vmem:[%s18039_s9 + $0x38] sm:$0xff] %v11355_v27  ;;  %v11317_v24 = vadd.f32 %v21912_v5, %v11299_v7  ;;  %v11318_v12 = vadd.f32 %v21912_v5, %v11300_v21  ;;  %v11420_v45 = vld [vmem:[%s18034_s6 + $0x98] sm:$0xff]  ;;  %v11421_v39 = vld [vmem:[%s18034_s6 + $0xa0] sm:$0xff] }
 0x883   : > { %v11319_v60 = vadd.f32 %v21912_v5, %v11301_v16  ;;  %v11391_v18 = vmul.f32 %v21910_v13, %v11377_v9  ;;  %v11342_v34 = vadd.f32 %v11328_v15, %v11314_v62  ;;  %v11343_v50 = vadd.f32 %v11329_v3, %v11315_v59  ;;  %v11422_v44 = vld [vmem:[%s18034_s6 + $0xa8] sm:$0xff]  ;;  %v11423_v43 = vld [vmem:[%s18034_s6 + $0xb0] sm:$0xff]  ;;  %v11424_v36 = vld [vmem:[%s18034_s6 + $0xb8] sm:$0xff] }
 0x884   : > { %v11344_v4 = vadd.f32 %v11330_v28, %v11316_v8  ;;  %v11404_v22 = vadd.f32 %v21912_v5, %v11390_v37  ;;  %v11345_v32 = vadd.f32 %v11331_v11, %v11317_v24  ;;  %v11346_v20 = vadd.f32 %v11332_v10, %v11318_v12  ;;  %v11425_v40 = vld [vmem:[%s18034_s6 + $0xc0] sm:$0xff]  ;;  %v11426_v28 = vld [vmem:[%s18034_s6 + $0xc8] sm:$0xff]  ;;  %v11427_v8 = vld [vmem:[%s18034_s6 + $0xd0] sm:$0xff] }
 0x885   : > { %v11347_v53 = vadd.f32 %v11333_v0, %v11319_v60  ;;  %v11405_v23 = vadd.f32 %v21912_v5, %v11391_v18  ;;  %v11356_v14 = vmax.f32 %v11342_v34, 0.0  ;;  %v11357_v26 = vmax.f32 %v11343_v50, 0.0  ;;  %v11386_v24 = vld [vmem:[%s21914_s8 + $0xc0] sm:$0xff]  ;;  %v11387_v12 = vld [vmem:[%s21914_s8 + $0xc8] sm:$0xff]  ;;  %v11388_v60 = vld [vmem:[%s21914_s8 + $0xd0] sm:$0xff] }
 0x886   : > { %v11358_v17 = vmax.f32 %v11344_v4, 0.0  ;;  %v11432_v57 = vadd.f32 %v11418_v61, %v11404_v22  ;;  %v11359_v63 = vmax.f32 %v11345_v32, 0.0  ;;  %v11360_v6 = vmax.f32 %v11346_v20, 0.0  ;;  %v11389_v4 = vld [vmem:[%s21914_s8 + $0xd8] sm:$0xff]  ;;  %v11474_v22 = vld [vmem:[%s21914_s8 + $0xe0] sm:$0xff] }
 0x887   : > { %v11361_v35 = vmax.f32 %v11347_v53, 0.0  ;;  %v11433_v47 = vadd.f32 %v11419_v19, %v11405_v23  ;;  %11370 = vst [vmem:[%s18039_s9 + $0x40] sm:$0xff] %v11356_v14  ;;  %11371 = vst [vmem:[%s18039_s9 + $0x48] sm:$0xff] %v11357_v26  ;;  %v11392_v41 = vmul.f32 %v21910_v13, %v11378_v25  ;;  %v11393_v46 = vmul.f32 %v21910_v13, %v11379_v30  ;;  %v11475_v19 = vld [vmem:[%s21914_s8 + $0xe8] sm:$0xff]  ;;  %v11476_v25 = vld [vmem:[%s21914_s8 + $0xf0] sm:$0xff] }
 0x888   : > { %11372 = vst [vmem:[%s18039_s9 + $0x50] sm:$0xff] %v11358_v17  ;;  %v11446_v42 = vmax.f32 %v11432_v57, 0.0  ;;  %v11394_v1 = vmul.f32 %v21910_v13, %v11380_v52  ;;  %11373 = vst [vmem:[%s18039_s9 + $0x58] sm:$0xff] %v11359_v63  ;;  %v11395_v33 = vmul.f32 %v21910_v13, %v11381_v31  ;;  %v11396_v48 = vmul.f32 %v21910_v13, %v11382_v54  ;;  %v11477_v17 = vld [vmem:[%s21914_s8 + $0xf8] sm:$0xff]  ;;  %v11429_v54 = vld [vmem:[%s18034_s6 + $0xe0] sm:$0xff] }
 0x889   : > { %11374 = vst [vmem:[%s18039_s9 + $0x60] sm:$0xff] %v11360_v6  ;;  %11375 = vst [vmem:[%s18039_s9 + $0x68] sm:$0xff] %v11361_v35  ;;  %v11447_v51 = vmax.f32 %v11433_v47, 0.0  ;;  %v11397_v55 = vmul.f32 %v21910_v13, %v11383_v29  ;;  %v11406_v56 = vadd.f32 %v21912_v5, %v11392_v41  ;;  %v11407_v2 = vadd.f32 %v21912_v5, %v11393_v46  ;;  %v11428_v31 = vld [vmem:[%s18034_s6 + $0xd8] sm:$0xff]  ;;  %v11430_v29 = vld [vmem:[%s18034_s6 + $0xe8] sm:$0xff] }
 0x88a   : > { %11460 = vst [vmem:[%s18039_s9 + $0x70] sm:$0xff] %v11446_v42  ;;  %v11408_v58 = vadd.f32 %v21912_v5, %v11394_v1  ;;  %v11398_v9 = vmul.f32 %v21910_v13, %v11384_v38  ;;  %v11409_v27 = vadd.f32 %v21912_v5, %v11395_v33  ;;  %v11410_v15 = vadd.f32 %v21912_v5, %v11396_v48  ;;  %v11431_v41 = vld [vmem:[%s18034_s6 + $0xf0] sm:$0xff]  ;;  %v11516_v46 = vld [vmem:[%s18034_s6 + $0xf8] sm:$0xff]  ;;  %v11517_v1 = vld [vmem:[%s18034_s6 + $0x100] sm:$0xff] }
 0x88b   : > { %11461 = vst [vmem:[%s18039_s9 + $0x78] sm:$0xff] %v11447_v51  ;;  %v11411_v3 = vadd.f32 %v21912_v5, %v11397_v55  ;;  %v11399_v7 = vmul.f32 %v21910_v13, %v11385_v49  ;;  %v11434_v21 = vadd.f32 %v11420_v45, %v11406_v56  ;;  %v11435_v16 = vadd.f32 %v11421_v39, %v11407_v2 }
 0x88c   : > { %v11436_v62 = vadd.f32 %v11422_v44, %v11408_v58  ;;  %v11412_v59 = vadd.f32 %v21912_v5, %v11398_v9  ;;  %v11437_v11 = vadd.f32 %v11423_v43, %v11409_v27  ;;  %v11438_v10 = vadd.f32 %v11424_v36, %v11410_v15  ;;  %v11518_v44 = vld [vmem:[%s18034_s6 + $0x108] sm:$0xff]  ;;  %v11519_v58 = vld [vmem:[%s18034_s6 + $0x110] sm:$0xff]  ;;  %v11478_v27 = vld [vmem:[%s21914_s8 + $0x100] sm:$0xff] }
 0x88d   : > { %v11439_v0 = vadd.f32 %v11425_v40, %v11411_v3  ;;  %v11413_v37 = vadd.f32 %v21912_v5, %v11399_v7  ;;  %v11448_v61 = vmax.f32 %v11434_v21, 0.0  ;;  %v11449_v18 = vmax.f32 %v11435_v16, 0.0  ;;  %v11479_v15 = vld [vmem:[%s21914_s8 + $0x108] sm:$0xff]  ;;  %v11480_v3 = vld [vmem:[%s21914_s8 + $0x110] sm:$0xff] }
 0x88e   : > { %v11450_v34 = vmax.f32 %v11436_v62, 0.0  ;;  %v11440_v50 = vadd.f32 %v11426_v28, %v11412_v59  ;;  %v11451_v32 = vmax.f32 %v11437_v11, 0.0  ;;  %v11452_v20 = vmax.f32 %v11438_v10, 0.0  ;;  %v11481_v62 = vld [vmem:[%s21914_s8 + $0x118] sm:$0xff]  ;;  %v11482_v59 = vld [vmem:[%s21914_s8 + $0x120] sm:$0xff] }
 0x88f   : > { %v11453_v53 = vmax.f32 %v11439_v0, 0.0  ;;  %v11441_v23 = vadd.f32 %v11427_v8, %v11413_v37  ;;  %11462 = vst [vmem:[%s18039_s9 + $0x80] sm:$0xff] %v11448_v61  ;;  %11463 = vst [vmem:[%s18039_s9 + $0x88] sm:$0xff] %v11449_v18  ;;  %v11400_v52 = vmul.f32 %v21910_v13, %v11386_v24  ;;  %v11401_v14 = vmul.f32 %v21910_v13, %v11387_v12  ;;  %v11483_v8 = vld [vmem:[%s21914_s8 + $0x128] sm:$0xff]  ;;  %v11484_v24 = vld [vmem:[%s21914_s8 + $0x130] sm:$0xff] }
 0x890   : > { %11464 = vst [vmem:[%s18039_s9 + $0x90] sm:$0xff] %v11450_v34  ;;  %v11454_v30 = vmax.f32 %v11440_v50, 0.0  ;;  %v11402_v26 = vmul.f32 %v21910_v13, %v11388_v60  ;;  %11465 = vst [vmem:[%s18039_s9 + $0x98] sm:$0xff] %v11451_v32  ;;  %v11403_v63 = vmul.f32 %v21910_v13, %v11389_v4  ;;  %v11488_v6 = vmul.f32 %v21910_v13, %v11474_v22  ;;  %v11485_v34 = vld [vmem:[%s21914_s8 + $0x138] sm:$0xff]  ;;  %v11521_v22 = vld [vmem:[%s18034_s6 + $0x120] sm:$0xff] }
 0x891   : > { %11466 = vst [vmem:[%s18039_s9 + $0xa0] sm:$0xff] %v11452_v20  ;;  %11467 = vst [vmem:[%s18039_s9 + $0xa8] sm:$0xff] %v11453_v53  ;;  %v11455_v57 = vmax.f32 %v11441_v23, 0.0  ;;  %v11489_v35 = vmul.f32 %v21910_v13, %v11475_v19  ;;  %v11414_v47 = vadd.f32 %v21912_v5, %v11400_v52  ;;  %v11415_v38 = vadd.f32 %v21912_v5, %v11401_v14  ;;  %v11520_v4 = vld [vmem:[%s18034_s6 + $0x118] sm:$0xff]  ;;  %v11522_v19 = vld [vmem:[%s18034_s6 + $0x128] sm:$0xff] }
 0x892   : > { %11468 = vst [vmem:[%s18039_s9 + $0xb0] sm:$0xff] %v11454_v30  ;;  %v11416_v42 = vadd.f32 %v21912_v5, %v11402_v26  ;;  %v11490_v49 = vmul.f32 %v21910_v13, %v11476_v25  ;;  %v11417_v51 = vadd.f32 %v21912_v5, %v11403_v63  ;;  %v11502_v45 = vadd.f32 %v21912_v5, %v11488_v6  ;;  %v11523_v52 = vld [vmem:[%s18034_s6 + $0x130] sm:$0xff]  ;;  %v11524_v14 = vld [vmem:[%s18034_s6 + $0x138] sm:$0xff]  ;;  %v11525_v26 = vld [vmem:[%s18034_s6 + $0x140] sm:$0xff] }
 0x893   : > { %11469 = vst [vmem:[%s18039_s9 + $0xb8] sm:$0xff] %v11455_v57  ;;  %v11503_v39 = vadd.f32 %v21912_v5, %v11489_v35  ;;  %v11491_v33 = vmul.f32 %v21910_v13, %v11477_v17  ;;  %v11442_v48 = vadd.f32 %v11428_v31, %v11414_v47  ;;  %v11443_v55 = vadd.f32 %v11429_v54, %v11415_v38 }
 0x894   : > { %v11444_v56 = vadd.f32 %v11430_v29, %v11416_v42  ;;  %v11504_v2 = vadd.f32 %v21912_v5, %v11490_v49  ;;  %v11445_v43 = vadd.f32 %v11431_v41, %v11417_v51  ;;  %v11530_v36 = vadd.f32 %v11516_v46, %v11502_v45  ;;  %v11526_v29 = vld [vmem:[%s18034_s6 + $0x148] sm:$0xff]  ;;  %v11527_v42 = vld [vmem:[%s18034_s6 + $0x150] sm:$0xff]  ;;  %v11486_v51 = vld [vmem:[%s21914_s8 + $0x140] sm:$0xff] }
 0x895   : > { %v11531_v40 = vadd.f32 %v11517_v1, %v11503_v39  ;;  %v11505_v9 = vadd.f32 %v21912_v5, %v11491_v33  ;;  %v11456_v28 = vmax.f32 %v11442_v48, 0.0  ;;  %v11457_v7 = vmax.f32 %v11443_v55, 0.0  ;;  %v11487_v45 = vld [vmem:[%s21914_s8 + $0x148] sm:$0xff] }
 0x896   : > { %v11458_v21 = vmax.f32 %v11444_v56, 0.0  ;;  %v11532_v16 = vadd.f32 %v11518_v44, %v11504_v2  ;;  %v11459_v11 = vmax.f32 %v11445_v43, 0.0  ;;  %v11544_v10 = vmax.f32 %v11530_v36, 0.0 }
 0x897   : > { %v11545_v0 = vmax.f32 %v11531_v40, 0.0  ;;  %v11533_v37 = vadd.f32 %v11519_v58, %v11505_v9  ;;  %11470 = vst [vmem:[%s18039_s9 + $0xc0] sm:$0xff] %v11456_v28  ;;  %11471 = vst [vmem:[%s18039_s9 + $0xc8] sm:$0xff] %v11457_v7  ;;  %v11492_v60 = vmul.f32 %v21910_v13, %v11478_v27  ;;  %v11493_v61 = vmul.f32 %v21910_v13, %v11479_v15  ;;  %v11528_v27 = vld [vmem:[%s18034_s6 + $0x158] sm:$0xff]  ;;  %v11529_v15 = vld [vmem:[%s18034_s6 + $0x160] sm:$0xff] }
 0x898   : > { %11472 = vst [vmem:[%s18039_s9 + $0xd0] sm:$0xff] %v11458_v21  ;;  %v11546_v12 = vmax.f32 %v11532_v16, 0.0  ;;  %v11494_v18 = vmul.f32 %v21910_v13, %v11480_v3  ;;  %11473 = vst [vmem:[%s18039_s9 + $0xd8] sm:$0xff] %v11459_v11  ;;  %v11495_v32 = vmul.f32 %v21910_v13, %v11481_v62  ;;  %v11496_v20 = vmul.f32 %v21910_v13, %v11482_v59 }
 0x899   : > { %11558 = vst [vmem:[%s18039_s9 + $0xe0] sm:$0xff] %v11544_v10  ;;  %11559 = vst [vmem:[%s18039_s9 + $0xe8] sm:$0xff] %v11545_v0  ;;  %v11547_v50 = vmax.f32 %v11533_v37, 0.0  ;;  %v11497_v53 = vmul.f32 %v21910_v13, %v11483_v8  ;;  %v11506_v23 = vadd.f32 %v21912_v5, %v11492_v60  ;;  %v11507_v25 = vadd.f32 %v21912_v5, %v11493_v61 }
 0x89a   : > { %11560 = vst [vmem:[%s18039_s9 + $0xf0] sm:$0xff] %v11546_v12  ;;  %v11508_v30 = vadd.f32 %v21912_v5, %v11494_v18  ;;  %v11498_v17 = vmul.f32 %v21910_v13, %v11484_v24  ;;  %v11509_v57 = vadd.f32 %v21912_v5, %v11495_v32  ;;  %v11510_v31 = vadd.f32 %v21912_v5, %v11496_v20 }
 0x89b   : > { %11561 = vst [vmem:[%s18039_s9 + $0xf8] sm:$0xff] %v11547_v50  ;;  %v11511_v54 = vadd.f32 %v21912_v5, %v11497_v53  ;;  %v11499_v63 = vmul.f32 %v21910_v13, %v11485_v34  ;;  %v11534_v6 = vadd.f32 %v11520_v4, %v11506_v23  ;;  %v11535_v35 = vadd.f32 %v11521_v22, %v11507_v25 }
 0x89c   : > { %v11536_v47 = vadd.f32 %v11522_v19, %v11508_v30  ;;  %v11512_v38 = vadd.f32 %v21912_v5, %v11498_v17  ;;  %v11537_v41 = vadd.f32 %v11523_v52, %v11509_v57  ;;  %v11538_v46 = vadd.f32 %v11524_v14, %v11510_v31 }
 0x89d   : > { %v11539_v1 = vadd.f32 %v11525_v26, %v11511_v54  ;;  %v11513_v49 = vadd.f32 %v21912_v5, %v11499_v63  ;;  %v11548_v39 = vmax.f32 %v11534_v6, 0.0  ;;  %v11549_v44 = vmax.f32 %v11535_v35, 0.0 }
 0x89e   : > { %v11550_v33 = vmax.f32 %v11536_v47, 0.0  ;;  %v11540_v48 = vadd.f32 %v11526_v29, %v11512_v38  ;;  %v11551_v55 = vmax.f32 %v11537_v41, 0.0  ;;  %v11552_v56 = vmax.f32 %v11538_v46, 0.0 }
 0x89f   : > { %v11553_v2 = vmax.f32 %v11539_v1, 0.0  ;;  %v11541_v58 = vadd.f32 %v11527_v42, %v11513_v49  ;;  %11562 = vst [vmem:[%s18039_s9 + $0x100] sm:$0xff] %v11548_v39  ;;  %11563 = vst [vmem:[%s18039_s9 + $0x108] sm:$0xff] %v11549_v44  ;;  %v11500_v36 = vmul.f32 %v21910_v13, %v11486_v51  ;;  %v11501_v40 = vmul.f32 %v21910_v13, %v11487_v45 }
 0x8a0   : > { %11564 = vst [vmem:[%s18039_s9 + $0x110] sm:$0xff] %v11550_v33  ;;  %v11554_v43 = vmax.f32 %v11540_v48, 0.0  ;;  %11565 = vst [vmem:[%s18039_s9 + $0x118] sm:$0xff] %v11551_v55 }
 0x8a1   : > { %11566 = vst [vmem:[%s18039_s9 + $0x120] sm:$0xff] %v11552_v56  ;;  %11567 = vst [vmem:[%s18039_s9 + $0x128] sm:$0xff] %v11553_v2  ;;  %v11555_v9 = vmax.f32 %v11541_v58, 0.0  ;;  %v11514_v3 = vadd.f32 %v21912_v5, %v11500_v36  ;;  %v11515_v28 = vadd.f32 %v21912_v5, %v11501_v40 }
 0x8a2   : > { %11568 = vst [vmem:[%s18039_s9 + $0x130] sm:$0xff] %v11554_v43 }
 0x8a3   : > { %11569 = vst [vmem:[%s18039_s9 + $0x138] sm:$0xff] %v11555_v9  ;;  %v11542_v7 = vadd.f32 %v11528_v27, %v11514_v3  ;;  %v11543_v21 = vadd.f32 %v11529_v15, %v11515_v28 }
 0x8a5   : > { %v11556_v16 = vmax.f32 %v11542_v7, 0.0  ;;  %v11557_v62 = vmax.f32 %v11543_v21, 0.0 }
 0x8a7   : > { %11570 = vst [vmem:[%s18039_s9 + $0x140] sm:$0xff] %v11556_v16  ;;  %11571 = vst [vmem:[%s18039_s9 + $0x148] sm:$0xff] %v11557_v62 }
 0x8a8 PF: > { %s15_s22 = sadd.s32 1, %s17946_s22   ;;  %s22147_s18 = smov %s17938_s20 }
 0x8a9   : > { %p12_p3 = scmp.ge.s32.totalorder %s15_s22, 8   ;;  %s22148_s19 = smov %s17942_s21 }
 0x8aa   : > { %s22149_s20 = smov %s22152_s23  ;;  %s22150_s21 = smov %s22156_s24 }
 0x8ab   :  { %14 = sbr.rel (!%p12_p3) target bundleno = 3 (0x3), region = 113 }

</bundles_post_ra>
